<compile_context>
chip_gen: v5e
topology: v5e:2x2
jax: 0.10.0
libtpu: 0.0.40
codegen_flags: <defaults>
</compile_context>

<pallas_src>
import functools

import numpy as np

import jax
import jax.numpy as jnp
from jax import lax
from jax.experimental import pallas as pl
from jax.experimental.pallas import tpu as pltpu


# ----------------------------------------------------------------------------------
# Host-side constant builders (hoisted out of the kernel, per review item R1)
# ----------------------------------------------------------------------------------
def _conv_tap_masks(H, W):
    """(9, H*W) f32.  Row k=(dy+1)*3+(dx+1) is 1 where pixel (y+dy, x+dx) is in-bounds."""
    y = np.arange(H * W) // W
    x = np.arange(H * W) % W
    rows = []
    for dy in (-1, 0, 1):
        for dx in (-1, 0, 1):
            rows.append((y + dy >= 0) & (y + dy < H) & (x + dx >= 0) & (x + dx < W))
    return np.stack(rows).astype(np.float32)


def _pool_select(H, W):
    """(H*W, H*W//4) 0/1.  Column p = i*(W//2)+j selects flat index (2i)*W + 2j.
    Its transpose is the even/even placement matrix for the 2x upsample."""
    Ws = W // 2
    q = np.arange(H * W)[:, None]
    p = np.arange((H // 2) * Ws)[None, :]
    return (q == 2 * (p // Ws) * W + 2 * (p % Ws)).astype(np.float32)


# ----------------------------------------------------------------------------------
# pltpu.roll direction probe (review item R3, made risk-free)
# ----------------------------------------------------------------------------------
def _roll_probe_kernel(o_ref):
    o_ref[...] = pltpu.roll(
        lax.broadcasted_iota(jnp.float32, (8, 1024), 1), shift=33, axis=1)


@functools.lru_cache(maxsize=None)
def _roll_mode():
    """'np'  : pltpu.roll(v, s)[i] == v[i - s]   (numpy semantics)
       'rev' : pltpu.roll(v, s)[i] == v[i + s]
       'concat': pltpu.roll unusable -> slice+concat fallback."""
    try:
        row = pl.pallas_call(
            _roll_probe_kernel,
            out_shape=jax.ShapeDtypeStruct((8, 1024), jnp.float32),
        )()[0]
        if float(row[33]) == 0.0:
            return "np"
        if float(row[0]) == 33.0:
            return "rev"
    except Exception:
        pass
    return "concat"


# ----------------------------------------------------------------------------------
# Fused Pallas kernel (one batch element per grid step)
# ----------------------------------------------------------------------------------
def _arnet_kernel(x_ref, encw_ref, decw_ref, finw_ref, ctw_ref, aff_ref, finb_ref,
                  mask_f_ref, mask_h_ref, mask_q_ref,
                  sel_f_ref, sel_h_ref, up_h_ref, up_f_ref,
                  o_ref, *, W, roll_mode):
    f32, bf16 = jnp.float32, jnp.bfloat16

    def shifted(v, off):
        # out[:, p] = v[:, (p + off) % n]  -- lane roll; edge wrap handled by caller masks.
        n = v.shape[-1]
        off = off % n
        if off == 0:
            return v
        if roll_mode != "concat" and n % 128 == 0:      # XLU lane roll (review R3)
            s = (n - off) if roll_mode == "np" else off
            return pltpu.roll(v, shift=s, axis=1)
        return jnp.concatenate([v[:, off:], v[:, :off]], axis=1)

    def conv3x3(h, wmat, masks, scale, shift, ww, act):
        # 3x3 stride-1 "same" conv as ONE (Cout, 9*Cin) x (9*Cin, H*W) f32 matmul.
        pieces = []
        k = 0
        for dy in (-1, 0, 1):
            for dx in (-1, 0, 1):
                s = shifted(h, dy * ww + dx)
                if not (dy == 0 and dx == 0):           # precomputed edge mask (R1)
                    s = s * masks[k:k + 1, :]
                pieces.append(s)
                k += 1
        xcol = jnp.concatenate(pieces, axis=0)          # (9*Cin, hw), tile-aligned f32
        y = jnp.dot(wmat, xcol, preferred_element_type=f32)
        if scale is not None:                           # folded eval-mode BN
            y = y * scale
        y = y + shift
        if act == "leaky":
            y = jnp.where(y > 0, y, 0.2 * y)
        elif act == "relu":
            y = jnp.maximum(y, 0.0)
        else:                                           # tanh (EUP)
            y = jnp.tanh(y)
        return y

    def pool2x2(h, sel, ww):
        # 2x2/stride-2 max pool: two shifted maxes + hoisted bf16 0/1 selection matmul.
        m = jnp.maximum(h, shifted(h, 1))
        m = jnp.maximum(m, shifted(m, ww))
        return jnp.dot(m.astype(bf16), sel, preferred_element_type=f32)

    def convtranspose2x2(h, ctw, up, bias, ws):
        # ConvTranspose2d(k=2, s=2):  out = sum_k roll(W_k @ (h @ S0), dy*wl+dx) + b
        # -> ONE scatter matmul (Cin rows) + one weight matmul + 3 rolls (review R2).
        co = ctw.shape[0] // 4
        wl = 2 * ws
        g = jnp.dot(h.astype(bf16), up, preferred_element_type=f32)   # (Cin, hwl)
        t = jnp.dot(ctw, g, preferred_element_type=f32)               # (4*Cout, hwl)
        out = t[0:co, :]
        for dy in (0, 1):
            for dx in (0, 1):
                k = dy * 2 + dx
                if k == 0:
                    continue
                # wrapped-in lanes are exactly zero (last/odd rows of t are zero),
                # so no mask is needed here.
                out = out + shifted(t[k * co:(k + 1) * co, :], -(dy * wl + dx))
        return out + bias

    x = x_ref[0]                                        # (Cin, H*W) f32
    encw, decw, finw = encw_ref[...], decw_ref[...], finw_ref[...]
    ctw = ctw_ref[...]
    aff = aff_ref[...]                                  # (Cin, 5): packed per-channel params
    enc_sc, enc_sh = aff[:, 0:1], aff[:, 1:2]
    dec_sc, dec_sh = aff[:, 2:3], aff[:, 3:4]
    ct_b = aff[:, 4:5]
    finb = finb_ref[...]
    mask_f, mask_h, mask_q = mask_f_ref[...], mask_h_ref[...], mask_q_ref[...]
    sel_f, sel_h = sel_f_ref[...], sel_h_ref[...]
    up_h, up_f = up_h_ref[...], up_f_ref[...]
    W2, W4 = W // 2, W // 4

    h = conv3x3(x, encw, mask_f, enc_sc, enc_sh, W, "leaky")     # encoder @ HxW
    h = pool2x2(h, sel_f, W)                                     # -> H/2 x W/2
    h = conv3x3(h, encw, mask_h, enc_sc, enc_sh, W2, "leaky")    # encoder
    h = pool2x2(h, sel_h, W2)                                    # -> H/4 x W/4
    h = conv3x3(h, encw, mask_q, enc_sc, enc_sh, W4, "leaky")    # encoder
    h = conv3x3(h, encw, mask_q, enc_sc, enc_sh, W4, "leaky")    # encoder
    h = conv3x3(h, decw, mask_q, dec_sc, dec_sh, W4, "relu")     # decoder
    h = convtranspose2x2(h, ctw, up_h, ct_b, W4)                 # contr -> H/2 x W/2
    h = conv3x3(h, decw, mask_h, dec_sc, dec_sh, W2, "relu")     # decoder
    h = convtranspose2x2(h, ctw, up_f, ct_b, W2)                 # contr -> H x W
    h = conv3x3(h, decw, mask_f, dec_sc, dec_sh, W, "relu")      # decoder
    h = conv3x3(h, finw, mask_f, None, finb, W, "tanh")          # final conv + tanh
    o_ref[0] = h


# ----------------------------------------------------------------------------------
# Wrapper: weight re-layout + hoisted constants + single pallas_call
# ----------------------------------------------------------------------------------
def arnet_forward_pallas(x_nchw, p):
    N, Cin, H, W = x_nchw.shape
    assert H % 4 == 0 and W % 4 == 0, "spatial dims must be divisible by 4"
    Cout = p["fin_w"].shape[-1]
    HW = H * W
    x = x_nchw.reshape(N, Cin, HW)                      # metadata-only, channels-first

    def conv_wmat(w_hwio):                              # (3,3,Cin,Co) -> (Co, 9*Cin)
        co = w_hwio.shape[-1]
        return jnp.transpose(w_hwio, (3, 0, 1, 2)).reshape(co, 9 * Cin)

    enc_w = conv_wmat(p["enc_w"])
    dec_w = conv_wmat(p["dec_w"])
    fin_w = conv_wmat(p["fin_w"])
    # ConvTranspose2d weight (Cin, Cout, 2, 2) -> (4*Cout, Cin), row (dy*2+dx)*Cout + co
    ct_w = jnp.transpose(p["ct_w"], (2, 3, 1, 0)).reshape(4 * Cin, Cin)

    # Packed per-channel affine params (review R6): [enc_scale, enc_shift, dec_scale,
    # dec_shift, ct_bias] as columns -> static lane slices in-kernel, no transposes.
    aff = jnp.stack([p["enc_scale"], p["enc_shift"],
                     p["dec_scale"], p["dec_shift"], p["ct_b"]], axis=1).astype(jnp.float32)
    fin_b = p["fin_b"].reshape(Cout, 1).astype(jnp.float32)

    # Hoisted constants (review R1): edge masks (f32) and 0/1 pool/upsample matrices
    # (bf16 -- exact) per resolution.  up = sel^T for the matching resolution pair.
    mask_f = jnp.asarray(_conv_tap_masks(H, W))
    mask_h = jnp.asarray(_conv_tap_masks(H // 2, W // 2))
    mask_q = jnp.asarray(_conv_tap_masks(H // 4, W // 4))
    sel_f_np = _pool_select(H, W)
    sel_h_np = _pool_select(H // 2, W // 2)
    sel_f = jnp.asarray(sel_f_np, jnp.bfloat16)
    sel_h = jnp.asarray(sel_h_np, jnp.bfloat16)
    up_f = jnp.asarray(sel_f_np.T, jnp.bfloat16)
    up_h = jnp.asarray(sel_h_np.T, jnp.bfloat16)

    cspec = lambda a: pl.BlockSpec(a.shape, lambda n: (0, 0))   # resident constants
    kernel = functools.partial(_arnet_kernel, W=W, roll_mode=_roll_mode())

    out = pl.pallas_call(
        kernel,
        out_shape=jax.ShapeDtypeStruct((N, Cout, HW), jnp.float32),
        grid=(N,),
        in_specs=[
            pl.BlockSpec((1, Cin, HW), lambda n: (n, 0, 0)),
            cspec(enc_w), cspec(dec_w), cspec(fin_w), cspec(ct_w),
            cspec(aff), cspec(fin_b),
            cspec(mask_f), cspec(mask_h), cspec(mask_q),
            cspec(sel_f), cspec(sel_h), cspec(up_h), cspec(up_f),
        ],
        out_specs=pl.BlockSpec((1, Cout, HW), lambda n: (n, 0, 0)),
        compiler_params=pltpu.CompilerParams(
            dimension_semantics=("parallel",),        # batch -> 2 TCs on v7x
            vmem_limit_bytes=32 * 1024 * 1024,        # well under v7x's 64 MiB
        ),
    )(x, enc_w, dec_w, fin_w, ct_w, aff, fin_b,
      mask_f, mask_h, mask_q, sel_f, sel_h, up_h, up_f)
    return out.reshape(N, Cout, H, W)                 # already NCHW, like PyTorch


# ----------------------------------------------------------------------------------
# Parameter construction (eval-mode BN folded into scale/shift)
# ----------------------------------------------------------------------------------
def init_params(key, cin, cout):
    ks = jax.random.split(key, 16)
    eps = 1e-5

    def nrm(k, shape, s=0.15):
        return s * jax.random.normal(k, shape, jnp.float32)

    p = {}
    # encoder: Conv2d(cin,cin,3,p=1) + BatchNorm2d(cin) [eval] + LeakyReLU(0.2)
    enc_w = nrm(ks[0], (3, 3, cin, cin))
    enc_b = nrm(ks[1], (cin,), 0.1)
    g = 1.0 + nrm(ks[2], (cin,), 0.1)
    beta = nrm(ks[3], (cin,), 0.1)
    mu = nrm(ks[4], (cin,), 0.1)
    var = 1.0 + jax.random.uniform(ks[5], (cin,), jnp.float32)
    p["enc_w"] = enc_w
    p["enc_scale"] = g / jnp.sqrt(var + eps)
    p["enc_shift"] = beta + (enc_b - mu) * p["enc_scale"]
    # decoder: Conv2d(cin,cin,3,p=1) + BatchNorm2d(cin) [eval] + ReLU
    dec_w = nrm(ks[6], (3, 3, cin, cin))
    dec_b = nrm(ks[7], (cin,), 0.1)
    g = 1.0 + nrm(ks[8], (cin,), 0.1)
    beta = nrm(ks[9], (cin,), 0.1)
    mu = nrm(ks[10], (cin,), 0.1)
    var = 1.0 + jax.random.uniform(ks[11], (cin,), jnp.float32)
    p["dec_w"] = dec_w
    p["dec_scale"] = g / jnp.sqrt(var + eps)
    p["dec_shift"] = beta + (dec_b - mu) * p["dec_scale"]
    # contr: ConvTranspose2d(cin, cin, kernel=2, stride=2) (PyTorch weight (Cin,Cout,2,2))
    p["ct_w"] = nrm(ks[12], (cin, cin, 2, 2))
    p["ct_b"] = nrm(ks[13], (cin,), 0.1)
    # final: Conv2d(cin, cout, 3, p=1) + Tanh
    p["fin_w"] = nrm(ks[14], (3, 3, cin, cout))
    p["fin_b"] = nrm(ks[15], (cout,), 0.1)
    p["fin_scale"] = jnp.ones((cout,), jnp.float32)
    return p


# ----------------------------------------------------------------------------------
# Pure-JAX reference (for correctness check only)
# ----------------------------------------------------------------------------------
def arnet_forward_ref(x_nchw, p):
    x = jnp.transpose(x_nchw, (0, 2, 3, 1))

    def conv(h, w, scale, shift, act):
        y = lax.conv_general_dilated(
            h, w, (1, 1), "SAME",
            dimension_numbers=("NHWC", "HWIO", "NHWC"),
            precision=lax.Precision.HIGHEST)
        y = y * scale + shift
        if act == "leaky":
            y = jnp.where(y > 0, y, 0.2 * y)
        elif act == "relu":
            y = jnp.maximum(y, 0.0)
        elif act == "tanh":
            y = jnp.tanh(y)
        return y

    def pool(h):
        return lax.reduce_window(h, -jnp.inf, lax.max, (1, 2, 2, 1), (1, 2, 2, 1), "VALID")

    def convT(h, w, b):
        N, H, W, _ = h.shape
        Cout = w.shape[1]
        t = jnp.einsum("nhwi,iokl->nhkwlo", h, w, precision=lax.Precision.HIGHEST)
        return t.reshape(N, 2 * H, 2 * W, Cout) + b

    enc = lambda h: conv(h, p["enc_w"], p["enc_scale"], p["enc_shift"], "leaky")
    dec = lambda h: conv(h, p["dec_w"], p["dec_scale"], p["dec_shift"], "relu")

    h = enc(x)
    h = pool(h)
    h = enc(h)
    h = pool(h)
    h = enc(h)
    h = enc(h)
    h = dec(h)
    h = convT(h, p["ct_w"], p["ct_b"])
    h = dec(h)
    h = convT(h, p["ct_w"], p["ct_b"])
    h = dec(h)
    h = conv(h, p["fin_w"], p["fin_scale"], p["fin_b"], "tanh")
    return jnp.transpose(h, (0, 3, 1, 2))


# ----------------------------------------------------------------------------------
if __name__ == "__main__":
    key = jax.random.PRNGKey(0)
    kx, kp = jax.random.split(key)

    N, C_in, C_out, H, W = 2, 8, 4, 32, 32          # spatial must be divisible by 4
    x = jax.random.normal(kx, (N, C_in, H, W), jnp.float32)   # NCHW, like PyTorch
    params = init_params(kp, C_in, C_out)

    _roll_mode()                                    # probe pltpu.roll outside of jit

    out = jax.block_until_ready(jax.jit(arnet_forward_pallas)(x, params))
    ref = jax.block_until_ready(arnet_forward_ref(x, params))

    assert out.shape == (N, C_out, H, W), out.shape
    assert bool(jnp.all(jnp.isfinite(out)))
    err = float(jnp.max(jnp.abs(out - ref)))
    if not jnp.allclose(out, ref, atol=2e-2, rtol=2e-2):
        raise SystemExit(f"mismatch vs reference, max abs err = {err}")
    print("KERNEL_OK")
</pallas_src>

<mosaic_0001>
module attributes {stable_mosaic.version = 11 : i64} {
  func.func @_arnet_kernel(%arg0: i32, %arg1: memref<1x8x1024xf32, #tpu.memory_space<vmem>>, %arg2: memref<8x72xf32, #tpu.memory_space<vmem>>, %arg3: memref<8x72xf32, #tpu.memory_space<vmem>>, %arg4: memref<4x72xf32, #tpu.memory_space<vmem>>, %arg5: memref<32x8xf32, #tpu.memory_space<vmem>>, %arg6: memref<8x5xf32, #tpu.memory_space<vmem>>, %arg7: memref<4x1xf32, #tpu.memory_space<vmem>>, %arg8: memref<9x1024xf32, #tpu.memory_space<vmem>>, %arg9: memref<9x256xf32, #tpu.memory_space<vmem>>, %arg10: memref<9x64xf32, #tpu.memory_space<vmem>>, %arg11: memref<1024x256xbf16, #tpu.memory_space<vmem>>, %arg12: memref<256x64xbf16, #tpu.memory_space<vmem>>, %arg13: memref<64x256xbf16, #tpu.memory_space<vmem>>, %arg14: memref<256x1024xbf16, #tpu.memory_space<vmem>>, %arg15: memref<1x4x1024xf32, #tpu.memory_space<vmem>>) attributes {dimension_semantics = [#tpu.dimension_semantics<parallel>], iteration_bounds = array<i64: 2>, scalar_prefetch = 0 : i64, scratch_operands = 0 : i64, tpu.core_type = #tpu.core_type<tc>, window_params = [{transform_indices = @transform_0, window_bounds = array<i64: 1, 8, 1024>}, {pipeline_mode = #tpu.pipeline_mode<synchronous>, transform_indices = @transform_1, window_bounds = array<i64: 8, 72>}, {pipeline_mode = #tpu.pipeline_mode<synchronous>, transform_indices = @transform_2, window_bounds = array<i64: 8, 72>}, {pipeline_mode = #tpu.pipeline_mode<synchronous>, transform_indices = @transform_3, window_bounds = array<i64: 4, 72>}, {pipeline_mode = #tpu.pipeline_mode<synchronous>, transform_indices = @transform_4, window_bounds = array<i64: 32, 8>}, {pipeline_mode = #tpu.pipeline_mode<synchronous>, transform_indices = @transform_5, window_bounds = array<i64: 8, 5>}, {pipeline_mode = #tpu.pipeline_mode<synchronous>, transform_indices = @transform_6, window_bounds = array<i64: 4, 1>}, {pipeline_mode = #tpu.pipeline_mode<synchronous>, transform_indices = @transform_7, window_bounds = array<i64: 9, 1024>}, {pipeline_mode = #tpu.pipeline_mode<synchronous>, transform_indices = @transform_8, window_bounds = array<i64: 9, 256>}, {pipeline_mode = #tpu.pipeline_mode<synchronous>, transform_indices = @transform_9, window_bounds = array<i64: 9, 64>}, {pipeline_mode = #tpu.pipeline_mode<synchronous>, transform_indices = @transform_10, window_bounds = array<i64: 1024, 256>}, {pipeline_mode = #tpu.pipeline_mode<synchronous>, transform_indices = @transform_11, window_bounds = array<i64: 256, 64>}, {pipeline_mode = #tpu.pipeline_mode<synchronous>, transform_indices = @transform_12, window_bounds = array<i64: 64, 256>}, {pipeline_mode = #tpu.pipeline_mode<synchronous>, transform_indices = @transform_13, window_bounds = array<i64: 256, 1024>}, {transform_indices = @transform_14, window_bounds = array<i64: 1, 4, 1024>}]} {
    %c0 = arith.constant 0 : index
    %c0_0 = arith.constant 0 : index
    %c0_1 = arith.constant 0 : index
    %0 = vector.load %arg1[%c0, %c0_0, %c0_1] : memref<1x8x1024xf32, #tpu.memory_space<vmem>>, vector<1x8x1024xf32>
    %1 = vector.shape_cast %0 : vector<1x8x1024xf32> to vector<8x1024xf32>
    %c0_2 = arith.constant 0 : index
    %c0_3 = arith.constant 0 : index
    %2 = vector.load %arg2[%c0_2, %c0_3] : memref<8x72xf32, #tpu.memory_space<vmem>>, vector<8x72xf32>
    %c0_4 = arith.constant 0 : index
    %c0_5 = arith.constant 0 : index
    %3 = vector.load %arg3[%c0_4, %c0_5] : memref<8x72xf32, #tpu.memory_space<vmem>>, vector<8x72xf32>
    %c0_6 = arith.constant 0 : index
    %c0_7 = arith.constant 0 : index
    %4 = vector.load %arg4[%c0_6, %c0_7] : memref<4x72xf32, #tpu.memory_space<vmem>>, vector<4x72xf32>
    %c0_8 = arith.constant 0 : index
    %c0_9 = arith.constant 0 : index
    %5 = vector.load %arg5[%c0_8, %c0_9] : memref<32x8xf32, #tpu.memory_space<vmem>>, vector<32x8xf32>
    %c0_10 = arith.constant 0 : index
    %c0_11 = arith.constant 0 : index
    %6 = vector.load %arg6[%c0_10, %c0_11] : memref<8x5xf32, #tpu.memory_space<vmem>>, vector<8x5xf32>
    %7 = vector.extract_strided_slice %6 {offsets = [0, 0], sizes = [8, 1], strides = [1, 1]} : vector<8x5xf32> to vector<8x1xf32>
    %8 = vector.extract_strided_slice %6 {offsets = [0, 1], sizes = [8, 1], strides = [1, 1]} : vector<8x5xf32> to vector<8x1xf32>
    %9 = vector.extract_strided_slice %6 {offsets = [0, 2], sizes = [8, 1], strides = [1, 1]} : vector<8x5xf32> to vector<8x1xf32>
    %10 = vector.extract_strided_slice %6 {offsets = [0, 3], sizes = [8, 1], strides = [1, 1]} : vector<8x5xf32> to vector<8x1xf32>
    %11 = vector.extract_strided_slice %6 {offsets = [0, 4], sizes = [8, 1], strides = [1, 1]} : vector<8x5xf32> to vector<8x1xf32>
    %c0_12 = arith.constant 0 : index
    %c0_13 = arith.constant 0 : index
    %12 = vector.load %arg7[%c0_12, %c0_13] : memref<4x1xf32, #tpu.memory_space<vmem>>, vector<4x1xf32>
    %c0_14 = arith.constant 0 : index
    %c0_15 = arith.constant 0 : index
    %13 = vector.load %arg8[%c0_14, %c0_15] : memref<9x1024xf32, #tpu.memory_space<vmem>>, vector<9x1024xf32>
    %c0_16 = arith.constant 0 : index
    %c0_17 = arith.constant 0 : index
    %14 = vector.load %arg9[%c0_16, %c0_17] : memref<9x256xf32, #tpu.memory_space<vmem>>, vector<9x256xf32>
    %c0_18 = arith.constant 0 : index
    %c0_19 = arith.constant 0 : index
    %15 = vector.load %arg10[%c0_18, %c0_19] : memref<9x64xf32, #tpu.memory_space<vmem>>, vector<9x64xf32>
    %c0_20 = arith.constant 0 : index
    %c0_21 = arith.constant 0 : index
    %16 = vector.load %arg11[%c0_20, %c0_21] : memref<1024x256xbf16, #tpu.memory_space<vmem>>, vector<1024x256xbf16>
    %c0_22 = arith.constant 0 : index
    %c0_23 = arith.constant 0 : index
    %17 = vector.load %arg12[%c0_22, %c0_23] : memref<256x64xbf16, #tpu.memory_space<vmem>>, vector<256x64xbf16>
    %c0_24 = arith.constant 0 : index
    %c0_25 = arith.constant 0 : index
    %18 = vector.load %arg13[%c0_24, %c0_25] : memref<64x256xbf16, #tpu.memory_space<vmem>>, vector<64x256xbf16>
    %c0_26 = arith.constant 0 : index
    %c0_27 = arith.constant 0 : index
    %19 = vector.load %arg14[%c0_26, %c0_27] : memref<256x1024xbf16, #tpu.memory_space<vmem>>, vector<256x1024xbf16>
    %20 = vector.extract_strided_slice %1 {offsets = [0, 991], sizes = [8, 33], strides = [1, 1]} : vector<8x1024xf32> to vector<8x33xf32>
    %21 = vector.extract_strided_slice %1 {offsets = [0, 0], sizes = [8, 991], strides = [1, 1]} : vector<8x1024xf32> to vector<8x991xf32>
    %22 = tpu.concatenate %20, %21 in 1 : vector<8x33xf32>, vector<8x991xf32> -> vector<8x1024xf32>
    %23 = vector.extract_strided_slice %13 {offsets = [0, 0], sizes = [1, 1024], strides = [1, 1]} : vector<9x1024xf32> to vector<1x1024xf32>
    %24 = vector.broadcast %23 : vector<1x1024xf32> to vector<8x1024xf32>
    %25 = arith.mulf %22, %24 : vector<8x1024xf32>
    %26 = vector.extract_strided_slice %1 {offsets = [0, 992], sizes = [8, 32], strides = [1, 1]} : vector<8x1024xf32> to vector<8x32xf32>
    %27 = vector.extract_strided_slice %1 {offsets = [0, 0], sizes = [8, 992], strides = [1, 1]} : vector<8x1024xf32> to vector<8x992xf32>
    %28 = tpu.concatenate %26, %27 in 1 : vector<8x32xf32>, vector<8x992xf32> -> vector<8x1024xf32>
    %29 = vector.extract_strided_slice %13 {offsets = [1, 0], sizes = [1, 1024], strides = [1, 1]} : vector<9x1024xf32> to vector<1x1024xf32>
    %30 = vector.broadcast %29 : vector<1x1024xf32> to vector<8x1024xf32>
    %31 = arith.mulf %28, %30 : vector<8x1024xf32>
    %32 = vector.extract_strided_slice %1 {offsets = [0, 993], sizes = [8, 31], strides = [1, 1]} : vector<8x1024xf32> to vector<8x31xf32>
    %33 = vector.extract_strided_slice %1 {offsets = [0, 0], sizes = [8, 993], strides = [1, 1]} : vector<8x1024xf32> to vector<8x993xf32>
    %34 = tpu.concatenate %32, %33 in 1 : vector<8x31xf32>, vector<8x993xf32> -> vector<8x1024xf32>
    %35 = vector.extract_strided_slice %13 {offsets = [2, 0], sizes = [1, 1024], strides = [1, 1]} : vector<9x1024xf32> to vector<1x1024xf32>
    %36 = vector.broadcast %35 : vector<1x1024xf32> to vector<8x1024xf32>
    %37 = arith.mulf %34, %36 : vector<8x1024xf32>
    %38 = vector.extract_strided_slice %1 {offsets = [0, 1023], sizes = [8, 1], strides = [1, 1]} : vector<8x1024xf32> to vector<8x1xf32>
    %39 = vector.extract_strided_slice %1 {offsets = [0, 0], sizes = [8, 1023], strides = [1, 1]} : vector<8x1024xf32> to vector<8x1023xf32>
    %40 = tpu.concatenate %38, %39 in 1 : vector<8x1xf32>, vector<8x1023xf32> -> vector<8x1024xf32>
    %41 = vector.extract_strided_slice %13 {offsets = [3, 0], sizes = [1, 1024], strides = [1, 1]} : vector<9x1024xf32> to vector<1x1024xf32>
    %42 = vector.broadcast %41 : vector<1x1024xf32> to vector<8x1024xf32>
    %43 = arith.mulf %40, %42 : vector<8x1024xf32>
    %44 = vector.extract_strided_slice %1 {offsets = [0, 1], sizes = [8, 1023], strides = [1, 1]} : vector<8x1024xf32> to vector<8x1023xf32>
    %45 = vector.extract_strided_slice %1 {offsets = [0, 0], sizes = [8, 1], strides = [1, 1]} : vector<8x1024xf32> to vector<8x1xf32>
    %46 = tpu.concatenate %44, %45 in 1 : vector<8x1023xf32>, vector<8x1xf32> -> vector<8x1024xf32>
    %47 = vector.extract_strided_slice %13 {offsets = [5, 0], sizes = [1, 1024], strides = [1, 1]} : vector<9x1024xf32> to vector<1x1024xf32>
    %48 = vector.broadcast %47 : vector<1x1024xf32> to vector<8x1024xf32>
    %49 = arith.mulf %46, %48 : vector<8x1024xf32>
    %50 = vector.extract_strided_slice %1 {offsets = [0, 31], sizes = [8, 993], strides = [1, 1]} : vector<8x1024xf32> to vector<8x993xf32>
    %51 = vector.extract_strided_slice %1 {offsets = [0, 0], sizes = [8, 31], strides = [1, 1]} : vector<8x1024xf32> to vector<8x31xf32>
    %52 = tpu.concatenate %50, %51 in 1 : vector<8x993xf32>, vector<8x31xf32> -> vector<8x1024xf32>
    %53 = vector.extract_strided_slice %13 {offsets = [6, 0], sizes = [1, 1024], strides = [1, 1]} : vector<9x1024xf32> to vector<1x1024xf32>
    %54 = vector.broadcast %53 : vector<1x1024xf32> to vector<8x1024xf32>
    %55 = arith.mulf %52, %54 : vector<8x1024xf32>
    %56 = vector.extract_strided_slice %1 {offsets = [0, 32], sizes = [8, 992], strides = [1, 1]} : vector<8x1024xf32> to vector<8x992xf32>
    %57 = vector.extract_strided_slice %1 {offsets = [0, 0], sizes = [8, 32], strides = [1, 1]} : vector<8x1024xf32> to vector<8x32xf32>
    %58 = tpu.concatenate %56, %57 in 1 : vector<8x992xf32>, vector<8x32xf32> -> vector<8x1024xf32>
    %59 = vector.extract_strided_slice %13 {offsets = [7, 0], sizes = [1, 1024], strides = [1, 1]} : vector<9x1024xf32> to vector<1x1024xf32>
    %60 = vector.broadcast %59 : vector<1x1024xf32> to vector<8x1024xf32>
    %61 = arith.mulf %58, %60 : vector<8x1024xf32>
    %62 = vector.extract_strided_slice %1 {offsets = [0, 33], sizes = [8, 991], strides = [1, 1]} : vector<8x1024xf32> to vector<8x991xf32>
    %63 = vector.extract_strided_slice %1 {offsets = [0, 0], sizes = [8, 33], strides = [1, 1]} : vector<8x1024xf32> to vector<8x33xf32>
    %64 = tpu.concatenate %62, %63 in 1 : vector<8x991xf32>, vector<8x33xf32> -> vector<8x1024xf32>
    %65 = vector.extract_strided_slice %13 {offsets = [8, 0], sizes = [1, 1024], strides = [1, 1]} : vector<9x1024xf32> to vector<1x1024xf32>
    %66 = vector.broadcast %65 : vector<1x1024xf32> to vector<8x1024xf32>
    %67 = arith.mulf %64, %66 : vector<8x1024xf32>
    %68 = tpu.concatenate %25, %31, %37, %43, %1, %49, %55, %61, %67 in 0 : vector<8x1024xf32>, vector<8x1024xf32>, vector<8x1024xf32>, vector<8x1024xf32>, vector<8x1024xf32>, vector<8x1024xf32>, vector<8x1024xf32>, vector<8x1024xf32>, vector<8x1024xf32> -> vector<72x1024xf32>
    %cst = arith.constant dense<0.000000e+00> : vector<8x1024xf32>
    %69 = tpu.matmul %2, %68, %cst {dimension_numbers = #tpu.dot_dimension_numbers<[1], [0], [0], [1], [0, 0, 1, 1], [], []>} : vector<8x72xf32>, vector<72x1024xf32>, vector<8x1024xf32> -> vector<8x1024xf32>
    %70 = vector.broadcast %7 : vector<8x1xf32> to vector<8x1024xf32>
    %71 = arith.mulf %69, %70 : vector<8x1024xf32>
    %72 = vector.broadcast %8 : vector<8x1xf32> to vector<8x1024xf32>
    %73 = arith.addf %71, %72 : vector<8x1024xf32>
    %cst_28 = arith.constant 0.000000e+00 : f32
    %74 = vector.broadcast %cst_28 : f32 to vector<8x1024xf32>
    %75 = arith.cmpf ogt, %73, %74 : vector<8x1024xf32>
    %cst_29 = arith.constant 2.000000e-01 : f32
    %76 = vector.broadcast %cst_29 : f32 to vector<8x1024xf32>
    %77 = arith.mulf %76, %73 : vector<8x1024xf32>
    %78 = arith.select %75, %73, %77 : vector<8x1024xi1>, vector<8x1024xf32>
    %79 = vector.extract_strided_slice %78 {offsets = [0, 1], sizes = [8, 1023], strides = [1, 1]} : vector<8x1024xf32> to vector<8x1023xf32>
    %80 = vector.extract_strided_slice %78 {offsets = [0, 0], sizes = [8, 1], strides = [1, 1]} : vector<8x1024xf32> to vector<8x1xf32>
    %81 = tpu.concatenate %79, %80 in 1 : vector<8x1023xf32>, vector<8x1xf32> -> vector<8x1024xf32>
    %82 = arith.maximumf %78, %81 : vector<8x1024xf32>
    %83 = vector.extract_strided_slice %82 {offsets = [0, 32], sizes = [8, 992], strides = [1, 1]} : vector<8x1024xf32> to vector<8x992xf32>
    %84 = vector.extract_strided_slice %82 {offsets = [0, 0], sizes = [8, 32], strides = [1, 1]} : vector<8x1024xf32> to vector<8x32xf32>
    %85 = tpu.concatenate %83, %84 in 1 : vector<8x992xf32>, vector<8x32xf32> -> vector<8x1024xf32>
    %86 = arith.maximumf %82, %85 : vector<8x1024xf32>
    %87 = arith.truncf %86 : vector<8x1024xf32> to vector<8x1024xbf16>
    %cst_30 = arith.constant dense<0.000000e+00> : vector<8x256xf32>
    %88 = tpu.matmul %87, %16, %cst_30 {dimension_numbers = #tpu.dot_dimension_numbers<[1], [0], [0], [1], [0, 0, 1, 1], [], []>} : vector<8x1024xbf16>, vector<1024x256xbf16>, vector<8x256xf32> -> vector<8x256xf32>
    %89 = vector.extract_strided_slice %88 {offsets = [0, 239], sizes = [8, 17], strides = [1, 1]} : vector<8x256xf32> to vector<8x17xf32>
    %90 = vector.extract_strided_slice %88 {offsets = [0, 0], sizes = [8, 239], strides = [1, 1]} : vector<8x256xf32> to vector<8x239xf32>
    %91 = tpu.concatenate %89, %90 in 1 : vector<8x17xf32>, vector<8x239xf32> -> vector<8x256xf32>
    %92 = vector.extract_strided_slice %14 {offsets = [0, 0], sizes = [1, 256], strides = [1, 1]} : vector<9x256xf32> to vector<1x256xf32>
    %93 = vector.broadcast %92 : vector<1x256xf32> to vector<8x256xf32>
    %94 = arith.mulf %91, %93 : vector<8x256xf32>
    %95 = vector.extract_strided_slice %88 {offsets = [0, 240], sizes = [8, 16], strides = [1, 1]} : vector<8x256xf32> to vector<8x16xf32>
    %96 = vector.extract_strided_slice %88 {offsets = [0, 0], sizes = [8, 240], strides = [1, 1]} : vector<8x256xf32> to vector<8x240xf32>
    %97 = tpu.concatenate %95, %96 in 1 : vector<8x16xf32>, vector<8x240xf32> -> vector<8x256xf32>
    %98 = vector.extract_strided_slice %14 {offsets = [1, 0], sizes = [1, 256], strides = [1, 1]} : vector<9x256xf32> to vector<1x256xf32>
    %99 = vector.broadcast %98 : vector<1x256xf32> to vector<8x256xf32>
    %100 = arith.mulf %97, %99 : vector<8x256xf32>
    %101 = vector.extract_strided_slice %88 {offsets = [0, 241], sizes = [8, 15], strides = [1, 1]} : vector<8x256xf32> to vector<8x15xf32>
    %102 = vector.extract_strided_slice %88 {offsets = [0, 0], sizes = [8, 241], strides = [1, 1]} : vector<8x256xf32> to vector<8x241xf32>
    %103 = tpu.concatenate %101, %102 in 1 : vector<8x15xf32>, vector<8x241xf32> -> vector<8x256xf32>
    %104 = vector.extract_strided_slice %14 {offsets = [2, 0], sizes = [1, 256], strides = [1, 1]} : vector<9x256xf32> to vector<1x256xf32>
    %105 = vector.broadcast %104 : vector<1x256xf32> to vector<8x256xf32>
    %106 = arith.mulf %103, %105 : vector<8x256xf32>
    %107 = vector.extract_strided_slice %88 {offsets = [0, 255], sizes = [8, 1], strides = [1, 1]} : vector<8x256xf32> to vector<8x1xf32>
    %108 = vector.extract_strided_slice %88 {offsets = [0, 0], sizes = [8, 255], strides = [1, 1]} : vector<8x256xf32> to vector<8x255xf32>
    %109 = tpu.concatenate %107, %108 in 1 : vector<8x1xf32>, vector<8x255xf32> -> vector<8x256xf32>
    %110 = vector.extract_strided_slice %14 {offsets = [3, 0], sizes = [1, 256], strides = [1, 1]} : vector<9x256xf32> to vector<1x256xf32>
    %111 = vector.broadcast %110 : vector<1x256xf32> to vector<8x256xf32>
    %112 = arith.mulf %109, %111 : vector<8x256xf32>
    %113 = vector.extract_strided_slice %88 {offsets = [0, 1], sizes = [8, 255], strides = [1, 1]} : vector<8x256xf32> to vector<8x255xf32>
    %114 = vector.extract_strided_slice %88 {offsets = [0, 0], sizes = [8, 1], strides = [1, 1]} : vector<8x256xf32> to vector<8x1xf32>
    %115 = tpu.concatenate %113, %114 in 1 : vector<8x255xf32>, vector<8x1xf32> -> vector<8x256xf32>
    %116 = vector.extract_strided_slice %14 {offsets = [5, 0], sizes = [1, 256], strides = [1, 1]} : vector<9x256xf32> to vector<1x256xf32>
    %117 = vector.broadcast %116 : vector<1x256xf32> to vector<8x256xf32>
    %118 = arith.mulf %115, %117 : vector<8x256xf32>
    %119 = vector.extract_strided_slice %88 {offsets = [0, 15], sizes = [8, 241], strides = [1, 1]} : vector<8x256xf32> to vector<8x241xf32>
    %120 = vector.extract_strided_slice %88 {offsets = [0, 0], sizes = [8, 15], strides = [1, 1]} : vector<8x256xf32> to vector<8x15xf32>
    %121 = tpu.concatenate %119, %120 in 1 : vector<8x241xf32>, vector<8x15xf32> -> vector<8x256xf32>
    %122 = vector.extract_strided_slice %14 {offsets = [6, 0], sizes = [1, 256], strides = [1, 1]} : vector<9x256xf32> to vector<1x256xf32>
    %123 = vector.broadcast %122 : vector<1x256xf32> to vector<8x256xf32>
    %124 = arith.mulf %121, %123 : vector<8x256xf32>
    %125 = vector.extract_strided_slice %88 {offsets = [0, 16], sizes = [8, 240], strides = [1, 1]} : vector<8x256xf32> to vector<8x240xf32>
    %126 = vector.extract_strided_slice %88 {offsets = [0, 0], sizes = [8, 16], strides = [1, 1]} : vector<8x256xf32> to vector<8x16xf32>
    %127 = tpu.concatenate %125, %126 in 1 : vector<8x240xf32>, vector<8x16xf32> -> vector<8x256xf32>
    %128 = vector.extract_strided_slice %14 {offsets = [7, 0], sizes = [1, 256], strides = [1, 1]} : vector<9x256xf32> to vector<1x256xf32>
    %129 = vector.broadcast %128 : vector<1x256xf32> to vector<8x256xf32>
    %130 = arith.mulf %127, %129 : vector<8x256xf32>
    %131 = vector.extract_strided_slice %88 {offsets = [0, 17], sizes = [8, 239], strides = [1, 1]} : vector<8x256xf32> to vector<8x239xf32>
    %132 = vector.extract_strided_slice %88 {offsets = [0, 0], sizes = [8, 17], strides = [1, 1]} : vector<8x256xf32> to vector<8x17xf32>
    %133 = tpu.concatenate %131, %132 in 1 : vector<8x239xf32>, vector<8x17xf32> -> vector<8x256xf32>
    %134 = vector.extract_strided_slice %14 {offsets = [8, 0], sizes = [1, 256], strides = [1, 1]} : vector<9x256xf32> to vector<1x256xf32>
    %135 = vector.broadcast %134 : vector<1x256xf32> to vector<8x256xf32>
    %136 = arith.mulf %133, %135 : vector<8x256xf32>
    %137 = tpu.concatenate %94, %100, %106, %112, %88, %118, %124, %130, %136 in 0 : vector<8x256xf32>, vector<8x256xf32>, vector<8x256xf32>, vector<8x256xf32>, vector<8x256xf32>, vector<8x256xf32>, vector<8x256xf32>, vector<8x256xf32>, vector<8x256xf32> -> vector<72x256xf32>
    %cst_31 = arith.constant dense<0.000000e+00> : vector<8x256xf32>
    %138 = tpu.matmul %2, %137, %cst_31 {dimension_numbers = #tpu.dot_dimension_numbers<[1], [0], [0], [1], [0, 0, 1, 1], [], []>} : vector<8x72xf32>, vector<72x256xf32>, vector<8x256xf32> -> vector<8x256xf32>
    %139 = vector.broadcast %7 : vector<8x1xf32> to vector<8x256xf32>
    %140 = arith.mulf %138, %139 : vector<8x256xf32>
    %141 = vector.broadcast %8 : vector<8x1xf32> to vector<8x256xf32>
    %142 = arith.addf %140, %141 : vector<8x256xf32>
    %cst_32 = arith.constant 0.000000e+00 : f32
    %143 = vector.broadcast %cst_32 : f32 to vector<8x256xf32>
    %144 = arith.cmpf ogt, %142, %143 : vector<8x256xf32>
    %cst_33 = arith.constant 2.000000e-01 : f32
    %145 = vector.broadcast %cst_33 : f32 to vector<8x256xf32>
    %146 = arith.mulf %145, %142 : vector<8x256xf32>
    %147 = arith.select %144, %142, %146 : vector<8x256xi1>, vector<8x256xf32>
    %148 = vector.extract_strided_slice %147 {offsets = [0, 1], sizes = [8, 255], strides = [1, 1]} : vector<8x256xf32> to vector<8x255xf32>
    %149 = vector.extract_strided_slice %147 {offsets = [0, 0], sizes = [8, 1], strides = [1, 1]} : vector<8x256xf32> to vector<8x1xf32>
    %150 = tpu.concatenate %148, %149 in 1 : vector<8x255xf32>, vector<8x1xf32> -> vector<8x256xf32>
    %151 = arith.maximumf %147, %150 : vector<8x256xf32>
    %152 = vector.extract_strided_slice %151 {offsets = [0, 16], sizes = [8, 240], strides = [1, 1]} : vector<8x256xf32> to vector<8x240xf32>
    %153 = vector.extract_strided_slice %151 {offsets = [0, 0], sizes = [8, 16], strides = [1, 1]} : vector<8x256xf32> to vector<8x16xf32>
    %154 = tpu.concatenate %152, %153 in 1 : vector<8x240xf32>, vector<8x16xf32> -> vector<8x256xf32>
    %155 = arith.maximumf %151, %154 : vector<8x256xf32>
    %156 = arith.truncf %155 : vector<8x256xf32> to vector<8x256xbf16>
    %cst_34 = arith.constant dense<0.000000e+00> : vector<8x64xf32>
    %157 = tpu.matmul %156, %17, %cst_34 {dimension_numbers = #tpu.dot_dimension_numbers<[1], [0], [0], [1], [0, 0, 1, 1], [], []>} : vector<8x256xbf16>, vector<256x64xbf16>, vector<8x64xf32> -> vector<8x64xf32>
    %158 = vector.extract_strided_slice %157 {offsets = [0, 55], sizes = [8, 9], strides = [1, 1]} : vector<8x64xf32> to vector<8x9xf32>
    %159 = vector.extract_strided_slice %157 {offsets = [0, 0], sizes = [8, 55], strides = [1, 1]} : vector<8x64xf32> to vector<8x55xf32>
    %160 = tpu.concatenate %158, %159 in 1 : vector<8x9xf32>, vector<8x55xf32> -> vector<8x64xf32>
    %161 = vector.extract_strided_slice %15 {offsets = [0, 0], sizes = [1, 64], strides = [1, 1]} : vector<9x64xf32> to vector<1x64xf32>
    %162 = vector.broadcast %161 : vector<1x64xf32> to vector<8x64xf32>
    %163 = arith.mulf %160, %162 : vector<8x64xf32>
    %164 = vector.extract_strided_slice %157 {offsets = [0, 56], sizes = [8, 8], strides = [1, 1]} : vector<8x64xf32> to vector<8x8xf32>
    %165 = vector.extract_strided_slice %157 {offsets = [0, 0], sizes = [8, 56], strides = [1, 1]} : vector<8x64xf32> to vector<8x56xf32>
    %166 = tpu.concatenate %164, %165 in 1 : vector<8x8xf32>, vector<8x56xf32> -> vector<8x64xf32>
    %167 = vector.extract_strided_slice %15 {offsets = [1, 0], sizes = [1, 64], strides = [1, 1]} : vector<9x64xf32> to vector<1x64xf32>
    %168 = vector.broadcast %167 : vector<1x64xf32> to vector<8x64xf32>
    %169 = arith.mulf %166, %168 : vector<8x64xf32>
    %170 = vector.extract_strided_slice %157 {offsets = [0, 57], sizes = [8, 7], strides = [1, 1]} : vector<8x64xf32> to vector<8x7xf32>
    %171 = vector.extract_strided_slice %157 {offsets = [0, 0], sizes = [8, 57], strides = [1, 1]} : vector<8x64xf32> to vector<8x57xf32>
    %172 = tpu.concatenate %170, %171 in 1 : vector<8x7xf32>, vector<8x57xf32> -> vector<8x64xf32>
    %173 = vector.extract_strided_slice %15 {offsets = [2, 0], sizes = [1, 64], strides = [1, 1]} : vector<9x64xf32> to vector<1x64xf32>
    %174 = vector.broadcast %173 : vector<1x64xf32> to vector<8x64xf32>
    %175 = arith.mulf %172, %174 : vector<8x64xf32>
    %176 = vector.extract_strided_slice %157 {offsets = [0, 63], sizes = [8, 1], strides = [1, 1]} : vector<8x64xf32> to vector<8x1xf32>
    %177 = vector.extract_strided_slice %157 {offsets = [0, 0], sizes = [8, 63], strides = [1, 1]} : vector<8x64xf32> to vector<8x63xf32>
    %178 = tpu.concatenate %176, %177 in 1 : vector<8x1xf32>, vector<8x63xf32> -> vector<8x64xf32>
    %179 = vector.extract_strided_slice %15 {offsets = [3, 0], sizes = [1, 64], strides = [1, 1]} : vector<9x64xf32> to vector<1x64xf32>
    %180 = vector.broadcast %179 : vector<1x64xf32> to vector<8x64xf32>
    %181 = arith.mulf %178, %180 : vector<8x64xf32>
    %182 = vector.extract_strided_slice %157 {offsets = [0, 1], sizes = [8, 63], strides = [1, 1]} : vector<8x64xf32> to vector<8x63xf32>
    %183 = vector.extract_strided_slice %157 {offsets = [0, 0], sizes = [8, 1], strides = [1, 1]} : vector<8x64xf32> to vector<8x1xf32>
    %184 = tpu.concatenate %182, %183 in 1 : vector<8x63xf32>, vector<8x1xf32> -> vector<8x64xf32>
    %185 = vector.extract_strided_slice %15 {offsets = [5, 0], sizes = [1, 64], strides = [1, 1]} : vector<9x64xf32> to vector<1x64xf32>
    %186 = vector.broadcast %185 : vector<1x64xf32> to vector<8x64xf32>
    %187 = arith.mulf %184, %186 : vector<8x64xf32>
    %188 = vector.extract_strided_slice %157 {offsets = [0, 7], sizes = [8, 57], strides = [1, 1]} : vector<8x64xf32> to vector<8x57xf32>
    %189 = vector.extract_strided_slice %157 {offsets = [0, 0], sizes = [8, 7], strides = [1, 1]} : vector<8x64xf32> to vector<8x7xf32>
    %190 = tpu.concatenate %188, %189 in 1 : vector<8x57xf32>, vector<8x7xf32> -> vector<8x64xf32>
    %191 = vector.extract_strided_slice %15 {offsets = [6, 0], sizes = [1, 64], strides = [1, 1]} : vector<9x64xf32> to vector<1x64xf32>
    %192 = vector.broadcast %191 : vector<1x64xf32> to vector<8x64xf32>
    %193 = arith.mulf %190, %192 : vector<8x64xf32>
    %194 = vector.extract_strided_slice %157 {offsets = [0, 8], sizes = [8, 56], strides = [1, 1]} : vector<8x64xf32> to vector<8x56xf32>
    %195 = vector.extract_strided_slice %157 {offsets = [0, 0], sizes = [8, 8], strides = [1, 1]} : vector<8x64xf32> to vector<8x8xf32>
    %196 = tpu.concatenate %194, %195 in 1 : vector<8x56xf32>, vector<8x8xf32> -> vector<8x64xf32>
    %197 = vector.extract_strided_slice %15 {offsets = [7, 0], sizes = [1, 64], strides = [1, 1]} : vector<9x64xf32> to vector<1x64xf32>
    %198 = vector.broadcast %197 : vector<1x64xf32> to vector<8x64xf32>
    %199 = arith.mulf %196, %198 : vector<8x64xf32>
    %200 = vector.extract_strided_slice %157 {offsets = [0, 9], sizes = [8, 55], strides = [1, 1]} : vector<8x64xf32> to vector<8x55xf32>
    %201 = vector.extract_strided_slice %157 {offsets = [0, 0], sizes = [8, 9], strides = [1, 1]} : vector<8x64xf32> to vector<8x9xf32>
    %202 = tpu.concatenate %200, %201 in 1 : vector<8x55xf32>, vector<8x9xf32> -> vector<8x64xf32>
    %203 = vector.extract_strided_slice %15 {offsets = [8, 0], sizes = [1, 64], strides = [1, 1]} : vector<9x64xf32> to vector<1x64xf32>
    %204 = vector.broadcast %203 : vector<1x64xf32> to vector<8x64xf32>
    %205 = arith.mulf %202, %204 : vector<8x64xf32>
    %206 = tpu.concatenate %163, %169, %175, %181, %157, %187, %193, %199, %205 in 0 : vector<8x64xf32>, vector<8x64xf32>, vector<8x64xf32>, vector<8x64xf32>, vector<8x64xf32>, vector<8x64xf32>, vector<8x64xf32>, vector<8x64xf32>, vector<8x64xf32> -> vector<72x64xf32>
    %cst_35 = arith.constant dense<0.000000e+00> : vector<8x64xf32>
    %207 = tpu.matmul %2, %206, %cst_35 {dimension_numbers = #tpu.dot_dimension_numbers<[1], [0], [0], [1], [0, 0, 1, 1], [], []>} : vector<8x72xf32>, vector<72x64xf32>, vector<8x64xf32> -> vector<8x64xf32>
    %208 = vector.broadcast %7 : vector<8x1xf32> to vector<8x64xf32>
    %209 = arith.mulf %207, %208 : vector<8x64xf32>
    %210 = vector.broadcast %8 : vector<8x1xf32> to vector<8x64xf32>
    %211 = arith.addf %209, %210 : vector<8x64xf32>
    %cst_36 = arith.constant 0.000000e+00 : f32
    %212 = vector.broadcast %cst_36 : f32 to vector<8x64xf32>
    %213 = arith.cmpf ogt, %211, %212 : vector<8x64xf32>
    %cst_37 = arith.constant 2.000000e-01 : f32
    %214 = vector.broadcast %cst_37 : f32 to vector<8x64xf32>
    %215 = arith.mulf %214, %211 : vector<8x64xf32>
    %216 = arith.select %213, %211, %215 : vector<8x64xi1>, vector<8x64xf32>
    %217 = vector.extract_strided_slice %216 {offsets = [0, 55], sizes = [8, 9], strides = [1, 1]} : vector<8x64xf32> to vector<8x9xf32>
    %218 = vector.extract_strided_slice %216 {offsets = [0, 0], sizes = [8, 55], strides = [1, 1]} : vector<8x64xf32> to vector<8x55xf32>
    %219 = tpu.concatenate %217, %218 in 1 : vector<8x9xf32>, vector<8x55xf32> -> vector<8x64xf32>
    %220 = vector.extract_strided_slice %15 {offsets = [0, 0], sizes = [1, 64], strides = [1, 1]} : vector<9x64xf32> to vector<1x64xf32>
    %221 = vector.broadcast %220 : vector<1x64xf32> to vector<8x64xf32>
    %222 = arith.mulf %219, %221 : vector<8x64xf32>
    %223 = vector.extract_strided_slice %216 {offsets = [0, 56], sizes = [8, 8], strides = [1, 1]} : vector<8x64xf32> to vector<8x8xf32>
    %224 = vector.extract_strided_slice %216 {offsets = [0, 0], sizes = [8, 56], strides = [1, 1]} : vector<8x64xf32> to vector<8x56xf32>
    %225 = tpu.concatenate %223, %224 in 1 : vector<8x8xf32>, vector<8x56xf32> -> vector<8x64xf32>
    %226 = vector.extract_strided_slice %15 {offsets = [1, 0], sizes = [1, 64], strides = [1, 1]} : vector<9x64xf32> to vector<1x64xf32>
    %227 = vector.broadcast %226 : vector<1x64xf32> to vector<8x64xf32>
    %228 = arith.mulf %225, %227 : vector<8x64xf32>
    %229 = vector.extract_strided_slice %216 {offsets = [0, 57], sizes = [8, 7], strides = [1, 1]} : vector<8x64xf32> to vector<8x7xf32>
    %230 = vector.extract_strided_slice %216 {offsets = [0, 0], sizes = [8, 57], strides = [1, 1]} : vector<8x64xf32> to vector<8x57xf32>
    %231 = tpu.concatenate %229, %230 in 1 : vector<8x7xf32>, vector<8x57xf32> -> vector<8x64xf32>
    %232 = vector.extract_strided_slice %15 {offsets = [2, 0], sizes = [1, 64], strides = [1, 1]} : vector<9x64xf32> to vector<1x64xf32>
    %233 = vector.broadcast %232 : vector<1x64xf32> to vector<8x64xf32>
    %234 = arith.mulf %231, %233 : vector<8x64xf32>
    %235 = vector.extract_strided_slice %216 {offsets = [0, 63], sizes = [8, 1], strides = [1, 1]} : vector<8x64xf32> to vector<8x1xf32>
    %236 = vector.extract_strided_slice %216 {offsets = [0, 0], sizes = [8, 63], strides = [1, 1]} : vector<8x64xf32> to vector<8x63xf32>
    %237 = tpu.concatenate %235, %236 in 1 : vector<8x1xf32>, vector<8x63xf32> -> vector<8x64xf32>
    %238 = vector.extract_strided_slice %15 {offsets = [3, 0], sizes = [1, 64], strides = [1, 1]} : vector<9x64xf32> to vector<1x64xf32>
    %239 = vector.broadcast %238 : vector<1x64xf32> to vector<8x64xf32>
    %240 = arith.mulf %237, %239 : vector<8x64xf32>
    %241 = vector.extract_strided_slice %216 {offsets = [0, 1], sizes = [8, 63], strides = [1, 1]} : vector<8x64xf32> to vector<8x63xf32>
    %242 = vector.extract_strided_slice %216 {offsets = [0, 0], sizes = [8, 1], strides = [1, 1]} : vector<8x64xf32> to vector<8x1xf32>
    %243 = tpu.concatenate %241, %242 in 1 : vector<8x63xf32>, vector<8x1xf32> -> vector<8x64xf32>
    %244 = vector.extract_strided_slice %15 {offsets = [5, 0], sizes = [1, 64], strides = [1, 1]} : vector<9x64xf32> to vector<1x64xf32>
    %245 = vector.broadcast %244 : vector<1x64xf32> to vector<8x64xf32>
    %246 = arith.mulf %243, %245 : vector<8x64xf32>
    %247 = vector.extract_strided_slice %216 {offsets = [0, 7], sizes = [8, 57], strides = [1, 1]} : vector<8x64xf32> to vector<8x57xf32>
    %248 = vector.extract_strided_slice %216 {offsets = [0, 0], sizes = [8, 7], strides = [1, 1]} : vector<8x64xf32> to vector<8x7xf32>
    %249 = tpu.concatenate %247, %248 in 1 : vector<8x57xf32>, vector<8x7xf32> -> vector<8x64xf32>
    %250 = vector.extract_strided_slice %15 {offsets = [6, 0], sizes = [1, 64], strides = [1, 1]} : vector<9x64xf32> to vector<1x64xf32>
    %251 = vector.broadcast %250 : vector<1x64xf32> to vector<8x64xf32>
    %252 = arith.mulf %249, %251 : vector<8x64xf32>
    %253 = vector.extract_strided_slice %216 {offsets = [0, 8], sizes = [8, 56], strides = [1, 1]} : vector<8x64xf32> to vector<8x56xf32>
    %254 = vector.extract_strided_slice %216 {offsets = [0, 0], sizes = [8, 8], strides = [1, 1]} : vector<8x64xf32> to vector<8x8xf32>
    %255 = tpu.concatenate %253, %254 in 1 : vector<8x56xf32>, vector<8x8xf32> -> vector<8x64xf32>
    %256 = vector.extract_strided_slice %15 {offsets = [7, 0], sizes = [1, 64], strides = [1, 1]} : vector<9x64xf32> to vector<1x64xf32>
    %257 = vector.broadcast %256 : vector<1x64xf32> to vector<8x64xf32>
    %258 = arith.mulf %255, %257 : vector<8x64xf32>
    %259 = vector.extract_strided_slice %216 {offsets = [0, 9], sizes = [8, 55], strides = [1, 1]} : vector<8x64xf32> to vector<8x55xf32>
    %260 = vector.extract_strided_slice %216 {offsets = [0, 0], sizes = [8, 9], strides = [1, 1]} : vector<8x64xf32> to vector<8x9xf32>
    %261 = tpu.concatenate %259, %260 in 1 : vector<8x55xf32>, vector<8x9xf32> -> vector<8x64xf32>
    %262 = vector.extract_strided_slice %15 {offsets = [8, 0], sizes = [1, 64], strides = [1, 1]} : vector<9x64xf32> to vector<1x64xf32>
    %263 = vector.broadcast %262 : vector<1x64xf32> to vector<8x64xf32>
    %264 = arith.mulf %261, %263 : vector<8x64xf32>
    %265 = tpu.concatenate %222, %228, %234, %240, %216, %246, %252, %258, %264 in 0 : vector<8x64xf32>, vector<8x64xf32>, vector<8x64xf32>, vector<8x64xf32>, vector<8x64xf32>, vector<8x64xf32>, vector<8x64xf32>, vector<8x64xf32>, vector<8x64xf32> -> vector<72x64xf32>
    %cst_38 = arith.constant dense<0.000000e+00> : vector<8x64xf32>
    %266 = tpu.matmul %2, %265, %cst_38 {dimension_numbers = #tpu.dot_dimension_numbers<[1], [0], [0], [1], [0, 0, 1, 1], [], []>} : vector<8x72xf32>, vector<72x64xf32>, vector<8x64xf32> -> vector<8x64xf32>
    %267 = vector.broadcast %7 : vector<8x1xf32> to vector<8x64xf32>
    %268 = arith.mulf %266, %267 : vector<8x64xf32>
    %269 = vector.broadcast %8 : vector<8x1xf32> to vector<8x64xf32>
    %270 = arith.addf %268, %269 : vector<8x64xf32>
    %cst_39 = arith.constant 0.000000e+00 : f32
    %271 = vector.broadcast %cst_39 : f32 to vector<8x64xf32>
    %272 = arith.cmpf ogt, %270, %271 : vector<8x64xf32>
    %cst_40 = arith.constant 2.000000e-01 : f32
    %273 = vector.broadcast %cst_40 : f32 to vector<8x64xf32>
    %274 = arith.mulf %273, %270 : vector<8x64xf32>
    %275 = arith.select %272, %270, %274 : vector<8x64xi1>, vector<8x64xf32>
    %276 = vector.extract_strided_slice %275 {offsets = [0, 55], sizes = [8, 9], strides = [1, 1]} : vector<8x64xf32> to vector<8x9xf32>
    %277 = vector.extract_strided_slice %275 {offsets = [0, 0], sizes = [8, 55], strides = [1, 1]} : vector<8x64xf32> to vector<8x55xf32>
    %278 = tpu.concatenate %276, %277 in 1 : vector<8x9xf32>, vector<8x55xf32> -> vector<8x64xf32>
    %279 = vector.extract_strided_slice %15 {offsets = [0, 0], sizes = [1, 64], strides = [1, 1]} : vector<9x64xf32> to vector<1x64xf32>
    %280 = vector.broadcast %279 : vector<1x64xf32> to vector<8x64xf32>
    %281 = arith.mulf %278, %280 : vector<8x64xf32>
    %282 = vector.extract_strided_slice %275 {offsets = [0, 56], sizes = [8, 8], strides = [1, 1]} : vector<8x64xf32> to vector<8x8xf32>
    %283 = vector.extract_strided_slice %275 {offsets = [0, 0], sizes = [8, 56], strides = [1, 1]} : vector<8x64xf32> to vector<8x56xf32>
    %284 = tpu.concatenate %282, %283 in 1 : vector<8x8xf32>, vector<8x56xf32> -> vector<8x64xf32>
    %285 = vector.extract_strided_slice %15 {offsets = [1, 0], sizes = [1, 64], strides = [1, 1]} : vector<9x64xf32> to vector<1x64xf32>
    %286 = vector.broadcast %285 : vector<1x64xf32> to vector<8x64xf32>
    %287 = arith.mulf %284, %286 : vector<8x64xf32>
    %288 = vector.extract_strided_slice %275 {offsets = [0, 57], sizes = [8, 7], strides = [1, 1]} : vector<8x64xf32> to vector<8x7xf32>
    %289 = vector.extract_strided_slice %275 {offsets = [0, 0], sizes = [8, 57], strides = [1, 1]} : vector<8x64xf32> to vector<8x57xf32>
    %290 = tpu.concatenate %288, %289 in 1 : vector<8x7xf32>, vector<8x57xf32> -> vector<8x64xf32>
    %291 = vector.extract_strided_slice %15 {offsets = [2, 0], sizes = [1, 64], strides = [1, 1]} : vector<9x64xf32> to vector<1x64xf32>
    %292 = vector.broadcast %291 : vector<1x64xf32> to vector<8x64xf32>
    %293 = arith.mulf %290, %292 : vector<8x64xf32>
    %294 = vector.extract_strided_slice %275 {offsets = [0, 63], sizes = [8, 1], strides = [1, 1]} : vector<8x64xf32> to vector<8x1xf32>
    %295 = vector.extract_strided_slice %275 {offsets = [0, 0], sizes = [8, 63], strides = [1, 1]} : vector<8x64xf32> to vector<8x63xf32>
    %296 = tpu.concatenate %294, %295 in 1 : vector<8x1xf32>, vector<8x63xf32> -> vector<8x64xf32>
    %297 = vector.extract_strided_slice %15 {offsets = [3, 0], sizes = [1, 64], strides = [1, 1]} : vector<9x64xf32> to vector<1x64xf32>
    %298 = vector.broadcast %297 : vector<1x64xf32> to vector<8x64xf32>
    %299 = arith.mulf %296, %298 : vector<8x64xf32>
    %300 = vector.extract_strided_slice %275 {offsets = [0, 1], sizes = [8, 63], strides = [1, 1]} : vector<8x64xf32> to vector<8x63xf32>
    %301 = vector.extract_strided_slice %275 {offsets = [0, 0], sizes = [8, 1], strides = [1, 1]} : vector<8x64xf32> to vector<8x1xf32>
    %302 = tpu.concatenate %300, %301 in 1 : vector<8x63xf32>, vector<8x1xf32> -> vector<8x64xf32>
    %303 = vector.extract_strided_slice %15 {offsets = [5, 0], sizes = [1, 64], strides = [1, 1]} : vector<9x64xf32> to vector<1x64xf32>
    %304 = vector.broadcast %303 : vector<1x64xf32> to vector<8x64xf32>
    %305 = arith.mulf %302, %304 : vector<8x64xf32>
    %306 = vector.extract_strided_slice %275 {offsets = [0, 7], sizes = [8, 57], strides = [1, 1]} : vector<8x64xf32> to vector<8x57xf32>
    %307 = vector.extract_strided_slice %275 {offsets = [0, 0], sizes = [8, 7], strides = [1, 1]} : vector<8x64xf32> to vector<8x7xf32>
    %308 = tpu.concatenate %306, %307 in 1 : vector<8x57xf32>, vector<8x7xf32> -> vector<8x64xf32>
    %309 = vector.extract_strided_slice %15 {offsets = [6, 0], sizes = [1, 64], strides = [1, 1]} : vector<9x64xf32> to vector<1x64xf32>
    %310 = vector.broadcast %309 : vector<1x64xf32> to vector<8x64xf32>
    %311 = arith.mulf %308, %310 : vector<8x64xf32>
    %312 = vector.extract_strided_slice %275 {offsets = [0, 8], sizes = [8, 56], strides = [1, 1]} : vector<8x64xf32> to vector<8x56xf32>
    %313 = vector.extract_strided_slice %275 {offsets = [0, 0], sizes = [8, 8], strides = [1, 1]} : vector<8x64xf32> to vector<8x8xf32>
    %314 = tpu.concatenate %312, %313 in 1 : vector<8x56xf32>, vector<8x8xf32> -> vector<8x64xf32>
    %315 = vector.extract_strided_slice %15 {offsets = [7, 0], sizes = [1, 64], strides = [1, 1]} : vector<9x64xf32> to vector<1x64xf32>
    %316 = vector.broadcast %315 : vector<1x64xf32> to vector<8x64xf32>
    %317 = arith.mulf %314, %316 : vector<8x64xf32>
    %318 = vector.extract_strided_slice %275 {offsets = [0, 9], sizes = [8, 55], strides = [1, 1]} : vector<8x64xf32> to vector<8x55xf32>
    %319 = vector.extract_strided_slice %275 {offsets = [0, 0], sizes = [8, 9], strides = [1, 1]} : vector<8x64xf32> to vector<8x9xf32>
    %320 = tpu.concatenate %318, %319 in 1 : vector<8x55xf32>, vector<8x9xf32> -> vector<8x64xf32>
    %321 = vector.extract_strided_slice %15 {offsets = [8, 0], sizes = [1, 64], strides = [1, 1]} : vector<9x64xf32> to vector<1x64xf32>
    %322 = vector.broadcast %321 : vector<1x64xf32> to vector<8x64xf32>
    %323 = arith.mulf %320, %322 : vector<8x64xf32>
    %324 = tpu.concatenate %281, %287, %293, %299, %275, %305, %311, %317, %323 in 0 : vector<8x64xf32>, vector<8x64xf32>, vector<8x64xf32>, vector<8x64xf32>, vector<8x64xf32>, vector<8x64xf32>, vector<8x64xf32>, vector<8x64xf32>, vector<8x64xf32> -> vector<72x64xf32>
    %cst_41 = arith.constant dense<0.000000e+00> : vector<8x64xf32>
    %325 = tpu.matmul %3, %324, %cst_41 {dimension_numbers = #tpu.dot_dimension_numbers<[1], [0], [0], [1], [0, 0, 1, 1], [], []>} : vector<8x72xf32>, vector<72x64xf32>, vector<8x64xf32> -> vector<8x64xf32>
    %326 = vector.broadcast %9 : vector<8x1xf32> to vector<8x64xf32>
    %327 = arith.mulf %325, %326 : vector<8x64xf32>
    %328 = vector.broadcast %10 : vector<8x1xf32> to vector<8x64xf32>
    %329 = arith.addf %327, %328 : vector<8x64xf32>
    %cst_42 = arith.constant 0.000000e+00 : f32
    %330 = vector.broadcast %cst_42 : f32 to vector<8x64xf32>
    %331 = arith.maximumf %329, %330 : vector<8x64xf32>
    %332 = arith.truncf %331 : vector<8x64xf32> to vector<8x64xbf16>
    %cst_43 = arith.constant dense<0.000000e+00> : vector<8x256xf32>
    %333 = tpu.matmul %332, %18, %cst_43 {dimension_numbers = #tpu.dot_dimension_numbers<[1], [0], [0], [1], [0, 0, 1, 1], [], []>} : vector<8x64xbf16>, vector<64x256xbf16>, vector<8x256xf32> -> vector<8x256xf32>
    %cst_44 = arith.constant dense<0.000000e+00> : vector<32x256xf32>
    %334 = tpu.matmul %5, %333, %cst_44 {dimension_numbers = #tpu.dot_dimension_numbers<[1], [0], [0], [1], [0, 0, 1, 1], [], []>} : vector<32x8xf32>, vector<8x256xf32>, vector<32x256xf32> -> vector<32x256xf32>
    %335 = vector.extract_strided_slice %334 {offsets = [0, 0], sizes = [8, 256], strides = [1, 1]} : vector<32x256xf32> to vector<8x256xf32>
    %336 = vector.extract_strided_slice %334 {offsets = [8, 0], sizes = [8, 256], strides = [1, 1]} : vector<32x256xf32> to vector<8x256xf32>
    %337 = vector.extract_strided_slice %336 {offsets = [0, 255], sizes = [8, 1], strides = [1, 1]} : vector<8x256xf32> to vector<8x1xf32>
    %338 = vector.extract_strided_slice %336 {offsets = [0, 0], sizes = [8, 255], strides = [1, 1]} : vector<8x256xf32> to vector<8x255xf32>
    %339 = tpu.concatenate %337, %338 in 1 : vector<8x1xf32>, vector<8x255xf32> -> vector<8x256xf32>
    %340 = arith.addf %335, %339 : vector<8x256xf32>
    %341 = vector.extract_strided_slice %334 {offsets = [16, 0], sizes = [8, 256], strides = [1, 1]} : vector<32x256xf32> to vector<8x256xf32>
    %342 = vector.extract_strided_slice %341 {offsets = [0, 240], sizes = [8, 16], strides = [1, 1]} : vector<8x256xf32> to vector<8x16xf32>
    %343 = vector.extract_strided_slice %341 {offsets = [0, 0], sizes = [8, 240], strides = [1, 1]} : vector<8x256xf32> to vector<8x240xf32>
    %344 = tpu.concatenate %342, %343 in 1 : vector<8x16xf32>, vector<8x240xf32> -> vector<8x256xf32>
    %345 = arith.addf %340, %344 : vector<8x256xf32>
    %346 = vector.extract_strided_slice %334 {offsets = [24, 0], sizes = [8, 256], strides = [1, 1]} : vector<32x256xf32> to vector<8x256xf32>
    %347 = vector.extract_strided_slice %346 {offsets = [0, 239], sizes = [8, 17], strides = [1, 1]} : vector<8x256xf32> to vector<8x17xf32>
    %348 = vector.extract_strided_slice %346 {offsets = [0, 0], sizes = [8, 239], strides = [1, 1]} : vector<8x256xf32> to vector<8x239xf32>
    %349 = tpu.concatenate %347, %348 in 1 : vector<8x17xf32>, vector<8x239xf32> -> vector<8x256xf32>
    %350 = arith.addf %345, %349 : vector<8x256xf32>
    %351 = vector.broadcast %11 : vector<8x1xf32> to vector<8x256xf32>
    %352 = arith.addf %350, %351 : vector<8x256xf32>
    %353 = vector.extract_strided_slice %352 {offsets = [0, 239], sizes = [8, 17], strides = [1, 1]} : vector<8x256xf32> to vector<8x17xf32>
    %354 = vector.extract_strided_slice %352 {offsets = [0, 0], sizes = [8, 239], strides = [1, 1]} : vector<8x256xf32> to vector<8x239xf32>
    %355 = tpu.concatenate %353, %354 in 1 : vector<8x17xf32>, vector<8x239xf32> -> vector<8x256xf32>
    %356 = vector.extract_strided_slice %14 {offsets = [0, 0], sizes = [1, 256], strides = [1, 1]} : vector<9x256xf32> to vector<1x256xf32>
    %357 = vector.broadcast %356 : vector<1x256xf32> to vector<8x256xf32>
    %358 = arith.mulf %355, %357 : vector<8x256xf32>
    %359 = vector.extract_strided_slice %352 {offsets = [0, 240], sizes = [8, 16], strides = [1, 1]} : vector<8x256xf32> to vector<8x16xf32>
    %360 = vector.extract_strided_slice %352 {offsets = [0, 0], sizes = [8, 240], strides = [1, 1]} : vector<8x256xf32> to vector<8x240xf32>
    %361 = tpu.concatenate %359, %360 in 1 : vector<8x16xf32>, vector<8x240xf32> -> vector<8x256xf32>
    %362 = vector.extract_strided_slice %14 {offsets = [1, 0], sizes = [1, 256], strides = [1, 1]} : vector<9x256xf32> to vector<1x256xf32>
    %363 = vector.broadcast %362 : vector<1x256xf32> to vector<8x256xf32>
    %364 = arith.mulf %361, %363 : vector<8x256xf32>
    %365 = vector.extract_strided_slice %352 {offsets = [0, 241], sizes = [8, 15], strides = [1, 1]} : vector<8x256xf32> to vector<8x15xf32>
    %366 = vector.extract_strided_slice %352 {offsets = [0, 0], sizes = [8, 241], strides = [1, 1]} : vector<8x256xf32> to vector<8x241xf32>
    %367 = tpu.concatenate %365, %366 in 1 : vector<8x15xf32>, vector<8x241xf32> -> vector<8x256xf32>
    %368 = vector.extract_strided_slice %14 {offsets = [2, 0], sizes = [1, 256], strides = [1, 1]} : vector<9x256xf32> to vector<1x256xf32>
    %369 = vector.broadcast %368 : vector<1x256xf32> to vector<8x256xf32>
    %370 = arith.mulf %367, %369 : vector<8x256xf32>
    %371 = vector.extract_strided_slice %352 {offsets = [0, 255], sizes = [8, 1], strides = [1, 1]} : vector<8x256xf32> to vector<8x1xf32>
    %372 = vector.extract_strided_slice %352 {offsets = [0, 0], sizes = [8, 255], strides = [1, 1]} : vector<8x256xf32> to vector<8x255xf32>
    %373 = tpu.concatenate %371, %372 in 1 : vector<8x1xf32>, vector<8x255xf32> -> vector<8x256xf32>
    %374 = vector.extract_strided_slice %14 {offsets = [3, 0], sizes = [1, 256], strides = [1, 1]} : vector<9x256xf32> to vector<1x256xf32>
    %375 = vector.broadcast %374 : vector<1x256xf32> to vector<8x256xf32>
    %376 = arith.mulf %373, %375 : vector<8x256xf32>
    %377 = vector.extract_strided_slice %352 {offsets = [0, 1], sizes = [8, 255], strides = [1, 1]} : vector<8x256xf32> to vector<8x255xf32>
    %378 = vector.extract_strided_slice %352 {offsets = [0, 0], sizes = [8, 1], strides = [1, 1]} : vector<8x256xf32> to vector<8x1xf32>
    %379 = tpu.concatenate %377, %378 in 1 : vector<8x255xf32>, vector<8x1xf32> -> vector<8x256xf32>
    %380 = vector.extract_strided_slice %14 {offsets = [5, 0], sizes = [1, 256], strides = [1, 1]} : vector<9x256xf32> to vector<1x256xf32>
    %381 = vector.broadcast %380 : vector<1x256xf32> to vector<8x256xf32>
    %382 = arith.mulf %379, %381 : vector<8x256xf32>
    %383 = vector.extract_strided_slice %352 {offsets = [0, 15], sizes = [8, 241], strides = [1, 1]} : vector<8x256xf32> to vector<8x241xf32>
    %384 = vector.extract_strided_slice %352 {offsets = [0, 0], sizes = [8, 15], strides = [1, 1]} : vector<8x256xf32> to vector<8x15xf32>
    %385 = tpu.concatenate %383, %384 in 1 : vector<8x241xf32>, vector<8x15xf32> -> vector<8x256xf32>
    %386 = vector.extract_strided_slice %14 {offsets = [6, 0], sizes = [1, 256], strides = [1, 1]} : vector<9x256xf32> to vector<1x256xf32>
    %387 = vector.broadcast %386 : vector<1x256xf32> to vector<8x256xf32>
    %388 = arith.mulf %385, %387 : vector<8x256xf32>
    %389 = vector.extract_strided_slice %352 {offsets = [0, 16], sizes = [8, 240], strides = [1, 1]} : vector<8x256xf32> to vector<8x240xf32>
    %390 = vector.extract_strided_slice %352 {offsets = [0, 0], sizes = [8, 16], strides = [1, 1]} : vector<8x256xf32> to vector<8x16xf32>
    %391 = tpu.concatenate %389, %390 in 1 : vector<8x240xf32>, vector<8x16xf32> -> vector<8x256xf32>
    %392 = vector.extract_strided_slice %14 {offsets = [7, 0], sizes = [1, 256], strides = [1, 1]} : vector<9x256xf32> to vector<1x256xf32>
    %393 = vector.broadcast %392 : vector<1x256xf32> to vector<8x256xf32>
    %394 = arith.mulf %391, %393 : vector<8x256xf32>
    %395 = vector.extract_strided_slice %352 {offsets = [0, 17], sizes = [8, 239], strides = [1, 1]} : vector<8x256xf32> to vector<8x239xf32>
    %396 = vector.extract_strided_slice %352 {offsets = [0, 0], sizes = [8, 17], strides = [1, 1]} : vector<8x256xf32> to vector<8x17xf32>
    %397 = tpu.concatenate %395, %396 in 1 : vector<8x239xf32>, vector<8x17xf32> -> vector<8x256xf32>
    %398 = vector.extract_strided_slice %14 {offsets = [8, 0], sizes = [1, 256], strides = [1, 1]} : vector<9x256xf32> to vector<1x256xf32>
    %399 = vector.broadcast %398 : vector<1x256xf32> to vector<8x256xf32>
    %400 = arith.mulf %397, %399 : vector<8x256xf32>
    %401 = tpu.concatenate %358, %364, %370, %376, %352, %382, %388, %394, %400 in 0 : vector<8x256xf32>, vector<8x256xf32>, vector<8x256xf32>, vector<8x256xf32>, vector<8x256xf32>, vector<8x256xf32>, vector<8x256xf32>, vector<8x256xf32>, vector<8x256xf32> -> vector<72x256xf32>
    %cst_45 = arith.constant dense<0.000000e+00> : vector<8x256xf32>
    %402 = tpu.matmul %3, %401, %cst_45 {dimension_numbers = #tpu.dot_dimension_numbers<[1], [0], [0], [1], [0, 0, 1, 1], [], []>} : vector<8x72xf32>, vector<72x256xf32>, vector<8x256xf32> -> vector<8x256xf32>
    %403 = vector.broadcast %9 : vector<8x1xf32> to vector<8x256xf32>
    %404 = arith.mulf %402, %403 : vector<8x256xf32>
    %405 = vector.broadcast %10 : vector<8x1xf32> to vector<8x256xf32>
    %406 = arith.addf %404, %405 : vector<8x256xf32>
    %cst_46 = arith.constant 0.000000e+00 : f32
    %407 = vector.broadcast %cst_46 : f32 to vector<8x256xf32>
    %408 = arith.maximumf %406, %407 : vector<8x256xf32>
    %409 = arith.truncf %408 : vector<8x256xf32> to vector<8x256xbf16>
    %cst_47 = arith.constant dense<0.000000e+00> : vector<8x1024xf32>
    %410 = tpu.matmul %409, %19, %cst_47 {dimension_numbers = #tpu.dot_dimension_numbers<[1], [0], [0], [1], [0, 0, 1, 1], [], []>} : vector<8x256xbf16>, vector<256x1024xbf16>, vector<8x1024xf32> -> vector<8x1024xf32>
    %cst_48 = arith.constant dense<0.000000e+00> : vector<32x1024xf32>
    %411 = tpu.matmul %5, %410, %cst_48 {dimension_numbers = #tpu.dot_dimension_numbers<[1], [0], [0], [1], [0, 0, 1, 1], [], []>} : vector<32x8xf32>, vector<8x1024xf32>, vector<32x1024xf32> -> vector<32x1024xf32>
    %412 = vector.extract_strided_slice %411 {offsets = [0, 0], sizes = [8, 1024], strides = [1, 1]} : vector<32x1024xf32> to vector<8x1024xf32>
    %413 = vector.extract_strided_slice %411 {offsets = [8, 0], sizes = [8, 1024], strides = [1, 1]} : vector<32x1024xf32> to vector<8x1024xf32>
    %414 = vector.extract_strided_slice %413 {offsets = [0, 1023], sizes = [8, 1], strides = [1, 1]} : vector<8x1024xf32> to vector<8x1xf32>
    %415 = vector.extract_strided_slice %413 {offsets = [0, 0], sizes = [8, 1023], strides = [1, 1]} : vector<8x1024xf32> to vector<8x1023xf32>
    %416 = tpu.concatenate %414, %415 in 1 : vector<8x1xf32>, vector<8x1023xf32> -> vector<8x1024xf32>
    %417 = arith.addf %412, %416 : vector<8x1024xf32>
    %418 = vector.extract_strided_slice %411 {offsets = [16, 0], sizes = [8, 1024], strides = [1, 1]} : vector<32x1024xf32> to vector<8x1024xf32>
    %419 = vector.extract_strided_slice %418 {offsets = [0, 992], sizes = [8, 32], strides = [1, 1]} : vector<8x1024xf32> to vector<8x32xf32>
    %420 = vector.extract_strided_slice %418 {offsets = [0, 0], sizes = [8, 992], strides = [1, 1]} : vector<8x1024xf32> to vector<8x992xf32>
    %421 = tpu.concatenate %419, %420 in 1 : vector<8x32xf32>, vector<8x992xf32> -> vector<8x1024xf32>
    %422 = arith.addf %417, %421 : vector<8x1024xf32>
    %423 = vector.extract_strided_slice %411 {offsets = [24, 0], sizes = [8, 1024], strides = [1, 1]} : vector<32x1024xf32> to vector<8x1024xf32>
    %424 = vector.extract_strided_slice %423 {offsets = [0, 991], sizes = [8, 33], strides = [1, 1]} : vector<8x1024xf32> to vector<8x33xf32>
    %425 = vector.extract_strided_slice %423 {offsets = [0, 0], sizes = [8, 991], strides = [1, 1]} : vector<8x1024xf32> to vector<8x991xf32>
    %426 = tpu.concatenate %424, %425 in 1 : vector<8x33xf32>, vector<8x991xf32> -> vector<8x1024xf32>
    %427 = arith.addf %422, %426 : vector<8x1024xf32>
    %428 = vector.broadcast %11 : vector<8x1xf32> to vector<8x1024xf32>
    %429 = arith.addf %427, %428 : vector<8x1024xf32>
    %430 = vector.extract_strided_slice %429 {offsets = [0, 991], sizes = [8, 33], strides = [1, 1]} : vector<8x1024xf32> to vector<8x33xf32>
    %431 = vector.extract_strided_slice %429 {offsets = [0, 0], sizes = [8, 991], strides = [1, 1]} : vector<8x1024xf32> to vector<8x991xf32>
    %432 = tpu.concatenate %430, %431 in 1 : vector<8x33xf32>, vector<8x991xf32> -> vector<8x1024xf32>
    %433 = vector.extract_strided_slice %13 {offsets = [0, 0], sizes = [1, 1024], strides = [1, 1]} : vector<9x1024xf32> to vector<1x1024xf32>
    %434 = vector.broadcast %433 : vector<1x1024xf32> to vector<8x1024xf32>
    %435 = arith.mulf %432, %434 : vector<8x1024xf32>
    %436 = vector.extract_strided_slice %429 {offsets = [0, 992], sizes = [8, 32], strides = [1, 1]} : vector<8x1024xf32> to vector<8x32xf32>
    %437 = vector.extract_strided_slice %429 {offsets = [0, 0], sizes = [8, 992], strides = [1, 1]} : vector<8x1024xf32> to vector<8x992xf32>
    %438 = tpu.concatenate %436, %437 in 1 : vector<8x32xf32>, vector<8x992xf32> -> vector<8x1024xf32>
    %439 = vector.extract_strided_slice %13 {offsets = [1, 0], sizes = [1, 1024], strides = [1, 1]} : vector<9x1024xf32> to vector<1x1024xf32>
    %440 = vector.broadcast %439 : vector<1x1024xf32> to vector<8x1024xf32>
    %441 = arith.mulf %438, %440 : vector<8x1024xf32>
    %442 = vector.extract_strided_slice %429 {offsets = [0, 993], sizes = [8, 31], strides = [1, 1]} : vector<8x1024xf32> to vector<8x31xf32>
    %443 = vector.extract_strided_slice %429 {offsets = [0, 0], sizes = [8, 993], strides = [1, 1]} : vector<8x1024xf32> to vector<8x993xf32>
    %444 = tpu.concatenate %442, %443 in 1 : vector<8x31xf32>, vector<8x993xf32> -> vector<8x1024xf32>
    %445 = vector.extract_strided_slice %13 {offsets = [2, 0], sizes = [1, 1024], strides = [1, 1]} : vector<9x1024xf32> to vector<1x1024xf32>
    %446 = vector.broadcast %445 : vector<1x1024xf32> to vector<8x1024xf32>
    %447 = arith.mulf %444, %446 : vector<8x1024xf32>
    %448 = vector.extract_strided_slice %429 {offsets = [0, 1023], sizes = [8, 1], strides = [1, 1]} : vector<8x1024xf32> to vector<8x1xf32>
    %449 = vector.extract_strided_slice %429 {offsets = [0, 0], sizes = [8, 1023], strides = [1, 1]} : vector<8x1024xf32> to vector<8x1023xf32>
    %450 = tpu.concatenate %448, %449 in 1 : vector<8x1xf32>, vector<8x1023xf32> -> vector<8x1024xf32>
    %451 = vector.extract_strided_slice %13 {offsets = [3, 0], sizes = [1, 1024], strides = [1, 1]} : vector<9x1024xf32> to vector<1x1024xf32>
    %452 = vector.broadcast %451 : vector<1x1024xf32> to vector<8x1024xf32>
    %453 = arith.mulf %450, %452 : vector<8x1024xf32>
    %454 = vector.extract_strided_slice %429 {offsets = [0, 1], sizes = [8, 1023], strides = [1, 1]} : vector<8x1024xf32> to vector<8x1023xf32>
    %455 = vector.extract_strided_slice %429 {offsets = [0, 0], sizes = [8, 1], strides = [1, 1]} : vector<8x1024xf32> to vector<8x1xf32>
    %456 = tpu.concatenate %454, %455 in 1 : vector<8x1023xf32>, vector<8x1xf32> -> vector<8x1024xf32>
    %457 = vector.extract_strided_slice %13 {offsets = [5, 0], sizes = [1, 1024], strides = [1, 1]} : vector<9x1024xf32> to vector<1x1024xf32>
    %458 = vector.broadcast %457 : vector<1x1024xf32> to vector<8x1024xf32>
    %459 = arith.mulf %456, %458 : vector<8x1024xf32>
    %460 = vector.extract_strided_slice %429 {offsets = [0, 31], sizes = [8, 993], strides = [1, 1]} : vector<8x1024xf32> to vector<8x993xf32>
    %461 = vector.extract_strided_slice %429 {offsets = [0, 0], sizes = [8, 31], strides = [1, 1]} : vector<8x1024xf32> to vector<8x31xf32>
    %462 = tpu.concatenate %460, %461 in 1 : vector<8x993xf32>, vector<8x31xf32> -> vector<8x1024xf32>
    %463 = vector.extract_strided_slice %13 {offsets = [6, 0], sizes = [1, 1024], strides = [1, 1]} : vector<9x1024xf32> to vector<1x1024xf32>
    %464 = vector.broadcast %463 : vector<1x1024xf32> to vector<8x1024xf32>
    %465 = arith.mulf %462, %464 : vector<8x1024xf32>
    %466 = vector.extract_strided_slice %429 {offsets = [0, 32], sizes = [8, 992], strides = [1, 1]} : vector<8x1024xf32> to vector<8x992xf32>
    %467 = vector.extract_strided_slice %429 {offsets = [0, 0], sizes = [8, 32], strides = [1, 1]} : vector<8x1024xf32> to vector<8x32xf32>
    %468 = tpu.concatenate %466, %467 in 1 : vector<8x992xf32>, vector<8x32xf32> -> vector<8x1024xf32>
    %469 = vector.extract_strided_slice %13 {offsets = [7, 0], sizes = [1, 1024], strides = [1, 1]} : vector<9x1024xf32> to vector<1x1024xf32>
    %470 = vector.broadcast %469 : vector<1x1024xf32> to vector<8x1024xf32>
    %471 = arith.mulf %468, %470 : vector<8x1024xf32>
    %472 = vector.extract_strided_slice %429 {offsets = [0, 33], sizes = [8, 991], strides = [1, 1]} : vector<8x1024xf32> to vector<8x991xf32>
    %473 = vector.extract_strided_slice %429 {offsets = [0, 0], sizes = [8, 33], strides = [1, 1]} : vector<8x1024xf32> to vector<8x33xf32>
    %474 = tpu.concatenate %472, %473 in 1 : vector<8x991xf32>, vector<8x33xf32> -> vector<8x1024xf32>
    %475 = vector.extract_strided_slice %13 {offsets = [8, 0], sizes = [1, 1024], strides = [1, 1]} : vector<9x1024xf32> to vector<1x1024xf32>
    %476 = vector.broadcast %475 : vector<1x1024xf32> to vector<8x1024xf32>
    %477 = arith.mulf %474, %476 : vector<8x1024xf32>
    %478 = tpu.concatenate %435, %441, %447, %453, %429, %459, %465, %471, %477 in 0 : vector<8x1024xf32>, vector<8x1024xf32>, vector<8x1024xf32>, vector<8x1024xf32>, vector<8x1024xf32>, vector<8x1024xf32>, vector<8x1024xf32>, vector<8x1024xf32>, vector<8x1024xf32> -> vector<72x1024xf32>
    %cst_49 = arith.constant dense<0.000000e+00> : vector<8x1024xf32>
    %479 = tpu.matmul %3, %478, %cst_49 {dimension_numbers = #tpu.dot_dimension_numbers<[1], [0], [0], [1], [0, 0, 1, 1], [], []>} : vector<8x72xf32>, vector<72x1024xf32>, vector<8x1024xf32> -> vector<8x1024xf32>
    %480 = vector.broadcast %9 : vector<8x1xf32> to vector<8x1024xf32>
    %481 = arith.mulf %479, %480 : vector<8x1024xf32>
    %482 = vector.broadcast %10 : vector<8x1xf32> to vector<8x1024xf32>
    %483 = arith.addf %481, %482 : vector<8x1024xf32>
    %cst_50 = arith.constant 0.000000e+00 : f32
    %484 = vector.broadcast %cst_50 : f32 to vector<8x1024xf32>
    %485 = arith.maximumf %483, %484 : vector<8x1024xf32>
    %486 = vector.extract_strided_slice %485 {offsets = [0, 991], sizes = [8, 33], strides = [1, 1]} : vector<8x1024xf32> to vector<8x33xf32>
    %487 = vector.extract_strided_slice %485 {offsets = [0, 0], sizes = [8, 991], strides = [1, 1]} : vector<8x1024xf32> to vector<8x991xf32>
    %488 = tpu.concatenate %486, %487 in 1 : vector<8x33xf32>, vector<8x991xf32> -> vector<8x1024xf32>
    %489 = vector.extract_strided_slice %13 {offsets = [0, 0], sizes = [1, 1024], strides = [1, 1]} : vector<9x1024xf32> to vector<1x1024xf32>
    %490 = vector.broadcast %489 : vector<1x1024xf32> to vector<8x1024xf32>
    %491 = arith.mulf %488, %490 : vector<8x1024xf32>
    %492 = vector.extract_strided_slice %485 {offsets = [0, 992], sizes = [8, 32], strides = [1, 1]} : vector<8x1024xf32> to vector<8x32xf32>
    %493 = vector.extract_strided_slice %485 {offsets = [0, 0], sizes = [8, 992], strides = [1, 1]} : vector<8x1024xf32> to vector<8x992xf32>
    %494 = tpu.concatenate %492, %493 in 1 : vector<8x32xf32>, vector<8x992xf32> -> vector<8x1024xf32>
    %495 = vector.extract_strided_slice %13 {offsets = [1, 0], sizes = [1, 1024], strides = [1, 1]} : vector<9x1024xf32> to vector<1x1024xf32>
    %496 = vector.broadcast %495 : vector<1x1024xf32> to vector<8x1024xf32>
    %497 = arith.mulf %494, %496 : vector<8x1024xf32>
    %498 = vector.extract_strided_slice %485 {offsets = [0, 993], sizes = [8, 31], strides = [1, 1]} : vector<8x1024xf32> to vector<8x31xf32>
    %499 = vector.extract_strided_slice %485 {offsets = [0, 0], sizes = [8, 993], strides = [1, 1]} : vector<8x1024xf32> to vector<8x993xf32>
    %500 = tpu.concatenate %498, %499 in 1 : vector<8x31xf32>, vector<8x993xf32> -> vector<8x1024xf32>
    %501 = vector.extract_strided_slice %13 {offsets = [2, 0], sizes = [1, 1024], strides = [1, 1]} : vector<9x1024xf32> to vector<1x1024xf32>
    %502 = vector.broadcast %501 : vector<1x1024xf32> to vector<8x1024xf32>
    %503 = arith.mulf %500, %502 : vector<8x1024xf32>
    %504 = vector.extract_strided_slice %485 {offsets = [0, 1023], sizes = [8, 1], strides = [1, 1]} : vector<8x1024xf32> to vector<8x1xf32>
    %505 = vector.extract_strided_slice %485 {offsets = [0, 0], sizes = [8, 1023], strides = [1, 1]} : vector<8x1024xf32> to vector<8x1023xf32>
    %506 = tpu.concatenate %504, %505 in 1 : vector<8x1xf32>, vector<8x1023xf32> -> vector<8x1024xf32>
    %507 = vector.extract_strided_slice %13 {offsets = [3, 0], sizes = [1, 1024], strides = [1, 1]} : vector<9x1024xf32> to vector<1x1024xf32>
    %508 = vector.broadcast %507 : vector<1x1024xf32> to vector<8x1024xf32>
    %509 = arith.mulf %506, %508 : vector<8x1024xf32>
    %510 = vector.extract_strided_slice %485 {offsets = [0, 1], sizes = [8, 1023], strides = [1, 1]} : vector<8x1024xf32> to vector<8x1023xf32>
    %511 = vector.extract_strided_slice %485 {offsets = [0, 0], sizes = [8, 1], strides = [1, 1]} : vector<8x1024xf32> to vector<8x1xf32>
    %512 = tpu.concatenate %510, %511 in 1 : vector<8x1023xf32>, vector<8x1xf32> -> vector<8x1024xf32>
    %513 = vector.extract_strided_slice %13 {offsets = [5, 0], sizes = [1, 1024], strides = [1, 1]} : vector<9x1024xf32> to vector<1x1024xf32>
    %514 = vector.broadcast %513 : vector<1x1024xf32> to vector<8x1024xf32>
    %515 = arith.mulf %512, %514 : vector<8x1024xf32>
    %516 = vector.extract_strided_slice %485 {offsets = [0, 31], sizes = [8, 993], strides = [1, 1]} : vector<8x1024xf32> to vector<8x993xf32>
    %517 = vector.extract_strided_slice %485 {offsets = [0, 0], sizes = [8, 31], strides = [1, 1]} : vector<8x1024xf32> to vector<8x31xf32>
    %518 = tpu.concatenate %516, %517 in 1 : vector<8x993xf32>, vector<8x31xf32> -> vector<8x1024xf32>
    %519 = vector.extract_strided_slice %13 {offsets = [6, 0], sizes = [1, 1024], strides = [1, 1]} : vector<9x1024xf32> to vector<1x1024xf32>
    %520 = vector.broadcast %519 : vector<1x1024xf32> to vector<8x1024xf32>
    %521 = arith.mulf %518, %520 : vector<8x1024xf32>
    %522 = vector.extract_strided_slice %485 {offsets = [0, 32], sizes = [8, 992], strides = [1, 1]} : vector<8x1024xf32> to vector<8x992xf32>
    %523 = vector.extract_strided_slice %485 {offsets = [0, 0], sizes = [8, 32], strides = [1, 1]} : vector<8x1024xf32> to vector<8x32xf32>
    %524 = tpu.concatenate %522, %523 in 1 : vector<8x992xf32>, vector<8x32xf32> -> vector<8x1024xf32>
    %525 = vector.extract_strided_slice %13 {offsets = [7, 0], sizes = [1, 1024], strides = [1, 1]} : vector<9x1024xf32> to vector<1x1024xf32>
    %526 = vector.broadcast %525 : vector<1x1024xf32> to vector<8x1024xf32>
    %527 = arith.mulf %524, %526 : vector<8x1024xf32>
    %528 = vector.extract_strided_slice %485 {offsets = [0, 33], sizes = [8, 991], strides = [1, 1]} : vector<8x1024xf32> to vector<8x991xf32>
    %529 = vector.extract_strided_slice %485 {offsets = [0, 0], sizes = [8, 33], strides = [1, 1]} : vector<8x1024xf32> to vector<8x33xf32>
    %530 = tpu.concatenate %528, %529 in 1 : vector<8x991xf32>, vector<8x33xf32> -> vector<8x1024xf32>
    %531 = vector.extract_strided_slice %13 {offsets = [8, 0], sizes = [1, 1024], strides = [1, 1]} : vector<9x1024xf32> to vector<1x1024xf32>
    %532 = vector.broadcast %531 : vector<1x1024xf32> to vector<8x1024xf32>
    %533 = arith.mulf %530, %532 : vector<8x1024xf32>
    %534 = tpu.concatenate %491, %497, %503, %509, %485, %515, %521, %527, %533 in 0 : vector<8x1024xf32>, vector<8x1024xf32>, vector<8x1024xf32>, vector<8x1024xf32>, vector<8x1024xf32>, vector<8x1024xf32>, vector<8x1024xf32>, vector<8x1024xf32>, vector<8x1024xf32> -> vector<72x1024xf32>
    %cst_51 = arith.constant dense<0.000000e+00> : vector<4x1024xf32>
    %535 = tpu.matmul %4, %534, %cst_51 {dimension_numbers = #tpu.dot_dimension_numbers<[1], [0], [0], [1], [0, 0, 1, 1], [], []>} : vector<4x72xf32>, vector<72x1024xf32>, vector<4x1024xf32> -> vector<4x1024xf32>
    %536 = vector.broadcast %12 : vector<4x1xf32> to vector<4x1024xf32>
    %537 = arith.addf %535, %536 : vector<4x1024xf32>
    %538 = math.tanh %537 : vector<4x1024xf32>
    %c0_52 = arith.constant 0 : index
    %c0_53 = arith.constant 0 : index
    %c0_54 = arith.constant 0 : index
    %539 = vector.load %arg15[%c0_52, %c0_53, %c0_54] : memref<1x4x1024xf32, #tpu.memory_space<vmem>>, vector<1x4x1024xf32>
    %540 = vector.shape_cast %539 : vector<1x4x1024xf32> to vector<4x1024xf32>
    %541 = vector.shape_cast %538 : vector<4x1024xf32> to vector<1x4x1024xf32>
    tpu.vector_store %arg15[%c0_52, %c0_53, %c0_54], %541 {strides = array<i32>} : memref<1x4x1024xf32, #tpu.memory_space<vmem>>, vector<1x4x1024xf32>,
    return
  }
  func.func @transform_0(%arg0: i32) -> (i32, i32, i32) {
    %c0_i32 = arith.constant 0 : i32
    %c0_i32_0 = arith.constant 0 : i32
    %c0_i32_1 = arith.constant 0 : i32
    return %arg0, %c0_i32, %c0_i32_0 : i32, i32, i32
  }
  func.func @transform_1(%arg0: i32) -> (i32, i32) {
    %c0_i32 = arith.constant 0 : i32
    %c0_i32_0 = arith.constant 0 : i32
    %c0_i32_1 = arith.constant 0 : i32
    return %c0_i32, %c0_i32_0 : i32, i32
  }
  func.func @transform_2(%arg0: i32) -> (i32, i32) {
    %c0_i32 = arith.constant 0 : i32
    %c0_i32_0 = arith.constant 0 : i32
    %c0_i32_1 = arith.constant 0 : i32
    return %c0_i32, %c0_i32_0 : i32, i32
  }
  func.func @transform_3(%arg0: i32) -> (i32, i32) {
    %c0_i32 = arith.constant 0 : i32
    %c0_i32_0 = arith.constant 0 : i32
    %c0_i32_1 = arith.constant 0 : i32
    return %c0_i32, %c0_i32_0 : i32, i32
  }
  func.func @transform_4(%arg0: i32) -> (i32, i32) {
    %c0_i32 = arith.constant 0 : i32
    %c0_i32_0 = arith.constant 0 : i32
    %c0_i32_1 = arith.constant 0 : i32
    return %c0_i32, %c0_i32_0 : i32, i32
  }
  func.func @transform_5(%arg0: i32) -> (i32, i32) {
    %c0_i32 = arith.constant 0 : i32
    %c0_i32_0 = arith.constant 0 : i32
    %c0_i32_1 = arith.constant 0 : i32
    return %c0_i32, %c0_i32_0 : i32, i32
  }
  func.func @transform_6(%arg0: i32) -> (i32, i32) {
    %c0_i32 = arith.constant 0 : i32
    %c0_i32_0 = arith.constant 0 : i32
    %c0_i32_1 = arith.constant 0 : i32
    return %c0_i32, %c0_i32_0 : i32, i32
  }
  func.func @transform_7(%arg0: i32) -> (i32, i32) {
    %c0_i32 = arith.constant 0 : i32
    %c0_i32_0 = arith.constant 0 : i32
    %c0_i32_1 = arith.constant 0 : i32
    return %c0_i32, %c0_i32_0 : i32, i32
  }
  func.func @transform_8(%arg0: i32) -> (i32, i32) {
    %c0_i32 = arith.constant 0 : i32
    %c0_i32_0 = arith.constant 0 : i32
    %c0_i32_1 = arith.constant 0 : i32
    return %c0_i32, %c0_i32_0 : i32, i32
  }
  func.func @transform_9(%arg0: i32) -> (i32, i32) {
    %c0_i32 = arith.constant 0 : i32
    %c0_i32_0 = arith.constant 0 : i32
    %c0_i32_1 = arith.constant 0 : i32
    return %c0_i32, %c0_i32_0 : i32, i32
  }
  func.func @transform_10(%arg0: i32) -> (i32, i32) {
    %c0_i32 = arith.constant 0 : i32
    %c0_i32_0 = arith.constant 0 : i32
    %c0_i32_1 = arith.constant 0 : i32
    return %c0_i32, %c0_i32_0 : i32, i32
  }
  func.func @transform_11(%arg0: i32) -> (i32, i32) {
    %c0_i32 = arith.constant 0 : i32
    %c0_i32_0 = arith.constant 0 : i32
    %c0_i32_1 = arith.constant 0 : i32
    return %c0_i32, %c0_i32_0 : i32, i32
  }
  func.func @transform_12(%arg0: i32) -> (i32, i32) {
    %c0_i32 = arith.constant 0 : i32
    %c0_i32_0 = arith.constant 0 : i32
    %c0_i32_1 = arith.constant 0 : i32
    return %c0_i32, %c0_i32_0 : i32, i32
  }
  func.func @transform_13(%arg0: i32) -> (i32, i32) {
    %c0_i32 = arith.constant 0 : i32
    %c0_i32_0 = arith.constant 0 : i32
    %c0_i32_1 = arith.constant 0 : i32
    return %c0_i32, %c0_i32_0 : i32, i32
  }
  func.func @transform_14(%arg0: i32) -> (i32, i32, i32) {
    %c0_i32 = arith.constant 0 : i32
    %c0_i32_0 = arith.constant 0 : i32
    %c0_i32_1 = arith.constant 0 : i32
    return %arg0, %c0_i32, %c0_i32_0 : i32, i32, i32
  }
}

</mosaic_0001>

<bundles_post_ra>
// kernel: arnet_forward_pallas.1
= control target key start
LH: loop header
LB: loop body
LE: loop exit
PB: predicated region body
PF: predicated region fallthrough
CT: control target
= control target key end

     0   :  { %19 = vsyncpa [#allocation3], 0  ;;  %s10144_s0 = inlined_call_operand.vmem [shape: f32[2,8,1024], index: 0, kind: input, shape index: {}]   ;;  %s10145_s1 = inlined_call_operand.vmem [shape: f32[8,72], index: 1, kind: input, shape index: {}]   ;;  %s10146_s2 = inlined_call_operand.vmem [shape: f32[8,72], index: 2, kind: input, shape index: {}]   ;;  %s10147_s3 = inlined_call_operand.vmem [shape: f32[4,72], index: 3, kind: input, shape index: {}]   ;;  %s10148_s4 = inlined_call_operand.vmem [shape: f32[32,8], index: 4, kind: input, shape index: {}]   ;;  %s10149_s5 = inlined_call_operand.vmem [shape: f32[8,5], index: 5, kind: input, shape index: {}]   ;;  %s10150_s6 = inlined_call_operand.vmem [shape: f32[4,1], index: 6, kind: input, shape index: {}]   ;;  %s10151_s7 = inlined_call_operand.vmem [shape: f32[9,1024], index: 7, kind: input, shape index: {}]   ;;  %s10152_s8 = inlined_call_operand.vmem [shape: f32[9,256], index: 8, kind: input, shape index: {}]   ;;  %s10153_s9 = inlined_call_operand.vmem [shape: f32[9,64], index: 9, kind: input, shape index: {}]   ;;  %s10154_s10 = inlined_call_operand.hbm [shape: bf16[1024,256], index: 10, kind: input, shape index: {}]   ;;  %s10155_s11 = inlined_call_operand.vmem [shape: bf16[256,64], index: 11, kind: input, shape index: {}]   ;;  %s10156_s12 = inlined_call_operand.vmem [shape: bf16[64,256], index: 12, kind: input, shape index: {}]   ;;  %s10157_s13 = inlined_call_operand.hbm [shape: bf16[256,1024], index: 13, kind: input, shape index: {}]   ;;  %s10158_s14 = inlined_call_operand.vmem [shape: f32[2,4,1024], index: 14, kind: output, shape index: {}]  }
   0x1   :  { %20 = vsyncpa [#allocation5], 0  ;;  %s7553_s29 = smov 0  }
   0x2 LB: > { %s394_s16 = sshll.u32 %s10154_s10, 4  ;;  %s5712_s17 = sadd.s32 4294967295, %s7437_s29   ;;  %s7437_s29 = sphi %s7553_s29, %s26_s29   ;;  %s395_s16 = int_to_ptr.hbm [resolvable:$true] %s394_s16 }
   0x3   : > { %p5714_p0 = scmp.ge.s32.totalorder %s7437_s29, 1  ;;  %p356_p1 = scmp.lt.s32.totalorder %s7437_s29, 3 }
   0x4   : > { %p7218_p2 = scmp.eq.s32.totalorder %s5712_s17, 0  ;;  %s7439_s19 = smov [#allocation2]  }
   0x5   : > { %p7564_p3 = pnand %p5714_p0, %p356_p1  ;;  %s396_s20 = sshll.u32 %s7439_s19, 4  ;;  %s397_s20 = int_to_ptr.vmem [resolvable:$true] %s396_s20 }
   0x6   : > { %s414_s23 = sshll.u32 %s10157_s13, 4  ;;  %s7440_s24 = smov [#allocation4]   ;;  %s415_s23 = int_to_ptr.hbm [resolvable:$true] %s414_s23 }
   0x7   : > { %p7211_p4 = pneg %p7564_p3  ;;  %s416_s25 = sshll.u32 %s7440_s24, 4  ;;  %s417_s25 = int_to_ptr.vmem [resolvable:$true] %s416_s25 }
   0x8   : > { %s7441_s26 = smov 128   ;;  %s7442_s27 = smov 8  }
   0x9   : > { %p7212_p5 = pnand %p7218_p2, %p7211_p4  ;;  %s7443_s28 = smov 512  }
   0xa   : > { %s7444_s30 = smov 32   ;;  %440 = sbr.rel (%p7564_p3) target bundleno = 4277 (0x10b5), region = 76 }
   0xb   : > { %7214 = dma.hbm_to_vmem [thread:$0]  (!%p7212_p5), %s395_s16, 16384, %s397_s20, [#allocation3], %s7441_s26, %s7441_s26, %s7442_s27  }
   0xc   : > { %7217 = dma.hbm_to_vmem [thread:$0]  (!%p7212_p5), %s415_s23, 16384, %s417_s25, [#allocation5], %s7443_s28, %s7443_s28, %s7444_s30  }
   0xf   : > { %7428 = dma.done.wait (%p7218_p2), [#allocation3], 16384  }
  0x10   : > { %7430 = vsyncadd (%p7218_p2), [#allocation3], 4294950912 }
  0x11   : > { %7432 = dma.done.wait (%p7218_p2), [#allocation5], 16384  }
  0x12   : > { %7434 = vsyncadd (%p7218_p2), [#allocation5], 4294950912  ;;  %p492_p6 = scmp.lt.s32.totalorder %s5712_s17, 1  ;;  %s10232_s18 = smov 95   ;;  %vm10266_vm0 = vcmask 777216   ;;  %v7719_v17 = vld [vmem:[%s10151_s7] sm:$0xff] }
  0x13   : > { %s10234_s21 = smov 96   ;;  %s10230_s22 = smov 97   ;;  %v7321_v9 = vld [vmem:[%s10151_s7 + $0x50] ss:$0 sm:$0xff]  ;;  %v7322_v18 = vld [vmem:[%s10151_s7 + $0x40] ss:$0 sm:$0xff] }
  0x14   : > { %s10631_s17 = smov (!%p492_p6, %s5712_s17), 1  ;;  %s10259_s23 = smov 127   ;;  %v7323_v19 = vld [vmem:[%s10151_s7 + $0x48] ss:$0 sm:$0xff]  ;;  %vm10268_vm1 = vcmask 785408   ;;  %v7732_v23 = vperm.slane %v7719_v17, 7 }
  0x15   : > { %s6920_s15 = sshll.u32 %s10631_s17, 6  ;;  %s7449_s24 = smov 1   ;;  %vm10265_vm2 = vcmask 793600   ;;  %v7745_v30 = vperm.slane %v7719_v17, 6  ;;  %v7324_v31 = vld [vmem:[%s10151_s7 + $0x58] ss:$0 sm:$0xff] }
  0x16   : > { %s7586_s20 = scalar_lea.vmem %s10144_s0, %s6920_s15  ;;  %s10228_s25 = smov 31   ;;  %v7766_v39 = vld [vmem:[%s10151_s7 + $0x18] sm:$0xff]  ;;  %v7771_v40 = vld [vmem:[%s10151_s7 + $0x10] sm:$0xff]  ;;  %v7780_v41 = vld [vmem:[%s10151_s7 + $0x8] sm:$0xff]  ;;  %vm1062_vm3 = vcmask 1039360   ;;  %v7818_v58 = vperm.slane %v7719_v17, 5 }
  0x17   : > { %v7589_v0 = vld [vmem:[%s7586_s20 + $0x10] sm:$0xff]  ;;  %v7592_v1 = vld [vmem:[%s7586_s20] sm:$0xff]  ;;  %v7601_v2 = vld [vmem:[%s7586_s20 + $0x18] sm:$0xff]  ;;  %s10238_s26 = smov 32   ;;  %s10236_s30 = smov 33   ;;  %v7783_v42 = vperm.slane %v7766_v39, 7 }
  0x18   : > { %1200 = vrot.lane.b32.xlu2 %v7589_v0, %s10232_s18  ;;  %1146 = vrot.lane.b32.xlu1 %v7592_v1, %s10234_s21  ;;  %v7604_v3 = vld [vmem:[%s7586_s20 + $0x8] sm:$0xff]  ;;  %v7613_v4 = vld [vmem:[%s7586_s20 + $0x20] sm:$0xff]  ;;  %v7788_v43 = vperm.slane %v7780_v41, 7  ;;  %v7791_v44 = vperm.slane %v7771_v40, 7  ;;  %v7796_v48 = vperm.slane %v7780_v41, 6  ;;  %v7813_v57 = vperm.slane %v7780_v41, 5 }
  0x19   : > { %1196 = vrot.lane.b32.xlu0 %v7592_v1, %s10232_s18  ;;  %v7640_v5 = vld [vmem:[%s7586_s20 + $0x28] sm:$0xff]  ;;  %v7649_v6 = vld [vmem:[%s7586_s20 + $0x38] sm:$0xff]  ;;  %v7658_v7 = vld [vmem:[%s7586_s20 + $0x30] sm:$0xff]  ;;  %10322 = vst [vmem:[#allocation8_spill] sm:$0xff] %v7783_v42  ;;  %vm1013_vm4 = vcmask 7168   ;;  %vm10244_vm5 = vcmask 252928  }
  0x1a   : > { %10323 = vst [vmem:[#allocation9_spill] sm:$0xff] %v7788_v43  ;;  %vm10271_vm6 = vcmask 261120   ;;  %vm10269_vm7 = vcmask 269312   ;;  %vm1246_vm8 = vcmask 588800   ;;  %s10245_s27 = smov 113   ;;  %s10249_s28 = smov 112  }
  0x1b   : > { %10324 = vst [vmem:[#allocation10_spill] sm:$0xff] %v7791_v44  ;;  %s10242_s15 = smov 111   ;;  %s10240_s16 = smov 15  }
  0x1c   : > { %10325 = vst [vmem:[#allocation11_spill] sm:$0xff] %v7796_v48  ;;  %s10251_s19 = smov 16   ;;  %s10247_s20 = smov 17  }
  0x1d   : > { %10326 = vst [vmem:[#allocation12_spill] sm:$0xff] %v7813_v57 }
  0x20   : > { %1202 = vrot.lane.b32.xlu2 %v7601_v2, %s10232_s18  ;;  %1148 = vrot.lane.b32.xlu1 %v7604_v3, %s10234_s21 }
  0x21   : > { %1198 = vrot.lane.b32.xlu0 %v7604_v3, %s10232_s18 }
  0x28   : > { %1098 = vrot.lane.b32.xlu2 %v7604_v3, %s10230_s22  ;;  %1096 = vrot.lane.b32.xlu1 %v7592_v1, %s10230_s22 }
  0x29   : > { %1204 = vrot.lane.b32.xlu0 %v7613_v4, %s10232_s18 }
  0x30   : > { %1154 = vrot.lane.b32.xlu2 %v7613_v4, %s10234_s21  ;;  %1152 = vrot.lane.b32.xlu1 %v7601_v2, %s10234_s21 }
  0x31   : > { %1150 = vrot.lane.b32.xlu0 %v7589_v0, %s10234_s21 }
  0x38   : > { %1100 = vrot.lane.b32.xlu2 %v7589_v0, %s10230_s22  ;;  %1048 = vrot.lane.b32.xlu1 %v7604_v3, %s10259_s23 }
  0x39   : > { %1046 = vrot.lane.b32.xlu0 %v7592_v1, %s10259_s23 }
  0x40   : > { %1050 = vrot.lane.b32.xlu2 %v7589_v0, %s10259_s23  ;;  %1104 = vrot.lane.b32.xlu1 %v7613_v4, %s10230_s22 }
  0x41   : > { %1102 = vrot.lane.b32.xlu0 %v7601_v2, %s10230_s22 }
  0x48   : > { %1206 = vrot.lane.b32.xlu2 %v7640_v5, %s10232_s18  ;;  %1054 = vrot.lane.b32.xlu1 %v7613_v4, %s10259_s23 }
  0x49   : > { %1052 = vrot.lane.b32.xlu0 %v7601_v2, %s10259_s23 }
  0x50   : > { %1156 = vrot.lane.b32.xlu2 %v7640_v5, %s10234_s21  ;;  %999 = vrot.lane.b32.xlu1 %v7592_v1, %s7449_s24 }
  0x51   : > { %996 = vrot.lane.b32.xlu0 %v7649_v6, %s7449_s24 }
  0x58   : > { %949 = vrot.lane.b32.xlu2 %v7592_v1, %s10228_s25  ;;  %946 = vrot.lane.b32.xlu1 %v7649_v6, %s10228_s25 }
  0x59   : > { %1208 = vrot.lane.b32.xlu0 %v7658_v7, %s10232_s18 }
  0x60   : > { %1005 = vrot.lane.b32.xlu2 %v7601_v2, %s7449_s24  ;;  %1003 = vrot.lane.b32.xlu1 %v7589_v0, %s7449_s24 }
  0x61   : > { %1001 = vrot.lane.b32.xlu0 %v7604_v3, %s7449_s24 }
  0x68   : > { %896 = vrot.lane.b32.xlu2 %v7649_v6, %s10238_s26  ;;  %1158 = vrot.lane.b32.xlu1 %v7658_v7, %s10234_s21 }
  0x69   : > { %1106 = vrot.lane.b32.xlu0 %v7640_v5, %s10230_s22 }
  0x70   : > { %953 = vrot.lane.b32.xlu2 %v7589_v0, %s10228_s25  ;;  %951 = vrot.lane.b32.xlu1 %v7604_v3, %s10228_s25 }
  0x71   : > { %899 = vrot.lane.b32.xlu0 %v7592_v1, %s10238_s26 }
  0x72   : > { %v1201_v8 = vpop.permute.xlu2 %1200 }
  0x78   : > { %1108 = vrot.lane.b32.xlu2 %v7658_v7, %s10230_s22  ;;  %1056 = vrot.lane.b32.xlu1 %v7640_v5, %s10259_s23 }
  0x79   : > { %955 = vrot.lane.b32.xlu0 %v7601_v2, %s10228_s25 }
  0x7a   : > { %v1203_v10 = vpop.permute.xlu2 %1202 }
  0x7b   : > { %v1215_v11 = vsel %vm10266_vm0, %v1201_v8, %v1203_v10 }
  0x7c   : > { %v1240_v12 = vmul.f32 %v7321_v9, %v1215_v11  ;;  %v7840_v11 = vperm.slane %v7766_v39, 6 }
  0x7e   : > { %1297 = vmatpush.msra.mxu2 %v1240_v12  ;;  %10328 = vst [vmem:[#allocation14_spill] sm:$0xff] %v7840_v11 }
  0x80   : > { %901 = vrot.lane.b32.xlu2 %v7604_v3, %s10238_s26  ;;  %849 = vrot.lane.b32.xlu1 %v7592_v1, %s10236_s30 }
  0x81   : > { %839 = vrot.lane.b32.xlu0 %v7649_v6, %s10236_s30 }
  0x82   : > { %v1099_v13 = vpop.permute.xlu2 %1098 }
  0x88   : > { %1058 = vrot.lane.b32.xlu2 %v7658_v7, %s10259_s23  ;;  %905 = vrot.lane.b32.xlu1 %v7601_v2, %s10238_s26 }
  0x89   : > { %903 = vrot.lane.b32.xlu0 %v7589_v0, %s10238_s26 }
  0x8a   : > { %v7706_v14 = vpop.permute.xlu2 %1154  ;;  %v7708_v15 = vpop.permute.xlu1 %1146 }
  0x8b   : > { %v7710_v16 = vpop.permute.xlu0 %1196 }
  0x90   : > { %855 = vrot.lane.b32.xlu2 %v7601_v2, %s10236_s30  ;;  %853 = vrot.lane.b32.xlu1 %v7589_v0, %s10236_s30 }
  0x91   : > { %851 = vrot.lane.b32.xlu0 %v7604_v3, %s10236_s30 }
  0x92   : > { %v7729_v20 = vpop.permute.xlu2 %1100  ;;  %v1149_v21 = vpop.permute.xlu1 %1148 }
  0x93   : > { %v1199_v22 = vpop.permute.xlu0 %1198  ;;  %v1163_v26 = vsel %vm10268_vm1, %v7708_v15, %v1149_v21  ;;  %v1114_v52 = vsel %vm10265_vm2, %v1099_v13, %v7729_v20 }
  0x94   : > { %v1213_v24 = vsel %vm10266_vm0, %v7710_v16, %v1199_v22  ;;  %v1214_v25 = vsel %vm10266_vm0, %v1199_v22, %v1201_v8  ;;  %v1188_v29 = vmul.f32 %v7732_v23, %v1163_v26  ;;  %v1139_v56 = vmul.f32 %v7796_v48, %v1114_v52 }
  0x95   : > { %v1238_v27 = vmul.f32 %v7322_v18, %v1213_v24  ;;  %v1239_v28 = vmul.f32 %v7323_v19, %v1214_v25  ;;  %v7902_v52 = vperm.slane %v7766_v39, 3 }
  0x97   : > { %1257 = vmatpush.msra.mxu0 %v1238_v27  ;;  %1277 = vmatpush.msra.mxu1 %v1239_v28  ;;  %10331 = vst [vmem:[#allocation17_spill] sm:$0xff] %v7902_v52 }
  0x98   : > { %957 = vrot.lane.b32.xlu2 %v7613_v4, %s10228_s25  ;;  %1210 = vrot.lane.b32.xlu1 %v7649_v6, %s10232_s18  ;;  %s7465_s18 = smov 121  }
  0x99   : > { %1007 = vrot.lane.b32.xlu0 %v7613_v4, %s7449_s24  ;;  %1258 = vmatpush.msra.mxu0 %v1188_v29 }
  0x9a   : > { %v7752_v32 = vpop.permute.xlu2 %1050  ;;  %v7754_v33 = vpop.permute.xlu1 %1096 }
  0x9b   : > { %v7756_v34 = vpop.permute.xlu0 %1204  ;;  %v1113_v35 = vsel %vm10265_vm2, %v7754_v33, %v1099_v13 }
  0x9c   : > { %v1216_v36 = vsel %vm10266_vm0, %v1203_v10, %v7756_v34  ;;  %v1138_v37 = vmul.f32 %v7745_v30, %v1113_v35  ;;  %v7837_v10 = vperm.slane %v7771_v40, 6  ;;  %v7879_v35 = vperm.slane %v7719_v17, 3 }
  0x9d   : > { %v1241_v38 = vmul.f32 %v7324_v31, %v1216_v36 }
  0x9e   : > { %1259 = vmatpush.msra.mxu0 %v1138_v37  ;;  %10327 = vst [vmem:[#allocation13_spill] sm:$0xff] %v7837_v10 }
  0x9f   : > { %1317 = vmatpush.msra.mxu3 %v1241_v38 }
  0xa0   : > { %907 = vrot.lane.b32.xlu2 %v7613_v4, %s10238_s26  ;;  %1160 = vrot.lane.b32.xlu1 %v7649_v6, %s10234_s21 }
  0xa1   : > { %1009 = vrot.lane.b32.xlu0 %v7640_v5, %s7449_s24 }
  0xa2   : > { %v7793_v45 = vpop.permute.xlu2 %1206  ;;  %v1153_v46 = vpop.permute.xlu1 %1152 }
  0xa3   : > { %v1151_v47 = vpop.permute.xlu0 %1150  ;;  %v1166_v49 = vsel %vm10268_vm1, %v1153_v46, %v7706_v14 }
  0xa4   : > { %v1164_v50 = vsel %vm10268_vm1, %v1149_v21, %v1151_v47  ;;  %v1165_v51 = vsel %vm10268_vm1, %v1151_v47, %v1153_v46  ;;  %v1191_v53 = vmul.f32 %v7783_v42, %v1166_v49  ;;  %v7891_v47 = vperm.slane %v7719_v17, 2 }
  0xa5   : > { %v1189_v54 = vmul.f32 %v7788_v43, %v1164_v50  ;;  %v1190_v55 = vmul.f32 %v7791_v44, %v1165_v51 }
  0xa6   : > { %1318 = vmatpush.msra.mxu3 %v1191_v53  ;;  %v7905_v53 = vperm.slane %v7780_v41, 3 }
  0xa7   : > { %1278 = vmatpush.msra.mxu1 %v1189_v54  ;;  %1298 = vmatpush.msra.mxu2 %v1190_v55  ;;  %v7908_v54 = vperm.slane %v7771_v40, 3 }
  0xa8   : > { %857 = vrot.lane.b32.xlu2 %v7613_v4, %s10236_s30  ;;  %1110 = vrot.lane.b32.xlu1 %v7649_v6, %s10230_s22  ;;  %10332 = vst [vmem:[#allocation18_spill] sm:$0xff] %v7905_v53  ;;  %s10257_s22 = smov 7  }
  0xa9   : > { %959 = vrot.lane.b32.xlu0 %v7640_v5, %s10228_s25  ;;  %1279 = vmatpush.msra.mxu1 %v1139_v56  ;;  %10333 = vst [vmem:[#allocation19_spill] sm:$0xff] %v7908_v54 }
  0xaa   : > { %v7820_v59 = vpop.permute.xlu2 %1156  ;;  %v1049_v60 = vpop.permute.xlu1 %1048 }
  0xab   : > { %v7822_v61 = vpop.permute.xlu0 %1046  ;;  %v1064_v62 = vsel %vm1062_vm3, %v1049_v60, %v7752_v32 }
  0xac   : > { %v1063_v63 = vsel %vm1062_vm3, %v7822_v61, %v1049_v60  ;;  %v1089_v8 = vmul.f32 %v7813_v57, %v1064_v62 }
  0xad   : > { %v1088_v9 = vmul.f32 %v7818_v58, %v1063_v63 }
  0xae   : > { %1280 = vmatpush.msra.mxu1 %v1089_v8 }
  0xaf   : > { %1260 = vmatpush.msra.mxu0 %v1088_v9 }
  0xb0   : > { %859 = vrot.lane.b32.xlu2 %v7640_v5, %s10236_s30  ;;  %1060 = vrot.lane.b32.xlu1 %v7649_v6, %s10259_s23 }
  0xb1   : > { %909 = vrot.lane.b32.xlu0 %v7640_v5, %s10238_s26  ;;  %1261 = vmatpush.msra.mxu0 %v7592_v1  ;;  %v7861_v1 = vperm.slane %v7771_v40, 5 }
  0xb2   : > { %v7843_v12 = vpop.permute.xlu2 %949  ;;  %v7845_v13 = vpop.permute.xlu1 %1104  ;;  %1281 = vmatpush.msra.mxu1 %v7604_v3  ;;  %v7864_v3 = vperm.slane %v7766_v39, 5 }
  0xb3   : > { %v1103_v18 = vpop.permute.xlu0 %1102  ;;  %10329 = vst [vmem:[#allocation15_spill] sm:$0xff] %v7861_v1 }
  0xb4   : > { %v1115_v19 = vsel %vm10265_vm2, %v7729_v20, %v1103_v18  ;;  %v1116_v21 = vsel %vm10265_vm2, %v1103_v18, %v7845_v13  ;;  %10330 = vst [vmem:[#allocation16_spill] sm:$0xff] %v7864_v3 }
  0xb5   : > { %v1140_v22 = vmul.f32 %v7837_v10, %v1115_v19  ;;  %v1141_v24 = vmul.f32 %v7840_v11, %v1116_v21 }
  0xb7   : > { %1299 = vmatpush.msra.mxu2 %v1140_v22  ;;  %1319 = vmatpush.msra.mxu3 %v1141_v24 }
  0xb8   : > { %911 = vrot.lane.b32.xlu2 %v7658_v7, %s10238_s26  ;;  %961 = vrot.lane.b32.xlu1 %v7658_v7, %s10228_s25  ;;  %s7461_s26 = smov 120   ;;  %s7470_s25 = smov 71  }
  0xb9   : > { %1011 = vrot.lane.b32.xlu0 %v7658_v7, %s7449_s24 }
  0xba   : > { %v7866_v20 = vpop.permute.xlu2 %1005  ;;  %v7868_v25 = vpop.permute.xlu1 %1054 }
  0xbb   : > { %v1053_v26 = vpop.permute.xlu0 %1052 }
  0xbc   : > { %v1065_v27 = vsel %vm1062_vm3, %v7752_v32, %v1053_v26  ;;  %v1066_v28 = vsel %vm1062_vm3, %v1053_v26, %v7868_v25  ;;  %v7926_v26 = vperm.slane %v7780_v41, 2 }
  0xbd   : > { %v1090_v29 = vmul.f32 %v7861_v1, %v1065_v27  ;;  %v1091_v31 = vmul.f32 %v7864_v3, %v1066_v28  ;;  %v7929_v27 = vperm.slane %v7771_v40, 2  ;;  %v7932_v28 = vperm.slane %v7719_v17, 1 }
  0xbf   : > { %1300 = vmatpush.msra.mxu2 %v1090_v29  ;;  %1320 = vmatpush.msra.mxu3 %v1091_v31  ;;  %10334 = vst [vmem:[#allocation20_spill] sm:$0xff] %v7929_v27  ;;  %v7935_v31 = vperm.slane %v7780_v41, 1 }
  0xc0   : > { %10335 = vst [vmem:[#allocation21_spill] sm:$0xff] %v7932_v28 }
  0xc1   : > { %861 = vrot.lane.b32.xlu0 %v7658_v7, %s10236_s30  ;;  %1301 = vmatpush.msra.mxu2 %v7589_v0  ;;  %10336 = vst [vmem:[#allocation22_spill] sm:$0xff] %v7935_v31  ;;  %s10273_s30 = smov 55  }
  0xc2   : > { %v7882_v36 = vpop.permute.xlu2 %896  ;;  %v1000_v32 = vpop.permute.xlu1 %999  ;;  %1321 = vmatpush.msra.mxu3 %v7601_v2 }
  0xc3   : > { %v7885_v37 = vpop.permute.xlu0 %996 }
  0xc4   : > { %v1029_v38 = vsel %vm1013_vm4, %v7885_v37, %v1000_v32 }
  0xc5   : > { %v1038_v46 = vmul.f32 %v7879_v35, %v1029_v38 }
  0xc7   : > { %1262 = vmatpush.msra.mxu0 %v1038_v46 }
  0xca   : > { %v954_v49 = vpop.permute.xlu2 %953  ;;  %v7893_v50 = vpop.permute.xlu1 %946 }
  0xcb   : > { %v7895_v0 = vpop.permute.xlu0 %1208  ;;  %v979_v2 = vsel %vm10244_vm5, %v7893_v50, %v7843_v12 }
  0xcc   : > { %v988_v51 = vmul.f32 %v7891_v47, %v979_v2 }
  0xce   : > { %1263 = vmatpush.msra.mxu0 %v988_v51 }
  0xd2   : > { %v1004_v55 = vpop.permute.xlu1 %1003  ;;  %v7910_v56 = vpop.permute.xlu2 %1108 }
  0xd3   : > { %v1002_v60 = vpop.permute.xlu0 %1001  ;;  %v1016_v62 = vsel %vm1013_vm4, %v1004_v55, %v7866_v20 }
  0xd4   : > { %v1014_v63 = vsel %vm1013_vm4, %v1000_v32, %v1002_v60  ;;  %v1015_v8 = vsel %vm1013_vm4, %v1002_v60, %v1004_v55  ;;  %v1041_v9 = vmul.f32 %v7902_v52, %v1016_v62 }
  0xd5   : > { %v1039_v18 = vmul.f32 %v7905_v53, %v1014_v63  ;;  %v1040_v19 = vmul.f32 %v7908_v54, %v1015_v8 }
  0xd6   : > { %1322 = vmatpush.msra.mxu3 %v1041_v9 }
  0xd7   : > { %1282 = vmatpush.msra.mxu1 %v1039_v18  ;;  %1302 = vmatpush.msra.mxu2 %v1040_v19 }
  0xda   : > { %v7919_v21 = vpop.permute.xlu1 %1158  ;;  %v7923_v24 = vpop.permute.xlu2 %901 }
  0xdb   : > { %v7921_v22 = vpop.permute.xlu0 %1106 }
  0xe2   : > { %v952_v29 = vpop.permute.xlu1 %951  ;;  %v7948_v8 = vpop.permute.xlu2 %1058 }
  0xe3   : > { %v900_v32 = vpop.permute.xlu0 %899  ;;  %v964_v38 = vsel %vm10244_vm5, %v7843_v12, %v952_v29  ;;  %v965_v46 = vsel %vm10244_vm5, %v952_v29, %v954_v49  ;;  %v7951_v12 = vperm.slane %v7766_v39, 2 }
  0xe4   : > { %v929_v2 = vsel %vm10271_vm6, %v7882_v36, %v900_v32  ;;  %v989_v51 = vmul.f32 %v7926_v26, %v964_v38  ;;  %v914_v55 = vsel %vm10271_vm6, %v900_v32, %v7923_v24  ;;  %v990_v60 = vmul.f32 %v7929_v27, %v965_v46  ;;  %v7968_v46 = vld [vmem:[%s10151_s7 + $0x20] sm:$0xff] }
  0xe5   : > { %v938_v62 = vmul.f32 %v7932_v28, %v929_v2  ;;  %v939_v63 = vmul.f32 %v7935_v31, %v914_v55  ;;  %10337 = vst [vmem:[#allocation23_spill] sm:$0xff] %v7951_v12  ;;  %v7963_v38 = vperm.slane %v7719_v17, 0  ;;  %v1217_v55 = vsel %vm10266_vm0, %v7756_v34, %v7793_v45  ;;  %v7996_v27 = vld [vmem:[%s10149_s5] sm:$0xff]  ;;  %v6025_v31 = vld [vmem:[#allocation2 + $0x248] sm:$0xf0] }
  0xe6   : > { %1283 = vmatpush.msra.mxu1 %v989_v51  ;;  %1303 = vmatpush.msra.mxu2 %v990_v60  ;;  %v7325_v51 = vld [vmem:[%s10151_s7 + $0x60] ss:$0 sm:$0xff]  ;;  %v7981_v60 = vperm.slane %v7968_v46, 7  ;;  %v1117_v34 = vsel %vm10265_vm2, %v7845_v13, %v7921_v22  ;;  %v8000_v54 = vperm.slane %v7968_v46, 5 }
  0xe7   : > { %1264 = vmatpush.msra.mxu0 %v938_v62  ;;  %10338 = vst [vmem:[#allocation24_spill] sm:$0xff] %v7963_v38 }
  0xe8   : > { %1284 = vmatpush.msra.mxu1 %v939_v63  ;;  %v1167_v63 = vsel %vm10268_vm1, %v7706_v14, %v7820_v59  ;;  %v8005_v14 = vld [vmem:[%s10145_s1] sm:$0xff] }
  0xea   : > { %v7953_v9 = vpop.permute.xlu1 %1056  ;;  %v7960_v32 = vpop.permute.xlu2 %855 }
  0xeb   : > { %v7955_v18 = vpop.permute.xlu0 %955  ;;  %v1067_v13 = vsel %vm1062_vm3, %v7868_v25, %v7953_v9 }
  0xec   : > { %v966_v19 = vsel %vm10244_vm5, %v954_v49, %v7955_v18  ;;  %v1092_v25 = vmul.f32 %v8000_v54, %v1067_v13  ;;  %v8037_v13 = vperm.slane %v7780_v41, 0 }
  0xed   : > { %v991_v29 = vmul.f32 %v7951_v12, %v966_v19  ;;  %v1242_v19 = vmul.f32 %v7325_v51, %v1217_v55  ;;  %v10163_v51 = vmov 0   ;;  %v8012_v55 = vperm.slane %v7771_v40, 1 }
  0xee   : > { %7269 = vset.pattern.permute.xlu1 %v10163_v51  ;;  %10342 = vst [vmem:[#allocation28_spill] sm:$0xff] %v8037_v13 }
  0xef   : > { %1323 = vmatpush.msra.mxu3 %v991_v29  ;;  %v7988_v29 = vperm.slane %v7968_v46, 6  ;;  %10339 = vst [vmem:[#allocation25_spill] sm:$0xff] %v8012_v55  ;;  %1412 = vperm.xlu1 %7269, %v7996_v27  }
  0xf2   : > { %v850_v2 = vpop.permute.xlu1 %849  ;;  %v8023_v51 = vpop.permute.xlu2 %957 }
  0xf3   : > { %v7973_v49 = vpop.permute.xlu0 %839 }
  0xf4   : > { %v879_v17 = vsel %vm10269_vm7, %v7973_v49, %v850_v2 }
  0xf5   : > { %v888_v62 = vmul.f32 %v7963_v38, %v879_v17  ;;  %v1192_v17 = vmul.f32 %v7981_v60, %v1167_v63 }
  0xf7   : > { %1265 = vmatpush.msra.mxu0 %v888_v62  ;;  %v8015_v62 = vperm.slane %v7766_v39, 1 }
  0xf8   : > { %5725 = vmatmul.msk.f32.vlgmr.msra.gmra.mxu0 %vm1246_vm8, %v8005_v14 }
  0xf9   : > { %1337 = vmatpush.msrb.mxu0 %v1242_v19  ;;  %10340 = vst [vmem:[#allocation26_spill] sm:$0xff] %v8015_v62  ;;  %v1142_v19 = vmul.f32 %v7988_v29, %v1117_v34  ;;  %v8033_v34 = vperm.slane %v7766_v39, 0 }
  0xfa   : > { %v8020_v63 = vpop.permute.xlu1 %905 }
  0xfb   : > { %1338 = vmatpush.msrb.mxu0 %v1192_v17  ;;  %v904_v1 = vpop.permute.xlu0 %903  ;;  %10341 = vst [vmem:[#allocation27_spill] sm:$0xff] %v8033_v34 }
  0xfc   : > { %v915_v10 = vsel %vm10271_vm6, %v7923_v24, %v904_v1  ;;  %v916_v44 = vsel %vm10271_vm6, %v904_v1, %v8020_v63  ;;  %v8040_v24 = vperm.slane %v7771_v40, 0 }
  0xfd   : > { %1339 = vmatpush.msrb.mxu0 %v1142_v19  ;;  %v940_v38 = vmul.f32 %v8012_v55, %v915_v10  ;;  %v941_v17 = vmul.f32 %v8015_v62, %v916_v44  ;;  %v8045_v10 = vld [vmem:[%s10151_s7 + $0x28] sm:$0xff] }
  0xfe   : > { %10343 = vst [vmem:[#allocation29_spill] sm:$0xff] %v8040_v24  ;;  %v8063_v28 = vperm.slane %v8045_v10, 7 }
  0xff   : > { %1340 = vmatpush.msrb.mxu0 %v1092_v25  ;;  %1304 = vmatpush.msra.mxu2 %v940_v38  ;;  %v1218_v38 = vsel %vm10266_vm0, %v7793_v45, %v7895_v0  ;;  %v8058_v25 = vpop.permute.xlu2 %907  ;;  %v1118_v45 = vsel %vm10265_vm2, %v7921_v22, %v7910_v56  ;;  %v1068_v22 = vsel %vm1062_vm3, %v7953_v9, %v7948_v8 }
 0x100   : > { %1324 = vmatpush.msra.mxu3 %v941_v17  ;;  %10344 = vst [vmem:[#allocation30_spill] sm:$0xff] %v8063_v28 }
 0x101   : > { %1341 = vmatpush.msrb.mxu0 %v7613_v4  ;;  %v7326_v4 = vld [vmem:[%s10151_s7 + $0x68] ss:$0 sm:$0xff] }
 0x102   : > { %v854_v19 = vpop.permute.xlu1 %853 }
 0x103   : > { %v852_v44 = vpop.permute.xlu0 %851  ;;  %v866_v1 = vsel %vm10269_vm7, %v854_v19, %v7960_v32 }
 0x104   : > { %v864_v39 = vsel %vm10269_vm7, %v850_v2, %v852_v44  ;;  %v865_v41 = vsel %vm10269_vm7, %v852_v44, %v854_v19  ;;  %v891_v40 = vmul.f32 %v8033_v34, %v866_v1  ;;  %v1168_v2 = vsel %vm10268_vm1, %v7820_v59, %v7919_v21  ;;  %v7327_v59 = vld [vmem:[%s10151_s7 + $0x70] ss:$0 sm:$0xff] }
 0x105   : > { %v889_v17 = vmul.f32 %v8037_v13, %v864_v39  ;;  %v890_v55 = vmul.f32 %v8040_v24, %v865_v41  ;;  %v1243_v19 = vmul.f32 %v7326_v4, %v1218_v38  ;;  %v8069_v44 = vperm.slane %v8045_v10, 6  ;;  %v6994_v13 = vld [vmem:[#allocation2 + $0x244] sm:$0xf] }
 0x106   : > { %1325 = vmatpush.msra.mxu3 %v891_v40  ;;  %v1193_v1 = vmul.f32 %v8063_v28, %v1168_v2  ;;  %v8086_v4 = vperm.slane %v8045_v10, 5  ;;  %v8089_v39 = vperm.slane %v7968_v46, 3 }
 0x107   : > { %1285 = vmatpush.msra.mxu1 %v889_v17  ;;  %1305 = vmatpush.msra.mxu2 %v890_v55  ;;  %10345 = vst [vmem:[#allocation31_spill] sm:$0xff] %v8069_v44  ;;  %v7328_v55 = vld [vmem:[%s10151_s7 + $0x78] ss:$0 sm:$0xff]  ;;  %v1143_v38 = vmul.f32 %v8069_v44, %v1118_v45  ;;  %v8112_v44 = vperm.slane %v7968_v46, 1 }
 0x108   : > { %5727 = vmatmul.msk.f32.vlgmr.msra.gmra.mxu2 %vm1246_vm8, %v8005_v14  ;;  %5728 = vmatmul.msk.f32.vlgmr.msra.gmra.mxu3 %vm1246_vm8, %v8005_v14  ;;  %10346 = vst [vmem:[#allocation32_spill] sm:$0xff] %v8086_v4  ;;  %v1093_v45 = vmul.f32 %v8086_v4, %v1068_v22  ;;  %v6981_v4 = vld [vmem:[#allocation2 + $0x1d4] sm:$0xf0] }
 0x109   : > { %1357 = vmatpush.msrb.mxu1 %v1243_v19  ;;  %v8102_v19 = vperm.slane %v7968_v46, 2  ;;  %10348 = vst [vmem:[#allocation34_spill] sm:$0xff] %v8112_v44 }
 0x10a   : > { %v1211_v41 = vpop.permute.xlu1 %1210  ;;  %5726 = vmatmul.msk.f32.vlgmr.msra.gmra.mxu1 %vm1246_vm8, %v8005_v14 }
 0x10b   : > { %1358 = vmatpush.msrb.mxu1 %v1193_v1  ;;  %v1008_v40 = vpop.permute.xlu0 %1007  ;;  %v1219_v17 = vsel %vm10266_vm0, %v7895_v0, %v1211_v41  ;;  %v1229_v2 = vsel %vm10266_vm0, %v1211_v41, %v7710_v16  ;;  %10347 = vst [vmem:[#allocation33_spill] sm:$0xff] %v8102_v19  ;;  %v967_v1 = vsel %vm10244_vm5, %v7955_v18, %v8023_v51  ;;  %v8117_v16 = vld [vmem:[%s10151_s7 + $0x30] sm:$0xff]  ;;  %vm2771_vm0 = vcmask 515072  }
 0x10c   : > { %v1017_v24 = vsel %vm1013_vm4, %v7866_v20, %v1008_v40  ;;  %v1244_v9 = vmul.f32 %v7327_v59, %v1219_v17  ;;  %v1245_v28 = vmul.f32 %v7328_v55, %v1229_v2  ;;  %v8122_v20 = vld [vmem:[%s10151_s7 + $0x38] sm:$0xff]  ;;  %v917_v18 = vsel %vm10271_vm6, %v8020_v63, %v8058_v25 }
 0x10d   : > { %1359 = vmatpush.msrb.mxu1 %v1143_v38  ;;  %v1042_v0 = vmul.f32 %v8089_v39, %v1017_v24  ;;  %v858_v24 = vpop.permute.xlu2 %857  ;;  %v992_v59 = vmul.f32 %v8102_v19, %v967_v1  ;;  %v8129_v55 = vperm.slane %v7968_v46, 0  ;;  %v8134_v22 = vperm.slane %v8117_v16, 7 }
 0x10e   : > { %1377 = vmatpush.msrb.mxu2 %v1244_v9  ;;  %1397 = vmatpush.msrb.mxu3 %v1245_v28  ;;  %v867_v41 = vsel %vm10269_vm7, %v7960_v32, %v858_v24  ;;  %v8137_v28 = vperm.slane %v8122_v20, 7  ;;  %v942_v63 = vmul.f32 %v8112_v44, %v917_v18  ;;  %v8142_v38 = vperm.slane %v8045_v10, 3 }
 0x10f   : > { %1360 = vmatpush.msrb.mxu1 %v1093_v45  ;;  %1342 = vmatpush.msrb.mxu0 %v1042_v0  ;;  %10349 = vst [vmem:[#allocation35_spill] sm:$0xff] %v8129_v55  ;;  %v7454_v46 = vmov 1   ;;  %v892_v32 = vmul.f32 %v8129_v55, %v867_v41 }
 0x110   : > { %10350 = vst [vmem:[#allocation36_spill] sm:$0xff] %v8134_v22  ;;  %7270 = vset.pattern.permute.xlu2 %v7454_v46 }
 0x111   : > { %10351 = vst [vmem:[#allocation37_spill] sm:$0xff] %v8137_v28  ;;  %1343 = vmatpush.msrb.mxu0 %v992_v59  ;;  %1361 = vmatpush.msrb.mxu1 %v7640_v5 }
 0x112   : > { %10352 = vst [vmem:[#allocation38_spill] sm:$0xff] %v8142_v38  ;;  %v1161_v17 = vpop.permute.xlu1 %1160  ;;  %1424 = vperm.xlu2 %7270, %v7996_v27   ;;  %v8163_v27 = vperm.slane %v8045_v10, 2 }
 0x113   : > { %1344 = vmatpush.msrb.mxu0 %v942_v63  ;;  %v1010_v2 = vpop.permute.xlu0 %1009  ;;  %v1169_v9 = vsel %vm10268_vm1, %v7919_v21, %v1161_v17  ;;  %v1179_v1 = vsel %vm10268_vm1, %v1161_v17, %v7708_v15  ;;  %v8157_v21 = vperm.slane %v8117_v16, 6  ;;  %v8160_v15 = vperm.slane %v8122_v20, 6 }
 0x114   : > { %v1018_v5 = vsel %vm1013_vm4, %v1008_v40, %v1010_v2  ;;  %v1194_v45 = vmul.f32 %v8134_v22, %v1169_v9  ;;  %v1195_v0 = vmul.f32 %v8137_v28, %v1179_v1  ;;  %10355 = vst [vmem:[#allocation41_spill] sm:$0xff] %v8163_v27  ;;  %v10356_v17 = vmov 0  }
 0x115   : > { %1345 = vmatpush.msrb.mxu0 %v892_v32  ;;  %v1043_v18 = vmul.f32 %v8142_v38, %v1018_v5  ;;  %10353 = vst [vmem:[#allocation39_spill] sm:$0xff] %v8157_v21  ;;  %v8176_v5 = vperm.slane %v8117_v16, 5  ;;  %v6983_v38 = vld [vmem:[#allocation2 + $0x1e4] sm:$0xf0] }
 0x116   : > { %5729 = vmatmul.msk.f32.vlgmr.msrb.gmra.mxu0 %vm1246_vm8, %v8005_v14  ;;  %1378 = vmatpush.msrb.mxu2 %v1194_v45  ;;  %10354 = vst [vmem:[#allocation40_spill] sm:$0xff] %v8160_v15  ;;  %v8182_v45 = vperm.slane %v8045_v10, 1 }
 0x117   : > { %1362 = vmatpush.msrb.mxu1 %v1043_v18  ;;  %1398 = vmatpush.msrb.mxu3 %v1195_v0  ;;  %10357 = vst [vmem:[#allocation42_spill] sm:$0xff] %v8176_v5 }
 0x118   : > { %10359 = vst [vmem:[#allocation44_spill] sm:$0xff] %v8182_v45 }
 0x11a   : > { %v1111_v40 = vpop.permute.xlu1 %1110  ;;  %7319 = vset.pattern.permute.xlu2 %v10356_v17 }
 0x11b   : > { %v960_v59 = vpop.permute.xlu0 %959  ;;  %v1119_v41 = vsel %vm10265_vm2, %v7910_v56, %v1111_v40  ;;  %v1129_v63 = vsel %vm10265_vm2, %v1111_v40, %v7754_v33  ;;  %v8179_v56 = vperm.slane %v8122_v20, 5  ;;  %v860_v33 = vpop.permute.xlu2 %859  ;;  %vm2791_vm2 = vcmask 457728  }
 0x11c   : > { %v968_v46 = vsel %vm10244_vm5, %v8023_v51, %v960_v59  ;;  %v1144_v32 = vmul.f32 %v8157_v21, %v1119_v41  ;;  %v1145_v9 = vmul.f32 %v8160_v15, %v1129_v63  ;;  %v8189_v41 = vperm.slane %v8045_v10, 0 }
 0x11d   : > { %v993_v1 = vmul.f32 %v8163_v27, %v968_v46  ;;  %10358 = vst [vmem:[#allocation43_spill] sm:$0xff] %v8179_v56  ;;  %v8204_v10 = vperm.slane %v8122_v20, 3  ;;  %v5975_v27 = vld [vmem:[#allocation2 + $0x1e0] sm:$0xf] }
 0x11e   : > { %1379 = vmatpush.msrb.mxu2 %v1144_v32  ;;  %1399 = vmatpush.msrb.mxu3 %v1145_v9  ;;  %10360 = vst [vmem:[#allocation45_spill] sm:$0xff] %v8189_v41  ;;  %v868_v9 = vsel %vm10269_vm7, %v858_v24, %v860_v33  ;;  %v5976_v15 = vor.u32 %v6983_v38, %v5975_v27  ;;  %v5959_v27 = vld [vmem:[#allocation2 + $0x1c0] sm:$0xf] }
 0x11f   : > { %1363 = vmatpush.msrb.mxu1 %v993_v1  ;;  %10362 = vst [vmem:[#allocation47_spill] sm:$0xff] %v8204_v10 }
 0x122   : > { %v1061_v51 = vpop.permute.xlu1 %1060 }
 0x123   : > { %v910_v0 = vpop.permute.xlu0 %909  ;;  %v1069_v18 = vsel %vm1062_vm3, %v7948_v8, %v1061_v51  ;;  %v1079_v40 = vsel %vm1062_vm3, %v1061_v51, %v7822_v61  ;;  %v893_v8 = vmul.f32 %v8189_v41, %v868_v9  ;;  %v8201_v61 = vperm.slane %v8117_v16, 3  ;;  %v912_v24 = vpop.permute.xlu2 %911 }
 0x124   : > { %v918_v63 = vsel %vm10271_vm6, %v8058_v25, %v910_v0  ;;  %v1094_v46 = vmul.f32 %v8176_v5, %v1069_v18  ;;  %v1095_v32 = vmul.f32 %v8179_v56, %v1079_v40  ;;  %v8209_v18 = vperm.slane %v8117_v16, 2 }
 0x125   : > { %v943_v1 = vmul.f32 %v8182_v45, %v918_v63  ;;  %10361 = vst [vmem:[#allocation46_spill] sm:$0xff] %v8201_v61 }
 0x126   : > { %1380 = vmatpush.msrb.mxu2 %v1094_v46  ;;  %1400 = vmatpush.msrb.mxu3 %v1095_v32  ;;  %10363 = vst [vmem:[#allocation48_spill] sm:$0xff] %v8209_v18 }
 0x127   : > { %1364 = vmatpush.msrb.mxu1 %v943_v1  ;;  %v8223_v1 = vperm.slane %v8117_v16, 1 }
 0x128   : > { %1381 = vmatpush.msrb.mxu2 %v7658_v7  ;;  %1401 = vmatpush.msrb.mxu3 %v7649_v6  ;;  %v8212_v7 = vperm.slane %v8122_v20, 2 }
 0x129   : > { %1365 = vmatpush.msrb.mxu1 %v893_v8  ;;  %10365 = vst [vmem:[#allocation50_spill] sm:$0xff] %v8223_v1  ;;  %v8226_v8 = vperm.slane %v8122_v20, 1 }
 0x12a   : > { %5730 = vmatmul.msk.f32.vlgmr.msrb.gmra.mxu1 %vm1246_vm8, %v8005_v14  ;;  %v962_v25 = vpop.permute.xlu1 %961  ;;  %10364 = vst [vmem:[#allocation49_spill] sm:$0xff] %v8212_v7 }
 0x12b   : > { %v1012_v51 = vpop.permute.xlu0 %1011  ;;  %v969_v63 = vsel %vm10244_vm5, %v960_v59, %v962_v25  ;;  %v970_v46 = vsel %vm10244_vm5, %v962_v25, %v7893_v50  ;;  %10366 = vst [vmem:[#allocation51_spill] sm:$0xff] %v8226_v8 }
 0x12c   : > { %v1019_v6 = vsel %vm1013_vm4, %v1010_v2, %v1012_v51  ;;  %v1020_v40 = vsel %vm1013_vm4, %v1012_v51, %v7885_v37  ;;  %v919_v2 = vsel %vm10271_vm6, %v910_v0, %v912_v24  ;;  %v920_v37 = vsel %vm10271_vm6, %v912_v24, %v7882_v36 }
 0x12d   : > { %v1044_v32 = vmul.f32 %v8201_v61, %v1019_v6  ;;  %v1045_v9 = vmul.f32 %v8204_v10, %v1020_v40  ;;  %v994_v59 = vmul.f32 %v8209_v18, %v969_v63  ;;  %v995_v50 = vmul.f32 %v8212_v7, %v970_v46  ;;  %v6931_v7 = vld [vmem:[#allocation2 + $0x44] sm:$0xf0]  ;;  %v6985_v10 = vld [vmem:[#allocation2 + $0x1f4] sm:$0xf0] }
 0x12e   : > { %v944_v25 = vmul.f32 %v8223_v1, %v919_v2  ;;  %v945_v51 = vmul.f32 %v8226_v8, %v920_v37  ;;  %v8236_v6 = vperm.slane %v8117_v16, 0  ;;  %v8239_v0 = vperm.slane %v8122_v20, 0 }
 0x12f   : > { %1382 = vmatpush.msrb.mxu2 %v1044_v32  ;;  %1402 = vmatpush.msrb.mxu3 %v1045_v9  ;;  %vm2732_vm6 = vcmask 72704  }
 0x130   : > { %10367 = vst [vmem:[#allocation52_spill] sm:$0xff] %v8236_v6 }
 0x131   : > { %1383 = vmatpush.msrb.mxu2 %v994_v59  ;;  %1403 = vmatpush.msrb.mxu3 %v995_v50  ;;  %10368 = vst [vmem:[#allocation53_spill] sm:$0xff] %v8239_v0 }
 0x133   : > { %1384 = vmatpush.msrb.mxu2 %v944_v25  ;;  %1404 = vmatpush.msrb.mxu3 %v945_v51  ;;  %v862_v36 = vpop.permute.xlu0 %861 }
 0x134   : > { %v869_v24 = vsel %vm10269_vm7, %v860_v33, %v862_v36  ;;  %v870_v40 = vsel %vm10269_vm7, %v862_v36, %v7973_v49  ;;  %vm2742_vm7 = vcmask 64512  }
 0x135   : > { %v894_v63 = vmul.f32 %v8236_v6, %v869_v24  ;;  %v895_v46 = vmul.f32 %v8239_v0, %v870_v40 }
 0x137   : > { %1385 = vmatpush.msrb.mxu2 %v894_v63  ;;  %1405 = vmatpush.msrb.mxu3 %v895_v46 }
 0x138   : > { %5731 = vmatmul.msk.f32.vlgmr.msrb.gmra.mxu2 %vm1246_vm8, %v8005_v14  ;;  %5732 = vmatmul.msk.f32.vlgmr.msrb.gmra.mxu3 %vm1246_vm8, %v8005_v14 }
 0x161   : > { %v8250_v16 = vpop.permute.xlu1 %1412 }
 0x16c   : > { %v8252_v32 = vpop.permute.xlu2 %1424 }
 0x175   : > { %v1267_v20 = vpop.f32.mrf.mxu0 }
 0x176   : > { %v1415_v33 = vmul.f32 %v8250_v16, %v1267_v20 }
 0x178   : > { %v1427_v25 = vadd.f32 %v8252_v32, %v1415_v33 }
 0x17a   : > { %v1443_v20 = vmul.f32 0.2, %v1427_v25  ;;  %vm1435_vm11 = vcmp.gt.f32.partialorder %v1427_v25, 0.0 }
 0x187   : > { %v1287_v6 = vpop.f32.mrf.mxu1 }
 0x18b   : > { %v1307_v49 = vpop.f32.mrf.mxu2  ;;  %v1327_v9 = vpop.f32.mrf.mxu3 }
 0x18c   : > { %v1417_v2 = vmul.f32 %v8250_v16, %v1307_v49  ;;  %v1418_v37 = vmul.f32 %v8250_v16, %v1327_v9 }
 0x18e   : > { %v1429_v59 = vadd.f32 %v8252_v32, %v1417_v2  ;;  %v1430_v50 = vadd.f32 %v8252_v32, %v1418_v37  ;;  %v1451_v2 = vsel %vm1435_vm11, %v1427_v25, %v1443_v20  ;;  %vm2501_vm11 = vcmask 916480  }
 0x190   : > { %vm1437_vm9 = vcmp.gt.f32.partialorder %v1429_v59, 0.0  ;;  %vm1438_vm10 = vcmp.gt.f32.partialorder %v1430_v50, 0.0  ;;  %v1445_v14 = vmul.f32 0.2, %v1429_v59  ;;  %v1446_v51 = vmul.f32 0.2, %v1430_v50 }
 0x192   : > { %v1453_v36 = vsel %vm1437_vm9, %v1429_v59, %v1445_v14  ;;  %v1454_v24 = vsel %vm1438_vm10, %v1430_v50, %v1446_v51  ;;  %v1416_v59 = vmul.f32 %v8250_v16, %v1287_v6  ;;  %vm2515_vm10 = vcmask 908288  }
 0x193   : > { %v1347_v40 = vpop.f32.mrf.mxu0  ;;  %v7271_v63 = vpack.i.bf16 %v1454_v24, %v1453_v36 }
 0x194   : > { %v1419_v46 = vmul.f32 %v8250_v16, %v1347_v40  ;;  %v1428_v50 = vadd.f32 %v8252_v32, %v1416_v59 }
 0x195   : > { %7272 = vrot.lane.b32.xlu0 %v7271_v63, %s10259_s23 }
 0x196   : > { %v1431_v49 = vadd.f32 %v8252_v32, %v1419_v46  ;;  %v1444_v40 = vmul.f32 0.2, %v1428_v50  ;;  %vm1436_vm13 = vcmp.gt.f32.partialorder %v1428_v50, 0.0 }
 0x198   : > { %v1447_v9 = vmul.f32 0.2, %v1431_v49  ;;  %vm1439_vm12 = vcmp.gt.f32.partialorder %v1431_v49, 0.0  ;;  %v1452_v1 = vsel %vm1436_vm13, %v1428_v50, %v1444_v40  ;;  %vm10272_vm13 = vcmask 121856  }
 0x19a   : > { %v1455_v33 = vsel %vm1439_vm12, %v1431_v49, %v1447_v9  ;;  %vm2487_vm12 = vcmask 924672  }
 0x19b   : > { %v7276_v37 = vpack.i.bf16 %v1451_v2, %v1455_v33 }
 0x19d   : > { %7277 = vrot.lane.b32.xlu1 %v7276_v37, %s10259_s23 }
 0x1a7   : > { %v1367_v14 = vpop.f32.mrf.mxu1 }
 0x1a8   : > { %v1420_v51 = vmul.f32 %v8250_v16, %v1367_v14 }
 0x1aa   : > { %v1432_v63 = vadd.f32 %v8252_v32, %v1420_v51 }
 0x1ac   : > { %v1448_v46 = vmul.f32 0.2, %v1432_v63  ;;  %vm1440_vm14 = vcmp.gt.f32.partialorder %v1432_v63, 0.0 }
 0x1ae   : > { %v8268_v25 = vsel %vm1440_vm14, %v1432_v63, %v1448_v46  ;;  %vm2420_vm14 = vcmask 138240  }
 0x1af   : > { %v7281_v20 = vpack.i.bf16 %v8268_v25, %v1452_v1 }
 0x1b1   : > { %7282 = vrot.lane.b32.xlu2 %v7281_v20, %s10259_s23 }
 0x1bb   : > { %v1387_v49 = vpop.f32.mrf.mxu2  ;;  %v1407_v6 = vpop.f32.mrf.mxu3 }
 0x1bc   : > { %v1421_v9 = vmul.f32 %v8250_v16, %v1387_v49  ;;  %v1422_v37 = vmul.f32 %v8250_v16, %v1407_v6 }
 0x1be   : > { %v1433_v59 = vadd.f32 %v8252_v32, %v1421_v9  ;;  %v1434_v14 = vadd.f32 %v8252_v32, %v1422_v37 }
 0x1c0   : > { %v1449_v51 = vmul.f32 0.2, %v1433_v59  ;;  %v1450_v18 = vmul.f32 0.2, %v1434_v14  ;;  %vm1441_vm15 = vcmp.gt.f32.partialorder %v1433_v59, 0.0  ;;  %vm1442_vm9 = vcmp.gt.f32.partialorder %v1434_v14, 0.0 }
 0x1c2   : > { %v8276_v50 = vsel %vm1441_vm15, %v1433_v59, %v1449_v51  ;;  %v8278_v40 = vsel %vm1442_vm9, %v1434_v14, %v1450_v18  ;;  %vm2434_vm15 = vcmask 130048  }
 0x1c3   : > { %v7286_v63 = vpack.i.bf16 %v8278_v40, %v8276_v50 }
 0x1c5   : > { %7287 = vrot.lane.b32.xlu0 %v7286_v63, %s10259_s23 }
 0x207   : > { %v7273_v46 = vpop.permute.xlu0 %7272 }
 0x208   : > { %v7275_v20 = vunpack.i.h.bf16 %v7273_v46  ;;  %v7274_v49 = vunpack.i.l.bf16 %v7273_v46 }
 0x20a   : > { %v1485_v61 = vsel %vm1062_vm3, %v7274_v49, %v7275_v20 }
 0x20b   : > { %v8283_v6 = vpop.permute.xlu2 %7282  ;;  %v8297_v5 = vmax.f32 %v1453_v36, %v1485_v61  ;;  %v5791_v36 = vld [vmem:[#allocation2 + $0x70] sm:$0xf] }
 0x20c   : > { %v7284_v9 = vunpack.i.l.bf16 %v8283_v6  ;;  %v10204_v59 = vunpack.i.h.bf16 %v8283_v6 }
 0x20e   : > { %v1484_v51 = vsel %vm1062_vm3, %v7284_v9, %v7274_v49  ;;  %v5775_v49 = vld [vmem:[#allocation2 + $0x50] sm:$0xf] }
 0x20f   : > { %v8286_v37 = vpop.permute.xlu1 %7277  ;;  %v8308_v8 = vmax.f32 %v1452_v1, %v1484_v51  ;;  %v6953_v51 = vld [vmem:[#allocation2 + $0xf4] sm:$0xf0] }
 0x210   : > { %v10203_v18 = vunpack.i.h.bf16 %v8286_v37  ;;  %v7279_v14 = vunpack.i.l.bf16 %v8286_v37 }
 0x212   : > { %v1487_v63 = vsel %vm1062_vm3, %v7279_v14, %v10204_v59  ;;  %v1486_v46 = vsel %vm1062_vm3, %v7275_v20, %v7279_v14  ;;  %v1483_v0 = vsel %vm1062_vm3, %v10203_v18, %v7284_v9  ;;  %v6933_v9 = vld [vmem:[#allocation2 + $0x54] sm:$0xf0]  ;;  %v5855_v14 = vld [vmem:[#allocation2 + $0xf0] sm:$0xf] }
 0x213   : > { %v8302_v21 = vmax.f32 %v1455_v33, %v1487_v63  ;;  %v8304_v22 = vmax.f32 %v1454_v24, %v1486_v46  ;;  %v8306_v41 = vmax.f32 %v1451_v2, %v1483_v0  ;;  %v6937_v24 = vld [vmem:[#allocation2 + $0x74] sm:$0xf0]  ;;  %v5783_v33 = vld [vmem:[#allocation2 + $0x60] sm:$0xf]  ;;  %v6935_v2 = vld [vmem:[#allocation2 + $0x64] sm:$0xf0]  ;;  %v5856_v63 = vor.u32 %v6953_v51, %v5855_v14 }
 0x214   : > { %v5792_v0 = vor.u32 %v6937_v24, %v5791_v36  ;;  %v5784_v1 = vor.u32 %v6935_v2, %v5783_v33  ;;  %v5919_v46 = vld [vmem:[#allocation2 + $0x170] sm:$0xf]  ;;  %v6969_v18 = vld [vmem:[#allocation2 + $0x174] sm:$0xf0]  ;;  %v5776_v45 = vor.u32 %v6933_v9, %v5775_v49  ;;  %v5847_v36 = vld [vmem:[#allocation2 + $0xe0] sm:$0xf] }
 0x215   : > { %1524 = vrot.lane.b32.xlu0 %v8302_v21, %s10234_s21  ;;  %v7291_v20 = vpack.i.bf16 %v8304_v22, %v8297_v5  ;;  %v7296_v61 = vpack.i.bf16 %v8308_v8, %v8306_v41  ;;  %v5983_v59 = vld [vmem:[#allocation2 + $0x1f0] sm:$0xf]  ;;  %2218 = vmatpush.bf16.msra.mxu1 %v5856_v63  ;;  %v6951_v24 = vld [vmem:[#allocation2 + $0xe4] sm:$0xf0]  ;;  %v6949_v9 = vld [vmem:[#allocation2 + $0xd4] sm:$0xf0] }
 0x216   : > { %2205 = vmatpush.bf16.msra.mxu0 %v5792_v0  ;;  %v5984_v56 = vor.u32 %v6985_v10, %v5983_v59  ;;  %v5911_v0 = vld [vmem:[#allocation2 + $0x160] sm:$0xf]  ;;  %v5848_v33 = vor.u32 %v6951_v24, %v5847_v36  ;;  %v6967_v2 = vld [vmem:[#allocation2 + $0x164] sm:$0xf0]  ;;  %v5759_v14 = vld [vmem:[#allocation2 + $0x30] sm:$0xf] }
 0x217   : > { %7292 = vrot.lane.b32.xlu1 %v7291_v20, %s10234_s21  ;;  %7297 = vrot.lane.b32.xlu2 %v7296_v61, %s10234_s21  ;;  %v5767_v20 = vld [vmem:[#allocation2 + $0x40] sm:$0xf]  ;;  %v5920_v61 = vor.u32 %v6969_v18, %v5919_v46  ;;  %v5912_v51 = vor.u32 %v6967_v2, %v5911_v0  ;;  %v5903_v18 = vld [vmem:[#allocation2 + $0x150] sm:$0xf]  ;;  %v6965_v46 = vld [vmem:[#allocation2 + $0x154] sm:$0xf0] }
 0x218   : > { %2244 = vmatpush.bf16.msra.mxu3 %v5984_v56  ;;  %v5768_v49 = vor.u32 %v6931_v7, %v5767_v20  ;;  %v6929_v63 = vld [vmem:[#allocation2 + $0x34] sm:$0xf0]  ;;  %v5967_v59 = vld [vmem:[#allocation2 + $0x1d0] sm:$0xf]  ;;  %v5831_v36 = vld [vmem:[#allocation2 + $0xc0] sm:$0xf] }
 0x219   : > { %2231 = vmatpush.bf16.msra.mxu2 %v5920_v61  ;;  %2219 = vmatpush.bf16.msra.mxu1 %v5848_v33  ;;  %v5904_v61 = vor.u32 %v6965_v46, %v5903_v18  ;;  %v6947_v24 = vld [vmem:[#allocation2 + $0xc4] sm:$0xf0]  ;;  %v5968_v28 = vor.u32 %v6981_v4, %v5967_v59  ;;  %v5895_v56 = vld [vmem:[#allocation2 + $0x140] sm:$0xf]  ;;  %v5760_v38 = vor.u32 %v6929_v63, %v5759_v14  ;;  %v6925_v18 = vld [vmem:[#allocation2 + $0x14] sm:$0xf0] }
 0x21a   : > { %2206 = vmatpush.bf16.msra.mxu0 %v5784_v1  ;;  %v5839_v1 = vld [vmem:[#allocation2 + $0xd0] sm:$0xf]  ;;  %v6963_v0 = vld [vmem:[#allocation2 + $0x144] sm:$0xf0]  ;;  %v5751_v7 = vld [vmem:[#allocation2 + $0x20] sm:$0xf]  ;;  %v5832_v2 = vor.u32 %v6947_v24, %v5831_v36  ;;  %v10370_v24 = vunpack.i.h.bf16 %v8286_v37 }
 0x21b   : > { %v5840_v10 = vor.u32 %v6949_v9, %v5839_v1  ;;  %v6927_v20 = vld [vmem:[#allocation2 + $0x24] sm:$0xf0]  ;;  %v5896_v33 = vor.u32 %v6963_v0, %v5895_v56  ;;  %v5743_v9 = vld [vmem:[#allocation2 + $0x10] sm:$0xf]  ;;  %v5735_v14 = vld [vmem:[#allocation2] sm:$0xf] }
 0x21c   : > { %2245 = vmatpush.bf16.msra.mxu3 %v5976_v15  ;;  %v5744_v4 = vor.u32 %v6925_v18, %v5743_v9  ;;  %v7001_v59 = vld [vmem:[#allocation2 + $0x274] sm:$0xf0]  ;;  %v5823_v9 = vld [vmem:[#allocation2 + $0xb0] sm:$0xf] }
 0x21d   : > { %2232 = vmatpush.bf16.msra.mxu2 %v5912_v51  ;;  %2220 = vmatpush.bf16.msra.mxu1 %v5840_v10  ;;  %v5752_v51 = vor.u32 %v6927_v20, %v5751_v7  ;;  %v6047_v10 = vld [vmem:[#allocation2 + $0x270] sm:$0xf]  ;;  %v6039_v7 = vld [vmem:[#allocation2 + $0x260] sm:$0xf]  ;;  %v6999_v20 = vld [vmem:[#allocation2 + $0x264] sm:$0xf0] }
 0x21e   : > { %2207 = vmatpush.bf16.msra.mxu0 %v5776_v45  ;;  %v6979_v45 = vld [vmem:[#allocation2 + $0x1c4] sm:$0xf0]  ;;  %v6945_v18 = vld [vmem:[#allocation2 + $0xb4] sm:$0xf0] }
 0x21f   : > { %v5960_v1 = vor.u32 %v6979_v45, %v5959_v27 }
 0x220   : > { %2246 = vmatpush.bf16.msra.mxu3 %v5968_v28 }
 0x221   : > { %2233 = vmatpush.bf16.msra.mxu2 %v5904_v61  ;;  %2221 = vmatpush.bf16.msra.mxu1 %v5832_v2  ;;  %v10369_v61 = vunpack.i.h.bf16 %v8283_v6  ;;  %v6048_v6 = vor.u32 %v7001_v59, %v6047_v10  ;;  %v6031_v2 = vld [vmem:[#allocation2 + $0x250] sm:$0xf] }
 0x222   : > { %2208 = vmatpush.bf16.msra.mxu0 %v5768_v49  ;;  %v6923_v49 = vld [vmem:[#allocation2 + $0x4] sm:$0xf0]  ;;  %v6015_v59 = vld [vmem:[#allocation2 + $0x230] sm:$0xf] }
 0x223   : > { %v5736_v0 = vor.u32 %v6923_v49, %v5735_v14  ;;  %v6961_v14 = vld [vmem:[#allocation2 + $0x134] sm:$0xf0]  ;;  %v5951_v49 = vld [vmem:[#allocation2 + $0x1b0] sm:$0xf] }
 0x224   : > { %2247 = vmatpush.bf16.msra.mxu3 %v5960_v1  ;;  %v6995_v1 = vld [vmem:[#allocation2 + $0x244] sm:$0xf0] }
 0x225   : > { %2234 = vmatpush.bf16.msra.mxu2 %v5896_v33 }
 0x226   : > { %2209 = vmatpush.bf16.msra.mxu0 %v5760_v38 }
 0x22a   : > { %2210 = vmatpush.bf16.msra.mxu0 %v5752_v51 }
 0x22e   : > { %2211 = vmatpush.bf16.msra.mxu0 %v5744_v4  ;;  %v5887_v4 = vld [vmem:[#allocation2 + $0x130] sm:$0xf] }
 0x232   : > { %2212 = vmatpush.bf16.msra.mxu0 %v5736_v0 }
 0x236   : > { %2257 = vmatpush.bf16.msrb.mxu0 %v6048_v6  ;;  %v6959_v6 = vld [vmem:[#allocation2 + $0x124] sm:$0xf0] }
 0x237   : > { %v7288_v15 = vpop.permute.xlu0 %7287 }
 0x238   : > { %v7290_v46 = vunpack.i.h.bf16 %v7288_v15  ;;  %v7289_v63 = vunpack.i.l.bf16 %v7288_v15  ;;  %v5824_v15 = vor.u32 %v6945_v18, %v5823_v9  ;;  %v6957_v18 = vld [vmem:[#allocation2 + $0x114] sm:$0xf0] }
 0x23a   : > { %v1488_v28 = vsel %vm1062_vm3, %v10369_v61, %v7289_v63  ;;  %v1489_v36 = vsel %vm1062_vm3, %v7289_v63, %v7290_v46  ;;  %v1499_v56 = vsel %vm1062_vm3, %v7290_v46, %v10370_v24  ;;  %v6977_v46 = vld [vmem:[#allocation2 + $0x1b4] sm:$0xf0]  ;;  %v5888_v63 = vor.u32 %v6961_v14, %v5887_v4  ;;  %2222 = vmatpush.bf16.msra.mxu1 %v5824_v15  ;;  %v6943_v24 = vld [vmem:[#allocation2 + $0xa4] sm:$0xf0]  ;;  %v5935_v4 = vld [vmem:[#allocation2 + $0x190] sm:$0xf] }
 0x23b   : > { %v8326_v38 = vmax.f32 %v8268_v25, %v1488_v28  ;;  %v8329_v27 = vmax.f32 %v8276_v50, %v1489_v36  ;;  %v8332_v45 = vmax.f32 %v8278_v40, %v1499_v56  ;;  %v6040_v25 = vor.u32 %v6999_v20, %v6039_v7  ;;  %v6997_v50 = vld [vmem:[#allocation2 + $0x254] sm:$0xf0]  ;;  %v6023_v40 = vld [vmem:[#allocation2 + $0x240] sm:$0xf]  ;;  %v6975_v20 = vld [vmem:[#allocation2 + $0x1a4] sm:$0xf0] }
 0x23c   : > { %v6032_v33 = vor.u32 %v6997_v50, %v6031_v2  ;;  %v6024_v51 = vor.u32 %v6995_v1, %v6023_v40  ;;  %v5952_v10 = vor.u32 %v6977_v46, %v5951_v49  ;;  %v6993_v61 = vld [vmem:[#allocation2 + $0x234] sm:$0xf0]  ;;  %v5815_v36 = vld [vmem:[#allocation2 + $0xa0] sm:$0xf]  ;;  %2235 = vmatpush.bf16.msra.mxu2 %v5888_v63  ;;  %v6991_v50 = vld [vmem:[#allocation2 + $0x224] sm:$0xf0] }
 0x23d   : > { %1526 = vrot.lane.b32.xlu2 %v8326_v38, %s10234_s21  ;;  %v7301_v37 = vpack.i.bf16 %v8332_v45, %v8329_v27  ;;  %2258 = vmatpush.bf16.msrb.mxu0 %v6040_v25  ;;  %v6016_v28 = vor.u32 %v6993_v61, %v6015_v59  ;;  %v5879_v56 = vld [vmem:[#allocation2 + $0x120] sm:$0xf]  ;;  %v5816_v0 = vor.u32 %v6943_v24, %v5815_v36  ;;  %v5807_v40 = vld [vmem:[#allocation2 + $0x90] sm:$0xf]  ;;  %v6941_v1 = vld [vmem:[#allocation2 + $0x94] sm:$0xf0] }
 0x23e   : > { %2248 = vmatpush.bf16.msra.mxu3 %v5952_v10  ;;  %v5943_v7 = vld [vmem:[#allocation2 + $0x1a0] sm:$0xf]  ;;  %v5808_v9 = vor.u32 %v6941_v1, %v5807_v40  ;;  %v6973_v15 = vld [vmem:[#allocation2 + $0x194] sm:$0xf0]  ;;  %v5999_v46 = vld [vmem:[#allocation2 + $0x210] sm:$0xf] }
 0x23f   : > { %7302 = vrot.lane.b32.xlu1 %v7301_v37, %s10234_s21  ;;  %v5880_v37 = vor.u32 %v6959_v6, %v5879_v56  ;;  %v5944_v25 = vor.u32 %v6975_v20, %v5943_v7  ;;  %v6007_v2 = vld [vmem:[#allocation2 + $0x220] sm:$0xf]  ;;  %2223 = vmatpush.bf16.msra.mxu1 %v5816_v0  ;;  %v5936_v49 = vor.u32 %v6973_v15, %v5935_v4  ;;  %v6989_v63 = vld [vmem:[#allocation2 + $0x214] sm:$0xf0]  ;;  %v6939_v61 = vld [vmem:[#allocation2 + $0x84] sm:$0xf0] }
 0x240   : > { %v5799_v10 = vld [vmem:[#allocation2 + $0x80] sm:$0xf]  ;;  %v6000_v59 = vor.u32 %v6989_v63, %v5999_v46  ;;  %v6955_v36 = vld [vmem:[#allocation2 + $0x104] sm:$0xf0]  ;;  %v6175_v40 = vld [vmem:[#allocation2 + $0x370] sm:$0xf] }
 0x241   : > { %2259 = vmatpush.bf16.msrb.mxu0 %v6032_v33  ;;  %v6008_v33 = vor.u32 %v6991_v50, %v6007_v2  ;;  %2236 = vmatpush.bf16.msra.mxu2 %v5880_v37  ;;  %v5800_v24 = vor.u32 %v6939_v61, %v5799_v10  ;;  %v5927_v0 = vld [vmem:[#allocation2 + $0x180] sm:$0xf]  ;;  %v6971_v6 = vld [vmem:[#allocation2 + $0x184] sm:$0xf0]  ;;  %v7017_v2 = vld [vmem:[#allocation2 + $0x2f4] sm:$0xf0] }
 0x242   : > { %2249 = vmatpush.bf16.msra.mxu3 %v5944_v25  ;;  %v5991_v7 = vld [vmem:[#allocation2 + $0x200] sm:$0xf]  ;;  %v5928_v20 = vor.u32 %v6971_v6, %v5927_v0  ;;  %v6987_v37 = vld [vmem:[#allocation2 + $0x204] sm:$0xf0]  ;;  %v6111_v25 = vld [vmem:[#allocation2 + $0x2f0] sm:$0xf] }
 0x243   : > { %2224 = vmatpush.bf16.msra.mxu1 %v5808_v9  ;;  %v5992_v50 = vor.u32 %v6987_v37, %v5991_v7  ;;  %v7033_v1 = vld [vmem:[#allocation2 + $0x374] sm:$0xf0]  ;;  %v6103_v15 = vld [vmem:[#allocation2 + $0x2e0] sm:$0xf]  ;;  %v7031_v63 = vld [vmem:[#allocation2 + $0x364] sm:$0xf0] }
 0x244   : > { %v6176_v9 = vor.u32 %v7033_v1, %v6175_v40  ;;  %v6231_v10 = vld [vmem:[#allocation2 + $0x3e0] sm:$0xf]  ;;  %v6159_v0 = vld [vmem:[#allocation2 + $0x350] sm:$0xf]  ;;  %v7029_v6 = vld [vmem:[#allocation2 + $0x354] sm:$0xf0] }
 0x245   : > { %2260 = vmatpush.bf16.msrb.mxu0 %v6024_v51  ;;  %v5871_v51 = vld [vmem:[#allocation2 + $0x110] sm:$0xf]  ;;  %v6160_v37 = vor.u32 %v7029_v6, %v6159_v0  ;;  %v7027_v1 = vld [vmem:[#allocation2 + $0x344] sm:$0xf0]  ;;  %v5793_v0 = vld [vmem:[#allocation2 + $0x78] sm:$0xf0] }
 0x246   : > { %v5872_v14 = vor.u32 %v6957_v18, %v5871_v51  ;;  %2250 = vmatpush.bf16.msra.mxu3 %v5936_v49  ;;  %v6239_v51 = vld [vmem:[#allocation2 + $0x3f0] sm:$0xf]  ;;  %v7049_v18 = vld [vmem:[#allocation2 + $0x3f4] sm:$0xf0]  ;;  %v6167_v49 = vld [vmem:[#allocation2 + $0x360] sm:$0xf] }
 0x247   : > { %2225 = vmatpush.bf16.msra.mxu1 %v5800_v24  ;;  %v6240_v4 = vor.u32 %v7049_v18, %v6239_v51  ;;  %v6168_v61 = vor.u32 %v7031_v63, %v6167_v49  ;;  %v7013_v24 = vld [vmem:[#allocation2 + $0x2d4] sm:$0xf0]  ;;  %v6223_v7 = vld [vmem:[#allocation2 + $0x3d0] sm:$0xf]  ;;  %v6215_v51 = vld [vmem:[#allocation2 + $0x3c0] sm:$0xf] }
 0x248   : > { %2237 = vmatpush.bf16.msra.mxu2 %v5872_v14  ;;  %v7015_v14 = vld [vmem:[#allocation2 + $0x2e4] sm:$0xf0]  ;;  %v6143_v49 = vld [vmem:[#allocation2 + $0x330] sm:$0xf]  ;;  %s7466_s21 = smov 56  }
 0x249   : > { %2261 = vmatpush.bf16.msrb.mxu0 %v6016_v28  ;;  %v5863_v28 = vld [vmem:[#allocation2 + $0x100] sm:$0xf]  ;;  %v6104_v46 = vor.u32 %v7015_v14, %v6103_v15  ;;  %v6079_v15 = vld [vmem:[#allocation2 + $0x2b0] sm:$0xf]  ;;  %v7009_v14 = vld [vmem:[#allocation2 + $0x2b4] sm:$0xf0] }
 0x24a   : > { %v5864_v56 = vor.u32 %v6955_v36, %v5863_v28  ;;  %2251 = vmatpush.bf16.msra.mxu3 %v5928_v20  ;;  %v6095_v36 = vld [vmem:[#allocation2 + $0x2d0] sm:$0xf]  ;;  %v7045_v20 = vld [vmem:[#allocation2 + $0x3d4] sm:$0xf0]  ;;  %v6080_v63 = vor.u32 %v7009_v14, %v6079_v15 }
 0x24b   : > { %v6063_v14 = vld [vmem:[#allocation2 + $0x290] sm:$0xf] }
 0x24c   : > { %2238 = vmatpush.bf16.msra.mxu2 %v5864_v56  ;;  %v6096_v56 = vor.u32 %v7013_v24, %v6095_v36  ;;  %v6936_v24 = vld [vmem:[#allocation2 + $0x74] sm:$0xf] }
 0x24d   : > { %2262 = vmatpush.bf16.msrb.mxu0 %v6008_v33  ;;  %v6112_v33 = vor.u32 %v7017_v2, %v6111_v25  ;;  %v6224_v25 = vor.u32 %v7045_v20, %v6223_v7  ;;  %v6087_v2 = vld [vmem:[#allocation2 + $0x2c0] sm:$0xf]  ;;  %v7007_v20 = vld [vmem:[#allocation2 + $0x2a4] sm:$0xf0]  ;;  %v5796_v15 = vor.u32 %v6936_v24, %v5793_v0 }
 0x24e   : > { %2296 = vmatpush.bf16.msrb.mxu3 %v6240_v4  ;;  %v6071_v7 = vld [vmem:[#allocation2 + $0x2a0] sm:$0xf] }
 0x24f   : > { %2270 = vmatpush.bf16.msrb.mxu1 %v6112_v33  ;;  %v6151_v33 = vld [vmem:[#allocation2 + $0x340] sm:$0xf] }
 0x250   : > { %2283 = vmatpush.bf16.msrb.mxu2 %v6176_v9  ;;  %v7043_v9 = vld [vmem:[#allocation2 + $0x3c4] sm:$0xf0]  ;;  %v6152_v18 = vor.u32 %v7027_v1, %v6151_v33  ;;  %v6055_v0 = vld [vmem:[#allocation2 + $0x280] sm:$0xf] }
 0x251   : > { %2263 = vmatpush.bf16.msrb.mxu0 %v6000_v59  ;;  %v7047_v59 = vld [vmem:[#allocation2 + $0x3e4] sm:$0xf0]  ;;  %v6216_v4 = vor.u32 %v7043_v9, %v6215_v51 }
 0x252   : > { %v6232_v28 = vor.u32 %v7047_v59, %v6231_v10  ;;  %v6207_v10 = vld [vmem:[#allocation2 + $0x3b0] sm:$0xf]  ;;  %v7041_v59 = vld [vmem:[#allocation2 + $0x3b4] sm:$0xf0]  ;;  %v7039_v33 = vld [vmem:[#allocation2 + $0x3a4] sm:$0xf0] }
 0x253   : > { %2271 = vmatpush.bf16.msrb.mxu1 %v6104_v46  ;;  %v7025_v46 = vld [vmem:[#allocation2 + $0x334] sm:$0xf0] }
 0x254   : > { %2284 = vmatpush.bf16.msrb.mxu2 %v6168_v61  ;;  %2297 = vmatpush.bf16.msrb.mxu3 %v6232_v28  ;;  %v6144_v61 = vor.u32 %v7025_v46, %v6143_v49  ;;  %v6208_v28 = vor.u32 %v7041_v59, %v6207_v10  ;;  %v7005_v49 = vld [vmem:[#allocation2 + $0x294] sm:$0xf0]  ;;  %v6127_v46 = vld [vmem:[#allocation2 + $0x310] sm:$0xf] }
 0x255   : > { %2264 = vmatpush.bf16.msrb.mxu0 %v5992_v50  ;;  %v7011_v50 = vld [vmem:[#allocation2 + $0x2c4] sm:$0xf0]  ;;  %v6064_v10 = vor.u32 %v7005_v49, %v6063_v14  ;;  %v7021_v59 = vld [vmem:[#allocation2 + $0x314] sm:$0xf0]  ;;  %v6930_v49 = vld [vmem:[#allocation2 + $0x44] sm:$0xf] }
 0x256   : > { %v6088_v40 = vor.u32 %v7011_v50, %v6087_v2  ;;  %v7023_v2 = vld [vmem:[#allocation2 + $0x324] sm:$0xf0]  ;;  %v6199_v50 = vld [vmem:[#allocation2 + $0x3a0] sm:$0xf] }
 0x257   : > { %2272 = vmatpush.bf16.msrb.mxu1 %v6096_v56  ;;  %v6200_v51 = vor.u32 %v7039_v33, %v6199_v50  ;;  %v7019_v33 = vld [vmem:[#allocation2 + $0x304] sm:$0xf0] }
 0x258   : > { %2285 = vmatpush.bf16.msrb.mxu2 %v6160_v37  ;;  %2298 = vmatpush.bf16.msrb.mxu3 %v6224_v25  ;;  %v6135_v37 = vld [vmem:[#allocation2 + $0x320] sm:$0xf]  ;;  %v6072_v25 = vor.u32 %v7007_v20, %v6071_v7  ;;  %v6128_v7 = vor.u32 %v7021_v59, %v6127_v46  ;;  %v5769_v46 = vld [vmem:[#allocation2 + $0x48] sm:$0xf0]  ;;  %v6926_v59 = vld [vmem:[#allocation2 + $0x24] sm:$0xf] }
 0x259   : > { %v6136_v1 = vor.u32 %v7023_v2, %v6135_v37  ;;  %v5777_v37 = vld [vmem:[#allocation2 + $0x58] sm:$0xf0]  ;;  %v6119_v2 = vld [vmem:[#allocation2 + $0x300] sm:$0xf] }
 0x25b   : > { %2273 = vmatpush.bf16.msrb.mxu1 %v6088_v40 }
 0x25c   : > { %2286 = vmatpush.bf16.msrb.mxu2 %v6152_v18  ;;  %2299 = vmatpush.bf16.msrb.mxu3 %v6216_v4  ;;  %v6934_v18 = vld [vmem:[#allocation2 + $0x64] sm:$0xf]  ;;  %v5785_v4 = vld [vmem:[#allocation2 + $0x68] sm:$0xf0] }
 0x25d   : > { %v5788_v24 = vor.u32 %v6934_v18, %v5785_v4  ;;  %v5772_v18 = vor.u32 %v6930_v49, %v5769_v46  ;;  %v6928_v4 = vld [vmem:[#allocation2 + $0x34] sm:$0xf] }
 0x25e   : > { %v6984_v46 = vld [vmem:[#allocation2 + $0x1f4] sm:$0xf] }
 0x25f   : > { %2274 = vmatpush.bf16.msrb.mxu1 %v6080_v63 }
 0x260   : > { %2287 = vmatpush.bf16.msrb.mxu2 %v6144_v61  ;;  %2300 = vmatpush.bf16.msrb.mxu3 %v6208_v28  ;;  %v6191_v61 = vld [vmem:[#allocation2 + $0x390] sm:$0xf]  ;;  %v7037_v28 = vld [vmem:[#allocation2 + $0x394] sm:$0xf0] }
 0x261   : > { %v6192_v20 = vor.u32 %v7037_v28, %v6191_v61  ;;  %v5753_v61 = vld [vmem:[#allocation2 + $0x28] sm:$0xf0] }
 0x263   : > { %2275 = vmatpush.bf16.msrb.mxu1 %v6072_v25  ;;  %v7003_v25 = vld [vmem:[#allocation2 + $0x284] sm:$0xf0] }
 0x264   : > { %2288 = vmatpush.bf16.msrb.mxu2 %v6136_v1  ;;  %2301 = vmatpush.bf16.msrb.mxu3 %v6200_v51  ;;  %v6056_v50 = vor.u32 %v7003_v25, %v6055_v0  ;;  %v7035_v1 = vld [vmem:[#allocation2 + $0x384] sm:$0xf0]  ;;  %v6120_v51 = vor.u32 %v7019_v33, %v6119_v2  ;;  %v5756_v0 = vor.u32 %v6926_v59, %v5753_v61  ;;  %v6952_v25 = vld [vmem:[#allocation2 + $0xf4] sm:$0xf]  ;;  %v5857_v2 = vld [vmem:[#allocation2 + $0xf8] sm:$0xf0] }
 0x265   : > { %v6922_v61 = vld [vmem:[#allocation2 + $0x4] sm:$0xf] }
 0x267   : > { %2276 = vmatpush.bf16.msrb.mxu1 %v6064_v10 }
 0x268   : > { %2289 = vmatpush.bf16.msrb.mxu2 %v6128_v7  ;;  %2302 = vmatpush.bf16.msrb.mxu3 %v6192_v20 }
 0x26b   : > { %2277 = vmatpush.bf16.msrb.mxu1 %v6056_v50 }
 0x26c   : > { %2290 = vmatpush.bf16.msrb.mxu2 %v6120_v51  ;;  %v5921_v51 = vld [vmem:[#allocation2 + $0x178] sm:$0xf0] }
 0x271   : > { %v8339_v36 = vpop.permute.xlu2 %7297 }
 0x272   : > { %v7300_v56 = vunpack.i.h.bf16 %v8339_v36  ;;  %v10223_v6 = vunpack.i.l.bf16 %v8339_v36 }
 0x274   : > { %v1532_v40 = vsel %vm10268_vm1, %v10223_v6, %v7300_v56  ;;  %v6049_v6 = vld [vmem:[#allocation2 + $0x278] sm:$0xf0] }
 0x275   : > { %v1549_v9 = vmax.f32 %v8306_v41, %v1532_v40  ;;  %v6932_v41 = vld [vmem:[#allocation2 + $0x54] sm:$0xf]  ;;  %v6183_v40 = vld [vmem:[#allocation2 + $0x380] sm:$0xf] }
 0x276   : > { %v5780_v14 = vor.u32 %v6932_v41, %v5777_v37  ;;  %v5745_v37 = vld [vmem:[#allocation2 + $0x18] sm:$0xf0] }
 0x277   : > { %v8349_v63 = vpack.c.bf16 %v1549_v9, %v1549_v9  ;;  %v6184_v9 = vor.u32 %v7035_v1, %v6183_v40  ;;  %v6968_v1 = vld [vmem:[#allocation2 + $0x174] sm:$0xf] }
 0x279   : > { %2213 = vmatmul.bf16.vlgmr.msra.gmra.mxu0 %v8349_v63  ;;  %2303 = vmatpush.bf16.msrb.mxu3 %v6184_v9 }
 0x27a   : > { %2309 = vmatpush.bf16.msra.mxu0 %v5796_v15  ;;  %v5761_v15 = vld [vmem:[#allocation2 + $0x38] sm:$0xf0] }
 0x27b   : > { %v5764_v10 = vor.u32 %v6928_v4, %v5761_v15  ;;  %v5860_v15 = vor.u32 %v6952_v25, %v5857_v2  ;;  %v6948_v2 = vld [vmem:[#allocation2 + $0xd4] sm:$0xf] }
 0x27e   : > { %2310 = vmatpush.bf16.msra.mxu0 %v5788_v24  ;;  %v6924_v24 = vld [vmem:[#allocation2 + $0x14] sm:$0xf] }
 0x27f   : > { %v5748_v4 = vor.u32 %v6924_v24, %v5745_v37 }
 0x282   : > { %2311 = vmatpush.bf16.msra.mxu0 %v5780_v14 }
 0x286   : > { %2312 = vmatpush.bf16.msra.mxu0 %v5772_v18  ;;  %v5985_v18 = vld [vmem:[#allocation2 + $0x1f8] sm:$0xf0] }
 0x287   : > { %v1525_v41 = vpop.permute.xlu0 %1524 }
 0x289   : > { %v7293_v28 = vpop.permute.xlu1 %7292 }
 0x28a   : > { %v7295_v7 = vunpack.i.h.bf16 %v7293_v28  ;;  %v7294_v20 = vunpack.i.l.bf16 %v7293_v28  ;;  %2313 = vmatpush.bf16.msra.mxu0 %v5764_v10  ;;  %v5737_v28 = vld [vmem:[#allocation2 + $0x8] sm:$0xf0] }
 0x28b   : > { %v5740_v24 = vor.u32 %v6922_v61, %v5737_v28  ;;  %v6946_v61 = vld [vmem:[#allocation2 + $0xc4] sm:$0xf] }
 0x28c   : > { %v1535_v50 = vsel %vm10268_vm1, %v7295_v7, %v1525_v41  ;;  %v1533_v33 = vsel %vm10268_vm1, %v7300_v56, %v7294_v20  ;;  %v1534_v40 = vsel %vm10268_vm1, %v7294_v20, %v7295_v7  ;;  %v5924_v7 = vor.u32 %v6968_v1, %v5921_v51  ;;  %v6950_v20 = vld [vmem:[#allocation2 + $0xe4] sm:$0xf]  ;;  %v5841_v1 = vld [vmem:[#allocation2 + $0xd8] sm:$0xf0]  ;;  %v6964_v51 = vld [vmem:[#allocation2 + $0x154] sm:$0xf] }
 0x28d   : > { %v1550_v9 = vmax.f32 %v8308_v8, %v1533_v33  ;;  %v1551_v14 = vmax.f32 %v8297_v5, %v1534_v40  ;;  %v1552_v49 = vmax.f32 %v8304_v22, %v1535_v50  ;;  %v5988_v8 = vor.u32 %v6984_v46, %v5985_v18  ;;  %v5849_v33 = vld [vmem:[#allocation2 + $0xe8] sm:$0xf0]  ;;  %v6966_v5 = vld [vmem:[#allocation2 + $0x164] sm:$0xf]  ;;  %v7000_v18 = vld [vmem:[#allocation2 + $0x274] sm:$0xf] }
 0x28e   : > { %2314 = vmatpush.bf16.msra.mxu0 %v5756_v0  ;;  %v5913_v40 = vld [vmem:[#allocation2 + $0x168] sm:$0xf0]  ;;  %v6982_v22 = vld [vmem:[#allocation2 + $0x1e4] sm:$0xf]  ;;  %v5852_v37 = vor.u32 %v6950_v20, %v5849_v33 }
 0x28f   : > { %v8360_v10 = vpack.c.bf16 %v1550_v9, %v1550_v9  ;;  %v8362_v59 = vpack.c.bf16 %v1551_v14, %v1551_v14  ;;  %v8364_v56 = vpack.c.bf16 %v1552_v49, %v1552_v49  ;;  %v5977_v0 = vld [vmem:[#allocation2 + $0x1e8] sm:$0xf0]  ;;  %v5916_v25 = vor.u32 %v6966_v5, %v5913_v40  ;;  %v5905_v9 = vld [vmem:[#allocation2 + $0x158] sm:$0xf0]  ;;  %v6980_v14 = vld [vmem:[#allocation2 + $0x1d4] sm:$0xf] }
 0x290   : > { %v5980_v50 = vor.u32 %v6982_v22, %v5977_v0  ;;  %v5969_v49 = vld [vmem:[#allocation2 + $0x1d8] sm:$0xf0]  ;;  %v5833_v20 = vld [vmem:[#allocation2 + $0xc8] sm:$0xf0]  ;;  %v6978_v40 = vld [vmem:[#allocation2 + $0x1c4] sm:$0xf]  ;;  %v6052_v0 = vor.u32 %v7000_v18, %v6049_v6 }
 0x291   : > { %2226 = vmatmul.bf16.vlgmr.msra.gmra.mxu1 %v8360_v10  ;;  %2239 = vmatmul.bf16.vlgmr.msra.gmra.mxu2 %v8362_v59  ;;  %v5897_v33 = vld [vmem:[#allocation2 + $0x148] sm:$0xf0]  ;;  %v6996_v18 = vld [vmem:[#allocation2 + $0x254] sm:$0xf] }
 0x292   : > { %2252 = vmatmul.bf16.vlgmr.msra.gmra.mxu3 %v8364_v56  ;;  %2315 = vmatpush.bf16.msra.mxu0 %v5748_v4  ;;  %v5844_v4 = vor.u32 %v6948_v2, %v5841_v1  ;;  %v5961_v22 = vld [vmem:[#allocation2 + $0x1c8] sm:$0xf0]  ;;  %v5836_v2 = vor.u32 %v6946_v61, %v5833_v20  ;;  %v6942_v61 = vld [vmem:[#allocation2 + $0xa4] sm:$0xf] }
 0x293   : > { %2322 = vmatpush.bf16.msra.mxu1 %v5860_v15  ;;  %2335 = vmatpush.bf16.msra.mxu2 %v5924_v7  ;;  %v5908_v15 = vor.u32 %v6964_v51, %v5905_v9  ;;  %v5972_v7 = vor.u32 %v6980_v14, %v5969_v49  ;;  %v6944_v51 = vld [vmem:[#allocation2 + $0xb4] sm:$0xf]  ;;  %v5889_v14 = vld [vmem:[#allocation2 + $0x138] sm:$0xf0] }
 0x294   : > { %2348 = vmatpush.bf16.msra.mxu3 %v5988_v8  ;;  %v6962_v8 = vld [vmem:[#allocation2 + $0x144] sm:$0xf]  ;;  %v6960_v9 = vld [vmem:[#allocation2 + $0x134] sm:$0xf]  ;;  %v5953_v49 = vld [vmem:[#allocation2 + $0x1b8] sm:$0xf0] }
 0x295   : > { %v5900_v1 = vor.u32 %v6962_v8, %v5897_v33  ;;  %v6958_v8 = vld [vmem:[#allocation2 + $0x124] sm:$0xf]  ;;  %v5881_v33 = vld [vmem:[#allocation2 + $0x128] sm:$0xf0] }
 0x296   : > { %2316 = vmatpush.bf16.msra.mxu0 %v5740_v24 }
 0x297   : > { %v8369_v46 = vpop.permute.xlu2 %1526  ;;  %2323 = vmatpush.bf16.msra.mxu1 %v5852_v37  ;;  %2336 = vmatpush.bf16.msra.mxu2 %v5916_v25  ;;  %v6998_v37 = vld [vmem:[#allocation2 + $0x264] sm:$0xf]  ;;  %v6041_v25 = vld [vmem:[#allocation2 + $0x268] sm:$0xf0] }
 0x298   : > { %v1536_v28 = vsel %vm10268_vm1, %v1525_v41, %v8369_v46  ;;  %2349 = vmatpush.bf16.msra.mxu3 %v5980_v50  ;;  %v5964_v41 = vor.u32 %v6978_v40, %v5961_v22  ;;  %v5825_v50 = vld [vmem:[#allocation2 + $0xb8] sm:$0xf0]  ;;  %v6044_v6 = vor.u32 %v6998_v37, %v6041_v25  ;;  %v5945_v40 = vld [vmem:[#allocation2 + $0x1a8] sm:$0xf0]  ;;  %v5884_v37 = vor.u32 %v6958_v8, %v5881_v33  ;;  %v6940_v25 = vld [vmem:[#allocation2 + $0x94] sm:$0xf] }
 0x299   : > { %v1553_v5 = vmax.f32 %v8302_v21, %v1536_v28  ;;  %v6976_v21 = vld [vmem:[#allocation2 + $0x1b4] sm:$0xf]  ;;  %v6033_v28 = vld [vmem:[#allocation2 + $0x258] sm:$0xf0]  ;;  %v5929_v8 = vld [vmem:[#allocation2 + $0x188] sm:$0xf0] }
 0x29a   : > { %v5956_v20 = vor.u32 %v6976_v21, %v5953_v49  ;;  %v6036_v22 = vor.u32 %v6996_v18, %v6033_v28  ;;  %v6992_v21 = vld [vmem:[#allocation2 + $0x234] sm:$0xf]  ;;  %v6017_v49 = vld [vmem:[#allocation2 + $0x238] sm:$0xf0]  ;;  %v6938_v28 = vld [vmem:[#allocation2 + $0x84] sm:$0xf] }
 0x29b   : > { %v8374_v24 = vpack.c.bf16 %v1553_v5, %v1553_v5  ;;  %2324 = vmatpush.bf16.msra.mxu1 %v5844_v4  ;;  %2337 = vmatpush.bf16.msra.mxu2 %v5908_v15  ;;  %v5828_v4 = vor.u32 %v6944_v51, %v5825_v50  ;;  %v5892_v15 = vor.u32 %v6960_v9, %v5889_v14  ;;  %v6974_v5 = vld [vmem:[#allocation2 + $0x1a4] sm:$0xf]  ;;  %v6956_v51 = vld [vmem:[#allocation2 + $0x114] sm:$0xf]  ;;  %v5937_v9 = vld [vmem:[#allocation2 + $0x198] sm:$0xf0] }
 0x29c   : > { %2350 = vmatpush.bf16.msra.mxu3 %v5972_v7  ;;  %v5817_v7 = vld [vmem:[#allocation2 + $0xa8] sm:$0xf0]  ;;  %v6972_v50 = vld [vmem:[#allocation2 + $0x194] sm:$0xf]  ;;  %v6028_v14 = vor.u32 %v6994_v13, %v6025_v31  ;;  %v6020_v33 = vor.u32 %v6992_v21, %v6017_v49  ;;  %v6113_v21 = vld [vmem:[#allocation2 + $0x2f8] sm:$0xf0] }
 0x29d   : > { %2265 = vmatmul.bf16.vlgmr.msrb.gmra.mxu0 %v8374_v24 }
 0x29e   : > { %2361 = vmatpush.bf16.msrb.mxu0 %v6052_v0  ;;  %v5820_v0 = vor.u32 %v6942_v61, %v5817_v7  ;;  %v6954_v61 = vld [vmem:[#allocation2 + $0x104] sm:$0xf] }
 0x29f   : > { %2325 = vmatpush.bf16.msra.mxu1 %v5836_v2  ;;  %2338 = vmatpush.bf16.msra.mxu2 %v5900_v1  ;;  %v5948_v2 = vor.u32 %v6974_v5, %v5945_v40  ;;  %v5809_v1 = vld [vmem:[#allocation2 + $0x98] sm:$0xf0]  ;;  %v6970_v7 = vld [vmem:[#allocation2 + $0x184] sm:$0xf]  ;;  %v6009_v40 = vld [vmem:[#allocation2 + $0x228] sm:$0xf0] }
 0x2a0   : > { %2351 = vmatpush.bf16.msra.mxu3 %v5964_v41  ;;  %v5873_v41 = vld [vmem:[#allocation2 + $0x118] sm:$0xf0]  ;;  %v6990_v5 = vld [vmem:[#allocation2 + $0x224] sm:$0xf] }
 0x2a1   : > { %v5876_v18 = vor.u32 %v6956_v51, %v5873_v41 }
 0x2a2   : > { %2362 = vmatpush.bf16.msrb.mxu0 %v6044_v6  ;;  %v5812_v6 = vor.u32 %v6940_v25, %v5809_v1  ;;  %v6001_v25 = vld [vmem:[#allocation2 + $0x218] sm:$0xf0] }
 0x2a3   : > { %2326 = vmatpush.bf16.msra.mxu1 %v5828_v4  ;;  %2339 = vmatpush.bf16.msra.mxu2 %v5892_v15  ;;  %v5940_v4 = vor.u32 %v6972_v50, %v5937_v9  ;;  %v5801_v15 = vld [vmem:[#allocation2 + $0x88] sm:$0xf0]  ;;  %v6986_v50 = vld [vmem:[#allocation2 + $0x204] sm:$0xf] }
 0x2a4   : > { %2352 = vmatpush.bf16.msra.mxu3 %v5956_v20  ;;  %v5865_v20 = vld [vmem:[#allocation2 + $0x108] sm:$0xf0]  ;;  %v5804_v31 = vor.u32 %v6938_v28, %v5801_v15  ;;  %v7032_v28 = vld [vmem:[#allocation2 + $0x374] sm:$0xf] }
 0x2a5   : > { %v5868_v13 = vor.u32 %v6954_v61, %v5865_v20  ;;  %v5993_v9 = vld [vmem:[#allocation2 + $0x208] sm:$0xf0] }
 0x2a6   : > { %2363 = vmatpush.bf16.msrb.mxu0 %v6036_v22  ;;  %v5932_v22 = vor.u32 %v6970_v7, %v5929_v8  ;;  %v7048_v7 = vld [vmem:[#allocation2 + $0x3f4] sm:$0xf]  ;;  %v6241_v8 = vld [vmem:[#allocation2 + $0x3f8] sm:$0xf0] }
 0x2a7   : > { %2327 = vmatpush.bf16.msra.mxu1 %v5820_v0  ;;  %2340 = vmatpush.bf16.msra.mxu2 %v5884_v37  ;;  %v6012_v0 = vor.u32 %v6990_v5, %v6009_v40  ;;  %v6988_v37 = vld [vmem:[#allocation2 + $0x214] sm:$0xf] }
 0x2a8   : > { %2353 = vmatpush.bf16.msra.mxu3 %v5948_v2  ;;  %v6004_v41 = vor.u32 %v6988_v37, %v6001_v25  ;;  %v6169_v37 = vld [vmem:[#allocation2 + $0x368] sm:$0xf0] }
 0x2aa   : > { %2364 = vmatpush.bf16.msrb.mxu0 %v6028_v14  ;;  %v7016_v14 = vld [vmem:[#allocation2 + $0x2f4] sm:$0xf] }
 0x2ab   : > { %2328 = vmatpush.bf16.msra.mxu1 %v5812_v6  ;;  %2341 = vmatpush.bf16.msra.mxu2 %v5876_v18  ;;  %v10371_v6 = vunpack.i.l.bf16 %v8339_v36  ;;  %v6116_v5 = vor.u32 %v7016_v14, %v6113_v21  ;;  %v7044_v14 = vld [vmem:[#allocation2 + $0x3d4] sm:$0xf]  ;;  %v6225_v21 = vld [vmem:[#allocation2 + $0x3d8] sm:$0xf0] }
 0x2ac   : > { %2354 = vmatpush.bf16.msra.mxu3 %v5940_v4  ;;  %v6177_v4 = vld [vmem:[#allocation2 + $0x378] sm:$0xf0] }
 0x2ad   : > { %2317 = vmatmul.bf16.vlgmr.msra.gmra.mxu0 %v8349_v63 }
 0x2ae   : > { %2365 = vmatpush.bf16.msrb.mxu0 %v6020_v33  ;;  %v5996_v33 = vor.u32 %v6986_v50, %v5993_v9  ;;  %v7028_v50 = vld [vmem:[#allocation2 + $0x354] sm:$0xf]  ;;  %v6161_v9 = vld [vmem:[#allocation2 + $0x358] sm:$0xf0] }
 0x2af   : > { %2329 = vmatpush.bf16.msra.mxu1 %v5804_v31  ;;  %2342 = vmatpush.bf16.msra.mxu2 %v5868_v13  ;;  %v6180_v31 = vor.u32 %v7032_v28, %v6177_v4  ;;  %v7014_v13 = vld [vmem:[#allocation2 + $0x2e4] sm:$0xf]  ;;  %v6089_v28 = vld [vmem:[#allocation2 + $0x2c8] sm:$0xf0] }
 0x2b0   : > { %2355 = vmatpush.bf16.msra.mxu3 %v5932_v22  ;;  %v6244_v22 = vor.u32 %v7048_v7, %v6241_v8  ;;  %v7026_v4 = vld [vmem:[#allocation2 + $0x344] sm:$0xf] }
 0x2b1   : > { %v7303_v2 = vpop.permute.xlu1 %7302 }
 0x2b2   : > { %v7305_v1 = vunpack.i.h.bf16 %v7303_v2  ;;  %v7304_v51 = vunpack.i.l.bf16 %v7303_v2  ;;  %2366 = vmatpush.bf16.msrb.mxu0 %v6012_v0  ;;  %v6105_v0 = vld [vmem:[#allocation2 + $0x2e8] sm:$0xf0] }
 0x2b3   : > { %v6108_v25 = vor.u32 %v7014_v13, %v6105_v0  ;;  %v6145_v13 = vld [vmem:[#allocation2 + $0x338] sm:$0xf0] }
 0x2b4   : > { %v1537_v49 = vsel %vm10268_vm1, %v8369_v46, %v7304_v51  ;;  %v1538_v63 = vsel %vm10268_vm1, %v7304_v51, %v7305_v1  ;;  %v1548_v18 = vsel %vm10268_vm1, %v7305_v1, %v10371_v6  ;;  %v7012_v1 = vld [vmem:[#allocation2 + $0x2d4] sm:$0xf]  ;;  %v7010_v6 = vld [vmem:[#allocation2 + $0x2c4] sm:$0xf]  ;;  %v6209_v0 = vld [vmem:[#allocation2 + $0x3b8] sm:$0xf0] }
 0x2b5   : > { %v1554_v15 = vmax.f32 %v8326_v38, %v1537_v49  ;;  %v1555_v61 = vmax.f32 %v8329_v27, %v1538_v63  ;;  %v1556_v20 = vmax.f32 %v8332_v45, %v1548_v18  ;;  %v7030_v38 = vld [vmem:[#allocation2 + $0x364] sm:$0xf]  ;;  %v6233_v45 = vld [vmem:[#allocation2 + $0x3e8] sm:$0xf0]  ;;  %v6164_v63 = vor.u32 %v7028_v50, %v6161_v9 }
 0x2b6   : > { %2367 = vmatpush.bf16.msrb.mxu0 %v6004_v41  ;;  %v7046_v27 = vld [vmem:[#allocation2 + $0x3e4] sm:$0xf]  ;;  %v6172_v2 = vor.u32 %v7030_v38, %v6169_v37  ;;  %v6097_v41 = vld [vmem:[#allocation2 + $0x2d8] sm:$0xf0]  ;;  %v6228_v18 = vor.u32 %v7044_v14, %v6225_v21  ;;  %v6092_v7 = vor.u32 %v7010_v6, %v6089_v28  ;;  %v7004_v14 = vld [vmem:[#allocation2 + $0x294] sm:$0xf] }
 0x2b7   : > { %v8387_v46 = vpack.c.bf16 %v1554_v15, %v1554_v15  ;;  %v8389_v40 = vpack.c.bf16 %v1555_v61, %v1555_v61  ;;  %v8391_v36 = vpack.c.bf16 %v1556_v20, %v1556_v20  ;;  %v6236_v51 = vor.u32 %v7046_v27, %v6233_v45  ;;  %v6153_v15 = vld [vmem:[#allocation2 + $0x348] sm:$0xf0]  ;;  %v7042_v61 = vld [vmem:[#allocation2 + $0x3c4] sm:$0xf]  ;;  %v6129_v6 = vld [vmem:[#allocation2 + $0x318] sm:$0xf0] }
 0x2b8   : > { %v6100_v49 = vor.u32 %v7012_v1, %v6097_v41  ;;  %v6217_v20 = vld [vmem:[#allocation2 + $0x3c8] sm:$0xf0]  ;;  %v6156_v8 = vor.u32 %v7026_v4, %v6153_v15  ;;  %v7006_v27 = vld [vmem:[#allocation2 + $0x2a4] sm:$0xf]  ;;  %v6193_v28 = vld [vmem:[#allocation2 + $0x398] sm:$0xf0] }
 0x2b9   : > { %2278 = vmatmul.bf16.vlgmr.msrb.gmra.mxu1 %v8387_v46  ;;  %2291 = vmatmul.bf16.vlgmr.msrb.gmra.mxu2 %v8389_v40  ;;  %v6137_v1 = vld [vmem:[#allocation2 + $0x328] sm:$0xf0]  ;;  %v7002_v4 = vld [vmem:[#allocation2 + $0x284] sm:$0xf]  ;;  %vm2752_vm1 = vcmask 56320  }
 0x2ba   : > { %2304 = vmatmul.bf16.vlgmr.msrb.gmra.mxu3 %v8391_v36  ;;  %2368 = vmatpush.bf16.msrb.mxu0 %v5996_v33  ;;  %v7008_v33 = vld [vmem:[#allocation2 + $0x2b4] sm:$0xf]  ;;  %v6201_v41 = vld [vmem:[#allocation2 + $0x3a8] sm:$0xf0] }
 0x2bb   : > { %2374 = vmatpush.bf16.msrb.mxu1 %v6116_v5  ;;  %2387 = vmatpush.bf16.msrb.mxu2 %v6180_v31  ;;  %v6081_v5 = vld [vmem:[#allocation2 + $0x2b8] sm:$0xf0]  ;;  %v7024_v31 = vld [vmem:[#allocation2 + $0x334] sm:$0xf] }
 0x2bc   : > { %2400 = vmatpush.bf16.msrb.mxu3 %v6244_v22  ;;  %v7040_v22 = vld [vmem:[#allocation2 + $0x3b4] sm:$0xf]  ;;  %v6084_v38 = vor.u32 %v7008_v33, %v6081_v5  ;;  %v6148_v37 = vor.u32 %v7024_v31, %v6145_v13 }
 0x2bd   : > { %2369 = vmatmul.bf16.vlgmr.msrb.gmra.mxu0 %v8374_v24  ;;  %v6220_v24 = vor.u32 %v7042_v61, %v6217_v20  ;;  %v6212_v45 = vor.u32 %v7040_v22, %v6209_v0  ;;  %v7018_v61 = vld [vmem:[#allocation2 + $0x304] sm:$0xf]  ;;  %v6121_v20 = vld [vmem:[#allocation2 + $0x308] sm:$0xf0] }
 0x2bf   : > { %2375 = vmatpush.bf16.msrb.mxu1 %v6108_v25  ;;  %2388 = vmatpush.bf16.msrb.mxu2 %v6172_v2  ;;  %v6073_v25 = vld [vmem:[#allocation2 + $0x2a8] sm:$0xf0]  ;;  %v7022_v2 = vld [vmem:[#allocation2 + $0x324] sm:$0xf] }
 0x2c0   : > { %2401 = vmatpush.bf16.msrb.mxu3 %v6236_v51  ;;  %v7038_v51 = vld [vmem:[#allocation2 + $0x3a4] sm:$0xf]  ;;  %v6076_v50 = vor.u32 %v7006_v27, %v6073_v25  ;;  %v6140_v9 = vor.u32 %v7022_v2, %v6137_v1 }
 0x2c1   : > { %v6204_v21 = vor.u32 %v7038_v51, %v6201_v41 }
 0x2c3   : > { %2376 = vmatpush.bf16.msrb.mxu1 %v6100_v49  ;;  %2389 = vmatpush.bf16.msrb.mxu2 %v6164_v63  ;;  %v6065_v49 = vld [vmem:[#allocation2 + $0x298] sm:$0xf0]  ;;  %v7020_v63 = vld [vmem:[#allocation2 + $0x314] sm:$0xf] }
 0x2c4   : > { %2402 = vmatpush.bf16.msrb.mxu3 %v6228_v18  ;;  %v7036_v18 = vld [vmem:[#allocation2 + $0x394] sm:$0xf] }
 0x2c5   : > { %v6196_v15 = vor.u32 %v7036_v18, %v6193_v28 }
 0x2c7   : > { %2377 = vmatpush.bf16.msrb.mxu1 %v6092_v7  ;;  %2390 = vmatpush.bf16.msrb.mxu2 %v6156_v8  ;;  %v7034_v7 = vld [vmem:[#allocation2 + $0x384] sm:$0xf]  ;;  %v6185_v8 = vld [vmem:[#allocation2 + $0x388] sm:$0xf0] }
 0x2c8   : > { %2403 = vmatpush.bf16.msrb.mxu3 %v6220_v24  ;;  %v6124_v24 = vor.u32 %v7018_v61, %v6121_v20  ;;  %v6188_v5 = vor.u32 %v7034_v7, %v6185_v8 }
 0x2c9   : > { %2330 = vmatmul.bf16.vlgmr.msra.gmra.mxu1 %v8360_v10  ;;  %2343 = vmatmul.bf16.vlgmr.msra.gmra.mxu2 %v8362_v59  ;;  %v6068_v10 = vor.u32 %v7004_v14, %v6065_v49  ;;  %v6132_v59 = vor.u32 %v7020_v63, %v6129_v6 }
 0x2ca   : > { %2356 = vmatmul.bf16.vlgmr.msra.gmra.mxu3 %v8364_v56  ;;  %v6057_v56 = vld [vmem:[#allocation2 + $0x288] sm:$0xf0] }
 0x2cb   : > { %2378 = vmatpush.bf16.msrb.mxu1 %v6084_v38  ;;  %2391 = vmatpush.bf16.msrb.mxu2 %v6148_v37  ;;  %v6060_v33 = vor.u32 %v7002_v4, %v6057_v56 }
 0x2cc   : > { %2404 = vmatpush.bf16.msrb.mxu3 %v6212_v45 }
 0x2cf   : > { %2379 = vmatpush.bf16.msrb.mxu1 %v6076_v50  ;;  %2392 = vmatpush.bf16.msrb.mxu2 %v6140_v9 }
 0x2d0   : > { %2405 = vmatpush.bf16.msrb.mxu3 %v6204_v21 }
 0x2d3   : > { %2380 = vmatpush.bf16.msrb.mxu1 %v6068_v10  ;;  %2393 = vmatpush.bf16.msrb.mxu2 %v6132_v59 }
 0x2d4   : > { %2406 = vmatpush.bf16.msrb.mxu3 %v6196_v15 }
 0x2d7   : > { %2381 = vmatpush.bf16.msrb.mxu1 %v6060_v33  ;;  %2394 = vmatpush.bf16.msrb.mxu2 %v6124_v24 }
 0x2d8   : > { %2407 = vmatpush.bf16.msrb.mxu3 %v6188_v5 }
 0x2da   : > { %2382 = vmatmul.bf16.vlgmr.msrb.gmra.mxu1 %v8387_v46  ;;  %2395 = vmatmul.bf16.vlgmr.msrb.gmra.mxu2 %v8389_v40 }
 0x2db   : > { %2408 = vmatmul.bf16.vlgmr.msrb.gmra.mxu3 %v8391_v36 }
 0x2f6   : > { %v2214_v31 = vpop.f32.mrf.mxu0 }
 0x2fe   : > { %v2216_v13 = vpop.f32.mrf.mxu0 }
 0x30e   : > { %v2227_v22 = vpop.f32.mrf.mxu1 }
 0x30f   : > { %v2228_v51 = vadd.f32 %v2227_v22, %v2214_v31 }
 0x314   : > { %v2240_v0 = vpop.f32.mrf.mxu2 }
 0x315   : > { %v2253_v38 = vpop.f32.mrf.mxu3  ;;  %v2241_v50 = vadd.f32 %v2240_v0, %v2228_v51 }
 0x316   : > { %v2229_v37 = vpop.f32.mrf.mxu1 }
 0x317   : > { %v2254_v46 = vadd.f32 %v2253_v38, %v2241_v50 }
 0x31a   : > { %v2266_v27 = vpop.f32.mrf.mxu0 }
 0x31b   : > { %v2267_v14 = vadd.f32 %v2266_v27, %v2254_v46  ;;  %v8442_v46 = vld [vmem:[%s10152_s8] sm:$0xff] }
 0x31c   : > { %v2242_v45 = vpop.f32.mrf.mxu2 }
 0x31d   : > { %v2255_v25 = vpop.f32.mrf.mxu3 }
 0x322   : > { %v2268_v2 = vpop.f32.mrf.mxu0 }
 0x32a   : > { %v2318_v1 = vpop.f32.mrf.mxu0 }
 0x332   : > { %v2320_v41 = vpop.f32.mrf.mxu0 }
 0x336   : > { %v2279_v9 = vpop.f32.mrf.mxu1 }
 0x337   : > { %v2280_v21 = vadd.f32 %v2279_v9, %v2267_v14 }
 0x33a   : > { %v2370_v40 = vpop.f32.mrf.mxu0 }
 0x33c   : > { %v2292_v36 = vpop.f32.mrf.mxu2 }
 0x33d   : > { %v2293_v49 = vadd.f32 %v2292_v36, %v2280_v21  ;;  %v2305_v63 = vpop.f32.mrf.mxu3  ;;  %v8452_v21 = vld [vmem:[%s10152_s8 + $0x18] ss:$0 sm:$0xff]  ;;  %v8457_v36 = vld [vmem:[%s10152_s8 + $0x8] sm:$0xff] }
 0x33e   : > { %v2281_v6 = vpop.f32.mrf.mxu1 }
 0x33f   : > { %v8403_v18 = vadd.f32 %v2305_v63, %v2293_v49  ;;  %v2507_v63 = vperm.slane %v8442_v46, 7  ;;  %v2508_v6 = vperm.slane %v8457_v36, 7 }
 0x341   : > { %2483 = vrot.lane.b32.xlu1 %v8403_v18, %s10245_s27  ;;  %2497 = vrot.lane.b32.xlu2 %v8403_v18, %s10249_s28 }
 0x342   : > { %2511 = vrot.lane.b32.xlu0 %v8403_v18, %s10242_s15  ;;  %v2372_v28 = vpop.f32.mrf.mxu0 }
 0x344   : > { %v2294_v10 = vpop.f32.mrf.mxu2 }
 0x345   : > { %v2307_v59 = vpop.f32.mrf.mxu3 }
 0x346   : > { %v2331_v4 = vpop.f32.mrf.mxu1 }
 0x347   : > { %v2332_v20 = vadd.f32 %v2331_v4, %v2318_v1  ;;  %v2493_v4 = vperm.slane %v8442_v46, 6 }
 0x349   : > { %2446 = vrot.lane.b32.xlu2 %v8403_v18, %s10240_s16 }
 0x34a   : > { %2470 = vrot.lane.b32.xlu0 %v8403_v18, %s10259_s23 }
 0x34c   : > { %v2344_v15 = vpop.f32.mrf.mxu2 }
 0x34d   : > { %v2357_v56 = vpop.f32.mrf.mxu3  ;;  %v2345_v7 = vadd.f32 %v2344_v15, %v2332_v20  ;;  %v2494_v15 = vperm.slane %v8457_v36, 6 }
 0x34e   : > { %v2333_v61 = vpop.f32.mrf.mxu1 }
 0x34f   : > { %v2358_v24 = vadd.f32 %v2357_v56, %v2345_v7 }
 0x351   : > { %v2371_v31 = vadd.f32 %v2370_v40, %v2358_v24  ;;  %v8447_v40 = vld [vmem:[%s10152_s8 + $0x10] ss:$0 sm:$0xff] }
 0x352   : > { %2460 = vrot.lane.b32.xlu0 %v8403_v18, %s7449_s24 }
 0x354   : > { %v2346_v8 = vpop.f32.mrf.mxu2 }
 0x355   : > { %v2359_v33 = vpop.f32.mrf.mxu3 }
 0x357   : > { %v2383_v5 = vpop.f32.mrf.mxu1 }
 0x358   : > { %v2384_v13 = vadd.f32 %v2383_v5, %v2371_v31 }
 0x35d   : > { %v2396_v22 = vpop.f32.mrf.mxu2 }
 0x35e   : > { %v2397_v0 = vadd.f32 %v2396_v22, %v2384_v13  ;;  %v2409_v38 = vpop.f32.mrf.mxu3  ;;  %v2479_v22 = vperm.slane %v8442_v46, 5 }
 0x35f   : > { %v2385_v37 = vpop.f32.mrf.mxu1 }
 0x360   : > { %v8417_v27 = vadd.f32 %v2409_v38, %v2397_v0  ;;  %v2480_v0 = vperm.slane %v8457_v36, 5 }
 0x362   : > { %2513 = vrot.lane.b32.xlu1 %v8417_v27, %s10242_s15  ;;  %2485 = vrot.lane.b32.xlu2 %v8417_v27, %s10245_s27  ;;  %s10274_s15 = smov 119   ;;  %s10253_s27 = smov 65  }
 0x363   : > { %2499 = vrot.lane.b32.xlu0 %v8417_v27, %s10249_s28 }
 0x365   : > { %v2398_v45 = vpop.f32.mrf.mxu2 }
 0x366   : > { %v2411_v25 = vpop.f32.mrf.mxu3 }
 0x36a   : > { %2472 = vrot.lane.b32.xlu1 %v8417_v27, %s10259_s23  ;;  %2457 = vrot.lane.b32.xlu2 %v8417_v27, %s7449_s24 }
 0x36b   : > { %2429 = vrot.lane.b32.xlu0 %v8417_v27, %s10251_s19 }
 0x372   : > { %2443 = vrot.lane.b32.xlu1 %v8417_v27, %s10240_s16  ;;  %2414 = vrot.lane.b32.xlu2 %v8417_v27, %s10247_s20  ;;  %s7464_s16 = smov 57  }
 0x373   : > { %2418 = vrot.lane.b32.xlu0 %v8403_v18, %s10247_s20  ;;  %s10255_s20 = smov 63  }
 0x37a   : > { %2432 = vrot.lane.b32.xlu1 %v8403_v18, %s10251_s19  ;;  %s10261_s19 = smov 8  }
 0x39b   : > { %v2498_v1 = vpop.permute.xlu2 %2497 }
 0x3a3   : > { %v2447_v41 = vpop.permute.xlu2 %2446 }
 0x3b3   : > { %v2484_v50 = vpop.permute.xlu1 %2483 }
 0x3b4   : > { %v2512_v2 = vpop.permute.xlu0 %2511 }
 0x3bc   : > { %v2471_v51 = vpop.permute.xlu0 %2470  ;;  %v2486_v14 = vpop.permute.xlu2 %2485 }
 0x3bd   : > { %v2488_v8 = vsel %vm2487_vm12, %v2484_v50, %v2486_v14  ;;  %v2492_v33 = vsel %vm2487_vm12, %v2486_v14, %v2484_v50  ;;  %v2466_v50 = vperm.slane %v8442_v46, 3  ;;  %v2467_v14 = vperm.slane %v8457_v36, 3 }
 0x3be   : > { %v2495_v31 = vmul.f32 %v2493_v4, %v2488_v8  ;;  %v2496_v13 = vmul.f32 %v2494_v15, %v2492_v33  ;;  %v10276_v33 = vperm.slane %v8442_v46, 1 }
 0x3c4   : > { %v2461_v9 = vpop.permute.xlu0 %2460  ;;  %v2458_v38 = vpop.permute.xlu2 %2457 }
 0x3d4   : > { %v2514_v49 = vpop.permute.xlu1 %2513 }
 0x3d5   : > { %v2516_v28 = vsel %vm2515_vm10, %v2512_v2, %v2514_v49  ;;  %v2520_v10 = vsel %vm2515_vm10, %v2514_v49, %v2512_v2  ;;  %v2500_v59 = vpop.permute.xlu0 %2499  ;;  %v2462_v49 = vsel %vm1013_vm4, %v2461_v9, %v2458_v38 }
 0x3d6   : > { %v2523_v56 = vmul.f32 %v8447_v40, %v2516_v28  ;;  %v2524_v61 = vmul.f32 %v8452_v21, %v2520_v10  ;;  %v2502_v20 = vsel %vm2501_vm11, %v2498_v1, %v2500_v59  ;;  %v2506_v7 = vsel %vm2501_vm11, %v2500_v59, %v2498_v1 }
 0x3d7   : > { %v2509_v24 = vmul.f32 %v2507_v63, %v2502_v20  ;;  %v2510_v5 = vmul.f32 %v2508_v6, %v2506_v7  ;;  %v2465_v28 = vsel %vm1013_vm4, %v2458_v38, %v2461_v9  ;;  %v2469_v59 = vmul.f32 %v2467_v14, %v2462_v49 }
 0x3d8   : > { %2532 = vmatpush.msra.mxu0 %v2523_v56  ;;  %2552 = vmatpush.msra.mxu1 %v2524_v61  ;;  %v10278_v56 = vperm.slane %v8442_v46, 2  ;;  %v10277_v61 = vperm.slane %v8457_v36, 2 }
 0x3da   : > { %2533 = vmatpush.msra.mxu0 %v2509_v24  ;;  %2553 = vmatpush.msra.mxu1 %v2510_v5  ;;  %v10275_v24 = vperm.slane %v8457_v36, 1  ;;  %v2415_v5 = vpop.permute.xlu2 %2414 }
 0x3dc   : > { %v2473_v37 = vpop.permute.xlu1 %2472  ;;  %2534 = vmatpush.msra.mxu0 %v2495_v31  ;;  %2554 = vmatpush.msra.mxu1 %v2496_v13  ;;  %v10270_v13 = vperm.slane %v8442_v46, 0 }
 0x3dd   : > { %v2474_v45 = vsel %vm1062_vm3, %v2471_v51, %v2473_v37  ;;  %v2478_v25 = vsel %vm1062_vm3, %v2473_v37, %v2471_v51  ;;  %v2430_v10 = vpop.permute.xlu0 %2429  ;;  %v2468_v51 = vmul.f32 %v2466_v50, %v2465_v28 }
 0x3de   : > { %v2481_v2 = vmul.f32 %v2479_v22, %v2474_v45  ;;  %v2482_v1 = vmul.f32 %v2480_v0, %v2478_v25 }
 0x3e0   : > { %2535 = vmatpush.msra.mxu0 %v2481_v2  ;;  %2555 = vmatpush.msra.mxu1 %v2482_v1 }
 0x3e2   : > { %2536 = vmatpush.msra.mxu0 %v8403_v18  ;;  %2556 = vmatpush.msra.mxu1 %v8417_v27 }
 0x3e4   : > { %v2444_v20 = vpop.permute.xlu1 %2443  ;;  %2537 = vmatpush.msra.mxu0 %v2468_v51  ;;  %2557 = vmatpush.msra.mxu1 %v2469_v59 }
 0x3e5   : > { %v2449_v9 = vsel %vm10272_vm13, %v2447_v41, %v2444_v20  ;;  %v2452_v7 = vsel %vm10272_vm13, %v2444_v20, %v2447_v41  ;;  %v2419_v8 = vpop.permute.xlu0 %2418  ;;  %v10267_v41 = vperm.slane %v8457_v36, 0 }
 0x3e6   : > { %v2455_v18 = vmul.f32 %v10278_v56, %v2452_v7  ;;  %v2456_v27 = vmul.f32 %v10277_v61, %v2449_v9  ;;  %v2421_v38 = vsel %vm2420_vm14, %v2419_v8, %v2415_v5  ;;  %v2424_v37 = vsel %vm2420_vm14, %v2415_v5, %v2419_v8 }
 0x3e7   : > { %v2427_v49 = vmul.f32 %v10270_v13, %v2424_v37  ;;  %v2428_v28 = vmul.f32 %v10267_v41, %v2421_v38  ;;  %v7057_v37 = vld [vmem:[%s10155_s11 + $0x38] sm:$0xff] }
 0x3e8   : > { %2538 = vmatpush.msra.mxu0 %v2455_v18  ;;  %2558 = vmatpush.msra.mxu1 %v2456_v27 }
 0x3e9   : > { %2699 = vmatpush.bf16.msra.mxu2 %v7057_v37 }
 0x3ec   : > { %v2433_v31 = vpop.permute.xlu1 %2432 }
 0x3ed   : > { %v2435_v45 = vsel %vm2434_vm15, %v2433_v31, %v2430_v10  ;;  %v2438_v25 = vsel %vm2434_vm15, %v2430_v10, %v2433_v31  ;;  %v8524_v10 = vld [vmem:[%s10145_s1] sm:$0xff] }
 0x3ee   : > { %v2441_v2 = vmul.f32 %v10276_v33, %v2438_v25  ;;  %v2442_v1 = vmul.f32 %v10275_v24, %v2435_v45  ;;  %v7065_v45 = vld [vmem:[%s10155_s11 + $0x78] sm:$0xff]  ;;  %v7056_v25 = vld [vmem:[%s10155_s11 + $0x30] sm:$0xff] }
 0x3ef   : > { %2712 = vmatpush.bf16.msra.mxu3 %v7065_v45  ;;  %2700 = vmatpush.bf16.msra.mxu2 %v7056_v25 }
 0x3f0   : > { %2539 = vmatpush.msra.mxu0 %v2441_v2  ;;  %2559 = vmatpush.msra.mxu1 %v2442_v1  ;;  %v7064_v2 = vld [vmem:[%s10155_s11 + $0x70] sm:$0xff]  ;;  %v7055_v1 = vld [vmem:[%s10155_s11 + $0x28] sm:$0xff] }
 0x3f2   : > { %2540 = vmatpush.msra.mxu0 %v2427_v49  ;;  %2560 = vmatpush.msra.mxu1 %v2428_v28  ;;  %v7063_v49 = vld [vmem:[%s10155_s11 + $0x68] sm:$0xff]  ;;  %v7054_v28 = vld [vmem:[%s10155_s11 + $0x20] sm:$0xff] }
 0x3f3   : > { %6245 = vmatmul.msk.f32.vlgmr.msra.gmra.mxu0 %vm1246_vm8, %v8524_v10  ;;  %6246 = vmatmul.msk.f32.vlgmr.msra.gmra.mxu1 %vm1246_vm8, %v8524_v10 }
 0x3f4   : > { %2713 = vmatpush.bf16.msra.mxu3 %v7064_v2  ;;  %2701 = vmatpush.bf16.msra.mxu2 %v7055_v1  ;;  %v7051_v1 = vld [vmem:[%s10155_s11 + $0x8] sm:$0xff] }
 0x3f8   : > { %2714 = vmatpush.bf16.msra.mxu3 %v7063_v49  ;;  %2702 = vmatpush.bf16.msra.mxu2 %v7054_v28  ;;  %v7059_v49 = vld [vmem:[%s10155_s11 + $0x48] sm:$0xff]  ;;  %v7050_v28 = vld [vmem:[%s10155_s11] sm:$0xff] }
 0x470   : > { %v2542_v51 = vpop.f32.mrf.mxu0  ;;  %v2562_v59 = vpop.f32.mrf.mxu1 }
 0x471   : > { %v2565_v20 = vmul.f32 %v2542_v51, %v8250_v16  ;;  %v2566_v9 = vmul.f32 %v2562_v59, %v8250_v16  ;;  %v7062_v51 = vld [vmem:[%s10155_s11 + $0x60] sm:$0xff]  ;;  %v7053_v59 = vld [vmem:[%s10155_s11 + $0x18] sm:$0xff] }
 0x472   : > { %2715 = vmatpush.bf16.msra.mxu3 %v7062_v51  ;;  %2703 = vmatpush.bf16.msra.mxu2 %v7053_v59 }
 0x473   : > { %v2567_v7 = vadd.f32 %v2565_v20, %v8252_v32  ;;  %v2568_v18 = vadd.f32 %v2566_v9, %v8252_v32  ;;  %v7061_v20 = vld [vmem:[%s10155_s11 + $0x58] sm:$0xff]  ;;  %v7052_v9 = vld [vmem:[%s10155_s11 + $0x10] sm:$0xff] }
 0x475   : > { %v2571_v27 = vmul.f32 0.2, %v2567_v7  ;;  %v2572_v8 = vmul.f32 0.2, %v2568_v18  ;;  %vm2569_vm9 = vcmp.gt.f32.partialorder %v2567_v7, 0.0  ;;  %vm2570_vm5 = vcmp.gt.f32.partialorder %v2568_v18, 0.0 }
 0x476   : > { %2716 = vmatpush.bf16.msra.mxu3 %v7061_v20  ;;  %2704 = vmatpush.bf16.msra.mxu2 %v7052_v9 }
 0x477   : > { %v2573_v5 = vsel %vm2569_vm9, %v2567_v7, %v2571_v27  ;;  %v2574_v31 = vsel %vm2570_vm5, %v2568_v18, %v2572_v8  ;;  %v7060_v7 = vld [vmem:[%s10155_s11 + $0x50] sm:$0xff]  ;;  %vm2801_vm5 = vcmask 449536   ;;  %vm2781_vm9 = vcmask 465920  }
 0x478   : > { %v7306_v38 = vpack.i.bf16 %v2574_v31, %v2573_v5 }
 0x47a   : > { %7307 = vrot.lane.b32.xlu1 %v7306_v38, %s10259_s23  ;;  %2717 = vmatpush.bf16.msra.mxu3 %v7060_v7 }
 0x47b   : > { %2705 = vmatpush.bf16.msra.mxu2 %v7051_v1 }
 0x47e   : > { %2718 = vmatpush.bf16.msra.mxu3 %v7059_v49 }
 0x47f   : > { %2706 = vmatpush.bf16.msra.mxu2 %v7050_v28 }
 0x4ec   : > { %v7308_v18 = vpop.permute.xlu1 %7307 }
 0x4ed   : > { %v7310_v27 = vunpack.i.h.bf16 %v7308_v18  ;;  %v7309_v8 = vunpack.i.l.bf16 %v7308_v18 }
 0x4ef   : > { %v2581_v38 = vsel %vm1062_vm3, %v7309_v8, %v7310_v27  ;;  %v2585_v37 = vsel %vm1062_vm3, %v7310_v27, %v7309_v8 }
 0x4f0   : > { %v2586_v45 = vmax.f32 %v2573_v5, %v2581_v38  ;;  %v2587_v25 = vmax.f32 %v2574_v31, %v2585_v37  ;;  %v7058_v5 = vld [vmem:[%s10155_s11 + $0x40] sm:$0xff] }
 0x4f1   : > { %2719 = vmatpush.bf16.msra.mxu3 %v7058_v5 }
 0x4f2   : > { %v7311_v2 = vpack.i.bf16 %v2587_v25, %v2586_v45 }
 0x4f4   : > { %7312 = vrot.lane.b32.xlu2 %v7311_v2, %s10249_s28  ;;  %s10263_s28 = smov 73  }
 0x54e   : > { %v7313_v31 = vpop.permute.xlu2 %7312 }
 0x54f   : > { %v7315_v51 = vunpack.i.h.bf16 %v7313_v31  ;;  %v7314_v59 = vunpack.i.l.bf16 %v7313_v31 }
 0x551   : > { %v2594_v20 = vsel %vm2501_vm11, %v7314_v59, %v7315_v51  ;;  %v2598_v9 = vsel %vm2501_vm11, %v7315_v51, %v7314_v59  ;;  %v540_v59 = vld [vmem:[%s10153_s9] sm:$0xff] }
 0x552   : > { %v2599_v7 = vmax.f32 %v2586_v45, %v2594_v20  ;;  %v2600_v18 = vmax.f32 %v2587_v25, %v2598_v9  ;;  %v8607_v25 = vld [vmem:[%s10153_s9 + $0x8] ss:$0 sm:$0xff]  ;;  %v8614_v9 = vperm.slane %v540_v59, 7 }
 0x554   : > { %v2601_v27 = vpack.c.bf16 %v2599_v7, %v2599_v7  ;;  %v2602_v8 = vpack.c.bf16 %v2600_v18, %v2600_v18  ;;  %v8616_v18 = vperm.slane %v540_v59, 6 }
 0x556   : > { %2707 = vmatmul.bf16.vlgmr.msra.gmra.mxu2 %v2601_v27  ;;  %2720 = vmatmul.bf16.vlgmr.msra.gmra.mxu3 %v2602_v8 }
 0x5d9   : > { %v2708_v38 = vpop.f32.mrf.mxu2  ;;  %v2721_v37 = vpop.f32.mrf.mxu3 }
 0x5da   : > { %v2722_v2 = vadd.f32 %v2721_v37, %v2708_v38 }
 0x5dc   : > { %2785 = vrot.lane.b32.xlu2 %v2722_v2, %s7461_s26  ;;  %2798 = vrot.lane.b32.xlu1 %v2722_v2, %s10273_s30 }
 0x5dd   : > { %2795 = vrot.lane.b32.xlu0 %v2722_v2, %s10274_s15 }
 0x5e1   : > { %v2710_v1 = vpop.f32.mrf.mxu2  ;;  %v2723_v49 = vpop.f32.mrf.mxu3 }
 0x5e4   : > { %2778 = vrot.lane.b32.xlu2 %v2722_v2, %s7464_s16  ;;  %2775 = vrot.lane.b32.xlu1 %v2722_v2, %s7465_s18 }
 0x5e5   : > { %2788 = vrot.lane.b32.xlu0 %v2722_v2, %s7466_s21 }
 0x5ec   : > { %2756 = vrot.lane.b32.xlu2 %v2722_v2, %s10253_s27  ;;  %2768 = vrot.lane.b32.xlu1 %v2722_v2, %s10255_s20  ;;  %s10280_s27 = smov 72   ;;  %s10279_s20 = smov 9  }
 0x5ed   : > { %2765 = vrot.lane.b32.xlu0 %v2722_v2, %s10259_s23  ;;  %s10372_s23 = smov 65  }
 0x5f4   : > { %2749 = vrot.lane.b32.xlu2 %v2722_v2, %s10257_s22  ;;  %2746 = vrot.lane.b32.xlu1 %v2722_v2, %s7470_s25  ;;  %s10375_s22 = smov 7  }
 0x5f5   : > { %2759 = vrot.lane.b32.xlu0 %v2722_v2, %s7449_s24 }
 0x5fc   : > { %2726 = vrot.lane.b32.xlu2 %v2722_v2, %s10263_s28  ;;  %2739 = vrot.lane.b32.xlu1 %v2722_v2, %s10261_s19  ;;  %s10373_s28 = smov 63   ;;  %s10374_s19 = smov 127  }
 0x5fd   : > { %2736 = vrot.lane.b32.xlu0 %v2722_v2, %s10280_s27 }
 0x605   : > { %2729 = vrot.lane.b32.xlu0 %v2722_v2, %s10279_s20 }
 0x636   : > { %v2786_v45 = vpop.permute.xlu2 %2785 }
 0x63e   : > { %v2779_v20 = vpop.permute.xlu2 %2778 }
 0x646   : > { %v2757_v49 = vpop.permute.xlu2 %2756 }
 0x64e   : > { %v2799_v28 = vpop.permute.xlu1 %2798 }
 0x64f   : > { %v2796_v5 = vpop.permute.xlu0 %2795 }
 0x650   : > { %v2802_v31 = vsel %vm2801_vm5, %v2796_v5, %v2799_v28  ;;  %v8622_v28 = vperm.slane %v540_v59, 5 }
 0x651   : > { %v2804_v51 = vmul.f32 %v8607_v25, %v2802_v31 }
 0x653   : > { %2812 = vmatpush.msrb.mxu0 %v2804_v51 }
 0x656   : > { %v2776_v7 = vpop.permute.xlu1 %2775 }
 0x657   : > { %v2789_v27 = vpop.permute.xlu0 %2788  ;;  %v2782_v8 = vsel %vm2781_vm9, %v2776_v7, %v2779_v20  ;;  %v2750_v7 = vpop.permute.xlu2 %2749 }
 0x658   : > { %v2792_v38 = vsel %vm2791_vm2, %v2786_v45, %v2789_v27  ;;  %v2784_v1 = vmul.f32 %v8616_v18, %v2782_v8  ;;  %v8626_v45 = vperm.slane %v540_v59, 3  ;;  %v8628_v27 = vperm.slane %v540_v59, 2 }
 0x659   : > { %v2794_v37 = vmul.f32 %v8614_v9, %v2792_v38 }
 0x65b   : > { %2813 = vmatpush.msrb.mxu0 %v2794_v37 }
 0x65d   : > { %2814 = vmatpush.msrb.mxu0 %v2784_v1 }
 0x65e   : > { %v2769_v5 = vpop.permute.xlu1 %2768 }
 0x65f   : > { %v2766_v31 = vpop.permute.xlu0 %2765 }
 0x660   : > { %v2772_v51 = vsel %vm2771_vm0, %v2766_v31, %v2769_v5 }
 0x661   : > { %v2774_v41 = vmul.f32 %v8622_v28, %v2772_v51 }
 0x663   : > { %2815 = vmatpush.msrb.mxu0 %v2774_v41  ;;  %v8634_v41 = vperm.slane %v540_v59, 1 }
 0x665   : > { %2816 = vmatpush.msrb.mxu0 %v2722_v2 }
 0x666   : > { %v2747_v20 = vpop.permute.xlu1 %2746 }
 0x667   : > { %v2760_v8 = vpop.permute.xlu0 %2759  ;;  %v2753_v38 = vsel %vm2752_vm1, %v2747_v20, %v2750_v7  ;;  %v8638_v20 = vperm.slane %v540_v59, 0 }
 0x668   : > { %v2762_v37 = vsel %vm1013_vm4, %v2757_v49, %v2760_v8  ;;  %v2755_v5 = vmul.f32 %v8628_v27, %v2753_v38  ;;  %v2727_v49 = vpop.permute.xlu2 %2726 }
 0x669   : > { %v2764_v1 = vmul.f32 %v8626_v45, %v2762_v37 }
 0x66b   : > { %2817 = vmatpush.msrb.mxu0 %v2764_v1 }
 0x66d   : > { %2818 = vmatpush.msrb.mxu0 %v2755_v5 }
 0x66e   : > { %v2740_v2 = vpop.permute.xlu1 %2739 }
 0x66f   : > { %v2737_v31 = vpop.permute.xlu0 %2736 }
 0x670   : > { %v2743_v51 = vsel %vm2742_vm7, %v2737_v31, %v2740_v2 }
 0x671   : > { %v2745_v13 = vmul.f32 %v8634_v41, %v2743_v51 }
 0x673   : > { %2819 = vmatpush.msrb.mxu0 %v2745_v13 }
 0x677   : > { %v2730_v7 = vpop.permute.xlu0 %2729 }
 0x678   : > { %v2733_v8 = vsel %vm2732_vm6, %v2727_v49, %v2730_v7 }
 0x679   : > { %v2735_v38 = vmul.f32 %v8638_v20, %v2733_v8 }
 0x67b   : > { %2820 = vmatpush.msrb.mxu0 %v2735_v38 }
 0x67c   : > { %6311 = vmatmul.msk.f32.vlgmr.msrb.gmra.mxu0 %vm1246_vm8, %v8524_v10 }
 0x6f9   : > { %v2822_v37 = vpop.f32.mrf.mxu0 }
 0x6fa   : > { %v2825_v1 = vmul.f32 %v2822_v37, %v8250_v16 }
 0x6fc   : > { %v2826_v5 = vadd.f32 %v2825_v1, %v8252_v32 }
 0x6fe   : > { %vm2827_vm13 = vcmp.gt.f32.partialorder %v2826_v5, 0.0  ;;  %v2828_v13 = vmul.f32 0.2, %v2826_v5 }
 0x700   : > { %v2829_v2 = vsel %vm2827_vm13, %v2826_v5, %v2828_v13 }
 0x701   : > { %2879 = vrot.lane.b32.xlu0 %v2829_v2, %s7461_s26  ;;  %2890 = vrot.lane.b32.xlu2 %v2829_v2, %s10273_s30  ;;  %s10376_s30 = smov 73  }
 0x702   : > { %2887 = vrot.lane.b32.xlu1 %v2829_v2, %s10274_s15  ;;  %s10377_s15 = smov 8  }
 0x709   : > { %2874 = vrot.lane.b32.xlu0 %v2829_v2, %s7464_s16  ;;  %2871 = vrot.lane.b32.xlu2 %v2829_v2, %s7465_s18 }
 0x70a   : > { %2882 = vrot.lane.b32.xlu1 %v2829_v2, %s7466_s21 }
 0x711   : > { %2855 = vrot.lane.b32.xlu0 %v2829_v2, %s10372_s23  ;;  %2866 = vrot.lane.b32.xlu2 %v2829_v2, %s10373_s28 }
 0x712   : > { %2863 = vrot.lane.b32.xlu1 %v2829_v2, %s10374_s19 }
 0x719   : > { %2850 = vrot.lane.b32.xlu0 %v2829_v2, %s10375_s22  ;;  %2847 = vrot.lane.b32.xlu2 %v2829_v2, %s7470_s25 }
 0x71a   : > { %2858 = vrot.lane.b32.xlu1 %v2829_v2, %s7449_s24 }
 0x721   : > { %2831 = vrot.lane.b32.xlu0 %v2829_v2, %s10376_s30  ;;  %2842 = vrot.lane.b32.xlu2 %v2829_v2, %s10377_s15 }
 0x722   : > { %2839 = vrot.lane.b32.xlu1 %v2829_v2, %s10280_s27  ;;  %s10379_s27 = smov 119  }
 0x72a   : > { %2834 = vrot.lane.b32.xlu1 %v2829_v2, %s10279_s20  ;;  %s10378_s20 = smov 55  }
 0x75b   : > { %v2891_v59 = vpop.permute.xlu2 %2890 }
 0x763   : > { %v2872_v7 = vpop.permute.xlu2 %2871 }
 0x76b   : > { %v2867_v24 = vpop.permute.xlu2 %2866 }
 0x773   : > { %v2880_v31 = vpop.permute.xlu0 %2879 }
 0x774   : > { %v2888_v51 = vpop.permute.xlu1 %2887 }
 0x775   : > { %v2893_v49 = vsel %vm2801_vm5, %v2888_v51, %v2891_v59 }
 0x776   : > { %v2894_v8 = vmul.f32 %v8607_v25, %v2893_v49  ;;  %v2848_v49 = vpop.permute.xlu2 %2847 }
 0x778   : > { %2902 = vmatpush.msrb.mxu1 %v2894_v8 }
 0x77b   : > { %v2875_v38 = vpop.permute.xlu0 %2874 }
 0x77c   : > { %v2883_v37 = vpop.permute.xlu1 %2882  ;;  %v2877_v1 = vsel %vm2781_vm9, %v2872_v7, %v2875_v38 }
 0x77d   : > { %v2885_v5 = vsel %vm2791_vm2, %v2880_v31, %v2883_v37  ;;  %v2878_v33 = vmul.f32 %v2877_v1, %v8616_v18 }
 0x77e   : > { %v2886_v13 = vmul.f32 %v2885_v5, %v8614_v9 }
 0x780   : > { %2903 = vmatpush.msrb.mxu1 %v2886_v13 }
 0x782   : > { %2904 = vmatpush.msrb.mxu1 %v2878_v33  ;;  %v2843_v33 = vpop.permute.xlu2 %2842 }
 0x783   : > { %v2856_v61 = vpop.permute.xlu0 %2855 }
 0x784   : > { %v2864_v56 = vpop.permute.xlu1 %2863 }
 0x785   : > { %v2869_v59 = vsel %vm2771_vm0, %v2864_v56, %v2867_v24 }
 0x786   : > { %v2870_v51 = vmul.f32 %v2869_v59, %v8622_v28 }
 0x788   : > { %2905 = vmatpush.msrb.mxu1 %v2870_v51 }
 0x78a   : > { %2906 = vmatpush.msrb.mxu1 %v2829_v2 }
 0x78b   : > { %v2851_v8 = vpop.permute.xlu0 %2850 }
 0x78c   : > { %v2859_v7 = vpop.permute.xlu1 %2858  ;;  %v2853_v31 = vsel %vm2752_vm1, %v2848_v49, %v2851_v8 }
 0x78d   : > { %v2861_v38 = vsel %vm1013_vm4, %v2856_v61, %v2859_v7  ;;  %v2854_v1 = vmul.f32 %v2853_v31, %v8628_v27 }
 0x78e   : > { %v2862_v37 = vmul.f32 %v2861_v38, %v8626_v45 }
 0x790   : > { %2907 = vmatpush.msrb.mxu1 %v2862_v37 }
 0x792   : > { %2908 = vmatpush.msrb.mxu1 %v2854_v1 }
 0x793   : > { %v2832_v2 = vpop.permute.xlu0 %2831 }
 0x794   : > { %v2840_v5 = vpop.permute.xlu1 %2839 }
 0x795   : > { %v2845_v56 = vsel %vm2742_vm7, %v2840_v5, %v2843_v33 }
 0x796   : > { %v2846_v24 = vmul.f32 %v2845_v56, %v8634_v41 }
 0x798   : > { %2909 = vmatpush.msrb.mxu1 %v2846_v24  ;;  %v6340_v24 = vld [vmem:[%s10156_s12 + $0x30] sm:$0xf] }
 0x79c   : > { %v2835_v13 = vpop.permute.xlu1 %2834 }
 0x79d   : > { %v2837_v59 = vsel %vm2732_vm6, %v2832_v2, %v2835_v13  ;;  %v7073_v2 = vld [vmem:[%s10156_s12 + $0x34] sm:$0xf0] }
 0x79e   : > { %v2838_v51 = vmul.f32 %v2837_v59, %v8638_v20 }
 0x7a0   : > { %2910 = vmatpush.msrb.mxu1 %v2838_v51  ;;  %v7475_v51 = vmov 2  }
 0x7a1   : > { %6312 = vmatmul.msk.f32.vlgmr.msrb.gmra.mxu1 %vm1246_vm8, %v8524_v10  ;;  %7316 = vset.pattern.permute.xlu0 %v7475_v51 }
 0x81e   : > { %v2912_v61 = vpop.f32.mrf.mxu1 }
 0x81f   : > { %v2915_v49 = vmul.f32 %v2912_v61, %v8250_v16  ;;  %v7476_v61 = vmov 3  }
 0x820   : > { %7317 = vset.pattern.permute.xlu1 %v7476_v61 }
 0x821   : > { %v2916_v8 = vadd.f32 %v2915_v49, %v8252_v32  ;;  %v6341_v49 = vor.u32 %v7073_v2, %v6340_v24 }
 0x823   : > { %vm2917_vm13 = vcmp.gt.f32.partialorder %v2916_v8, 0.0  ;;  %v2918_v7 = vmul.f32 0.2, %v2916_v8  ;;  %3068 = vmatpush.bf16.msrb.mxu3 %v6341_v49 }
 0x825   : > { %v8682_v31 = vsel %vm2917_vm13, %v2916_v8, %v2918_v7  ;;  %v6332_v8 = vld [vmem:[%s10156_s12 + $0x20] sm:$0xf] }
 0x826   : > { %2969 = vrot.lane.b32.xlu1 %v8682_v31, %s7461_s26  ;;  %2980 = vrot.lane.b32.xlu0 %v8682_v31, %s10378_s20  ;;  %s10380_s26 = smov 72  }
 0x827   : > { %2977 = vrot.lane.b32.xlu2 %v8682_v31, %s10379_s27 }
 0x82e   : > { %2964 = vrot.lane.b32.xlu1 %v8682_v31, %s7464_s16  ;;  %2961 = vrot.lane.b32.xlu0 %v8682_v31, %s7465_s18  ;;  %s10381_s16 = smov 9   ;;  %s10404_s18 = smov 97  }
 0x82f   : > { %2972 = vrot.lane.b32.xlu2 %v8682_v31, %s7466_s21  ;;  %s10405_s21 = smov 31  }
 0x836   : > { %2945 = vrot.lane.b32.xlu1 %v8682_v31, %s10372_s23  ;;  %2956 = vrot.lane.b32.xlu0 %v8682_v31, %s10373_s28  ;;  %s10384_s28 = smov 16  }
 0x837   : > { %2953 = vrot.lane.b32.xlu2 %v8682_v31, %s10374_s19 }
 0x83e   : > { %2940 = vrot.lane.b32.xlu1 %v8682_v31, %s10375_s22  ;;  %2937 = vrot.lane.b32.xlu0 %v8682_v31, %s7470_s25  ;;  %s10385_s22 = smov 17  }
 0x83f   : > { %2948 = vrot.lane.b32.xlu2 %v8682_v31, %s7449_s24 }
 0x846   : > { %2921 = vrot.lane.b32.xlu1 %v8682_v31, %s10376_s30  ;;  %2932 = vrot.lane.b32.xlu0 %v8682_v31, %s10377_s15  ;;  %s10388_s30 = smov 112   ;;  %s10389_s15 = smov 15  }
 0x847   : > { %2929 = vrot.lane.b32.xlu2 %v8682_v31, %s10380_s26  ;;  %s10386_s26 = smov 113  }
 0x84f   : > { %2924 = vrot.lane.b32.xlu2 %v8682_v31, %s10381_s16  ;;  %s10387_s16 = smov 111  }
 0x881   : > { %v2978_v16 = vpop.permute.xlu2 %2977 }
 0x889   : > { %v2973_v32 = vpop.permute.xlu2 %2972 }
 0x891   : > { %v2954_v37 = vpop.permute.xlu2 %2953 }
 0x898   : > { %v2970_v10 = vpop.permute.xlu1 %2969  ;;  %v2981_v38 = vpop.permute.xlu0 %2980 }
 0x899   : > { %v2975_v1 = vsel %vm2791_vm2, %v2970_v10, %v2973_v32  ;;  %v2983_v33 = vsel %vm2801_vm5, %v2978_v16, %v2981_v38  ;;  %v8739_v16 = vld [vmem:[%s10149_s5] sm:$0xff]  ;;  %v7071_v10 = vld [vmem:[%s10156_s12 + $0x24] sm:$0xf0] }
 0x89a   : > { %v2984_v5 = vmul.f32 %v8607_v25, %v2983_v33  ;;  %v2976_v56 = vmul.f32 %v2975_v1, %v8614_v9  ;;  %v7072_v25 = vld [vmem:[%s10156_s12 + $0x34] sm:$0xf]  ;;  %v6342_v9 = vld [vmem:[%s10156_s12 + $0x38] sm:$0xf0]  ;;  %3009 = vperm.xlu0 %7316, %v8739_v16   ;;  %3014 = vperm.xlu1 %7317, %v8739_v16   ;;  %v7070_v38 = vld [vmem:[%s10156_s12 + $0x24] sm:$0xf] }
 0x89b   : > { %v6345_v32 = vor.u32 %v7072_v25, %v6342_v9  ;;  %v6334_v1 = vld [vmem:[%s10156_s12 + $0x28] sm:$0xf0] }
 0x89c   : > { %2995 = vmatpush.msrb.mxu2 %v2984_v5  ;;  %v6333_v5 = vor.u32 %v7071_v10, %v6332_v8  ;;  %v6337_v24 = vor.u32 %v7070_v38, %v6334_v1 }
 0x89d   : > { %3081 = vmatpush.bf16.msra.mxu0 %v6345_v32 }
 0x89e   : > { %2996 = vmatpush.msrb.mxu2 %v2976_v56  ;;  %v2949_v56 = vpop.permute.xlu2 %2948  ;;  %3069 = vmatpush.bf16.msrb.mxu3 %v6333_v5  ;;  %v6326_v5 = vld [vmem:[%s10156_s12 + $0x18] sm:$0xf0] }
 0x8a0   : > { %v2965_v13 = vpop.permute.xlu1 %2964  ;;  %v2962_v59 = vpop.permute.xlu0 %2961 }
 0x8a1   : > { %v2967_v7 = vsel %vm2781_vm9, %v2962_v59, %v2965_v13  ;;  %3082 = vmatpush.bf16.msra.mxu0 %v6337_v24  ;;  %v7067_v24 = vld [vmem:[%s10156_s12 + $0x4] sm:$0xf0] }
 0x8a2   : > { %v2968_v33 = vmul.f32 %v2967_v7, %v8616_v18 }
 0x8a4   : > { %2997 = vmatpush.msrb.mxu2 %v2968_v33 }
 0x8a6   : > { %v2930_v25 = vpop.permute.xlu2 %2929 }
 0x8a8   : > { %v2946_v2 = vpop.permute.xlu1 %2945  ;;  %v2957_v13 = vpop.permute.xlu0 %2956 }
 0x8a9   : > { %v2959_v59 = vsel %vm2771_vm0, %v2954_v37, %v2957_v13  ;;  %v2951_v61 = vsel %vm1013_vm4, %v2946_v2, %v2949_v56  ;;  %v6316_v56 = vld [vmem:[%s10156_s12] sm:$0xf]  ;;  %v7066_v13 = vld [vmem:[%s10156_s12 + $0x4] sm:$0xf]  ;;  %vm3060_vm0 = vcmask 523264  }
 0x8aa   : > { %v2960_v51 = vmul.f32 %v2959_v59, %v8622_v28  ;;  %v2952_v18 = vmul.f32 %v2951_v61, %v8626_v45  ;;  %v6318_v59 = vld [vmem:[%s10156_s12 + $0x8] sm:$0xf0] }
 0x8ab   : > { %v6321_v61 = vor.u32 %v7066_v13, %v6318_v59 }
 0x8ac   : > { %2998 = vmatpush.msrb.mxu2 %v2960_v51  ;;  %v6317_v51 = vor.u32 %v7067_v24, %v6316_v56 }
 0x8ae   : > { %2999 = vmatpush.msrb.mxu2 %v8682_v31  ;;  %v2925_v32 = vpop.permute.xlu2 %2924  ;;  %v8767_v31 = vld [vmem:[%s10146_s2] sm:$0xff] }
 0x8b0   : > { %v2941_v49 = vpop.permute.xlu1 %2940  ;;  %v2938_v9 = vpop.permute.xlu0 %2937  ;;  %3000 = vmatpush.msrb.mxu2 %v2952_v18 }
 0x8b1   : > { %v2943_v8 = vsel %vm2752_vm1, %v2938_v9, %v2941_v49  ;;  %vm10390_vm1 = vcmask 121856  }
 0x8b2   : > { %v2944_v7 = vmul.f32 %v2943_v8, %v8628_v27  ;;  %v6324_v27 = vld [vmem:[%s10156_s12 + $0x10] sm:$0xf]  ;;  %vm10391_vm2 = vmmov %vm10390_vm1 }
 0x8b4   : > { %3001 = vmatpush.msrb.mxu2 %v2944_v7 }
 0x8b8   : > { %v2922_v37 = vpop.permute.xlu1 %2921  ;;  %v2933_v10 = vpop.permute.xlu0 %2932 }
 0x8b9   : > { %v2927_v28 = vsel %vm2732_vm6, %v2922_v37, %v2925_v32  ;;  %v2935_v38 = vsel %vm2742_vm7, %v2930_v25, %v2933_v10  ;;  %v514_v37 = vld [vmem:[%s10148_s4] sm:$0xff]  ;;  %vm10400_vm6 = vcmask 261120  }
 0x8ba   : > { %v2936_v1 = vmul.f32 %v2935_v38, %v8634_v41  ;;  %v2928_v45 = vmul.f32 %v2927_v28, %v8638_v20  ;;  %v7069_v41 = vld [vmem:[%s10156_s12 + $0x14] sm:$0xf0]  ;;  %v7068_v20 = vld [vmem:[%s10156_s12 + $0x14] sm:$0xf]  ;;  %v515_v38 = vld [vmem:[%s10148_s4 + $0x8] sm:$0xff] }
 0x8bb   : > { %v6325_v33 = vor.u32 %v7069_v41, %v6324_v27  ;;  %v6329_v2 = vor.u32 %v7068_v20, %v6326_v5  ;;  %v516_v27 = vld [vmem:[%s10148_s4 + $0x10] sm:$0xff]  ;;  %v517_v41 = vld [vmem:[%s10148_s4 + $0x18] sm:$0xff]  ;;  %v7477_v20 = vmov 4   ;;  %vm10412_vm9 = vmmov %vm10400_vm6 }
 0x8bc   : > { %3002 = vmatpush.msrb.mxu2 %v2936_v1  ;;  %7318 = vset.pattern.permute.xlu0 %v7477_v20 }
 0x8bd   : > { %3070 = vmatpush.bf16.msrb.mxu3 %v6325_v33  ;;  %3083 = vmatpush.bf16.msra.mxu0 %v6329_v2 }
 0x8be   : > { %3003 = vmatpush.msrb.mxu2 %v2928_v45 }
 0x8bf   : > { %6313 = vmatmul.msk.f32.vlgmr.msrb.gmra.mxu2 %vm1246_vm8, %v8767_v31 }
 0x8c1   : > { %3071 = vmatpush.bf16.msrb.mxu3 %v6317_v51  ;;  %3084 = vmatpush.bf16.msra.mxu0 %v6321_v61 }
 0x90c   : > { %v8795_v25 = vpop.permute.xlu0 %3009  ;;  %v8797_v49 = vpop.permute.xlu1 %3014 }
 0x90d   : > { %10382 = vst [vmem:[#allocation54_spill] sm:$0xff] %v8795_v25 }
 0x90e   : > { %10383 = vst [vmem:[#allocation55_spill] sm:$0xff] %v8797_v49 }
 0x942   : > { %v3005_v18 = vpop.f32.mrf.mxu2 }
 0x943   : > { %v3012_v9 = vmul.f32 %v8795_v25, %v3005_v18 }
 0x945   : > { %v3017_v8 = vadd.f32 %v8797_v49, %v3012_v9 }
 0x947   : > { %v3018_v7 = vmax.f32 %v3017_v8, 0.0 }
 0x949   : > { %v3019_v32 = vpack.c.bf16 %v3018_v7, %v3018_v7 }
 0x94b   : > { %6346 = vmatmul.msk.bf16.vlgmr.msrb.gmra.mxu3 %vm3060_vm0, %v3019_v32  ;;  %6347 = vmatmul.msk.bf16.vlgmr.msra.gmra.mxu0 %vm3060_vm0, %v3019_v32  ;;  %vm10414_vm0 = vmmov %vm10400_vm6 }
 0x9c8   : > { %v3086_v10 = vpop.f32.mrf.mxu0 }
 0x9c9   : > { %3146 = vmatpush.msra.mxu2 %v3086_v10 }
 0x9ca   : > { %6352 = vmatmul.msk.f32.vlgmr.msra.gmra.mxu2 %vm2742_vm7, %v514_v37 }
 0x9ce   : > { %v3073_v28 = vpop.f32.mrf.mxu3 }
 0x9cf   : > { %3117 = vmatpush.msra.mxu1 %v3073_v28 }
 0x9d0   : > { %v3088_v1 = vpop.f32.mrf.mxu0  ;;  %6348 = vmatmul.msk.f32.vlgmr.msra.gmra.mxu1 %vm2742_vm7, %v514_v37 }
 0x9d2   : > { %6353 = vmatmul.msk.f32.gmra.mxu2 %vm2742_vm7, %v515_v38 }
 0x9d6   : > { %v3075_v45 = vpop.f32.mrf.mxu3 }
 0x9d8   : > { %6349 = vmatmul.msk.f32.gmra.mxu1 %vm2742_vm7, %v515_v38 }
 0x9da   : > { %6354 = vmatmul.msk.f32.gmra.mxu2 %vm2742_vm7, %v516_v27 }
 0x9e0   : > { %6350 = vmatmul.msk.f32.gmra.mxu1 %vm2742_vm7, %v516_v27 }
 0x9e2   : > { %6355 = vmatmul.msk.f32.gmra.mxu2 %vm2742_vm7, %v517_v41 }
 0x9e8   : > { %6351 = vmatmul.msk.f32.gmra.mxu1 %vm2742_vm7, %v517_v41 }
 0xa4d   : > { %v3119_v33 = vpop.f32.mrf.mxu1  ;;  %v3148_v5 = vpop.f32.mrf.mxu2 }
 0xa55   : > { %v3122_v56 = vpop.f32.mrf.mxu1  ;;  %v3151_v24 = vpop.f32.mrf.mxu2 }
 0xa56   : > { %3161 = vrot.lane.b32.xlu2 %v3151_v24, %s7449_s24  ;;  %3165 = vrot.lane.b32.xlu1 %v3122_v56, %s7449_s24 }
 0xa5d   : > { %v3125_v2 = vpop.f32.mrf.mxu1  ;;  %v3154_v13 = vpop.f32.mrf.mxu2 }
 0xa5e   : > { %3174 = vrot.lane.b32.xlu2 %v3154_v13, %s10384_s28  ;;  %3178 = vrot.lane.b32.xlu0 %v3125_v2, %s10384_s28 }
 0xa65   : > { %v3157_v59 = vpop.f32.mrf.mxu2  ;;  %v3128_v51 = vpop.f32.mrf.mxu1 }
 0xa66   : > { %3187 = vrot.lane.b32.xlu1 %v3157_v59, %s10385_s22  ;;  %3200 = vperm.xlu0 %7318, %v8739_v16  }
 0xa67   : > { %3191 = vrot.lane.b32.xlu2 %v3128_v51, %s10385_s22 }
 0xa6e   : > { %7320 = vset.pattern.permute.xlu0 %v10356_v17 }
 0xab0   : > { %v3162_v61 = vpop.permute.xlu2 %3161 }
 0xab8   : > { %v3175_v18 = vpop.permute.xlu2 %3174 }
 0xac1   : > { %v3192_v1 = vpop.permute.xlu2 %3191 }
 0xac8   : > { %v3166_v9 = vpop.permute.xlu1 %3165 }
 0xac9   : > { %v3167_v7 = vsel %vm1013_vm4, %v3166_v9, %v3162_v61  ;;  %v3170_v32 = vsel %vm1013_vm4, %v3162_v61, %v3166_v9 }
 0xaca   : > { %v3171_v28 = vadd.f32 %v3170_v32, %v3119_v33  ;;  %v3172_v38 = vadd.f32 %v3167_v7, %v3148_v5 }
 0xad0   : > { %v3179_v8 = vpop.permute.xlu0 %3178 }
 0xad1   : > { %v3180_v37 = vsel %vm2434_vm15, %v3179_v8, %v3175_v18  ;;  %v3183_v10 = vsel %vm2434_vm15, %v3175_v18, %v3179_v8 }
 0xad2   : > { %v3184_v16 = vadd.f32 %v3183_v10, %v3171_v28  ;;  %v3185_v45 = vadd.f32 %v3180_v37, %v3172_v38 }
 0xad8   : > { %v3188_v27 = vpop.permute.xlu1 %3187  ;;  %v8835_v20 = vpop.permute.xlu0 %3200 }
 0xad9   : > { %v3193_v17 = vsel %vm2420_vm14, %v3192_v1, %v3188_v27  ;;  %v3196_v41 = vsel %vm2420_vm14, %v3188_v27, %v3192_v1  ;;  %v7190_v27 = vld [vmem:[#allocation4 + $0x39c] sm:$0xf0] }
 0xada   : > { %v3197_v56 = vadd.f32 %v3196_v41, %v3184_v16  ;;  %v3198_v24 = vadd.f32 %v3193_v17, %v3185_v45  ;;  %v7198_v16 = vld [vmem:[#allocation4 + $0x3dc] sm:$0xf0] }
 0xadb   : > { %v6808_v45 = vld [vmem:[#allocation4 + $0x380] sm:$0xf] }
 0xadc   : > { %v8838_v2 = vadd.f32 %v8835_v20, %v3197_v56  ;;  %v8841_v13 = vadd.f32 %v8835_v20, %v3198_v24 }
 0xade   : > { %3262 = vrot.lane.b32.xlu0 %v8838_v2, %s10386_s26  ;;  %3284 = vrot.lane.b32.xlu1 %v8838_v2, %s10387_s16 }
 0xadf   : > { %3286 = vrot.lane.b32.xlu2 %v8841_v13, %s10387_s16  ;;  %s10399_s16 = smov 33  }
 0xae6   : > { %3273 = vrot.lane.b32.xlu1 %v8838_v2, %s10388_s30  ;;  %3253 = vrot.lane.b32.xlu0 %v8841_v13, %s10374_s19 }
 0xae7   : > { %3275 = vrot.lane.b32.xlu2 %v8841_v13, %s10388_s30  ;;  %s10402_s30 = smov 96  }
 0xaee   : > { %3229 = vrot.lane.b32.xlu0 %v8841_v13, %s10389_s15  ;;  %3264 = vrot.lane.b32.xlu1 %v8841_v13, %s10386_s26  ;;  %s10398_s26 = smov 32  }
 0xaef   : > { %3251 = vrot.lane.b32.xlu2 %v8838_v2, %s10374_s19 }
 0xaf6   : > { %3221 = vrot.lane.b32.xlu0 %v8838_v2, %s10384_s28  ;;  %3240 = vrot.lane.b32.xlu1 %v8841_v13, %s7449_s24 }
 0xaf7   : > { %3243 = vrot.lane.b32.xlu2 %v8838_v2, %s7449_s24 }
 0xafe   : > { %3232 = vrot.lane.b32.xlu1 %v8838_v2, %s10389_s15  ;;  %s10403_s15 = smov 95  }
 0xaff   : > { %3218 = vrot.lane.b32.xlu2 %v8841_v13, %s10384_s28 }
 0xb06   : > { %3206 = vrot.lane.b32.xlu1 %v8841_v13, %s10385_s22 }
 0xb07   : > { %3210 = vrot.lane.b32.xlu2 %v8838_v2, %s10385_s22 }
 0xb39   : > { %v3287_v33 = vpop.permute.xlu2 %3286 }
 0xb41   : > { %v3276_v5 = vpop.permute.xlu2 %3275 }
 0xb49   : > { %v3252_v28 = vpop.permute.xlu2 %3251 }
 0xb50   : > { %v3263_v59 = vpop.permute.xlu0 %3262  ;;  %v3285_v51 = vpop.permute.xlu1 %3284 }
 0xb51   : > { %v3288_v61 = vsel %vm2515_vm10, %v3285_v51, %v3287_v33  ;;  %v3292_v18 = vsel %vm2515_vm10, %v3287_v33, %v3285_v51  ;;  %v6809_v33 = vor.u32 %v7190_v27, %v6808_v45  ;;  %v6584_v51 = vld [vmem:[#allocation4 + $0x1c0] sm:$0xf]  ;;  %vm10406_vm10 = vmmov %vm10400_vm6 }
 0xb52   : > { %v3293_v9 = vmul.f32 %v8447_v40, %v3288_v61  ;;  %v3294_v8 = vmul.f32 %v8452_v21, %v3292_v18  ;;  %v6840_v40 = vld [vmem:[#allocation4 + $0x3c0] sm:$0xf] }
 0xb53   : > { %v6841_v21 = vor.u32 %v7198_v16, %v6840_v40  ;;  %v7134_v61 = vld [vmem:[#allocation4 + $0x1dc] sm:$0xf0] }
 0xb54   : > { %3302 = vmatpush.msra.mxu3 %v3293_v9  ;;  %3322 = vmatpush.msrb.mxu0 %v3294_v8  ;;  %v6585_v9 = vor.u32 %v7134_v61, %v6584_v51  ;;  %v6776_v8 = vld [vmem:[#allocation4 + $0x340] sm:$0xf] }
 0xb55   : > { %3996 = vmatpush.bf16.msrb.mxu2 %v6841_v21  ;;  %v6520_v27 = vld [vmem:[#allocation4 + $0x140] sm:$0xf] }
 0xb56   : > { %3983 = vmatpush.bf16.msrb.mxu1 %v6585_v9  ;;  %v7158_v51 = vld [vmem:[#allocation4 + $0x29c] sm:$0xf0] }
 0xb58   : > { %v3274_v7 = vpop.permute.xlu1 %3273  ;;  %v3254_v10 = vpop.permute.xlu0 %3253 }
 0xb59   : > { %v3277_v32 = vsel %vm2501_vm11, %v3274_v7, %v3276_v5  ;;  %v3281_v37 = vsel %vm2501_vm11, %v3276_v5, %v3274_v7  ;;  %v3255_v17 = vsel %vm1062_vm3, %v3252_v28, %v3254_v10  ;;  %v3259_v56 = vsel %vm1062_vm3, %v3254_v10, %v3252_v28  ;;  %v7182_v7 = vld [vmem:[#allocation4 + $0x35c] sm:$0xf0]  ;;  %3997 = vmatpush.bf16.msrb.mxu2 %v6809_v33  ;;  %vm10407_vm11 = vmmov %vm10400_vm6 }
 0xb5a   : > { %v3282_v38 = vmul.f32 %v3277_v32, %v2507_v63  ;;  %v3283_v1 = vmul.f32 %v3281_v37, %v2508_v6  ;;  %v3244_v32 = vpop.permute.xlu2 %3243  ;;  %v3260_v37 = vmul.f32 %v3255_v17, %v2479_v22  ;;  %v7126_v10 = vld [vmem:[#allocation4 + $0x19c] sm:$0xf0] }
 0xb5b   : > { %v7118_v17 = vld [vmem:[#allocation4 + $0x15c] sm:$0xf0] }
 0xb5c   : > { %3303 = vmatpush.msra.mxu3 %v3282_v38  ;;  %3323 = vmatpush.msrb.mxu0 %v3283_v1  ;;  %v6744_v38 = vld [vmem:[#allocation4 + $0x300] sm:$0xf] }
 0xb5d   : > { %v7174_v1 = vld [vmem:[#allocation4 + $0x31c] sm:$0xf0] }
 0xb5e   : > { %v6488_v33 = vld [vmem:[#allocation4 + $0x100] sm:$0xf] }
 0xb60   : > { %v3265_v41 = vpop.permute.xlu1 %3264  ;;  %v3230_v18 = vpop.permute.xlu0 %3229 }
 0xb61   : > { %v3266_v24 = vsel %vm2487_vm12, %v3263_v59, %v3265_v41  ;;  %v3270_v63 = vsel %vm2487_vm12, %v3265_v41, %v3263_v59  ;;  %v3261_v59 = vmul.f32 %v3259_v56, %v2480_v0  ;;  %v6745_v0 = vor.u32 %v7174_v1, %v6744_v38  ;;  %v6712_v56 = vld [vmem:[#allocation4 + $0x2c0] sm:$0xf] }
 0xb62   : > { %v3271_v6 = vmul.f32 %v3266_v24, %v2493_v4  ;;  %v3272_v5 = vmul.f32 %v3270_v63, %v2494_v15  ;;  %v6777_v4 = vor.u32 %v7182_v7, %v6776_v8  ;;  %v6552_v15 = vld [vmem:[#allocation4 + $0x180] sm:$0xf]  ;;  %v6521_v41 = vor.u32 %v7118_v17, %v6520_v27  ;;  %v3219_v63 = vpop.permute.xlu2 %3218 }
 0xb63   : > { %v6553_v28 = vor.u32 %v7126_v10, %v6552_v15  ;;  %v6456_v10 = vld [vmem:[#allocation4 + $0xc0] sm:$0xf] }
 0xb64   : > { %3304 = vmatpush.msra.mxu3 %v3271_v6  ;;  %3324 = vmatpush.msrb.mxu0 %v3272_v5  ;;  %v7110_v6 = vld [vmem:[#allocation4 + $0x11c] sm:$0xf0] }
 0xb65   : > { %3998 = vmatpush.bf16.msrb.mxu2 %v6777_v4  ;;  %3984 = vmatpush.bf16.msrb.mxu1 %v6553_v28  ;;  %v6489_v5 = vor.u32 %v7110_v6, %v6488_v33  ;;  %v10393_v4 = vperm.slane %v8457_v36, 2  ;;  %v7102_v28 = vld [vmem:[#allocation4 + $0xdc] sm:$0xf0] }
 0xb66   : > { %3305 = vmatpush.msra.mxu3 %v3260_v37  ;;  %3325 = vmatpush.msrb.mxu0 %v3261_v59  ;;  %v10392_v37 = vperm.slane %v8442_v46, 2  ;;  %v6457_v38 = vor.u32 %v7102_v28, %v6456_v10  ;;  %v6648_v1 = vld [vmem:[#allocation4 + $0x240] sm:$0xf]  ;;  %v6554_v10 = vld [vmem:[#allocation4 + $0x1a0] sm:$0xf0] }
 0xb67   : > { %v6424_v27 = vld [vmem:[#allocation4 + $0x80] sm:$0xf] }
 0xb68   : > { %v3241_v40 = vpop.permute.xlu1 %3240  ;;  %3306 = vmatpush.msra.mxu3 %v8838_v2  ;;  %3326 = vmatpush.msrb.mxu0 %v8841_v13  ;;  %v7166_v2 = vld [vmem:[#allocation4 + $0x2dc] sm:$0xf0]  ;;  %v3222_v13 = vpop.permute.xlu0 %3221 }
 0xb69   : > { %v3245_v22 = vsel %vm1013_vm4, %v3244_v32, %v3241_v40  ;;  %v3248_v16 = vsel %vm1013_vm4, %v3241_v40, %v3244_v32  ;;  %3999 = vmatpush.bf16.msrb.mxu2 %v6745_v0  ;;  %v6713_v24 = vor.u32 %v7166_v2, %v6712_v56  ;;  %3985 = vmatpush.bf16.msrb.mxu1 %v6521_v41  ;;  %v7150_v40 = vld [vmem:[#allocation4 + $0x25c] sm:$0xf0]  ;;  %v6842_v41 = vld [vmem:[#allocation4 + $0x3e0] sm:$0xf0] }
 0xb6a   : > { %v3249_v21 = vmul.f32 %v3248_v16, %v2466_v50  ;;  %v3250_v45 = vmul.f32 %v3245_v22, %v2467_v14  ;;  %v6680_v50 = vld [vmem:[#allocation4 + $0x280] sm:$0xf]  ;;  %v3223_v14 = vsel %vm2434_vm15, %v3222_v13, %v3219_v63  ;;  %v3226_v9 = vsel %vm2434_vm15, %v3219_v63, %v3222_v13  ;;  %v7130_v56 = vld [vmem:[#allocation4 + $0x1c4] sm:$0xf]  ;;  %vm10410_vm15 = vmmov %vm10400_vm6 }
 0xb6b   : > { %v6681_v32 = vor.u32 %v7158_v51, %v6680_v50  ;;  %v10394_v22 = vperm.slane %v8442_v46, 1  ;;  %v7094_v17 = vld [vmem:[#allocation4 + $0x9c] sm:$0xf0]  ;;  %v6586_v2 = vld [vmem:[#allocation4 + $0x1e0] sm:$0xf0] }
 0xb6c   : > { %3307 = vmatpush.msra.mxu3 %v3249_v21  ;;  %3327 = vmatpush.msrb.mxu0 %v3250_v45  ;;  %v6649_v21 = vor.u32 %v7150_v40, %v6648_v1  ;;  %v7194_v45 = vld [vmem:[#allocation4 + $0x3c4] sm:$0xf]  ;;  %v6425_v13 = vor.u32 %v7094_v17, %v6424_v27  ;;  %v6616_v33 = vld [vmem:[#allocation4 + $0x200] sm:$0xf] }
 0xb6d   : > { %4000 = vmatpush.bf16.msrb.mxu2 %v6713_v24  ;;  %3986 = vmatpush.bf16.msrb.mxu1 %v6489_v5  ;;  %v3227_v16 = vmul.f32 %v3226_v9, %v10394_v22  ;;  %v3211_v24 = vpop.permute.xlu2 %3210  ;;  %v7142_v6 = vld [vmem:[#allocation4 + $0x21c] sm:$0xf0]  ;;  %v7186_v51 = vld [vmem:[#allocation4 + $0x384] sm:$0xf] }
 0xb6e   : > { %v6617_v28 = vor.u32 %v7142_v6, %v6616_v33  ;;  %v7086_v1 = vld [vmem:[#allocation4 + $0x5c] sm:$0xf0]  ;;  %v6522_v27 = vld [vmem:[#allocation4 + $0x160] sm:$0xf0]  ;;  %v6784_v33 = vld [vmem:[#allocation4 + $0x348] sm:$0xf] }
 0xb6f   : > { %v6360_v17 = vld [vmem:[#allocation4] sm:$0xf] }
 0xb70   : > { %v3233_v61 = vpop.permute.xlu1 %3232 }
 0xb71   : > { %v3234_v8 = vsel %vm10390_vm1, %v3233_v61, %v3230_v18  ;;  %v3237_v7 = vsel %vm10391_vm2, %v3230_v18, %v3233_v61  ;;  %v10395_v18 = vperm.slane %v8457_v36, 1  ;;  %4001 = vmatpush.bf16.msrb.mxu2 %v6681_v32  ;;  %3987 = vmatpush.bf16.msrb.mxu1 %v6457_v38  ;;  %v10396_v61 = vperm.slane %v8442_v46, 0  ;;  %v6392_v38 = vld [vmem:[#allocation4 + $0x40] sm:$0xf]  ;;  %v6816_v46 = vld [vmem:[#allocation4 + $0x388] sm:$0xf]  ;;  %vm10417_vm2 = vmmov %vm10414_vm0 }
 0xb72   : > { %v3238_v59 = vmul.f32 %v3237_v7, %v10392_v37  ;;  %v3239_v15 = vmul.f32 %v3234_v8, %v10393_v4  ;;  %v10397_v8 = vperm.slane %v8457_v36, 0  ;;  %v6845_v32 = vor.u32 %v7194_v45, %v6842_v41  ;;  %v6848_v4 = vld [vmem:[#allocation4 + $0x3c8] sm:$0xf]  ;;  %v7114_v45 = vld [vmem:[#allocation4 + $0x144] sm:$0xf] }
 0xb73   : > { %v3228_v0 = vmul.f32 %v3223_v14, %v10395_v18  ;;  %v6810_v14 = vld [vmem:[#allocation4 + $0x3a0] sm:$0xf0]  ;;  %v6589_v37 = vor.u32 %v7130_v56, %v6586_v2  ;;  %v6393_v22 = vor.u32 %v7086_v1, %v6392_v38  ;;  %v7191_v36 = vld [vmem:[#allocation4 + $0x3a4] sm:$0xf0]  ;;  %v7078_v41 = vld [vmem:[#allocation4 + $0x1c] sm:$0xf0] }
 0xb74   : > { %3308 = vmatpush.msra.mxu3 %v3238_v59  ;;  %3328 = vmatpush.msrb.mxu0 %v3239_v15  ;;  %v7122_v59 = vld [vmem:[#allocation4 + $0x184] sm:$0xf]  ;;  %v7199_v15 = vld [vmem:[#allocation4 + $0x3e4] sm:$0xf0]  ;;  %v6817_v56 = vor.u32 %v7191_v36, %v6816_v46  ;;  %v6361_v2 = vor.u32 %v7078_v41, %v6360_v17 }
 0xb75   : > { %4002 = vmatpush.bf16.msrb.mxu2 %v6649_v21  ;;  %3988 = vmatpush.bf16.msrb.mxu1 %v6425_v13  ;;  %v6849_v40 = vor.u32 %v7199_v15, %v6848_v4  ;;  %v7178_v18 = vld [vmem:[#allocation4 + $0x344] sm:$0xf]  ;;  %v6557_v21 = vor.u32 %v7122_v59, %v6554_v10  ;;  %v6592_v13 = vld [vmem:[#allocation4 + $0x1c8] sm:$0xf] }
 0xb76   : > { %3309 = vmatpush.msra.mxu3 %v3227_v16  ;;  %3329 = vmatpush.msrb.mxu0 %v3228_v0  ;;  %v6813_v16 = vor.u32 %v7186_v51, %v6810_v14  ;;  %v6778_v0 = vld [vmem:[#allocation4 + $0x360] sm:$0xf0]  ;;  %v7183_v14 = vld [vmem:[#allocation4 + $0x364] sm:$0xf0] }
 0xb77   : > { %v6781_v6 = vor.u32 %v7178_v18, %v6778_v0  ;;  %v7106_v51 = vld [vmem:[#allocation4 + $0x104] sm:$0xf]  ;;  %v7175_v59 = vld [vmem:[#allocation4 + $0x324] sm:$0xf0] }
 0xb78   : > { %v3207_v63 = vpop.permute.xlu1 %3206  ;;  %v7162_v15 = vld [vmem:[#allocation4 + $0x2c4] sm:$0xf]  ;;  %v7167_v18 = vld [vmem:[#allocation4 + $0x2e4] sm:$0xf0] }
 0xb79   : > { %v3212_v5 = vsel %vm2420_vm14, %v3211_v24, %v3207_v63  ;;  %v3215_v50 = vsel %vm2420_vm14, %v3207_v63, %v3211_v24  ;;  %4003 = vmatpush.bf16.msrb.mxu2 %v6617_v28  ;;  %3989 = vmatpush.bf16.msrb.mxu1 %v6393_v22  ;;  %v7135_v24 = vld [vmem:[#allocation4 + $0x1e4] sm:$0xf0]  ;;  %v6714_v10 = vld [vmem:[#allocation4 + $0x2e0] sm:$0xf0] }
 0xb7a   : > { %v3216_v9 = vmul.f32 %v3215_v50, %v10396_v61  ;;  %v3217_v7 = vmul.f32 %v3212_v5, %v10397_v8  ;;  %v6593_v63 = vor.u32 %v7135_v24, %v6592_v13  ;;  %v6746_v5 = vld [vmem:[#allocation4 + $0x320] sm:$0xf0]  ;;  %v6525_v50 = vor.u32 %v7114_v45, %v6522_v27  ;;  %v7127_v8 = vld [vmem:[#allocation4 + $0x1a4] sm:$0xf0] }
 0xb7b   : > { %v6490_v61 = vld [vmem:[#allocation4 + $0x120] sm:$0xf0]  ;;  %v7119_v22 = vld [vmem:[#allocation4 + $0x164] sm:$0xf0]  ;;  %v6717_v0 = vor.u32 %v7162_v15, %v6714_v10 }
 0xb7c   : > { %3310 = vmatpush.msra.mxu3 %v3216_v9  ;;  %3330 = vmatpush.msrb.mxu0 %v3217_v7  ;;  %v6560_v9 = vld [vmem:[#allocation4 + $0x188] sm:$0xf]  ;;  %v6785_v7 = vor.u32 %v7183_v14, %v6784_v33  ;;  %v6493_v28 = vor.u32 %v7106_v51, %v6490_v61  ;;  %v7098_v38 = vld [vmem:[#allocation4 + $0xc4] sm:$0xf] }
 0xb7d   : > { %6356 = vmatmul.msk.f32.vlgmr.msra.gmra.mxu3 %vm1246_vm8, %v8767_v31  ;;  %6357 = vmatmul.msk.f32.vlgmr.msrb.gmra.mxu0 %vm1246_vm8, %v8767_v31  ;;  %v7170_v31 = vld [vmem:[#allocation4 + $0x304] sm:$0xf] }
 0xb7e   : > { %4022 = vmatpush.bf16.msra.mxu0 %v6845_v32  ;;  %4009 = vmatpush.bf16.msrb.mxu3 %v6589_v37  ;;  %v6561_v32 = vor.u32 %v7127_v8, %v6560_v9  ;;  %v6752_v37 = vld [vmem:[#allocation4 + $0x308] sm:$0xf]  ;;  %v6749_v4 = vor.u32 %v7170_v31, %v6746_v5  ;;  %v6458_v1 = vld [vmem:[#allocation4 + $0xe0] sm:$0xf0]  ;;  %v7195_v8 = vld [vmem:[#allocation4 + $0x3cc] sm:$0xf] }
 0xb7f   : > { %4048 = vmatpush.bf16.msra.mxu2 %v6849_v40  ;;  %3990 = vmatpush.bf16.msrb.mxu1 %v6361_v2  ;;  %v6528_v40 = vld [vmem:[#allocation4 + $0x148] sm:$0xf]  ;;  %v6753_v46 = vor.u32 %v7175_v59, %v6752_v37  ;;  %v6682_v45 = vld [vmem:[#allocation4 + $0x2a0] sm:$0xf0]  ;;  %v6461_v27 = vor.u32 %v7098_v38, %v6458_v1  ;;  %v6850_v37 = vld [vmem:[#allocation4 + $0x3e8] sm:$0xf0] }
 0xb80   : > { %v6529_v36 = vor.u32 %v7119_v22, %v6528_v40  ;;  %v7090_v17 = vld [vmem:[#allocation4 + $0x84] sm:$0xf]  ;;  %v7111_v2 = vld [vmem:[#allocation4 + $0x124] sm:$0xf0]  ;;  %v7131_v59 = vld [vmem:[#allocation4 + $0x1cc] sm:$0xf] }
 0xb81   : > { %v6426_v41 = vld [vmem:[#allocation4 + $0xa0] sm:$0xf0]  ;;  %v7187_v38 = vld [vmem:[#allocation4 + $0x38c] sm:$0xf] }
 0xb82   : > { %4023 = vmatpush.bf16.msra.mxu0 %v6813_v16  ;;  %4010 = vmatpush.bf16.msrb.mxu3 %v6557_v21  ;;  %v6720_v16 = vld [vmem:[#allocation4 + $0x2c8] sm:$0xf]  ;;  %v7154_v21 = vld [vmem:[#allocation4 + $0x284] sm:$0xf]  ;;  %v6429_v33 = vor.u32 %v7090_v17, %v6426_v41  ;;  %v6818_v40 = vld [vmem:[#allocation4 + $0x3a8] sm:$0xf0] }
 0xb83   : > { %4049 = vmatpush.bf16.msra.mxu2 %v6817_v56  ;;  %4035 = vmatpush.bf16.msra.mxu1 %v6593_v63  ;;  %v6496_v56 = vld [vmem:[#allocation4 + $0x108] sm:$0xf]  ;;  %v6721_v13 = vor.u32 %v7167_v18, %v6720_v16  ;;  %v6685_v31 = vor.u32 %v7154_v21, %v6682_v45  ;;  %v7146_v63 = vld [vmem:[#allocation4 + $0x244] sm:$0xf]  ;;  %v7123_v22 = vld [vmem:[#allocation4 + $0x18c] sm:$0xf] }
 0xb84   : > { %v6497_v24 = vor.u32 %v7111_v2, %v6496_v56  ;;  %v7082_v5 = vld [vmem:[#allocation4 + $0x44] sm:$0xf]  ;;  %v7179_v16 = vld [vmem:[#allocation4 + $0x34c] sm:$0xf] }
 0xb85   : > { %v7138_v14 = vld [vmem:[#allocation4 + $0x204] sm:$0xf]  ;;  %v7115_v21 = vld [vmem:[#allocation4 + $0x14c] sm:$0xf] }
 0xb86   : > { %4024 = vmatpush.bf16.msra.mxu0 %v6781_v6  ;;  %4011 = vmatpush.bf16.msrb.mxu3 %v6525_v50  ;;  %v6650_v6 = vld [vmem:[#allocation4 + $0x260] sm:$0xf0]  ;;  %v6530_v45 = vld [vmem:[#allocation4 + $0x168] sm:$0xf0] }
 0xb87   : > { %4050 = vmatpush.bf16.msra.mxu2 %v6785_v7  ;;  %4036 = vmatpush.bf16.msra.mxu1 %v6561_v32  ;;  %v6394_v50 = vld [vmem:[#allocation4 + $0x60] sm:$0xf0]  ;;  %v6653_v51 = vor.u32 %v7146_v63, %v6650_v6  ;;  %v7171_v17 = vld [vmem:[#allocation4 + $0x30c] sm:$0xf]  ;;  %v6533_v41 = vor.u32 %v7115_v21, %v6530_v45  ;;  %v6624_v21 = vld [vmem:[#allocation4 + $0x208] sm:$0xf] }
 0xb88   : > { %v6618_v61 = vld [vmem:[#allocation4 + $0x220] sm:$0xf0]  ;;  %v6397_v9 = vor.u32 %v7082_v5, %v6394_v50  ;;  %v6754_v56 = vld [vmem:[#allocation4 + $0x328] sm:$0xf0]  ;;  %v6688_v5 = vld [vmem:[#allocation4 + $0x288] sm:$0xf] }
 0xb89   : > { %v7074_v7 = vld [vmem:[#allocation4 + $0x4] sm:$0xf]  ;;  %v6621_v15 = vor.u32 %v7138_v14, %v6618_v61  ;;  %v7107_v2 = vld [vmem:[#allocation4 + $0x10c] sm:$0xf]  ;;  %v7159_v50 = vld [vmem:[#allocation4 + $0x2a4] sm:$0xf0] }
 0xb8a   : > { %4025 = vmatpush.bf16.msra.mxu0 %v6749_v4  ;;  %4012 = vmatpush.bf16.msrb.mxu3 %v6493_v28  ;;  %v6362_v32 = vld [vmem:[#allocation4 + $0x20] sm:$0xf0]  ;;  %v6594_v4 = vld [vmem:[#allocation4 + $0x1e8] sm:$0xf0]  ;;  %v6853_v28 = vor.u32 %v7195_v8, %v6850_v37  ;;  %v6689_v14 = vor.u32 %v7159_v50, %v6688_v5  ;;  %v6464_v8 = vld [vmem:[#allocation4 + $0xc8] sm:$0xf] }
 0xb8b   : > { %4051 = vmatpush.bf16.msra.mxu2 %v6753_v46  ;;  %4037 = vmatpush.bf16.msra.mxu1 %v6529_v36  ;;  %v6365_v10 = vor.u32 %v7074_v7, %v6362_v32  ;;  %v6597_v1 = vor.u32 %v7131_v59, %v6594_v4  ;;  %v6562_v46 = vld [vmem:[#allocation4 + $0x1a8] sm:$0xf0]  ;;  %v6821_v36 = vor.u32 %v7187_v38, %v6818_v40  ;;  %v7103_v7 = vld [vmem:[#allocation4 + $0xe4] sm:$0xf0] }
 0xb8c   : > { %v6565_v18 = vor.u32 %v7123_v22, %v6562_v46  ;;  %v7163_v63 = vld [vmem:[#allocation4 + $0x2cc] sm:$0xf]  ;;  %v6465_v37 = vor.u32 %v7103_v7, %v6464_v8  ;;  %v6432_v22 = vld [vmem:[#allocation4 + $0x88] sm:$0xf]  ;;  %v6856_v7 = vld [vmem:[#allocation4 + $0x3d0] sm:$0xf] }
 0xb8d   : > { %v6690_v61 = vld [vmem:[#allocation4 + $0x2a8] sm:$0xf0]  ;;  %v7095_v46 = vld [vmem:[#allocation4 + $0xa4] sm:$0xf0] }
 0xb8e   : > { %4026 = vmatpush.bf16.msra.mxu0 %v6717_v0  ;;  %4013 = vmatpush.bf16.msrb.mxu3 %v6461_v27  ;;  %v6786_v0 = vld [vmem:[#allocation4 + $0x368] sm:$0xf0]  ;;  %v7143_v45 = vld [vmem:[#allocation4 + $0x224] sm:$0xf0] }
 0xb8f   : > { %4052 = vmatpush.bf16.msra.mxu2 %v6721_v13  ;;  %4038 = vmatpush.bf16.msra.mxu1 %v6497_v24  ;;  %v6789_v27 = vor.u32 %v7179_v16, %v6786_v0  ;;  %v6498_v13 = vld [vmem:[#allocation4 + $0x128] sm:$0xf0]  ;;  %v6757_v24 = vor.u32 %v7171_v17, %v6754_v56  ;;  %v6433_v16 = vor.u32 %v7095_v46, %v6432_v22  ;;  %v7079_v5 = vld [vmem:[#allocation4 + $0x24] sm:$0xf0]  ;;  %v7192_v46 = vld [vmem:[#allocation4 + $0x3ac] sm:$0xf0] }
 0xb90   : > { %v7099_v32 = vld [vmem:[#allocation4 + $0xcc] sm:$0xf]  ;;  %v6625_v17 = vor.u32 %v7143_v45, %v6624_v21  ;;  %v7136_v21 = vld [vmem:[#allocation4 + $0x1ec] sm:$0xf0]  ;;  %v7132_v45 = vld [vmem:[#allocation4 + $0x1d4] sm:$0xf] }
 0xb91   : > { %v6466_v59 = vld [vmem:[#allocation4 + $0xe8] sm:$0xf0] }
 0xb92   : > { %4027 = vmatpush.bf16.msra.mxu0 %v6685_v31  ;;  %4014 = vmatpush.bf16.msrb.mxu3 %v6429_v33  ;;  %v6501_v31 = vor.u32 %v7107_v2, %v6498_v13  ;;  %v6722_v33 = vld [vmem:[#allocation4 + $0x2e8] sm:$0xf0]  ;;  %v6469_v4 = vor.u32 %v7099_v32, %v6466_v59  ;;  %v6400_v2 = vld [vmem:[#allocation4 + $0x48] sm:$0xf]  ;;  %v7196_v59 = vld [vmem:[#allocation4 + $0x3d4] sm:$0xf] }
 0xb93   : > { %v6725_v6 = vor.u32 %v7163_v63, %v6722_v33  ;;  %4053 = vmatpush.bf16.msra.mxu2 %v6689_v14  ;;  %4039 = vmatpush.bf16.msra.mxu1 %v6465_v37  ;;  %v7087_v13 = vld [vmem:[#allocation4 + $0x64] sm:$0xf0]  ;;  %v6370_v14 = vld [vmem:[#allocation4 + $0x28] sm:$0xf0]  ;;  %v7200_v37 = vld [vmem:[#allocation4 + $0x3ec] sm:$0xf0] }
 0xb94   : > { %v6401_v63 = vor.u32 %v7087_v13, %v6400_v2  ;;  %v7184_v2 = vld [vmem:[#allocation4 + $0x36c] sm:$0xf0] }
 0xb96   : > { %4028 = vmatpush.bf16.msra.mxu0 %v6653_v51  ;;  %4015 = vmatpush.bf16.msrb.mxu3 %v6397_v9  ;;  %v7155_v51 = vld [vmem:[#allocation4 + $0x28c] sm:$0xf] }
 0xb97   : > { %v6693_v9 = vor.u32 %v7155_v51, %v6690_v61  ;;  %4040 = vmatpush.bf16.msra.mxu1 %v6433_v16  ;;  %v7075_v51 = vld [vmem:[#allocation4 + $0xc] sm:$0xf]  ;;  %v6826_v16 = vld [vmem:[#allocation4 + $0x3b0] sm:$0xf0] }
 0xb98   : > { %v6373_v61 = vor.u32 %v7075_v51, %v6370_v14  ;;  %v7124_v51 = vld [vmem:[#allocation4 + $0x194] sm:$0xf] }
 0xb99   : > { %v6570_v14 = vld [vmem:[#allocation4 + $0x1b0] sm:$0xf0] }
 0xb9a   : > { %4029 = vmatpush.bf16.msra.mxu0 %v6621_v15  ;;  %4016 = vmatpush.bf16.msrb.mxu3 %v6365_v10  ;;  %v6656_v15 = vld [vmem:[#allocation4 + $0x248] sm:$0xf] }
 0xb9b   : > { %v7151_v10 = vld [vmem:[#allocation4 + $0x264] sm:$0xf0]  ;;  %4041 = vmatpush.bf16.msra.mxu1 %v6401_v63 }
 0xb9c   : > { %v6657_v38 = vor.u32 %v7151_v10, %v6656_v15 }
 0xb9e   : > { %4074 = vmatpush.bf16.msrb.mxu0 %v6853_v28  ;;  %4061 = vmatpush.bf16.msra.mxu3 %v6597_v1  ;;  %v7147_v28 = vld [vmem:[#allocation4 + $0x24c] sm:$0xf] }
 0xb9f   : > { %v6658_v1 = vld [vmem:[#allocation4 + $0x268] sm:$0xf0]  ;;  %4054 = vmatpush.bf16.msra.mxu2 %v6657_v38 }
 0xba0   : > { %v6661_v40 = vor.u32 %v7147_v28, %v6658_v1  ;;  %v6857_v28 = vor.u32 %v7200_v37, %v6856_v7  ;;  %v6824_v1 = vld [vmem:[#allocation4 + $0x390] sm:$0xf]  ;;  %v6762_v37 = vld [vmem:[#allocation4 + $0x330] sm:$0xf0] }
 0xba1   : > { %v7176_v7 = vld [vmem:[#allocation4 + $0x32c] sm:$0xf0] }
 0xba2   : > { %4075 = vmatpush.bf16.msrb.mxu0 %v6821_v36  ;;  %4062 = vmatpush.bf16.msra.mxu3 %v6565_v18  ;;  %v7091_v36 = vld [vmem:[#allocation4 + $0x8c] sm:$0xf] }
 0xba3   : > { %v6434_v18 = vld [vmem:[#allocation4 + $0xa8] sm:$0xf0]  ;;  %4055 = vmatpush.bf16.msra.mxu2 %v6625_v17  ;;  %v6825_v17 = vor.u32 %v7192_v46, %v6824_v1  ;;  %v6728_v46 = vld [vmem:[#allocation4 + $0x2d0] sm:$0xf] }
 0xba4   : > { %v6437_v0 = vor.u32 %v7091_v36, %v6434_v18  ;;  %v7188_v36 = vld [vmem:[#allocation4 + $0x394] sm:$0xf]  ;;  %v6600_v18 = vld [vmem:[#allocation4 + $0x1d0] sm:$0xf] }
 0xba5   : > { %v6601_v63 = vor.u32 %v7136_v21, %v6600_v18  ;;  %v6730_v18 = vld [vmem:[#allocation4 + $0x2f0] sm:$0xf0] }
 0xba6   : > { %4076 = vmatpush.bf16.msrb.mxu0 %v6789_v27  ;;  %4063 = vmatpush.bf16.msra.mxu3 %v6533_v41  ;;  %v7139_v27 = vld [vmem:[#allocation4 + $0x20c] sm:$0xf] }
 0xba7   : > { %v6626_v41 = vld [vmem:[#allocation4 + $0x228] sm:$0xf0] }
 0xba8   : > { %v6629_v56 = vor.u32 %v7139_v27, %v6626_v41  ;;  %v6602_v27 = vld [vmem:[#allocation4 + $0x1f0] sm:$0xf0]  ;;  %v6829_v41 = vor.u32 %v7188_v36, %v6826_v16  ;;  %v7168_v36 = vld [vmem:[#allocation4 + $0x2ec] sm:$0xf0] }
 0xba9   : > { %v7164_v16 = vld [vmem:[#allocation4 + $0x2d4] sm:$0xf] }
 0xbaa   : > { %4077 = vmatpush.bf16.msrb.mxu0 %v6757_v24  ;;  %4064 = vmatpush.bf16.msra.mxu3 %v6501_v31  ;;  %v7083_v24 = vld [vmem:[#allocation4 + $0x4c] sm:$0xf] }
 0xbab   : > { %v6402_v31 = vld [vmem:[#allocation4 + $0x68] sm:$0xf0] }
 0xbac   : > { %v6405_v33 = vor.u32 %v7083_v24, %v6402_v31  ;;  %v7180_v24 = vld [vmem:[#allocation4 + $0x354] sm:$0xf] }
 0xbad   : > { %v6794_v31 = vld [vmem:[#allocation4 + $0x370] sm:$0xf0] }
 0xbae   : > { %4078 = vmatpush.bf16.msrb.mxu0 %v6725_v6  ;;  %4065 = vmatpush.bf16.msra.mxu3 %v6469_v4  ;;  %v6368_v6 = vld [vmem:[#allocation4 + $0x8] sm:$0xf]  ;;  %v6858_v4 = vld [vmem:[#allocation4 + $0x3f0] sm:$0xf0] }
 0xbaf   : > { %v6369_v50 = vor.u32 %v7079_v5, %v6368_v6  ;;  %v6861_v38 = vor.u32 %v7196_v59, %v6858_v4  ;;  %v6568_v6 = vld [vmem:[#allocation4 + $0x190] sm:$0xf]  ;;  %v6573_v4 = vor.u32 %v7124_v51, %v6570_v14  ;;  %v7100_v14 = vld [vmem:[#allocation4 + $0xd4] sm:$0xf] }
 0xbb0   : > { %v7104_v51 = vld [vmem:[#allocation4 + $0xec] sm:$0xf0] }
 0xbb1   : > { %4042 = vmatpush.bf16.msra.mxu1 %v6369_v50  ;;  %v7128_v50 = vld [vmem:[#allocation4 + $0x1ac] sm:$0xf0] }
 0xbb2   : > { %4079 = vmatpush.bf16.msrb.mxu0 %v6693_v9  ;;  %4066 = vmatpush.bf16.msra.mxu3 %v6437_v0  ;;  %v6569_v59 = vor.u32 %v7128_v50, %v6568_v6  ;;  %v6472_v50 = vld [vmem:[#allocation4 + $0xd0] sm:$0xf] }
 0xbb6   : > { %4080 = vmatpush.bf16.msrb.mxu0 %v6661_v40  ;;  %4067 = vmatpush.bf16.msra.mxu3 %v6405_v33  ;;  %v6605_v33 = vor.u32 %v7132_v45, %v6602_v27  ;;  %v6504_v45 = vld [vmem:[#allocation4 + $0x110] sm:$0xf] }
 0xbb7   : > { %v7112_v27 = vld [vmem:[#allocation4 + $0x12c] sm:$0xf0] }
 0xbba   : > { %4081 = vmatpush.bf16.msrb.mxu0 %v6629_v56  ;;  %4068 = vmatpush.bf16.msra.mxu3 %v6373_v61  ;;  %v6792_v56 = vld [vmem:[#allocation4 + $0x350] sm:$0xf] }
 0xbbb   : > { %v6793_v61 = vor.u32 %v7184_v2, %v6792_v56  ;;  %v6729_v56 = vor.u32 %v7168_v36, %v6728_v46  ;;  %v6733_v2 = vor.u32 %v7164_v16, %v6730_v18  ;;  %v6632_v36 = vld [vmem:[#allocation4 + $0x210] sm:$0xf]  ;;  %v7140_v18 = vld [vmem:[#allocation4 + $0x214] sm:$0xf] }
 0xbbc   : > { %v7144_v16 = vld [vmem:[#allocation4 + $0x22c] sm:$0xf0] }
 0xbfa   : > { %v3332_v9 = vpop.f32.mrf.mxu0 }
 0xbfb   : > { %v3336_v8 = vmul.f32 %v3332_v9, %v8795_v25  ;;  %v6797_v9 = vor.u32 %v7180_v24, %v6794_v31  ;;  %v7160_v24 = vld [vmem:[#allocation4 + $0x2ac] sm:$0xf0]  ;;  %v7156_v31 = vld [vmem:[#allocation4 + $0x294] sm:$0xf] }
 0xbfd   : > { %v3338_v32 = vadd.f32 %v3336_v8, %v8797_v49  ;;  %v6760_v8 = vld [vmem:[#allocation4 + $0x310] sm:$0xf] }
 0xbfe   : > { %v6761_v1 = vor.u32 %v7176_v7, %v6760_v8  ;;  %v6664_v7 = vld [vmem:[#allocation4 + $0x250] sm:$0xf] }
 0xbff   : > { %v3340_v15 = vmax.f32 %v3338_v32, 0.0  ;;  %v7172_v32 = vld [vmem:[#allocation4 + $0x314] sm:$0xf] }
 0xc00   : > { %v3312_v10 = vpop.f32.mrf.mxu3 }
 0xc01   : > { %v8929_v40 = vpack.c.bf16 %v3340_v15, %v3340_v15  ;;  %v3335_v22 = vmul.f32 %v3312_v10, %v8795_v25  ;;  %v6536_v15 = vld [vmem:[#allocation4 + $0x150] sm:$0xf] }
 0xc02   : > { %v7120_v10 = vld [vmem:[#allocation4 + $0x16c] sm:$0xf0] }
 0xc03   : > { %v3337_v0 = vadd.f32 %v3335_v22, %v8797_v49  ;;  %4004 = vmatmul.bf16.vlgmr.msrb.gmra.mxu2 %v8929_v40  ;;  %4030 = vmatmul.bf16.vlgmr.msra.gmra.mxu0 %v8929_v40  ;;  %v6765_v22 = vor.u32 %v7172_v32, %v6762_v37  ;;  %v7152_v32 = vld [vmem:[#allocation4 + $0x26c] sm:$0xf0]  ;;  %v7148_v37 = vld [vmem:[#allocation4 + $0x254] sm:$0xf] }
 0xc04   : > { %4100 = vmatpush.bf16.msrb.mxu2 %v6857_v28  ;;  %4126 = vmatpush.bf16.msra.mxu0 %v6861_v38  ;;  %v7116_v28 = vld [vmem:[#allocation4 + $0x154] sm:$0xf] }
 0xc05   : > { %v3339_v13 = vmax.f32 %v3337_v0, 0.0  ;;  %v6538_v38 = vld [vmem:[#allocation4 + $0x170] sm:$0xf0]  ;;  %v6537_v0 = vor.u32 %v7120_v10, %v6536_v15  ;;  %v6440_v10 = vld [vmem:[#allocation4 + $0x90] sm:$0xf] }
 0xc06   : > { %v6541_v21 = vor.u32 %v7116_v28, %v6538_v38  ;;  %v7096_v28 = vld [vmem:[#allocation4 + $0xac] sm:$0xf0]  ;;  %v7092_v38 = vld [vmem:[#allocation4 + $0x94] sm:$0xf] }
 0xc07   : > { %v8935_v5 = vpack.c.bf16 %v3339_v13, %v3339_v13  ;;  %v6696_v13 = vld [vmem:[#allocation4 + $0x290] sm:$0xf] }
 0xc08   : > { %4101 = vmatpush.bf16.msrb.mxu2 %v6825_v17  ;;  %4127 = vmatpush.bf16.msra.mxu0 %v6829_v41  ;;  %v7108_v17 = vld [vmem:[#allocation4 + $0x114] sm:$0xf] }
 0xc09   : > { %3991 = vmatmul.bf16.vlgmr.msrb.gmra.mxu1 %v8935_v5  ;;  %4017 = vmatmul.bf16.vlgmr.msrb.gmra.mxu3 %v8935_v5  ;;  %v6506_v41 = vld [vmem:[#allocation4 + $0x130] sm:$0xf0] }
 0xc0a   : > { %4087 = vmatpush.bf16.msrb.mxu1 %v6601_v63  ;;  %4113 = vmatpush.bf16.msrb.mxu3 %v6605_v33  ;;  %v6698_v63 = vld [vmem:[#allocation4 + $0x2b0] sm:$0xf0]  ;;  %v6505_v33 = vor.u32 %v7112_v27, %v6504_v45  ;;  %v6509_v6 = vor.u32 %v7108_v17, %v6506_v41  ;;  %v7201_v45 = vld [vmem:[#allocation4 + $0x3f4] sm:$0xf0]  ;;  %v6441_v27 = vor.u32 %v7096_v28, %v6440_v10  ;;  %v7197_v41 = vld [vmem:[#allocation4 + $0x3dc] sm:$0xf] }
 0xc0b   : > { %v6701_v8 = vor.u32 %v7156_v31, %v6698_v63  ;;  %v6410_v31 = vld [vmem:[#allocation4 + $0x70] sm:$0xf0]  ;;  %v6633_v63 = vor.u32 %v7144_v16, %v6632_v36  ;;  %v7137_v10 = vld [vmem:[#allocation4 + $0x1f4] sm:$0xf0]  ;;  %v7133_v28 = vld [vmem:[#allocation4 + $0x1dc] sm:$0xf] }
 0xc0c   : > { %4102 = vmatpush.bf16.msrb.mxu2 %v6793_v61  ;;  %4128 = vmatpush.bf16.msra.mxu0 %v6797_v9  ;;  %v6474_v61 = vld [vmem:[#allocation4 + $0xf0] sm:$0xf0]  ;;  %v6697_v9 = vor.u32 %v7160_v24, %v6696_v13  ;;  %v7088_v13 = vld [vmem:[#allocation4 + $0x6c] sm:$0xf0] }
 0xc0d   : > { %v6477_v15 = vor.u32 %v7100_v14, %v6474_v61  ;;  %v7084_v24 = vld [vmem:[#allocation4 + $0x54] sm:$0xf]  ;;  %v7193_v14 = vld [vmem:[#allocation4 + $0x3b4] sm:$0xf0]  ;;  %v7189_v61 = vld [vmem:[#allocation4 + $0x39c] sm:$0xf] }
 0xc0e   : > { %4088 = vmatpush.bf16.msrb.mxu1 %v6569_v59  ;;  %4114 = vmatpush.bf16.msrb.mxu3 %v6573_v4  ;;  %v6666_v59 = vld [vmem:[#allocation4 + $0x270] sm:$0xf0]  ;;  %v6473_v4 = vor.u32 %v7104_v51, %v6472_v50  ;;  %v6832_v51 = vld [vmem:[#allocation4 + $0x398] sm:$0xf] }
 0xc0f   : > { %v6669_v46 = vor.u32 %v7148_v37, %v6666_v59  ;;  %v7080_v37 = vld [vmem:[#allocation4 + $0x2c] sm:$0xf0]  ;;  %v7076_v59 = vld [vmem:[#allocation4 + $0x14] sm:$0xf] }
 0xc10   : > { %4103 = vmatpush.bf16.msrb.mxu2 %v6761_v1  ;;  %4129 = vmatpush.bf16.msra.mxu0 %v6765_v22  ;;  %v6442_v1 = vld [vmem:[#allocation4 + $0xb0] sm:$0xf0]  ;;  %v6665_v22 = vor.u32 %v7152_v32, %v6664_v7  ;;  %v6834_v7 = vld [vmem:[#allocation4 + $0x3b8] sm:$0xf0]  ;;  %v6376_v32 = vld [vmem:[#allocation4 + $0x10] sm:$0xf] }
 0xc11   : > { %v6445_v17 = vor.u32 %v7092_v38, %v6442_v1  ;;  %v6610_v38 = vld [vmem:[#allocation4 + $0x1f8] sm:$0xf0]  ;;  %v6833_v1 = vor.u32 %v7193_v14, %v6832_v51  ;;  %v6377_v36 = vor.u32 %v7080_v37, %v6376_v32  ;;  %v6544_v14 = vld [vmem:[#allocation4 + $0x158] sm:$0xf] }
 0xc12   : > { %4089 = vmatpush.bf16.msrb.mxu1 %v6537_v0  ;;  %4115 = vmatpush.bf16.msrb.mxu3 %v6541_v21  ;;  %v6634_v0 = vld [vmem:[#allocation4 + $0x230] sm:$0xf0]  ;;  %v6864_v21 = vld [vmem:[#allocation4 + $0x3d8] sm:$0xf] }
 0xc13   : > { %4056 = vmatmul.bf16.vlgmr.msra.gmra.mxu2 %v8929_v40  ;;  %4082 = vmatmul.bf16.vlgmr.msrb.gmra.mxu0 %v8929_v40  ;;  %v6736_v37 = vld [vmem:[#allocation4 + $0x2d8] sm:$0xf] }
 0xc14   : > { %4104 = vmatpush.bf16.msrb.mxu2 %v6729_v56  ;;  %4130 = vmatpush.bf16.msra.mxu0 %v6733_v2  ;;  %v6866_v56 = vld [vmem:[#allocation4 + $0x3f8] sm:$0xf0]  ;;  %v6408_v2 = vld [vmem:[#allocation4 + $0x50] sm:$0xf] }
 0xc15   : > { %v6869_v50 = vor.u32 %v7197_v41, %v6866_v56  ;;  %v7129_v41 = vld [vmem:[#allocation4 + $0x1b4] sm:$0xf0]  ;;  %v7125_v56 = vld [vmem:[#allocation4 + $0x19c] sm:$0xf] }
 0xc16   : > { %4090 = vmatpush.bf16.msrb.mxu1 %v6505_v33  ;;  %4116 = vmatpush.bf16.msrb.mxu3 %v6509_v6  ;;  %v6637_v33 = vor.u32 %v7140_v18, %v6634_v0  ;;  %v6865_v6 = vor.u32 %v7201_v45, %v6864_v21  ;;  %v7185_v18 = vld [vmem:[#allocation4 + $0x374] sm:$0xf0]  ;;  %v7181_v0 = vld [vmem:[#allocation4 + $0x35c] sm:$0xf] }
 0xc17   : > { %v6802_v21 = vld [vmem:[#allocation4 + $0x378] sm:$0xf0] }
 0xc18   : > { %4105 = vmatpush.bf16.msrb.mxu2 %v6697_v9  ;;  %4131 = vmatpush.bf16.msra.mxu0 %v6701_v8  ;;  %v6409_v9 = vor.u32 %v7088_v13, %v6408_v2  ;;  %v6413_v8 = vor.u32 %v7084_v24, %v6410_v31  ;;  %v6578_v2 = vld [vmem:[#allocation4 + $0x1b8] sm:$0xf0]  ;;  %v6805_v24 = vor.u32 %v7181_v0, %v6802_v21  ;;  %v6768_v31 = vld [vmem:[#allocation4 + $0x318] sm:$0xf] }
 0xc19   : > { %4043 = vmatmul.bf16.vlgmr.msra.gmra.mxu1 %v8935_v5  ;;  %4069 = vmatmul.bf16.vlgmr.msra.gmra.mxu3 %v8935_v5  ;;  %v6581_v51 = vor.u32 %v7125_v56, %v6578_v2  ;;  %v7161_v0 = vld [vmem:[#allocation4 + $0x2b4] sm:$0xf0]  ;;  %v7157_v21 = vld [vmem:[#allocation4 + $0x29c] sm:$0xf] }
 0xc1a   : > { %4091 = vmatpush.bf16.msrb.mxu1 %v6473_v4  ;;  %4117 = vmatpush.bf16.msrb.mxu3 %v6477_v15  ;;  %v6378_v4 = vld [vmem:[#allocation4 + $0x30] sm:$0xf0]  ;;  %v6608_v15 = vld [vmem:[#allocation4 + $0x1d8] sm:$0xf]  ;;  %v7101_v2 = vld [vmem:[#allocation4 + $0xdc] sm:$0xf] }
 0xc1b   : > { %v6381_v16 = vor.u32 %v7076_v59, %v6378_v4  ;;  %v6609_v45 = vor.u32 %v7137_v10, %v6608_v15  ;;  %v7169_v59 = vld [vmem:[#allocation4 + $0x2f4] sm:$0xf0]  ;;  %v7165_v4 = vld [vmem:[#allocation4 + $0x2dc] sm:$0xf] }
 0xc1c   : > { %4106 = vmatpush.bf16.msrb.mxu2 %v6665_v22  ;;  %4132 = vmatpush.bf16.msra.mxu0 %v6669_v46  ;;  %v6837_v22 = vor.u32 %v7189_v61, %v6834_v7  ;;  %v6800_v46 = vld [vmem:[#allocation4 + $0x358] sm:$0xf]  ;;  %v6738_v15 = vld [vmem:[#allocation4 + $0x2f8] sm:$0xf0] }
 0xc1d   : > { %v6801_v13 = vor.u32 %v7185_v18, %v6800_v46  ;;  %v7121_v61 = vld [vmem:[#allocation4 + $0x174] sm:$0xf0]  ;;  %v6514_v46 = vld [vmem:[#allocation4 + $0x138] sm:$0xf0] }
 0xc1e   : > { %4092 = vmatpush.bf16.msrb.mxu1 %v6441_v27  ;;  %4118 = vmatpush.bf16.msrb.mxu3 %v6445_v17  ;;  %v6613_v27 = vor.u32 %v7133_v28, %v6610_v38  ;;  %v6576_v17 = vld [vmem:[#allocation4 + $0x198] sm:$0xf]  ;;  %v6545_v10 = vor.u32 %v7121_v61, %v6544_v14 }
 0xc1f   : > { %v6512_v38 = vld [vmem:[#allocation4 + $0x118] sm:$0xf] }
 0xc20   : > { %4107 = vmatpush.bf16.msrb.mxu2 %v6633_v63  ;;  %4133 = vmatpush.bf16.msra.mxu0 %v6637_v33  ;;  %v7177_v63 = vld [vmem:[#allocation4 + $0x334] sm:$0xf0]  ;;  %v7173_v33 = vld [vmem:[#allocation4 + $0x31c] sm:$0xf] }
 0xc21   : > { %v6769_v7 = vor.u32 %v7177_v63, %v6768_v31  ;;  %v6704_v18 = vld [vmem:[#allocation4 + $0x298] sm:$0xf] }
 0xc22   : > { %4093 = vmatpush.bf16.msrb.mxu1 %v6409_v9  ;;  %4119 = vmatpush.bf16.msrb.mxu3 %v6413_v8  ;;  %v7117_v9 = vld [vmem:[#allocation4 + $0x15c] sm:$0xf]  ;;  %v7105_v56 = vld [vmem:[#allocation4 + $0xf4] sm:$0xf0] }
 0xc23   : > { %4108 = vmatmul.bf16.vlgmr.msrb.gmra.mxu2 %v8929_v40  ;;  %4134 = vmatmul.bf16.vlgmr.msra.gmra.mxu0 %v8929_v40  ;;  %v6546_v8 = vld [vmem:[#allocation4 + $0x178] sm:$0xf0]  ;;  %v6672_v63 = vld [vmem:[#allocation4 + $0x258] sm:$0xf] }
 0xc24   : > { %4152 = vmatpush.bf16.msra.mxu2 %v6865_v6  ;;  %4178 = vmatpush.bf16.msrb.mxu0 %v6869_v50  ;;  %v6770_v6 = vld [vmem:[#allocation4 + $0x338] sm:$0xf0]  ;;  %v6577_v50 = vor.u32 %v7129_v41, %v6576_v17  ;;  %v6549_v28 = vor.u32 %v7117_v9, %v6546_v8  ;;  %v6480_v41 = vld [vmem:[#allocation4 + $0xd8] sm:$0xf] }
 0xc25   : > { %v6773_v32 = vor.u32 %v7173_v33, %v6770_v6  ;;  %v7153_v33 = vld [vmem:[#allocation4 + $0x274] sm:$0xf0]  ;;  %v7149_v6 = vld [vmem:[#allocation4 + $0x25c] sm:$0xf] }
 0xc26   : > { %4094 = vmatpush.bf16.msrb.mxu1 %v6377_v36  ;;  %4120 = vmatpush.bf16.msrb.mxu3 %v6381_v16  ;;  %v6737_v36 = vor.u32 %v7169_v59, %v6736_v37  ;;  %v6741_v16 = vor.u32 %v7165_v4, %v6738_v15  ;;  %v6448_v61 = vld [vmem:[#allocation4 + $0x98] sm:$0xf]  ;;  %v7093_v8 = vld [vmem:[#allocation4 + $0x9c] sm:$0xf] }
 0xc27   : > { %v7097_v9 = vld [vmem:[#allocation4 + $0xb4] sm:$0xf0]  ;;  %v7141_v15 = vld [vmem:[#allocation4 + $0x21c] sm:$0xf] }
 0xc28   : > { %4153 = vmatpush.bf16.msra.mxu2 %v6833_v1  ;;  %4179 = vmatpush.bf16.msrb.mxu0 %v6837_v22  ;;  %v7113_v1 = vld [vmem:[#allocation4 + $0x134] sm:$0xf0]  ;;  %v7109_v22 = vld [vmem:[#allocation4 + $0x11c] sm:$0xf] }
 0xc29   : > { %4095 = vmatmul.bf16.vlgmr.msrb.gmra.mxu1 %v8935_v5  ;;  %4121 = vmatmul.bf16.vlgmr.msrb.gmra.mxu3 %v8935_v5  ;;  %v6517_v17 = vor.u32 %v7109_v22, %v6514_v46  ;;  %v6640_v59 = vld [vmem:[#allocation4 + $0x218] sm:$0xf]  ;;  %v7085_v46 = vld [vmem:[#allocation4 + $0x5c] sm:$0xf] }
 0xc2a   : > { %4139 = vmatpush.bf16.msra.mxu1 %v6609_v45  ;;  %4165 = vmatpush.bf16.msra.mxu3 %v6613_v27  ;;  %v6706_v45 = vld [vmem:[#allocation4 + $0x2b8] sm:$0xf0]  ;;  %v6513_v27 = vor.u32 %v7113_v1, %v6512_v38  ;;  %v7145_v4 = vld [vmem:[#allocation4 + $0x234] sm:$0xf0] }
 0xc2b   : > { %v6709_v31 = vor.u32 %v7157_v21, %v6706_v45  ;;  %v6416_v1 = vld [vmem:[#allocation4 + $0x58] sm:$0xf] }
 0xc2c   : > { %4154 = vmatpush.bf16.msra.mxu2 %v6801_v13  ;;  %4180 = vmatpush.bf16.msrb.mxu0 %v6805_v24  ;;  %v6482_v13 = vld [vmem:[#allocation4 + $0xf8] sm:$0xf0]  ;;  %v6705_v24 = vor.u32 %v7161_v0, %v6704_v18  ;;  %v7089_v22 = vld [vmem:[#allocation4 + $0x74] sm:$0xf0] }
 0xc2d   : > { %v6485_v14 = vor.u32 %v7101_v2, %v6482_v13  ;;  %v6417_v0 = vor.u32 %v7089_v22, %v6416_v1  ;;  %v6384_v45 = vld [vmem:[#allocation4 + $0x18] sm:$0xf] }
 0xc2e   : > { %4140 = vmatpush.bf16.msra.mxu1 %v6577_v50  ;;  %4166 = vmatpush.bf16.msra.mxu3 %v6581_v51  ;;  %v6674_v50 = vld [vmem:[#allocation4 + $0x278] sm:$0xf0]  ;;  %v6481_v51 = vor.u32 %v7105_v56, %v6480_v41 }
 0xc2f   : > { %v6677_v37 = vor.u32 %v7149_v6, %v6674_v50  ;;  %v6386_v41 = vld [vmem:[#allocation4 + $0x38] sm:$0xf0]  ;;  %v8954_v6 = vld [vmem:[%s10148_s4] sm:$0xff] }
 0xc30   : > { %4155 = vmatpush.bf16.msra.mxu2 %v6769_v7  ;;  %4181 = vmatpush.bf16.msrb.mxu0 %v6773_v32  ;;  %v6450_v7 = vld [vmem:[#allocation4 + $0xb8] sm:$0xf0]  ;;  %v6673_v32 = vor.u32 %v7153_v33, %v6672_v63 }
 0xc31   : > { %v6453_v38 = vor.u32 %v7093_v8, %v6450_v7  ;;  %v7353_v1 = vld [vmem:[%s10148_s4 + $0x18] sm:$0xff] }
 0xc32   : > { %4141 = vmatpush.bf16.msra.mxu1 %v6545_v10  ;;  %4167 = vmatpush.bf16.msra.mxu3 %v6549_v28  ;;  %v6642_v10 = vld [vmem:[#allocation4 + $0x238] sm:$0xf0]  ;;  %v6449_v28 = vor.u32 %v7097_v9, %v6448_v61  ;;  %v8963_v61 = vld [vmem:[%s10148_s4 + $0x8] sm:$0xff] }
 0xc33   : > { %v6645_v18 = vor.u32 %v7141_v15, %v6642_v10 }
 0xc34   : > { %4156 = vmatpush.bf16.msra.mxu2 %v6737_v36  ;;  %4182 = vmatpush.bf16.msrb.mxu0 %v6741_v16  ;;  %v6418_v36 = vld [vmem:[#allocation4 + $0x78] sm:$0xf0]  ;;  %v6641_v16 = vor.u32 %v7145_v4, %v6640_v59  ;;  %v7352_v59 = vld [vmem:[%s10148_s4 + $0x10] sm:$0xff] }
 0xc35   : > { %v6421_v21 = vor.u32 %v7085_v46, %v6418_v36 }
 0xc36   : > { %4142 = vmatpush.bf16.msra.mxu1 %v6513_v27  ;;  %4168 = vmatpush.bf16.msra.mxu3 %v6517_v17  ;;  %v7081_v27 = vld [vmem:[#allocation4 + $0x34] sm:$0xf0]  ;;  %v7077_v17 = vld [vmem:[#allocation4 + $0x1c] sm:$0xf] }
 0xc37   : > { %v6385_v56 = vor.u32 %v7081_v27, %v6384_v45  ;;  %v6389_v2 = vor.u32 %v7077_v17, %v6386_v41 }
 0xc38   : > { %4157 = vmatpush.bf16.msra.mxu2 %v6705_v24  ;;  %4183 = vmatpush.bf16.msrb.mxu0 %v6709_v31 }
 0xc3a   : > { %4143 = vmatpush.bf16.msra.mxu1 %v6481_v51  ;;  %4169 = vmatpush.bf16.msra.mxu3 %v6485_v14 }
 0xc3c   : > { %4158 = vmatpush.bf16.msra.mxu2 %v6673_v32  ;;  %4184 = vmatpush.bf16.msrb.mxu0 %v6677_v37 }
 0xc3e   : > { %4144 = vmatpush.bf16.msra.mxu1 %v6449_v28  ;;  %4170 = vmatpush.bf16.msra.mxu3 %v6453_v38 }
 0xc40   : > { %4159 = vmatpush.bf16.msra.mxu2 %v6641_v16  ;;  %4185 = vmatpush.bf16.msrb.mxu0 %v6645_v18 }
 0xc42   : > { %4145 = vmatpush.bf16.msra.mxu1 %v6417_v0  ;;  %4171 = vmatpush.bf16.msra.mxu3 %v6421_v21 }
 0xc43   : > { %4160 = vmatmul.bf16.vlgmr.msra.gmra.mxu2 %v8929_v40  ;;  %4186 = vmatmul.bf16.vlgmr.msrb.gmra.mxu0 %v8929_v40 }
 0xc46   : > { %4146 = vmatpush.bf16.msra.mxu1 %v6385_v56  ;;  %4172 = vmatpush.bf16.msra.mxu3 %v6389_v2 }
 0xc49   : > { %4147 = vmatmul.bf16.vlgmr.msra.gmra.mxu1 %v8935_v5  ;;  %4173 = vmatmul.bf16.vlgmr.msra.gmra.mxu3 %v8935_v5 }
 0xc80   : > { %v4031_v13 = vpop.f32.mrf.mxu0 }
 0xc86   : > { %v3992_v24 = vpop.f32.mrf.mxu1  ;;  %v4005_v31 = vpop.f32.mrf.mxu2 }
 0xc87   : > { %v4006_v63 = vadd.f32 %v4005_v31, %v3992_v24 }
 0xc88   : > { %v4033_v33 = vpop.f32.mrf.mxu0 }
 0xc89   : > { %4206 = vmatpush.msrb.mxu1 %v4006_v63 }
 0xc8a   : > { %6870 = vmatmul.msk.f32.vlgmr.msrb.gmra.mxu1 %vm2742_vm7, %v8954_v6 }
 0xc8c   : > { %v4018_v40 = vpop.f32.mrf.mxu3 }
 0xc8d   : > { %v4032_v50 = vadd.f32 %v4031_v13, %v4018_v40 }
 0xc8e   : > { %v3994_v51 = vpop.f32.mrf.mxu1  ;;  %v4007_v14 = vpop.f32.mrf.mxu2 }
 0xc8f   : > { %4235 = vmatpush.msrb.mxu2 %v4032_v50 }
 0xc90   : > { %v4083_v5 = vpop.f32.mrf.mxu0  ;;  %6874 = vmatmul.msk.f32.vlgmr.msrb.gmra.mxu2 %vm2742_vm7, %v8954_v6 }
 0xc92   : > { %6871 = vmatmul.msk.f32.gmra.mxu1 %vm2742_vm7, %v8963_v61 }
 0xc94   : > { %v4020_v9 = vpop.f32.mrf.mxu3 }
 0xc96   : > { %v4044_v8 = vpop.f32.mrf.mxu1  ;;  %v4057_v7 = vpop.f32.mrf.mxu2 }
 0xc97   : > { %v4058_v32 = vadd.f32 %v4057_v7, %v4044_v8 }
 0xc98   : > { %v4085_v37 = vpop.f32.mrf.mxu0  ;;  %6875 = vmatmul.msk.f32.gmra.mxu2 %vm2742_vm7, %v8963_v61 }
 0xc99   : > { %4264 = vmatpush.msrb.mxu3 %v4058_v32 }
 0xc9a   : > { %6872 = vmatmul.msk.f32.gmra.mxu1 %vm2742_vm7, %v7352_v59  ;;  %6878 = vmatmul.msk.f32.vlgmr.msrb.gmra.mxu3 %vm2742_vm7, %v8954_v6 }
 0xc9c   : > { %v4070_v4 = vpop.f32.mrf.mxu3 }
 0xc9d   : > { %v4084_v15 = vadd.f32 %v4083_v5, %v4070_v4 }
 0xc9e   : > { %v4046_v10 = vpop.f32.mrf.mxu1  ;;  %v4059_v28 = vpop.f32.mrf.mxu2 }
 0xc9f   : > { %4293 = vmatpush.msra.mxu0 %v4084_v15 }
 0xca0   : > { %v4135_v38 = vpop.f32.mrf.mxu0  ;;  %6876 = vmatmul.msk.f32.gmra.mxu2 %vm2742_vm7, %v7352_v59  ;;  %6882 = vmatmul.msk.f32.vlgmr.msra.gmra.mxu0 %vm2742_vm7, %v8954_v6 }
 0xca2   : > { %6873 = vmatmul.msk.f32.gmra.mxu1 %vm2742_vm7, %v7353_v1  ;;  %6879 = vmatmul.msk.f32.gmra.mxu3 %vm2742_vm7, %v8963_v61 }
 0xca4   : > { %v4072_v22 = vpop.f32.mrf.mxu3 }
 0xca6   : > { %v4109_v46 = vpop.f32.mrf.mxu2  ;;  %v4096_v36 = vpop.f32.mrf.mxu1 }
 0xca7   : > { %v4110_v16 = vadd.f32 %v4109_v46, %v4096_v36 }
 0xca8   : > { %v4137_v18 = vpop.f32.mrf.mxu0  ;;  %6877 = vmatmul.msk.f32.gmra.mxu2 %vm2742_vm7, %v7353_v1  ;;  %6883 = vmatmul.msk.f32.gmra.mxu0 %vm2742_vm7, %v8963_v61 }
 0xca9   : > { %4322 = vmatpush.msra.mxu1 %v4110_v16 }
 0xcaa   : > { %6880 = vmatmul.msk.f32.gmra.mxu3 %vm2742_vm7, %v7352_v59  ;;  %6886 = vmatmul.msk.f32.vlgmr.msra.gmra.mxu1 %vm2742_vm7, %v8954_v6 }
 0xcac   : > { %v4122_v0 = vpop.f32.mrf.mxu3 }
 0xcad   : > { %v4136_v21 = vadd.f32 %v4135_v38, %v4122_v0 }
 0xcae   : > { %v4111_v45 = vpop.f32.mrf.mxu2  ;;  %v4098_v27 = vpop.f32.mrf.mxu1 }
 0xcaf   : > { %4351 = vmatpush.msra.mxu2 %v4136_v21 }
 0xcb0   : > { %6884 = vmatmul.msk.f32.gmra.mxu0 %vm2742_vm7, %v7352_v59  ;;  %6890 = vmatmul.msk.f32.vlgmr.msra.gmra.mxu2 %vm2742_vm7, %v8954_v6 }
 0xcb2   : > { %6881 = vmatmul.msk.f32.gmra.mxu3 %vm2742_vm7, %v7353_v1  ;;  %6887 = vmatmul.msk.f32.gmra.mxu1 %vm2742_vm7, %v8963_v61 }
 0xcb4   : > { %v4124_v17 = vpop.f32.mrf.mxu3 }
 0xcb8   : > { %6885 = vmatmul.msk.f32.gmra.mxu0 %vm2742_vm7, %v7353_v1  ;;  %6891 = vmatmul.msk.f32.gmra.mxu2 %vm2742_vm7, %v8963_v61 }
 0xcba   : > { %6888 = vmatmul.msk.f32.gmra.mxu1 %vm2742_vm7, %v7352_v59 }
 0xcc0   : > { %v4187_v41 = vpop.f32.mrf.mxu0  ;;  %6892 = vmatmul.msk.f32.gmra.mxu2 %vm2742_vm7, %v7352_v59 }
 0xcc2   : > { %6889 = vmatmul.msk.f32.gmra.mxu1 %vm2742_vm7, %v7353_v1 }
 0xcc6   : > { %v4148_v56 = vpop.f32.mrf.mxu1  ;;  %v4161_v2 = vpop.f32.mrf.mxu2 }
 0xcc7   : > { %v4162_v13 = vadd.f32 %v4161_v2, %v4148_v56 }
 0xcc8   : > { %v4189_v24 = vpop.f32.mrf.mxu0  ;;  %6893 = vmatmul.msk.f32.gmra.mxu2 %vm2742_vm7, %v7353_v1 }
 0xcc9   : > { %4380 = vmatpush.msrb.mxu0 %v4162_v13  ;;  %7202 = vmatpush.msra.mxu3 %v4162_v13 }
 0xcca   : > { %6895 = vmatmul.msk.f32.vlgmr.msra.gmra.mxu3 %vm2742_vm7, %v8963_v61  ;;  %6894 = vmatmul.msk.f32.vlgmr.msrb.gmra.mxu0 %vm2742_vm7, %v8954_v6 }
 0xccc   : > { %v4174_v31 = vpop.f32.mrf.mxu3 }
 0xccd   : > { %v4188_v63 = vadd.f32 %v4187_v41, %v4174_v31 }
 0xcce   : > { %v4150_v33 = vpop.f32.mrf.mxu1  ;;  %v4163_v40 = vpop.f32.mrf.mxu2 }
 0xccf   : > { %4409 = vmatpush.msra.mxu0 %v4188_v63 }
 0xcd2   : > { %6896 = vmatmul.msk.f32.gmra.mxu3 %vm2742_vm7, %v7352_v59  ;;  %6898 = vmatmul.msk.f32.vlgmr.msra.gmra.mxu0 %vm2742_vm7, %v8954_v6 }
 0xcd4   : > { %v4176_v50 = vpop.f32.mrf.mxu3 }
 0xcda   : > { %6899 = vmatmul.msk.f32.gmra.mxu0 %vm2742_vm7, %v8963_v61  ;;  %6897 = vmatmul.msk.f32.gmra.mxu3 %vm2742_vm7, %v7353_v1 }
 0xce2   : > { %6900 = vmatmul.msk.f32.gmra.mxu0 %vm2742_vm7, %v7352_v59 }
 0xcea   : > { %6901 = vmatmul.msk.f32.gmra.mxu0 %vm2742_vm7, %v7353_v1  ;;  %vm10401_vm7 = vcmask 269312  }
 0xceb   : > { %vm10408_vm12 = vmmov %vm10401_vm7 }
 0xcec   : > { %vm10409_vm14 = vmmov %vm10401_vm7 }
 0xced   : > { %vm10411_vm5 = vmmov %vm10401_vm7 }
 0xcee   : > { %vm10413_vm13 = vmmov %vm10411_vm5 }
 0xcef   : > { %vm10415_vm1 = vmmov %vm10411_vm5 }
 0xd07   : > { %v9015_v51 = vpop.f32.mrf.mxu1 }
 0xd0f   : > { %v4211_v14 = vpop.f32.mrf.mxu1 }
 0xd10   : > { %4434 = vrot.lane.b32.xlu1 %v4211_v14, %s7449_s24 }
 0xd13   : > { %v4237_v5 = vpop.f32.mrf.mxu2 }
 0xd17   : > { %v4214_v9 = vpop.f32.mrf.mxu1 }
 0xd18   : > { %4483 = vrot.lane.b32.xlu1 %v4214_v9, %s10398_s26 }
 0xd1b   : > { %v4240_v6 = vpop.f32.mrf.mxu2 }
 0xd1c   : > { %4436 = vrot.lane.b32.xlu2 %v4240_v6, %s7449_s24 }
 0xd1d   : > { %v9020_v8 = vpop.f32.mrf.mxu3  ;;  %v9022_v61 = vpop.f32.mrf.mxu0 }
 0xd1f   : > { %v4217_v7 = vpop.f32.mrf.mxu1 }
 0xd20   : > { %4532 = vrot.lane.b32.xlu1 %v4217_v7, %s10399_s16 }
 0xd23   : > { %v4243_v32 = vpop.f32.mrf.mxu2 }
 0xd24   : > { %4485 = vrot.lane.b32.xlu2 %v4243_v32, %s10398_s26 }
 0xd25   : > { %v4269_v37 = vpop.f32.mrf.mxu3  ;;  %v4298_v59 = vpop.f32.mrf.mxu0 }
 0xd26   : > { %4438 = vrot.lane.b32.xlu0 %v4269_v37, %s7449_s24 }
 0xd27   : > { %v9028_v4 = vpop.f32.mrf.mxu1 }
 0xd28   : > { %4440 = vrot.lane.b32.xlu1 %v4298_v59, %s7449_s24 }
 0xd2b   : > { %v4246_v15 = vpop.f32.mrf.mxu2 }
 0xd2c   : > { %4534 = vrot.lane.b32.xlu2 %v4246_v15, %s10399_s16 }
 0xd2d   : > { %v4272_v10 = vpop.f32.mrf.mxu3  ;;  %v4301_v28 = vpop.f32.mrf.mxu0 }
 0xd2e   : > { %4487 = vrot.lane.b32.xlu0 %v4272_v10, %s10398_s26 }
 0xd2f   : > { %v4327_v38 = vpop.f32.mrf.mxu1 }
 0xd30   : > { %4489 = vrot.lane.b32.xlu1 %v4301_v28, %s10398_s26 }
 0xd33   : > { %v9033_v1 = vpop.f32.mrf.mxu2 }
 0xd34   : > { %4442 = vrot.lane.b32.xlu2 %v4327_v38, %s7449_s24 }
 0xd35   : > { %v4275_v22 = vpop.f32.mrf.mxu3  ;;  %v4304_v46 = vpop.f32.mrf.mxu0 }
 0xd36   : > { %4536 = vrot.lane.b32.xlu0 %v4275_v22, %s10399_s16 }
 0xd37   : > { %v4330_v36 = vpop.f32.mrf.mxu1 }
 0xd38   : > { %4538 = vrot.lane.b32.xlu1 %v4304_v46, %s10399_s16 }
 0xd3b   : > { %v4356_v16 = vpop.f32.mrf.mxu2 }
 0xd3c   : > { %4491 = vrot.lane.b32.xlu2 %v4330_v36, %s10398_s26 }
 0xd3e   : > { %4444 = vrot.lane.b32.xlu0 %v4356_v16, %s7449_s24 }
 0xd3f   : > { %v4333_v18 = vpop.f32.mrf.mxu1 }
 0xd43   : > { %v4359_v21 = vpop.f32.mrf.mxu2 }
 0xd44   : > { %4540 = vrot.lane.b32.xlu2 %v4333_v18, %s10399_s16 }
 0xd47   : > { %v9040_v0 = vpop.f32.mrf.mxu0 }
 0xd4b   : > { %v4362_v17 = vpop.f32.mrf.mxu2 }
 0xd4c   : > { %4493 = vrot.lane.b32.xlu2 %v4359_v21, %s10398_s26 }
 0xd4d   : > { %v4385_v45 = vpop.f32.mrf.mxu3 }
 0xd4e   : > { %4446 = vrot.lane.b32.xlu1 %v4385_v45, %s7449_s24 }
 0xd4f   : > { %v9044_v27 = vpop.f32.mrf.mxu0 }
 0xd55   : > { %v4388_v41 = vpop.f32.mrf.mxu3 }
 0xd56   : > { %4495 = vrot.lane.b32.xlu0 %v4388_v41, %s10398_s26  ;;  %4542 = vrot.lane.b32.xlu1 %v4362_v17, %s10399_s16 }
 0xd57   : > { %v4414_v56 = vpop.f32.mrf.mxu0 }
 0xd5d   : > { %v4391_v2 = vpop.f32.mrf.mxu3 }
 0xd5e   : > { %4424 = vrot.lane.b32.xlu0 %v4414_v56, %s7449_s24  ;;  %4544 = vrot.lane.b32.xlu2 %v4391_v2, %s10399_s16 }
 0xd5f   : > { %v4417_v13 = vpop.f32.mrf.mxu0 }
 0xd66   : > { %4473 = vrot.lane.b32.xlu0 %v4417_v13, %s10398_s26 }
 0xd67   : > { %v4420_v24 = vpop.f32.mrf.mxu0 }
 0xd6e   : > { %4522 = vrot.lane.b32.xlu0 %v4420_v24, %s10399_s16 }
 0xd76   : > { %v4437_v31 = vpop.permute.xlu2 %4436 }
 0xd7e   : > { %v4486_v33 = vpop.permute.xlu2 %4485 }
 0xd82   : > { %v9053_v63 = vpop.permute.xlu1 %4434 }
 0xd83   : > { %v4448_v50 = vsel %vm1013_vm4, %v9053_v63, %v4437_v31 }
 0xd84   : > { %v4465_v9 = vadd.f32 %v4448_v50, %v4237_v5 }
 0xd86   : > { %v4535_v6 = vpop.permute.xlu2 %4534 }
 0xd8a   : > { %v9055_v40 = vpop.permute.xlu1 %4483 }
 0xd8b   : > { %v4497_v14 = vsel %vm10400_vm6, %v9055_v40, %v4486_v33  ;;  %vm10418_vm6 = vmmov %vm10415_vm1 }
 0xd8c   : > { %v4514_v7 = vadd.f32 %v4497_v14, %v4465_v9 }
 0xd92   : > { %v9061_v32 = vpop.permute.xlu1 %4532 }
 0xd93   : > { %v4546_v37 = vsel %vm10401_vm7, %v9061_v32, %v4535_v6  ;;  %vm10419_vm7 = vmmov %vm10414_vm0 }
 0xd94   : > { %v4563_v59 = vadd.f32 %v4546_v37, %v4514_v7 }
 0xd96   : > { %v9066_v15 = vadd.f32 %v4563_v59, %v8835_v20 }
 0xd98   : > { %v4439_v10 = vpop.permute.xlu0 %4438  ;;  %4834 = vrot.lane.b32.xlu0 %v9066_v15, %s10402_s30  ;;  %4875 = vrot.lane.b32.xlu1 %v9066_v15, %s10403_s15 }
 0xd99   : > { %4793 = vrot.lane.b32.xlu2 %v9066_v15, %s10404_s18  ;;  %v4449_v22 = vsel %vm1013_vm4, %v4437_v31, %v4439_v10 }
 0xd9a   : > { %v4441_v5 = vpop.permute.xlu1 %4440  ;;  %v4466_v16 = vadd.f32 %v4449_v22, %v9020_v8 }
 0xd9b   : > { %v4450_v46 = vsel %vm1013_vm4, %v4439_v10, %v4441_v5 }
 0xd9c   : > { %v4467_v21 = vadd.f32 %v4450_v46, %v9022_v61 }
 0xda0   : > { %v4488_v28 = vpop.permute.xlu0 %4487  ;;  %4714 = vrot.lane.b32.xlu0 %v9066_v15, %s7449_s24  ;;  %4752 = vrot.lane.b32.xlu1 %v9066_v15, %s10374_s19 }
 0xda1   : > { %4673 = vrot.lane.b32.xlu2 %v9066_v15, %s10405_s21  ;;  %v4498_v36 = vsel %vm10406_vm10, %v4486_v33, %v4488_v28  ;;  %v4443_v33 = vpop.permute.xlu2 %4442  ;;  %vm10420_vm10 = vmmov %vm10415_vm1 }
 0xda2   : > { %v4490_v38 = vpop.permute.xlu1 %4489  ;;  %v4515_v45 = vadd.f32 %v4498_v36, %v4466_v16  ;;  %v4451_v14 = vsel %vm1013_vm4, %v4441_v5, %v4443_v33 }
 0xda3   : > { %v4499_v18 = vsel %vm10407_vm11, %v4488_v28, %v4490_v38  ;;  %v4468_v7 = vadd.f32 %v4451_v14, %v9028_v4  ;;  %vm10422_vm11 = vcmask 785408  }
 0xda4   : > { %v4516_v56 = vadd.f32 %v4499_v18, %v4467_v21 }
 0xda8   : > { %v4537_v17 = vpop.permute.xlu0 %4536  ;;  %4591 = vrot.lane.b32.xlu1 %v9066_v15, %s10399_s16 }
 0xda9   : > { %v4547_v41 = vsel %vm10408_vm12, %v4535_v6, %v4537_v17  ;;  %4632 = vrot.lane.b32.xlu2 %v9066_v15, %s10398_s26  ;;  %v4492_v50 = vpop.permute.xlu2 %4491  ;;  %vm10423_vm12 = vcmask 777216  }
 0xdaa   : > { %v4564_v2 = vadd.f32 %v4547_v41, %v4515_v45  ;;  %v4539_v13 = vpop.permute.xlu1 %4538  ;;  %v4500_v6 = vsel %vm10410_vm15, %v4490_v38, %v4492_v50  ;;  %vm10426_vm15 = vmmov %vm10423_vm12 }
 0xdab   : > { %v4548_v24 = vsel %vm10409_vm14, %v4537_v17, %v4539_v13  ;;  %v4517_v59 = vadd.f32 %v4500_v6, %v4468_v7  ;;  %vm10425_vm14 = vcmask 793600  }
 0xdac   : > { %v9093_v8 = vadd.f32 %v4564_v2, %v8835_v20  ;;  %v4565_v31 = vadd.f32 %v4548_v24, %v4516_v56 }
 0xdae   : > { %v9096_v61 = vadd.f32 %v4565_v31, %v8835_v20  ;;  %4877 = vrot.lane.b32.xlu0 %v9093_v8, %s10403_s15 }
 0xdb0   : > { %4879 = vrot.lane.b32.xlu1 %v9096_v61, %s10403_s15  ;;  %v4445_v5 = vpop.permute.xlu0 %4444 }
 0xdb1   : > { %4836 = vrot.lane.b32.xlu2 %v9093_v8, %s10402_s30  ;;  %v4541_v9 = vpop.permute.xlu2 %4540  ;;  %v4452_v4 = vsel %vm1013_vm4, %v4443_v33, %v4445_v5 }
 0xdb2   : > { %v4549_v37 = vsel %vm10411_vm5, %v4539_v13, %v4541_v9  ;;  %v4469_v46 = vadd.f32 %v4452_v4, %v9033_v1  ;;  %vm10427_vm5 = vmmov %vm10422_vm11 }
 0xdb3   : > { %v4566_v28 = vadd.f32 %v4549_v37, %v4517_v59 }
 0xdb5   : > { %v9133_v22 = vadd.f32 %v4566_v28, %v8835_v20 }
 0xdb6   : > { %4838 = vrot.lane.b32.xlu0 %v9096_v61, %s10402_s30 }
 0xdb8   : > { %4754 = vrot.lane.b32.xlu1 %v9093_v8, %s10374_s19 }
 0xdb9   : > { %4795 = vrot.lane.b32.xlu2 %v9093_v8, %s10404_s18  ;;  %v4494_v38 = vpop.permute.xlu2 %4493 }
 0xdba   : > { %v4501_v16 = vsel %vm10412_vm9, %v4492_v50, %v4494_v38  ;;  %vm10428_vm9 = vmmov %vm10425_vm14 }
 0xdbb   : > { %v4518_v45 = vadd.f32 %v4501_v16, %v4469_v46 }
 0xdbe   : > { %4797 = vrot.lane.b32.xlu0 %v9096_v61, %s10404_s18 }
 0xdc0   : > { %4716 = vrot.lane.b32.xlu1 %v9093_v8, %s7449_s24  ;;  %v4447_v10 = vpop.permute.xlu1 %4446 }
 0xdc1   : > { %4756 = vrot.lane.b32.xlu2 %v9096_v61, %s10374_s19  ;;  %v4453_v56 = vsel %vm1013_vm4, %v4445_v5, %v4447_v10  ;;  %v4545_v2 = vpop.permute.xlu2 %4544 }
 0xdc2   : > { %v4470_v24 = vadd.f32 %v4453_v56, %v9040_v0 }
 0xdc6   : > { %4675 = vrot.lane.b32.xlu0 %v9093_v8, %s10405_s21 }
 0xdc8   : > { %4677 = vrot.lane.b32.xlu1 %v9096_v61, %s10405_s21  ;;  %v4543_v36 = vpop.permute.xlu1 %4542  ;;  %v4496_v18 = vpop.permute.xlu0 %4495 }
 0xdc9   : > { %4718 = vrot.lane.b32.xlu2 %v9096_v61, %s7449_s24  ;;  %v4550_v21 = vsel %vm10413_vm13, %v4541_v9, %v4543_v36  ;;  %v4502_v13 = vsel %vm10414_vm0, %v4494_v38, %v4496_v18  ;;  %v4551_v33 = vsel %vm10415_vm1, %v4543_v36, %v4545_v2  ;;  %vm10429_vm13 = vmmov %vm10423_vm12 }
 0xdca   : > { %v4567_v17 = vadd.f32 %v4550_v21, %v4518_v45  ;;  %v4519_v31 = vadd.f32 %v4502_v13, %v4470_v24  ;;  %vm10431_vm0 = vmmov %vm10427_vm5 }
 0xdcb   : > { %vm10432_vm1 = vmmov %vm10428_vm9 }
 0xdcc   : > { %v9152_v41 = vadd.f32 %v4567_v17, %v8835_v20  ;;  %v4568_v14 = vadd.f32 %v4551_v33, %v4519_v31  ;;  %v9249_v33 = vld [vmem:[%s10151_s7 + $0x48] ss:$0 sm:$0xff] }
 0xdcd   : > { %10424 = vst [vmem:[#allocation58_spill] sm:$0xff] %v9249_v33 }
 0xdce   : > { %4634 = vrot.lane.b32.xlu0 %v9093_v8, %s10398_s26  ;;  %v9175_v0 = vadd.f32 %v4568_v14, %v8835_v20 }
 0xdd0   : > { %4636 = vrot.lane.b32.xlu1 %v9096_v61, %s10398_s26  ;;  %v4425_v1 = vpop.permute.xlu0 %4424  ;;  %10416 = vst [vmem:[#allocation56_spill] sm:$0xff] %v9175_v0 }
 0xdd1   : > { %4593 = vrot.lane.b32.xlu2 %v9093_v8, %s10399_s16  ;;  %v4463_v6 = vsel %vm1013_vm4, %v4425_v1, %v9053_v63 }
 0xdd2   : > { %v4464_v28 = vadd.f32 %v4463_v6, %v9015_v51 }
 0xdd6   : > { %4595 = vrot.lane.b32.xlu0 %v9096_v61, %s10399_s16 }
 0xdd8   : > { %4840 = vrot.lane.b32.xlu1 %v9133_v22, %s10402_s30  ;;  %v4474_v50 = vpop.permute.xlu0 %4473 }
 0xdd9   : > { %4881 = vrot.lane.b32.xlu2 %v9133_v22, %s10403_s15  ;;  %v4512_v37 = vsel %vm10417_vm2, %v4474_v50, %v9055_v40  ;;  %v4454_v40 = vsel %vm1013_vm4, %v4447_v10, %v4425_v1  ;;  %vm10433_vm2 = vcmask 252928  }
 0xdda   : > { %v4513_v4 = vadd.f32 %v4512_v37, %v4464_v28  ;;  %v4471_v46 = vadd.f32 %v4454_v40, %v9044_v27 }
 0xdde   : > { %4758 = vrot.lane.b32.xlu0 %v9133_v22, %s10374_s19 }
 0xde0   : > { %4799 = vrot.lane.b32.xlu1 %v9133_v22, %s10404_s18  ;;  %v4523_v7 = vpop.permute.xlu0 %4522 }
 0xde1   : > { %4679 = vrot.lane.b32.xlu2 %v9133_v22, %s10405_s21  ;;  %v4561_v5 = vsel %vm10418_vm6, %v4523_v7, %v9061_v32  ;;  %v4503_v32 = vsel %vm10419_vm7, %v4496_v18, %v4474_v50  ;;  %v4552_v36 = vsel %vm10420_vm10, %v4545_v2, %v4523_v7  ;;  %vm10434_vm6 = vmmov %vm10419_vm7 }
 0xde2   : > { %v4562_v38 = vadd.f32 %v4561_v5, %v4513_v4  ;;  %v4520_v16 = vadd.f32 %v4503_v32, %v4471_v46  ;;  %vm10435_vm7 = vmmov %vm10420_vm10 }
 0xde3   : > { %vm10436_vm10 = vmmov %vm10423_vm12 }
 0xde4   : > { %v9200_v51 = vadd.f32 %v4562_v38, %v8835_v20  ;;  %v4569_v21 = vadd.f32 %v4552_v36, %v4520_v16 }
 0xde6   : > { %4801 = vrot.lane.b32.xlu0 %v9152_v41, %s10404_s18  ;;  %v9218_v27 = vadd.f32 %v4569_v21, %v8835_v20 }
 0xde8   : > { %4720 = vrot.lane.b32.xlu1 %v9133_v22, %s7449_s24  ;;  %10421 = vst [vmem:[#allocation57_spill] sm:$0xff] %v9218_v27 }
 0xde9   : > { %4638 = vrot.lane.b32.xlu2 %v9133_v22, %s10398_s26 }
 0xdee   : > { %4722 = vrot.lane.b32.xlu0 %v9152_v41, %s7449_s24 }
 0xdf0   : > { %4883 = vrot.lane.b32.xlu1 %v9152_v41, %s10403_s15 }
 0xdf1   : > { %4760 = vrot.lane.b32.xlu2 %v9152_v41, %s10374_s19 }
 0xdf3   : > { %v9170_v9 = vpop.permute.xlu2 %4793 }
 0xdf6   : > { %4681 = vrot.lane.b32.xlu0 %v9152_v41, %s10405_s21 }
 0xdf8   : > { %4842 = vrot.lane.b32.xlu1 %v9152_v41, %s10402_s30 }
 0xdf9   : > { %4885 = vrot.lane.b32.xlu2 %v9175_v0, %s10403_s15 }
 0xdfb   : > { %v9185_v59 = vpop.permute.xlu2 %4673 }
 0xdfe   : > { %4803 = vrot.lane.b32.xlu0 %v9175_v0, %s10404_s18 }
 0xe00   : > { %4844 = vrot.lane.b32.xlu1 %v9175_v0, %s10402_s30 }
 0xe01   : > { %4762 = vrot.lane.b32.xlu2 %v9175_v0, %s10374_s19 }
 0xe03   : > { %v9196_v63 = vpop.permute.xlu2 %4632 }
 0xe06   : > { %4873 = vrot.lane.b32.xlu0 %v9200_v51, %s10403_s15 }
 0xe08   : > { %4724 = vrot.lane.b32.xlu1 %v9175_v0, %s7449_s24 }
 0xe09   : > { %4832 = vrot.lane.b32.xlu2 %v9200_v51, %s10402_s30 }
 0xe0a   : > { %v9211_v10 = vpop.permute.xlu1 %4875  ;;  %v9213_v17 = vpop.permute.xlu0 %4834 }
 0xe0b   : > { %v4837_v45 = vpop.permute.xlu2 %4836 }
 0xe0c   : > { %v4849_v24 = vsel %vm10422_vm11, %v9213_v17, %v4837_v45  ;;  %vm10438_vm11 = vmmov %vm10432_vm1 }
 0xe0d   : > { %v4866_v28 = vmul.f32 %v4849_v24, %v7788_v43 }
 0xe0e   : > { %4750 = vrot.lane.b32.xlu0 %v9200_v51, %s10374_s19 }
 0xe10   : > { %4791 = vrot.lane.b32.xlu1 %v9200_v51, %s10404_s18 }
 0xe11   : > { %4709 = vrot.lane.b32.xlu2 %v9218_v27, %s7449_s24 }
 0xe12   : > { %v9224_v18 = vpop.permute.xlu1 %4752  ;;  %v9228_v56 = vpop.permute.xlu0 %4714 }
 0xe13   : > { %v4796_v1 = vpop.permute.xlu2 %4795 }
 0xe14   : > { %v4808_v6 = vsel %vm10425_vm14, %v9170_v9, %v4796_v1  ;;  %vm10440_vm14 = vmmov %vm10433_vm2 }
 0xe15   : > { %v4825_v5 = vmul.f32 %v4808_v6, %v7796_v48 }
 0xe16   : > { %4712 = vrot.lane.b32.xlu0 %v9200_v51, %s7449_s24 }
 0xe18   : > { %4627 = vrot.lane.b32.xlu1 %v9218_v27, %s10398_s26 }
 0xe19   : > { %4668 = vrot.lane.b32.xlu2 %v9218_v27, %s10405_s21 }
 0xe1a   : > { %v9234_v20 = vpop.permute.xlu1 %4591 }
 0xe1b   : > { %v4757_v2 = vpop.permute.xlu2 %4756 }
 0xe1e   : > { %4671 = vrot.lane.b32.xlu0 %v9200_v51, %s10405_s21 }
 0xe20   : > { %v4878_v13 = vpop.permute.xlu0 %4877  ;;  %4589 = vrot.lane.b32.xlu1 %v9200_v51, %s10399_s16 }
 0xe21   : > { %v4890_v31 = vsel %vm10423_vm12, %v9211_v10, %v4878_v13  ;;  %4630 = vrot.lane.b32.xlu2 %v9200_v51, %s10398_s26  ;;  %vm10439_vm12 = vmmov %vm10431_vm0 }
 0xe22   : > { %v4907_v50 = vmul.f32 %v9249_v33, %v4890_v31  ;;  %v4880_v14 = vpop.permute.xlu1 %4879 }
 0xe23   : > { %v9255_v7 = vsel %vm10426_vm15, %v4878_v13, %v4880_v14  ;;  %v9257_v37 = vpop.permute.xlu2 %4718  ;;  %vm10441_vm15 = vmmov %vm10434_vm6 }
 0xe24   : > { %4941 = vmatpush.msrb.mxu2 %v4907_v50  ;;  %v9294_v50 = vld [vmem:[%s10151_s7 + $0x58] ss:$0 sm:$0xff] }
 0xe25   : > { %10430 = vst [vmem:[#allocation59_spill] sm:$0xff] %v9294_v50 }
 0xe26   : > { %4887 = vrot.lane.b32.xlu0 %v9218_v27, %s10403_s15  ;;  %4942 = vmatpush.msrb.mxu2 %v4866_v28 }
 0xe28   : > { %v4839_v4 = vpop.permute.xlu0 %4838  ;;  %4805 = vrot.lane.b32.xlu1 %v9218_v27, %s10404_s18  ;;  %4943 = vmatpush.msrb.mxu2 %v4825_v5 }
 0xe29   : > { %v9266_v38 = vsel %vm10427_vm5, %v4837_v45, %v4839_v4  ;;  %4846 = vrot.lane.b32.xlu2 %v9218_v27, %s10402_s30  ;;  %vm10442_vm5 = vmmov %vm10431_vm0 }
 0xe2a   : > { %v4755_v40 = vpop.permute.xlu1 %4754 }
 0xe2b   : > { %v4767_v32 = vsel %vm1062_vm3, %v9224_v18, %v4755_v40  ;;  %v9273_v46 = vsel %vm1062_vm3, %v4755_v40, %v4757_v2  ;;  %v9275_v36 = vpop.permute.xlu2 %4593 }
 0xe2c   : > { %v4784_v16 = vmul.f32 %v4767_v32, %v7813_v57 }
 0xe2e   : > { %4579 = vrot.lane.b32.xlu0 %v9218_v27, %s10399_s16  ;;  %4944 = vmatpush.msrb.mxu2 %v4784_v16 }
 0xe30   : > { %v4798_v21 = vpop.permute.xlu0 %4797  ;;  %4683 = vrot.lane.b32.xlu1 %v9175_v0, %s10405_s21  ;;  %4945 = vmatpush.msrb.mxu2 %v9066_v15 }
 0xe31   : > { %v9284_v45 = vsel %vm10428_vm9, %v4796_v1, %v4798_v21  ;;  %4597 = vrot.lane.b32.xlu2 %v9133_v22, %s10399_s16  ;;  %vm10443_vm9 = vmmov %vm10436_vm10 }
 0xe32   : > { %v9288_v13 = vpop.permute.xlu1 %4716 }
 0xe33   : > { %v4882_v24 = vpop.permute.xlu2 %4881 }
 0xe34   : > { %v4892_v31 = vsel %vm10429_vm13, %v4880_v14, %v4882_v24  ;;  %vm10444_vm13 = vmmov %vm10432_vm1 }
 0xe35   : > { %v4909_v6 = vmul.f32 %v9294_v50, %v4892_v31 }
 0xe36   : > { %4764 = vrot.lane.b32.xlu0 %v9218_v27, %s10374_s19 }
 0xe37   : > { %4981 = vmatpush.msrb.mxu3 %v4909_v6 }
 0xe38   : > { %v9299_v15 = vpop.permute.xlu0 %4675  ;;  %4642 = vrot.lane.b32.xlu1 %v9175_v0, %s10398_s26 }
 0xe39   : > { %4599 = vrot.lane.b32.xlu2 %v9152_v41, %s10399_s16 }
 0xe3a   : > { %v9305_v1 = vpop.permute.xlu1 %4677 }
 0xe3b   : > { %v9307_v14 = vpop.permute.xlu2 %4679 }
 0xe3e   : > { %4640 = vrot.lane.b32.xlu0 %v9152_v41, %s10398_s26 }
 0xe40   : > { %v9311_v28 = vpop.permute.xlu0 %4634 }
 0xe42   : > { %v9313_v5 = vpop.permute.xlu1 %4636 }
 0xe43   : > { %v9315_v40 = vpop.permute.xlu2 %4638 }
 0xe46   : > { %4601 = vrot.lane.b32.xlu0 %v9175_v0, %s10399_s16 }
 0xe48   : > { %v9319_v32 = vpop.permute.xlu0 %4595 }
 0xe4a   : > { %v4841_v16 = vpop.permute.xlu1 %4840 }
 0xe4b   : > { %v4851_v31 = vsel %vm10431_vm0, %v4839_v4, %v4841_v16  ;;  %v9322_v6 = vpop.permute.xlu2 %4760  ;;  %v4728_v4 = vsel %vm1013_vm4, %v9288_v13, %v9257_v37  ;;  %vm10445_vm0 = vmmov %vm10435_vm7 }
 0xe4c   : > { %v4868_v57 = vmul.f32 %v4851_v31, %v7783_v42 }
 0xe4e   : > { %4982 = vmatpush.msrb.mxu3 %v4868_v57  ;;  %v4687_v57 = vsel %vm10433_vm2, %v9299_v15, %v9305_v1 }
 0xe50   : > { %v4759_v48 = vpop.permute.xlu0 %4758 }
 0xe51   : > { %v4769_v33 = vsel %vm1062_vm3, %v4757_v2, %v4759_v48  ;;  %v4745_v2 = vmul.f32 %v4728_v4, %v7902_v52 }
 0xe52   : > { %v4800_v43 = vpop.permute.xlu1 %4799  ;;  %v4786_v0 = vmul.f32 %v4769_v33, %v7864_v3 }
 0xe53   : > { %v4810_v50 = vsel %vm10432_vm1, %v4798_v21, %v4800_v43  ;;  %v9327_v49 = vpop.permute.xlu2 %4885  ;;  %vm10446_vm1 = vmmov %vm10434_vm6 }
 0xe54   : > { %v4827_v25 = vmul.f32 %v4810_v50, %v7840_v11  ;;  %v4704_v50 = vmul.f32 %v4687_v57, %v7951_v12  ;;  %v4770_v11 = vsel %vm1062_vm3, %v4759_v48, %v9322_v6  ;;  %vm10447_vm2 = vmmov %vm10446_vm1 }
 0xe56   : > { %4983 = vmatpush.msrb.mxu3 %v4827_v25  ;;  %v4646_v25 = vsel %vm10434_vm6, %v9311_v28, %v9313_v5  ;;  %vm10448_vm6 = vmmov %vm10440_vm14 }
 0xe57   : > { %v4663_v31 = vmul.f32 %v4646_v25, %v8015_v62  ;;  %v9364_v25 = vld [vmem:[%s10146_s2] sm:$0xff] }
 0xe58   : > { %v9334_v27 = vpop.permute.xlu0 %4801  ;;  %4984 = vmatpush.msrb.mxu3 %v4786_v0  ;;  %v4605_v0 = vsel %vm10435_vm7, %v9275_v36, %v9319_v32  ;;  %vm10449_vm7 = vmmov %vm10448_vm6 }
 0xe59   : > { %v4622_v4 = vmul.f32 %v4605_v0, %v8033_v34 }
 0xe5a   : > { %v4721_v21 = vpop.permute.xlu1 %4720  ;;  %4985 = vmatpush.msrb.mxu3 %v9096_v61 }
 0xe5b   : > { %v9344_v33 = vpop.permute.xlu2 %4762 }
 0xe5c   : > { %4986 = vmatpush.msrb.mxu3 %v4745_v2 }
 0xe5e   : > { %4987 = vmatpush.msrb.mxu3 %v4704_v50  ;;  %v9371_v50 = vld [vmem:[%s10151_s7 + $0x60] ss:$0 sm:$0xff] }
 0xe5f   : > { %10437 = vst [vmem:[#allocation60_spill] sm:$0xff] %v9371_v50 }
 0xe60   : > { %v4723_v52 = vpop.permute.xlu0 %4722  ;;  %4988 = vmatpush.msrb.mxu3 %v4663_v31 }
 0xe61   : > { %v9353_v61 = vsel %vm1013_vm4, %v4721_v21, %v4723_v52 }
 0xe62   : > { %v9355_v3 = vpop.permute.xlu1 %4883  ;;  %4989 = vmatpush.msrb.mxu3 %v4622_v4  ;;  %v4811_v4 = vsel %vm10438_vm11, %v4800_v43, %v9334_v27  ;;  %v4729_v43 = vsel %vm1013_vm4, %v9257_v37, %v4721_v21  ;;  %vm10453_vm11 = vmmov %vm10443_vm9 }
 0xe63   : > { %v4893_v57 = vsel %vm10436_vm10, %v4882_v24, %v9355_v3  ;;  %v9359_v2 = vpop.permute.xlu2 %4832  ;;  %6905 = vmatmul.msk.f32.vlgmr.msrb.gmra.mxu3 %vm1246_vm8, %v9364_v25  ;;  %v4746_v48 = vmul.f32 %v4729_v43, %v8089_v39  ;;  %vm10450_vm10 = vmmov %vm10445_vm0 }
 0xe64   : > { %v4910_v0 = vmul.f32 %v9371_v50, %v4893_v57  ;;  %v4828_v57 = vmul.f32 %v4811_v4, %v7988_v29 }
 0xe66   : > { %5001 = vmatpush.msrb.mxu0 %v4910_v0  ;;  %v4787_v0 = vmul.f32 %v4770_v11, %v8000_v54  ;;  %v4647_v11 = vsel %vm10441_vm15, %v9313_v5, %v9315_v40  ;;  %vm10458_vm15 = vmmov %vm10442_vm5 }
 0xe67   : > { %v4664_v37 = vmul.f32 %v4647_v11, %v8112_v44 }
 0xe68   : > { %v9374_v31 = vpop.permute.xlu0 %4681 }
 0xe6a   : > { %v9376_v24 = vpop.permute.xlu1 %4842 }
 0xe6b   : > { %v4852_v34 = vsel %vm10439_vm12, %v4841_v16, %v9376_v24  ;;  %v9382_v62 = vpop.permute.xlu2 %4709  ;;  %vm10455_vm12 = vmmov %vm10442_vm5 }
 0xe6c   : > { %v4869_v12 = vmul.f32 %v4852_v34, %v7981_v60  ;;  %v4688_v34 = vsel %vm10440_vm14, %v9305_v1, %v9307_v14  ;;  %v4848_v1 = vsel %vm10442_vm5, %v9359_v2, %v9213_v17  ;;  %vm10457_vm14 = vmmov %vm10444_vm13 }
 0xe6d   : > { %v4865_v17 = vmul.f32 %v4848_v1, %v7732_v23  ;;  %vm10459_vm5 = vmmov %vm10443_vm9 }
 0xe6e   : > { %5002 = vmatpush.msrb.mxu0 %v4869_v12  ;;  %v4705_v12 = vmul.f32 %v4688_v34, %v8102_v19  ;;  %v10454_v19 = vld [vmem:[#allocation28_spill] sm:$0xff] }
 0xe70   : > { %v9389_v50 = vpop.permute.xlu0 %4803  ;;  %5003 = vmatpush.msrb.mxu0 %v4828_v57 }
 0xe72   : > { %v9393_v42 = vpop.permute.xlu1 %4844  ;;  %5004 = vmatpush.msrb.mxu0 %v4787_v0 }
 0xe73   : > { %v9398_v16 = vpop.permute.xlu2 %4668 }
 0xe74   : > { %5005 = vmatpush.msrb.mxu0 %v9133_v22  ;;  %v9415_v22 = vld [vmem:[%s10151_s7 + $0x40] ss:$0 sm:$0xff] }
 0xe76   : > { %5006 = vmatpush.msrb.mxu0 %v4746_v48 }
 0xe78   : > { %v4874_v21 = vpop.permute.xlu0 %4873  ;;  %5007 = vmatpush.msrb.mxu0 %v4705_v12 }
 0xe79   : > { %v4889_v4 = vsel %vm10443_vm9, %v4874_v21, %v9211_v10  ;;  %vm10462_vm9 = vmmov %vm10444_vm13 }
 0xe7a   : > { %v4906_v5 = vmul.f32 %v9415_v22, %v4889_v4  ;;  %v9418_v57 = vpop.permute.xlu1 %4724  ;;  %5008 = vmatpush.msrb.mxu0 %v4664_v37 }
 0xe7b   : > { %v9422_v0 = vsel %vm1013_vm4, %v4723_v52, %v9418_v57  ;;  %v4631_v43 = vpop.permute.xlu2 %4630 }
 0xe7c   : > { %4921 = vmatpush.msrb.mxu1 %v4906_v5 }
 0xe7e   : > { %4922 = vmatpush.msrb.mxu1 %v4865_v17 }
 0xe80   : > { %v9425_v10 = vpop.permute.xlu0 %4750 }
 0xe81   : > { %v4766_v48 = vsel %vm1062_vm3, %v9425_v10, %v9224_v18 }
 0xe82   : > { %v4792_v34 = vpop.permute.xlu1 %4791  ;;  %v4783_v37 = vmul.f32 %v4766_v48, %v7818_v58 }
 0xe83   : > { %v4807_v11 = vsel %vm10444_vm13, %v4792_v34, %v9170_v9  ;;  %v9432_v12 = vpop.permute.xlu2 %4846  ;;  %vm10467_vm13 = vmmov %vm10448_vm6 }
 0xe84   : > { %v4824_v52 = vmul.f32 %v4807_v11, %v7745_v30 }
 0xe86   : > { %4923 = vmatpush.msrb.mxu1 %v4824_v52 }
 0xe88   : > { %v4713_v1 = vpop.permute.xlu0 %4712  ;;  %4924 = vmatpush.msrb.mxu1 %v4783_v37 }
 0xe89   : > { %v4726_v4 = vsel %vm1013_vm4, %v4713_v1, %v9228_v56  ;;  %v4741_v5 = vsel %vm1013_vm4, %v9382_v62, %v4713_v1  ;;  %v4644_v1 = vsel %vm10446_vm1, %v4631_v43, %v9196_v63  ;;  %vm10475_vm1 = vmmov %vm10448_vm6 }
 0xe8a   : > { %v4742_v18 = vmul.f32 %v4741_v5, %v7879_v35  ;;  %v4743_v17 = vmul.f32 %v4726_v4, %v7905_v53  ;;  %v9442_v9 = vpop.permute.xlu1 %4627  ;;  %4925 = vmatpush.msrb.mxu1 %v9200_v51  ;;  %v10452_v53 = vld [vmem:[#allocation21_spill] sm:$0xff] }
 0xe8b   : > { %v9445_v11 = vpop.permute.xlu2 %4597  ;;  %v4659_v51 = vsel %vm10447_vm2, %v9442_v9, %v4631_v43  ;;  %v4894_v43 = vsel %vm10453_vm11, %v9355_v3, %v9327_v49  ;;  %v4812_v3 = vsel %vm10457_vm14, %v9334_v27, %v9389_v50  ;;  %vm10476_vm2 = vmmov %vm10475_vm1 }
 0xe8c   : > { %v4606_v48 = vsel %vm10445_vm0, %v9319_v32, %v9445_v11  ;;  %4926 = vmatpush.msrb.mxu1 %v4742_v18  ;;  %4946 = vmatpush.msrb.mxu2 %v4743_v17  ;;  %v4660_v44 = vmul.f32 %v4659_v51, %v10452_v53  ;;  %vm10485_vm11 = vmmov %vm10445_vm0 }
 0xe8d   : > { %v4623_v52 = vmul.f32 %v4606_v48, %v8129_v55  ;;  %vm10489_vm14 = vmmov %vm10459_vm5 }
 0xe8f   : > { %5009 = vmatpush.msrb.mxu0 %v4623_v52  ;;  %v10451_v52 = vld [vmem:[#allocation22_spill] sm:$0xff] }
 0xe90   : > { %6906 = vmatmul.msk.f32.vlgmr.msrb.gmra.mxu0 %vm1246_vm8, %v9364_v25  ;;  %v4672_v37 = vpop.permute.xlu0 %4671  ;;  %v4661_v55 = vmul.f32 %v4644_v1, %v10451_v52  ;;  %v9477_v1 = vld [vmem:[%s10151_s7 + $0x68] ss:$0 sm:$0xff]  ;;  %v10466_v52 = vld [vmem:[#allocation40_spill] sm:$0xff] }
 0xe91   : > { %v4685_v4 = vsel %vm10448_vm6, %v4672_v37, %v9185_v59  ;;  %v4700_v32 = vsel %vm10449_vm7, %v9398_v16, %v4672_v37  ;;  %10456 = vst [vmem:[#allocation21_spill] sm:$0xff] %v9477_v1  ;;  %v4911_v51 = vmul.f32 %v9477_v1, %v4894_v43  ;;  %v10463_v43 = vld [vmem:[#allocation31_spill] sm:$0xff]  ;;  %v10465_v1 = vld [vmem:[#allocation32_spill] sm:$0xff]  ;;  %vm10480_vm6 = vcmask 261120  }
 0xe92   : > { %v4701_v5 = vmul.f32 %v4700_v32, %v7891_v47  ;;  %v4702_v18 = vmul.f32 %v4685_v4, %v7926_v26  ;;  %v4590_v17 = vpop.permute.xlu1 %4589  ;;  %v4853_v4 = vsel %vm10455_vm12, %v9376_v24, %v9393_v42  ;;  %v10460_v24 = vld [vmem:[#allocation30_spill] sm:$0xff]  ;;  %vm10483_vm7 = vmmov %vm10480_vm6 }
 0xe93   : > { %v4603_v48 = vsel %vm10450_vm10, %v4590_v17, %v9234_v20  ;;  %vm10484_vm10 = vmmov %vm10445_vm0 }
 0xe94   : > { %4927 = vmatpush.msrb.mxu1 %v4701_v5  ;;  %4947 = vmatpush.msrb.mxu2 %v4702_v18  ;;  %v4620_v37 = vmul.f32 %v4603_v48, %v10454_v19  ;;  %v4870_v5 = vmul.f32 %v4853_v4, %v10460_v24  ;;  %v9496_v18 = vld [vmem:[%s10151_s7 + $0x78] ss:$0 sm:$0xff]  ;;  %v10464_v4 = vld [vmem:[#allocation37_spill] sm:$0xff]  ;;  %vm10486_vm12 = vmmov %vm10480_vm6 }
 0xe95   : > { %10461 = vst [vmem:[#allocation61_spill] sm:$0xff] %v9496_v18 }
 0xe96   : > { %4928 = vmatpush.msrb.mxu1 %v4660_v44  ;;  %4948 = vmatpush.msrb.mxu2 %v4661_v55  ;;  %v4864_v44 = vsel %vm10458_vm15, %v9432_v12, %v9359_v2  ;;  %v4771_v2 = vsel %vm1062_vm3, %v9322_v6, %v9344_v33  ;;  %v4689_v6 = vsel %vm10467_vm13, %v9307_v14, %v9374_v31  ;;  %vm10500_vm13 = vmmov %vm10475_vm1 }
 0xe97   : > { %v4872_v24 = vmul.f32 %v4864_v44, %v10464_v4  ;;  %v4788_v19 = vmul.f32 %v4771_v2, %v10465_v1 }
 0xe98   : > { %v9480_v32 = vpop.permute.xlu0 %4887  ;;  %4949 = vmatpush.msrb.mxu2 %v4620_v37  ;;  %v4829_v37 = vmul.f32 %v4812_v3, %v10463_v43  ;;  %v10468_v3 = vld [vmem:[#allocation38_spill] sm:$0xff] }
 0xe99   : > { %v4905_v55 = vsel %vm10459_vm5, %v9480_v32, %v4874_v21  ;;  %6903 = vmatmul.msk.f32.vlgmr.msrb.gmra.mxu2 %vm1246_vm8, %v9364_v25  ;;  %v4747_v44 = vmul.f32 %v9353_v61, %v10468_v3  ;;  %v10471_v61 = vld [vmem:[#allocation10_spill] sm:$0xff]  ;;  %vm10494_vm5 = vmmov %vm10462_vm9 }
 0xe9a   : > { %v4913_v48 = vmul.f32 %v9496_v18, %v4905_v55  ;;  %5021 = vmatpush.msra.mxu2 %v4911_v51  ;;  %v9499_v27 = vpop.permute.xlu1 %4805 }
 0xe9b   : > { %v4823_v21 = vsel %vm10462_vm9, %v9499_v27, %v4792_v34  ;;  %vm10496_vm9 = vmmov %vm10445_vm0 }
 0xe9c   : > { %5022 = vmatpush.msra.mxu2 %v4870_v5  ;;  %5061 = vmatpush.msra.mxu3 %v4913_v48  ;;  %v4831_v55 = vmul.f32 %v4823_v21, %v10466_v52  ;;  %v10469_v5 = vld [vmem:[#allocation24_spill] sm:$0xff] }
 0xe9e   : > { %5023 = vmatpush.msra.mxu2 %v4829_v37  ;;  %5062 = vmatpush.msra.mxu3 %v4872_v24  ;;  %v10470_v24 = vld [vmem:[#allocation41_spill] sm:$0xff] }
 0xe9f   : > { %v4706_v21 = vmul.f32 %v4689_v6, %v10470_v24 }
 0xea0   : > { %5024 = vmatpush.msra.mxu2 %v4788_v19  ;;  %v9510_v51 = vpop.permute.xlu0 %4579  ;;  %5063 = vmatpush.msra.mxu3 %v4831_v55  ;;  %v9526_v19 = vld [vmem:[%s10151_s7 + $0x50] ss:$0 sm:$0xff] }
 0xea1   : > { %v4618_v34 = vsel %vm10445_vm0, %v9510_v51, %v4590_v17  ;;  %v4908_v14 = vmul.f32 %v9526_v19, %v9255_v7  ;;  %v10472_v17 = vld [vmem:[#allocation13_spill] sm:$0xff]  ;;  %vm10503_vm0 = vmmov %vm10480_vm6 }
 0xea2   : > { %v4619_v48 = vmul.f32 %v4618_v34, %v10469_v5  ;;  %5025 = vmatpush.msra.mxu2 %v9152_v41  ;;  %v9521_v2 = vpop.permute.xlu1 %4683  ;;  %v4867_v41 = vmul.f32 %v9266_v38, %v10471_v61  ;;  %v4826_v37 = vmul.f32 %v9284_v45, %v10472_v17  ;;  %v10473_v34 = vld [vmem:[#allocation15_spill] sm:$0xff]  ;;  %v4727_v38 = vsel %vm1013_vm4, %v9228_v56, %v9288_v13  ;;  %v4600_v56 = vpop.permute.xlu2 %4599  ;;  %v10479_v13 = vld [vmem:[#allocation57_spill] sm:$0xff] }
 0xea3   : > { %v4785_v6 = vmul.f32 %v9273_v46, %v10473_v34  ;;  %v4686_v45 = vsel %vm10475_vm1, %v9185_v59, %v9299_v15  ;;  %v4691_v46 = vsel %vm10476_vm2, %v9521_v2, %v9398_v16  ;;  %v10482_v15 = vld [vmem:[#allocation49_spill] sm:$0xff]  ;;  %vm10505_vm1 = vmmov %vm10496_vm9 }
 0xea4   : > { %5026 = vmatpush.msra.mxu2 %v4747_v44  ;;  %4929 = vmatpush.msrb.mxu1 %v4619_v48  ;;  %v10474_v44 = vld [vmem:[#allocation43_spill] sm:$0xff]  ;;  %vm10513_vm2 = vmmov %vm10458_vm15 }
 0xea5   : > { %6902 = vmatmul.msk.f32.vlgmr.msrb.gmra.mxu1 %vm1246_vm8, %v9364_v25 }
 0xea6   : > { %4961 = vmatpush.msra.mxu1 %v4908_v14  ;;  %5027 = vmatpush.msra.mxu2 %v4706_v21  ;;  %v4732_v14 = vsel %vm1013_vm4, %v9418_v57, %v9382_v62  ;;  %v10477_v21 = vld [vmem:[#allocation19_spill] sm:$0xff]  ;;  %v4645_v62 = vsel %vm10480_vm6, %v9196_v63, %v9311_v28  ;;  %v10481_v57 = vld [vmem:[#allocation20_spill] sm:$0xff]  ;;  %v10487_v28 = vld [vmem:[#allocation25_spill] sm:$0xff] }
 0xea7   : > { %v4703_v59 = vmul.f32 %v4686_v45, %v10481_v57  ;;  %v10488_v45 = vld [vmem:[#allocation44_spill] sm:$0xff]  ;;  %vm10514_vm6 = vmmov %vm10489_vm14 }
 0xea8   : > { %4962 = vmatpush.msra.mxu1 %v4867_v41  ;;  %v4765_v55 = vpop.permute.xlu0 %4764  ;;  %v4744_v41 = vmul.f32 %v4727_v38, %v10477_v21  ;;  %v4607_v38 = vsel %vm10485_vm11, %v9445_v11, %v4600_v56  ;;  %v9586_v11 = vld [vmem:[%s10151_s7 + $0x70] ss:$0 sm:$0xff]  ;;  %vm10526_vm11 = vmmov %vm10505_vm1 }
 0xea9   : > { %v4782_v7 = vsel %vm1062_vm3, %v4765_v55, %v9425_v10  ;;  %10493 = vst [vmem:[#allocation24_spill] sm:$0xff] %v9586_v11 }
 0xeaa   : > { %v4790_v48 = vmul.f32 %v4782_v7, %v10474_v44  ;;  %4963 = vmatpush.msra.mxu1 %v4826_v37  ;;  %v4643_v10 = vpop.permute.xlu1 %4642  ;;  %v10478_v37 = vld [vmem:[#allocation47_spill] sm:$0xff] }
 0xeab   : > { %v4749_v7 = vmul.f32 %v4732_v14, %v10478_v37  ;;  %v4650_v16 = vsel %vm10483_vm7, %v4643_v10, %v9442_v9  ;;  %v4662_v14 = vmul.f32 %v4645_v62, %v10487_v28  ;;  %v4895_v9 = vsel %vm10489_vm14, %v9327_v49, %v9480_v32  ;;  %vm10516_vm7 = vmmov %vm10494_vm5 }
 0xeac   : > { %4964 = vmatpush.msra.mxu1 %v4785_v6  ;;  %5064 = vmatpush.msra.mxu3 %v4790_v48  ;;  %v4708_v6 = vmul.f32 %v4691_v46, %v10482_v15  ;;  %v4912_v49 = vmul.f32 %v9586_v11, %v4895_v9  ;;  %v4813_v32 = vsel %vm10494_vm5, %v9389_v50, %v9499_v27  ;;  %v10499_v27 = vld [vmem:[#allocation42_spill] sm:$0xff]  ;;  %vm10531_vm14 = vmmov %vm10513_vm2 }
 0xeae   : > { %4965 = vmatpush.msra.mxu1 %v9093_v8  ;;  %5065 = vmatpush.msra.mxu3 %v10479_v13  ;;  %v4604_v8 = vsel %vm10484_vm10, %v9234_v20, %v9275_v36  ;;  %v10491_v13 = vld [vmem:[#allocation29_spill] sm:$0xff]  ;;  %vm10522_vm10 = vmmov %vm10514_vm6 }
 0xeaf   : > { %v4621_v20 = vmul.f32 %v4604_v8, %v10491_v13  ;;  %v10492_v36 = vld [vmem:[#allocation45_spill] sm:$0xff] }
 0xeb0   : > { %4966 = vmatpush.msra.mxu1 %v4744_v41  ;;  %v4641_v48 = vpop.permute.xlu0 %4640  ;;  %5066 = vmatpush.msra.mxu3 %v4749_v7  ;;  %v10490_v41 = vld [vmem:[#allocation51_spill] sm:$0xff]  ;;  %v4624_v15 = vmul.f32 %v4607_v38, %v10492_v36  ;;  %v10498_v8 = vld [vmem:[#allocation53_spill] sm:$0xff] }
 0xeb1   : > { %v4648_v63 = vsel %vm10486_vm12, %v9315_v40, %v4641_v48  ;;  %v4667_v7 = vmul.f32 %v4650_v16, %v10490_v41  ;;  %v4854_v40 = vsel %vm10458_vm15, %v9393_v42, %v9432_v12  ;;  %v10495_v42 = vld [vmem:[#allocation36_spill] sm:$0xff]  ;;  %v10515_v41 = vld [vmem:[#allocation59_spill] sm:$0xff]  ;;  %vm10530_vm12 = vmmov %vm10494_vm5 }
 0xeb2   : > { %v4665_v46 = vmul.f32 %v4648_v63, %v10488_v45  ;;  %4967 = vmatpush.msra.mxu1 %v4703_v59  ;;  %5067 = vmatpush.msra.mxu3 %v4708_v6  ;;  %v4871_v12 = vmul.f32 %v4854_v40, %v10495_v42  ;;  %v4772_v59 = vsel %vm1062_vm3, %v9344_v33, %v4765_v55  ;;  %v10497_v6 = vld [vmem:[#allocation39_spill] sm:$0xff]  ;;  %v10501_v55 = vld [vmem:[#allocation46_spill] sm:$0xff]  ;;  %v10502_v63 = vld [vmem:[#allocation56_spill] sm:$0xff] }
 0xeb3   : > { %v4830_v16 = vmul.f32 %v4813_v32, %v10497_v6  ;;  %v4789_v38 = vmul.f32 %v4772_v59, %v10499_v27  ;;  %v4690_v33 = vsel %vm10500_vm13, %v9374_v31, %v9521_v2  ;;  %vm10534_vm15 = vmmov %vm10514_vm6 }
 0xeb4   : > { %4968 = vmatpush.msra.mxu1 %v4662_v14  ;;  %5028 = vmatpush.msra.mxu2 %v4665_v46  ;;  %v4649_v14 = vsel %vm10503_vm0, %v4641_v48, %v4643_v10  ;;  %v10504_v46 = vld [vmem:[#allocation48_spill] sm:$0xff]  ;;  %vm10535_vm5 = vmmov %vm10514_vm6  ;;  %vm10542_vm0 = vcmask 252928  }
 0xeb5   : > { %5068 = vmatpush.msra.mxu3 %v4667_v7  ;;  %v4707_v9 = vmul.f32 %v4690_v33, %v10504_v46  ;;  %v10517_v46 = vld [vmem:[#allocation8_spill] sm:$0xff]  ;;  %vm10541_vm13 = vmmov %vm10513_vm2 }
 0xeb6   : > { %4969 = vmatpush.msra.mxu1 %v4621_v20  ;;  %5029 = vmatpush.msra.mxu2 %v4624_v15  ;;  %v10506_v20 = vld [vmem:[#allocation50_spill] sm:$0xff] }
 0xeb7   : > { %6904 = vmatmul.msk.f32.vlgmr.msra.gmra.mxu1 %vm1246_vm8, %v9364_v25  ;;  %6907 = vmatmul.msk.f32.vlgmr.msra.gmra.mxu2 %vm1246_vm8, %v9364_v25  ;;  %v4666_v40 = vmul.f32 %v4649_v14, %v10506_v20 }
 0xeb8   : > { %5041 = vmatpush.msrb.mxu1 %v4912_v49  ;;  %v4602_v62 = vpop.permute.xlu0 %4601  ;;  %v10507_v49 = vld [vmem:[#allocation52_spill] sm:$0xff] }
 0xeb9   : > { %v4609_v15 = vsel %vm10496_vm9, %v4602_v62, %v9510_v51  ;;  %v4748_v51 = vmul.f32 %v9422_v0, %v10501_v55  ;;  %v4608_v7 = vsel %vm10505_vm1, %v4600_v56, %v4602_v62  ;;  %v10508_v0 = vld [vmem:[#allocation54_spill] sm:$0xff]  ;;  %vm10540_vm9 = vmmov %vm10513_vm2  ;;  %vm10544_vm1 = vcmask 261120  }
 0xeba   : > { %v4626_v50 = vmul.f32 %v4609_v15, %v10498_v8  ;;  %5042 = vmatpush.msrb.mxu1 %v4871_v12  ;;  %v4625_v32 = vmul.f32 %v4608_v7, %v10507_v49  ;;  %v10509_v12 = vld [vmem:[#allocation55_spill] sm:$0xff]  ;;  %v10518_v55 = vld [vmem:[#allocation14_spill] sm:$0xff] }
 0xebc   : > { %5043 = vmatpush.msrb.mxu1 %v4830_v16  ;;  %5069 = vmatpush.msra.mxu3 %v4626_v50 }
 0xebd   : > { %6909 = vmatmul.msk.f32.vlgmr.msra.gmra.mxu3 %vm1246_vm8, %v9364_v25 }
 0xebe   : > { %5044 = vmatpush.msrb.mxu1 %v4789_v38 }
 0xec0   : > { %5045 = vmatpush.msrb.mxu1 %v10502_v63 }
 0xec2   : > { %5046 = vmatpush.msrb.mxu1 %v4748_v51 }
 0xec4   : > { %5047 = vmatpush.msrb.mxu1 %v4707_v9 }
 0xec6   : > { %5048 = vmatpush.msrb.mxu1 %v4666_v40 }
 0xec8   : > { %5049 = vmatpush.msrb.mxu1 %v4625_v32 }
 0xec9   : > { %6908 = vmatmul.msk.f32.vlgmr.msrb.gmra.mxu1 %vm1246_vm8, %v9364_v25 }
 0xee6   : > { %v4991_v31 = vpop.f32.mrf.mxu3 }
 0xee7   : > { %v5077_v2 = vmul.f32 %v4991_v31, %v10508_v0 }
 0xee9   : > { %v5085_v10 = vadd.f32 %v5077_v2, %v10509_v12 }
 0xeeb   : > { %v9621_v48 = vmax.f32 %v5085_v10, 0.0 }
 0xeed   : > { %5317 = vrot.lane.b32.xlu2 %v9621_v48, %s10404_s18  ;;  %5358 = vrot.lane.b32.xlu1 %v9621_v48, %s10402_s30 }
 0xeee   : > { %5399 = vrot.lane.b32.xlu0 %v9621_v48, %s10403_s15 }
 0xef5   : > { %5197 = vrot.lane.b32.xlu2 %v9621_v48, %s10405_s21  ;;  %5156 = vrot.lane.b32.xlu1 %v9621_v48, %s10398_s26 }
 0xef6   : > { %5276 = vrot.lane.b32.xlu0 %v9621_v48, %s10374_s19 }
 0xefe   : > { %5238 = vrot.lane.b32.xlu0 %v9621_v48, %s7449_s24 }
 0xf06   : > { %5115 = vrot.lane.b32.xlu0 %v9621_v48, %s10399_s16 }
 0xf0d   : > { %v5011_v25 = vpop.f32.mrf.mxu0 }
 0xf0e   : > { %v5078_v56 = vmul.f32 %v5011_v25, %v10508_v0 }
 0xf10   : > { %v5086_v62 = vadd.f32 %v5078_v56, %v10509_v12 }
 0xf12   : > { %v9641_v59 = vmax.f32 %v5086_v62, 0.0 }
 0xf14   : > { %5319 = vrot.lane.b32.xlu0 %v9641_v59, %s10404_s18  ;;  %5360 = vrot.lane.b32.xlu2 %v9641_v59, %s10402_s30 }
 0xf15   : > { %5401 = vrot.lane.b32.xlu1 %v9641_v59, %s10403_s15 }
 0xf1c   : > { %5199 = vrot.lane.b32.xlu0 %v9641_v59, %s10405_s21  ;;  %5240 = vrot.lane.b32.xlu2 %v9641_v59, %s7449_s24  ;;  %v4951_v15 = vpop.f32.mrf.mxu2 }
 0xf1d   : > { %5278 = vrot.lane.b32.xlu1 %v9641_v59, %s10374_s19  ;;  %v5075_v16 = vmul.f32 %v4951_v15, %v10508_v0 }
 0xf1f   : > { %v5083_v50 = vadd.f32 %v5075_v16, %v10509_v12 }
 0xf21   : > { %v9657_v38 = vmax.f32 %v5083_v50, 0.0 }
 0xf22   : > { %v4931_v33 = vpop.f32.mrf.mxu1 }
 0xf23   : > { %v5074_v51 = vmul.f32 %v4931_v33, %v10508_v0 }
 0xf24   : > { %5313 = vrot.lane.b32.xlu0 %v9657_v38, %s10404_s18  ;;  %5354 = vrot.lane.b32.xlu2 %v9657_v38, %s10402_s30 }
 0xf25   : > { %5158 = vrot.lane.b32.xlu1 %v9641_v59, %s10398_s26  ;;  %v5082_v63 = vadd.f32 %v5074_v51, %v10509_v12 }
 0xf27   : > { %v9673_v14 = vmax.f32 %v5082_v63, 0.0 }
 0xf2c   : > { %5193 = vrot.lane.b32.xlu0 %v9657_v38, %s10405_s21  ;;  %5152 = vrot.lane.b32.xlu2 %v9657_v38, %s10398_s26 }
 0xf2d   : > { %5395 = vrot.lane.b32.xlu1 %v9657_v38, %s10403_s15 }
 0xf34   : > { %5232 = vrot.lane.b32.xlu0 %v9673_v14, %s7449_s24  ;;  %5393 = vrot.lane.b32.xlu2 %v9673_v14, %s10403_s15  ;;  %v4971_v16 = vpop.f32.mrf.mxu1 }
 0xf35   : > { %5272 = vrot.lane.b32.xlu1 %v9657_v38, %s10374_s19  ;;  %v5076_v50 = vmul.f32 %v4971_v16, %v10508_v0 }
 0xf37   : > { %v5084_v51 = vadd.f32 %v5076_v50, %v10509_v12 }
 0xf3a   : > { %v5031_v9 = vpop.f32.mrf.mxu2 }
 0xf3b   : > { %v5079_v7 = vmul.f32 %v5031_v9, %v10508_v0  ;;  %v9743_v9 = vmax.f32 %v5084_v51, 0.0 }
 0xf3c   : > { %5311 = vrot.lane.b32.xlu0 %v9673_v14, %s10404_s18  ;;  %5191 = vrot.lane.b32.xlu2 %v9673_v14, %s10405_s21 }
 0xf3d   : > { %5234 = vrot.lane.b32.xlu1 %v9657_v38, %s7449_s24  ;;  %v5087_v40 = vadd.f32 %v5079_v7, %v10509_v12 }
 0xf3f   : > { %v9695_v32 = vmax.f32 %v5087_v40, 0.0 }
 0xf40   : > { %v5071_v31 = vpop.f32.mrf.mxu3 }
 0xf41   : > { %10510 = vst [vmem:[#allocation10_spill] sm:$0xff] %v9695_v32  ;;  %v5081_v2 = vmul.f32 %v5071_v31, %v10508_v0 }
 0xf43   : > { %v5089_v10 = vadd.f32 %v5081_v2, %v10509_v12 }
 0xf44   : > { %5109 = vrot.lane.b32.xlu0 %v9673_v14, %s10399_s16  ;;  %5270 = vrot.lane.b32.xlu2 %v9673_v14, %s10374_s19 }
 0xf45   : > { %5111 = vrot.lane.b32.xlu1 %v9657_v38, %s10399_s16  ;;  %v9711_v25 = vmax.f32 %v5089_v10, 0.0 }
 0xf46   : > { %v5051_v2 = vpop.f32.mrf.mxu1 }
 0xf47   : > { %10511 = vst [vmem:[#allocation13_spill] sm:$0xff] %v9711_v25  ;;  %v9713_v56 = vpop.permute.xlu2 %5317  ;;  %v5080_v10 = vmul.f32 %v5051_v2, %v10508_v0 }
 0xf49   : > { %v5088_v16 = vadd.f32 %v5080_v10, %v10509_v12 }
 0xf4b   : > { %v9771_v49 = vmax.f32 %v5088_v16, 0.0 }
 0xf4c   : > { %5362 = vrot.lane.b32.xlu2 %v9695_v32, %s10402_s30  ;;  %5403 = vrot.lane.b32.xlu0 %v9695_v32, %s10403_s15 }
 0xf4d   : > { %5352 = vrot.lane.b32.xlu1 %v9673_v14, %s10402_s30  ;;  %10512 = vst [vmem:[#allocation15_spill] sm:$0xff] %v9771_v49 }
 0xf4f   : > { %v9729_v15 = vpop.permute.xlu2 %5197 }
 0xf54   : > { %5160 = vrot.lane.b32.xlu2 %v9695_v32, %s10398_s26  ;;  %5280 = vrot.lane.b32.xlu0 %v9695_v32, %s10374_s19 }
 0xf55   : > { %5150 = vrot.lane.b32.xlu1 %v9673_v14, %s10398_s26 }
 0xf5c   : > { %5407 = vrot.lane.b32.xlu2 %v9711_v25, %s10403_s15  ;;  %5242 = vrot.lane.b32.xlu0 %v9695_v32, %s7449_s24 }
 0xf5d   : > { %5321 = vrot.lane.b32.xlu1 %v9695_v32, %s10404_s18 }
 0xf5f   : > { %v9751_v40 = vpop.permute.xlu1 %5358 }
 0xf60   : > { %v9721_v62 = vpop.permute.xlu0 %5399 }
 0xf64   : > { %5284 = vrot.lane.b32.xlu2 %v9711_v25, %s10374_s19  ;;  %5325 = vrot.lane.b32.xlu0 %v9711_v25, %s10404_s18 }
 0xf65   : > { %5201 = vrot.lane.b32.xlu1 %v9695_v32, %s10405_s21 }
 0xf67   : > { %v9769_v8 = vpop.permute.xlu1 %5156 }
 0xf68   : > { %v9732_v33 = vpop.permute.xlu0 %5276 }
 0xf6c   : > { %5188 = vrot.lane.b32.xlu2 %v9711_v25, %s10405_s21  ;;  %5147 = vrot.lane.b32.xlu0 %v9711_v25, %s10398_s26 }
 0xf6d   : > { %5366 = vrot.lane.b32.xlu1 %v9711_v25, %s10402_s30 }
 0xf6e   : > { %v9741_v63 = vpop.permute.xlu2 %5360 }
 0xf6f   : > { %v5371_v10 = vsel %vm10513_vm2, %v9751_v40, %v9741_v63  ;;  %vm10545_vm2 = vmmov %vm10535_vm5 }
 0xf70   : > { %v9745_v7 = vpop.permute.xlu0 %5238  ;;  %v5388_v37 = vmul.f32 %v5371_v10, %v10517_v46 }
 0xf74   : > { %5397 = vrot.lane.b32.xlu2 %v9743_v9, %s10403_s15  ;;  %5356 = vrot.lane.b32.xlu0 %v9743_v9, %s10402_s30 }
 0xf75   : > { %5229 = vrot.lane.b32.xlu1 %v9711_v25, %s7449_s24 }
 0xf76   : > { %v9755_v31 = vpop.permute.xlu2 %5240 }
 0xf78   : > { %v9765_v50 = vpop.permute.xlu0 %5115 }
 0xf7c   : > { %5274 = vrot.lane.b32.xlu2 %v9743_v9, %s10374_s19  ;;  %5154 = vrot.lane.b32.xlu0 %v9743_v9, %s10398_s26 }
 0xf7d   : > { %5099 = vrot.lane.b32.xlu1 %v9711_v25, %s10399_s16 }
 0xf7e   : > { %v9767_v51 = vpop.permute.xlu2 %5354 }
 0xf84   : > { %5236 = vrot.lane.b32.xlu2 %v9743_v9, %s7449_s24  ;;  %5364 = vrot.lane.b32.xlu0 %v9771_v49, %s10402_s30  ;;  %s6921_s30 = sshll.u32 %s10631_s17, 5 }
 0xf85   : > { %5315 = vrot.lane.b32.xlu1 %v9743_v9, %s10404_s18 }
 0xf86   : > { %v9779_v0 = vpop.permute.xlu0 %5319  ;;  %v9781_v12 = vpop.permute.xlu2 %5152 }
 0xf87   : > { %v9783_v2 = vpop.permute.xlu1 %5401  ;;  %v5330_v36 = vsel %vm10516_vm7, %v9713_v56, %v9779_v0  ;;  %vm10547_vm7 = vmmov %vm10540_vm9 }
 0xf88   : > { %v5412_v16 = vsel %vm10514_vm6, %v9721_v62, %v9783_v2  ;;  %v5347_v45 = vmul.f32 %v5330_v36, %v10518_v55  ;;  %vm10546_vm6 = vmmov %vm10526_vm11 }
 0xf89   : > { %v5429_v20 = vmul.f32 %v10515_v41, %v5412_v16 }
 0xf8b   : > { %5509 = vmatpush.msrb.mxu3 %v5429_v20  ;;  %v10520_v20 = vld [vmem:[#allocation16_spill] sm:$0xff] }
 0xf8c   : > { %5113 = vrot.lane.b32.xlu2 %v9743_v9, %s10399_s16  ;;  %5162 = vrot.lane.b32.xlu0 %v9771_v49, %s10398_s26 }
 0xf8d   : > { %5195 = vrot.lane.b32.xlu1 %v9743_v9, %s10405_s21  ;;  %5510 = vmatpush.msrb.mxu3 %v5388_v37 }
 0xf8e   : > { %v9803_v41 = vpop.permute.xlu0 %5199  ;;  %v9805_v16 = vpop.permute.xlu2 %5393 }
 0xf8f   : > { %10519 = vst [vmem:[#allocation19_spill] sm:$0xff] %v9805_v16  ;;  %v9807_v24 = vpop.permute.xlu1 %5278  ;;  %5511 = vmatpush.msrb.mxu3 %v5347_v45 }
 0xf90   : > { %v5289_v46 = vsel %vm1062_vm3, %v9732_v33, %v9807_v24 }
 0xf91   : > { %v5306_v10 = vmul.f32 %v5289_v46, %v10520_v20 }
 0xf93   : > { %5512 = vmatpush.msrb.mxu3 %v5306_v10 }
 0xf94   : > { %5323 = vrot.lane.b32.xlu2 %v9771_v49, %s10404_s18  ;;  %5119 = vrot.lane.b32.xlu0 %v9695_v32, %s10399_s16 }
 0xf95   : > { %5405 = vrot.lane.b32.xlu1 %v9771_v49, %s10403_s15  ;;  %5513 = vmatpush.msrb.mxu3 %v9621_v48 }
 0xf96   : > { %v9820_v37 = vpop.permute.xlu0 %5313  ;;  %v9822_v45 = vpop.permute.xlu2 %5191 }
 0xf97   : > { %v9824_v36 = vpop.permute.xlu1 %5158 }
 0xf9c   : > { %5203 = vrot.lane.b32.xlu2 %v9771_v49, %s10405_s21  ;;  %s501_s21 = scalar_lea.vmem %s10158_s14, %s6921_s30 }
 0xf9d   : > { %5282 = vrot.lane.b32.xlu1 %v9771_v49, %s10374_s19 }
 0xf9e   : > { %v9830_v55 = vpop.permute.xlu0 %5193  ;;  %v9832_v46 = vpop.permute.xlu2 %5270 }
 0xf9f   : > { %10521 = vst [vmem:[#allocation57_spill] sm:$0xff] %v9832_v46  ;;  %v5396_v20 = vpop.permute.xlu1 %5395 }
 0xfa0   : > { %v5409_v48 = vsel %vm10522_vm10, %v9805_v16, %v5396_v20  ;;  %vm10549_vm10 = vmmov %vm10530_vm12 }
 0xfa1   : > { %v5426_v10 = vmul.f32 %v9415_v22, %v5409_v48 }
 0xfa3   : > { %5449 = vmatpush.msra.mxu0 %v5426_v10 }
 0xfa4   : > { %5117 = vrot.lane.b32.xlu2 %v9641_v59, %s10399_s16 }
 0xfa5   : > { %5244 = vrot.lane.b32.xlu1 %v9771_v49, %s7449_s24 }
 0xfa6   : > { %v5233_v32 = vpop.permute.xlu0 %5232  ;;  %v9841_v3 = vpop.permute.xlu2 %5362 }
 0xfa7   : > { %v9843_v25 = vpop.permute.xlu1 %5272 }
 0xfa8   : > { %v5286_v18 = vsel %vm1062_vm3, %v9832_v46, %v9843_v25 }
 0xfad   : > { %5121 = vrot.lane.b32.xlu1 %v9771_v49, %s10399_s16 }
 0xfae   : > { %v9847_v27 = vpop.permute.xlu0 %5311  ;;  %v9849_v1 = vpop.permute.xlu2 %5160 }
 0xfaf   : > { %10523 = vst [vmem:[#allocation20_spill] sm:$0xff] %v9847_v27  ;;  %v9851_v22 = vpop.permute.xlu1 %5234  ;;  %v5327_v52 = vsel %vm10530_vm12, %v9847_v27, %v9820_v37  ;;  %vm10551_vm12 = vmmov %vm10549_vm10 }
 0xfb0   : > { %10524 = vst [vmem:[#allocation25_spill] sm:$0xff] %v9849_v1  ;;  %v9855_v48 = vsel %vm1013_vm4, %v5233_v32, %v9851_v22  ;;  %v5344_v13 = vmul.f32 %v5327_v52, %v7745_v30  ;;  %v10536_v52 = vld [vmem:[#allocation58_spill] sm:$0xff] }
 0xfb6   : > { %v5110_v10 = vpop.permute.xlu0 %5109  ;;  %v9857_v6 = vpop.permute.xlu2 %5407 }
 0xfb7   : > { %10525 = vst [vmem:[#allocation56_spill] sm:$0xff] %v9857_v6  ;;  %v9859_v43 = vpop.permute.xlu1 %5111 }
 0xfb8   : > { %v9863_v44 = vsel %vm10526_vm11, %v5110_v10, %v9859_v43  ;;  %vm10550_vm11 = vmmov %vm10549_vm10 }
 0xfb9   : > { %10527 = vst [vmem:[#allocation54_spill] sm:$0xff] %v9863_v44 }
 0xfbe   : > { %v9865_v49 = vpop.permute.xlu0 %5403  ;;  %v9867_v42 = vpop.permute.xlu2 %5284 }
 0xfbf   : > { %10528 = vst [vmem:[#allocation55_spill] sm:$0xff] %v9867_v42  ;;  %v9869_v1 = vpop.permute.xlu1 %5352  ;;  %v5303_v42 = vmul.f32 %v5286_v18, %v7818_v58 }
 0xfc0   : > { %10529 = vst [vmem:[#allocation59_spill] sm:$0xff] %v9869_v1  ;;  %v5368_v11 = vsel %vm10531_vm14, %v9869_v1, %v9767_v51  ;;  %vm10553_vm14 = vmmov %vm10542_vm0 }
 0xfc1   : > { %v5385_v4 = vmul.f32 %v5368_v11, %v7732_v23 }
 0xfc3   : > { %5450 = vmatpush.msra.mxu0 %v5385_v4 }
 0xfc5   : > { %5451 = vmatpush.msra.mxu0 %v5344_v13 }
 0xfc6   : > { %v9883_v44 = vpop.permute.xlu0 %5280  ;;  %v9885_v6 = vpop.permute.xlu2 %5188 }
 0xfc7   : > { %10532 = vst [vmem:[#allocation8_spill] sm:$0xff] %v9885_v6  ;;  %v9887_v27 = vpop.permute.xlu1 %5150  ;;  %5452 = vmatpush.msra.mxu0 %v5303_v42 }
 0xfc9   : > { %5453 = vmatpush.msra.mxu0 %v9673_v14 }
 0xfce   : > { %v9890_v23 = vpop.permute.xlu0 %5242  ;;  %v5398_v11 = vpop.permute.xlu2 %5397 }
 0xfcf   : > { %10533 = vst [vmem:[#allocation14_spill] sm:$0xff] %v9890_v23  ;;  %v9892_v1 = vpop.permute.xlu1 %5321  ;;  %v5410_v30 = vsel %vm10534_vm15, %v5396_v20, %v5398_v11  ;;  %v5411_v58 = vsel %vm10535_vm5, %v5398_v11, %v9721_v62  ;;  %v10539_v62 = vld [vmem:[#allocation17_spill] sm:$0xff]  ;;  %vm10554_vm15 = vmmov %vm10544_vm1 }
 0xfd0   : > { %v5427_v18 = vmul.f32 %v10536_v52, %v5410_v30  ;;  %v5428_v4 = vmul.f32 %v9526_v19, %v5411_v58  ;;  %vm10555_vm5 = vmmov %vm10542_vm0 }
 0xfd2   : > { %5469 = vmatpush.msrb.mxu2 %v5427_v18  ;;  %5489 = vmatpush.msra.mxu1 %v5428_v4  ;;  %v5220_v4 = vsel %vm10542_vm0, %v9885_v6, %v9822_v45  ;;  %vm10562_vm0 = vmmov %vm10544_vm1 }
 0xfd6   : > { %v9899_v13 = vpop.permute.xlu0 %5325  ;;  %v5275_v42 = vpop.permute.xlu2 %5274 }
 0xfd7   : > { %10537 = vst [vmem:[#allocation16_spill] sm:$0xff] %v9899_v13  ;;  %v9901_v14 = vpop.permute.xlu1 %5201 }
 0xfd8   : > { %10538 = vst [vmem:[#allocation58_spill] sm:$0xff] %v9901_v14 }
 0xfde   : > { %v9903_v23 = vpop.permute.xlu0 %5147  ;;  %v5237_v46 = vpop.permute.xlu2 %5236 }
 0xfdf   : > { %v9905_v16 = vpop.permute.xlu1 %5366  ;;  %v5248_v20 = vsel %vm1013_vm4, %v5237_v46, %v9745_v7 }
 0xfe0   : > { %v5265_v11 = vmul.f32 %v5248_v20, %v10539_v62  ;;  %v10543_v20 = vld [vmem:[#allocation9_spill] sm:$0xff] }
 0xfe2   : > { %5514 = vmatpush.msrb.mxu3 %v5265_v11 }
 0xfe6   : > { %v5357_v30 = vpop.permute.xlu0 %5356  ;;  %v9910_v19 = vpop.permute.xlu2 %5113 }
 0xfe7   : > { %v9912_v58 = vpop.permute.xlu1 %5229  ;;  %v5369_v52 = vsel %vm10540_vm9, %v9767_v51, %v5357_v30  ;;  %v5370_v18 = vsel %vm10541_vm13, %v5357_v30, %v9751_v40  ;;  %v5179_v51 = vsel %vm10544_vm1, %v9903_v23, %v9887_v27  ;;  %v5221_v40 = vmul.f32 %v5220_v4, %v7891_v47  ;;  %vm10560_vm9 = vmmov %vm10544_vm1 }
 0xfe8   : > { %v5261_v14 = vsel %vm1013_vm4, %v9912_v58, %v5233_v32  ;;  %v5386_v62 = vmul.f32 %v5369_v52, %v10543_v20  ;;  %v5387_v11 = vmul.f32 %v5370_v18, %v10471_v61  ;;  %v5180_v30 = vmul.f32 %v5179_v51, %v10452_v53  ;;  %v10548_v53 = vld [vmem:[#allocation60_spill] sm:$0xff]  ;;  %vm10561_vm13 = vmmov %vm10546_vm6 }
 0xfe9   : > { %v5262_v13 = vmul.f32 %v5261_v14, %v7879_v35  ;;  %v5413_v61 = vsel %vm10545_vm2, %v9783_v2, %v9865_v49  ;;  %v5372_v47 = vsel %vm10547_vm7, %v9741_v63, %v9841_v3  ;;  %v5331_v52 = vsel %vm10549_vm10, %v9779_v0, %v9892_v1  ;;  %vm10563_vm1 = vmmov %vm10562_vm0 }
 0xfea   : > { %5470 = vmatpush.msrb.mxu2 %v5386_v62  ;;  %5490 = vmatpush.msra.mxu1 %v5387_v11  ;;  %v5430_v14 = vmul.f32 %v10548_v53, %v5413_v61  ;;  %v5389_v2 = vmul.f32 %v5372_v47, %v7981_v60  ;;  %v5290_v18 = vsel %vm1062_vm3, %v9807_v24, %v9883_v44  ;;  %vm10564_vm2 = vmmov %vm10555_vm5 }
 0xfeb   : > { %5454 = vmatpush.msra.mxu0 %v5262_v13  ;;  %v5287_v0 = vsel %vm1062_vm3, %v9843_v25, %v5275_v42  ;;  %v5288_v60 = vsel %vm1062_vm3, %v5275_v42, %v9732_v33  ;;  %v5208_v25 = vsel %vm10553_vm14, %v9729_v15, %v9803_v41  ;;  %v5167_v33 = vsel %vm10554_vm15, %v9769_v8, %v9824_v36  ;;  %vm10568_vm7 = vmmov %vm10561_vm13 }
 0xfec   : > { %vm10570_vm10 = vmmov %vm10568_vm7  ;;  %vm10584_vm14 = vcmask 793600  }
 0xfed   : > { %5455 = vmatpush.msra.mxu0 %v5221_v40  ;;  %v5247_v40 = vsel %vm1013_vm4, %v9851_v22, %v5237_v46 }
 0xfee   : > { %v9931_v6 = vpop.permute.xlu2 %5323  ;;  %v5155_v4 = vpop.permute.xlu0 %5154 }
 0xfef   : > { %v9936_v32 = vpop.permute.xlu1 %5099  ;;  %5456 = vmatpush.msra.mxu0 %v5180_v30  ;;  %v10557_v30 = vld [vmem:[#allocation33_spill] sm:$0xff]  ;;  %v5165_v22 = vsel %vm10562_vm0, %v9781_v12, %v5155_v4  ;;  %vm10594_vm0 = vmmov %vm10584_vm14 }
 0xff0   : > { %v5138_v35 = vsel %vm10546_vm6, %v9936_v32, %v5110_v10  ;;  %v5348_v10 = vmul.f32 %v5331_v52, %v7988_v29  ;;  %v5249_v29 = vsel %vm1013_vm4, %v9745_v7, %v9755_v31  ;;  %v5305_v7 = vmul.f32 %v5288_v60, %v10473_v34  ;;  %vm10565_vm6 = vmmov %vm10564_vm2 }
 0xff1   : > { %v5139_v13 = vmul.f32 %v5138_v35, %v10469_v5  ;;  %v5307_v5 = vmul.f32 %v5290_v18, %v8000_v54  ;;  %v10552_v54 = vld [vmem:[#allocation11_spill] sm:$0xff]  ;;  %v5225_v61 = vmul.f32 %v5208_v25, %v10557_v30  ;;  %v10558_v35 = vld [vmem:[#allocation34_spill] sm:$0xff] }
 0xff2   : > { %v5184_v47 = vmul.f32 %v5167_v33, %v10558_v35  ;;  %v10582_v33 = vld [vmem:[#allocation20_spill] sm:$0xff] }
 0xff3   : > { %5457 = vmatpush.msra.mxu0 %v5139_v13  ;;  %v10559_v13 = vld [vmem:[#allocation18_spill] sm:$0xff] }
 0xff4   : > { %v5263_v34 = vmul.f32 %v9855_v48, %v10559_v13  ;;  %v5166_v48 = vsel %vm10563_vm1, %v5155_v4, %v9769_v8  ;;  %v5124_v8 = vsel %vm10568_vm7, %v9859_v43, %v9910_v19  ;;  %v10576_v43 = vld [vmem:[#allocation26_spill] sm:$0xff]  ;;  %vm10596_vm1 = vmmov %vm10594_vm0 }
 0xff5   : > { %5529 = vmatpush.msrb.mxu0 %v5430_v14  ;;  %v10566_v14 = vld [vmem:[#allocation23_spill] sm:$0xff]  ;;  %v5183_v60 = vmul.f32 %v5166_v48, %v10576_v43  ;;  %v10597_v48 = vld [vmem:[#allocation30_spill] sm:$0xff] }
 0xff6   : > { %v9953_v63 = vpop.permute.xlu2 %5203  ;;  %v10606_v43 = vld [vmem:[#allocation58_spill] sm:$0xff] }
 0xff7   : > { %5530 = vmatpush.msrb.mxu0 %v5389_v2  ;;  %v5316_v20 = vpop.permute.xlu1 %5315  ;;  %v10567_v2 = vld [vmem:[#allocation35_spill] sm:$0xff] }
 0xff8   : > { %v5328_v62 = vsel %vm10550_vm11, %v9820_v37, %v5316_v20  ;;  %v5329_v24 = vsel %vm10551_vm12, %v5316_v20, %v9713_v56  ;;  %v5205_v56 = vsel %vm10555_vm5, %v9822_v45, %v9830_v55  ;;  %v10556_v37 = vld [vmem:[#allocation12_spill] sm:$0xff]  ;;  %vm10573_vm11 = vcmask 777216   ;;  %v10574_v20 = vld [vmem:[#allocation59_spill] sm:$0xff] }
 0xff9   : > { %5531 = vmatpush.msrb.mxu0 %v5348_v10  ;;  %v5345_v11 = vmul.f32 %v5328_v62, %v10552_v54  ;;  %v5346_v51 = vmul.f32 %v5329_v24, %v10472_v17  ;;  %v5304_v42 = vmul.f32 %v5287_v0, %v10556_v37  ;;  %v5266_v17 = vmul.f32 %v5249_v29, %v8089_v39  ;;  %v10577_v62 = vld [vmem:[#allocation28_spill] sm:$0xff]  ;;  %v10578_v24 = vld [vmem:[#allocation54_spill] sm:$0xff]  ;;  %v10580_v54 = vld [vmem:[#allocation27_spill] sm:$0xff] }
 0xffa   : > { %v5222_v45 = vmul.f32 %v5205_v56, %v7926_v26  ;;  %v5164_v39 = vsel %vm10560_vm9, %v9887_v27, %v9781_v12  ;;  %v10569_v12 = vld [vmem:[#allocation22_spill] sm:$0xff]  ;;  %v5182_v10 = vmul.f32 %v5165_v22, %v10487_v28  ;;  %vm10575_vm12 = vcmask 785408   ;;  %v10032_v28 = vld [vmem:[%s10147_s3] sm:$0xf]  ;;  %vm10587_vm5 = vmmov %vm10573_vm11 }
 0xffb   : > { %5532 = vmatpush.msrb.mxu0 %v5307_v5  ;;  %5471 = vmatpush.msrb.mxu2 %v5345_v11  ;;  %v10572_v5 = vld [vmem:[#allocation56_spill] sm:$0xff]  ;;  %v5384_v0 = vsel %vm10575_vm12, %v9905_v16, %v10574_v20  ;;  %v5140_v29 = vmul.f32 %v10578_v24, %v10577_v62  ;;  %vm10586_vm15 = vmmov %vm10575_vm12  ;;  %v10605_v20 = vld [vmem:[#allocation14_spill] sm:$0xff] }
 0xffc   : > { %5491 = vmatpush.msra.mxu1 %v5346_v51  ;;  %6910 = vmatmul.msk.f32.vlgmr.msra.gmra.mxu0 %vm1246_vm8, %v10032_v28  ;;  %v10581_v51 = vld [vmem:[#allocation61_spill] sm:$0xff]  ;;  %v10583_v56 = vld [vmem:[#allocation16_spill] sm:$0xff]  ;;  %vm10588_vm9 = vmmov %vm10587_vm5 }
 0xffd   : > { %5533 = vmatpush.msrb.mxu0 %v9641_v59  ;;  %5472 = vmatpush.msrb.mxu2 %v5304_v42  ;;  %v5264_v59 = vmul.f32 %v5247_v40, %v10477_v21  ;;  %v5343_v37 = vsel %vm10584_vm14, %v10583_v56, %v10582_v33  ;;  %v10585_v42 = vld [vmem:[#allocation37_spill] sm:$0xff]  ;;  %v519_v40 = vld [vmem:[%s10150_s6] sm:$0xf]  ;;  %v5333_v22 = vsel %vm10596_vm1, %v9931_v6, %v10583_v56 }
 0xffe   : > { %5492 = vmatpush.msra.mxu1 %v5305_v7  ;;  %v9989_v53 = vpop.permute.xlu2 %5117  ;;  %v5392_v7 = vmul.f32 %v5384_v0, %v10585_v42  ;;  %5436 = vperm.xlu2 %7319, %v519_v40   ;;  %v5250_v0 = vsel %vm1013_vm4, %v9755_v31, %v10605_v20 }
 0xfff   : > { %5534 = vmatpush.msrb.mxu0 %v5266_v17  ;;  %v5196_v46 = vpop.permute.xlu1 %5195  ;;  %5473 = vmatpush.msrb.mxu2 %v9657_v38  ;;  %v5126_v26 = vsel %vm10561_vm13, %v9765_v50, %v9989_v53  ;;  %v5365_v38 = vpop.permute.xlu0 %5364  ;;  %vm10589_vm13 = vmmov %vm10575_vm12 }
0x1000   : > { %5493 = vmatpush.msra.mxu1 %v9743_v9  ;;  %v5206_v27 = vsel %vm10564_vm2, %v9830_v55, %v5196_v46  ;;  %v5207_v21 = vsel %vm10565_vm6, %v5196_v46, %v9729_v15  ;;  %v5143_v18 = vmul.f32 %v5126_v26, %v10567_v2  ;;  %v5181_v55 = vmul.f32 %v5164_v39, %v10569_v12  ;;  %vm10613_vm6 = vmmov %vm10564_vm2 }
0x1001   : > { %5535 = vmatpush.msrb.mxu0 %v5225_v61  ;;  %v5223_v9 = vmul.f32 %v5206_v27, %v10481_v57  ;;  %v5224_v52 = vmul.f32 %v5207_v21, %v10566_v14  ;;  %5474 = vmatpush.msrb.mxu2 %v5263_v34  ;;  %v5125_v15 = vsel %vm10570_vm10, %v9910_v19, %v9765_v50  ;;  %v10571_v57 = vld [vmem:[#allocation19_spill] sm:$0xff]  ;;  %v10579_v50 = vld [vmem:[#allocation29_spill] sm:$0xff]  ;;  %v10591_v34 = vld [vmem:[#allocation24_spill] sm:$0xff] }
0x1002   : > { %5494 = vmatpush.msra.mxu1 %v5264_v59  ;;  %v5425_v4 = vsel %vm10573_vm11, %v10572_v5, %v10571_v57  ;;  %v5141_v19 = vmul.f32 %v5124_v8, %v10579_v50  ;;  %v5142_v11 = vmul.f32 %v5125_v15, %v10580_v54  ;;  %v5373_v30 = vsel %vm10586_vm15, %v9841_v3, %v5365_v38  ;;  %v10592_v3 = vld [vmem:[#allocation57_spill] sm:$0xff]  ;;  %v10599_v14 = vld [vmem:[#allocation43_spill] sm:$0xff]  ;;  %v10602_v15 = vld [vmem:[#allocation32_spill] sm:$0xff] }
0x1003   : > { %5536 = vmatpush.msrb.mxu0 %v5184_v47  ;;  %5475 = vmatpush.msrb.mxu2 %v5222_v45  ;;  %v5433_v25 = vmul.f32 %v10581_v51, %v5425_v4  ;;  %v5374_v47 = vsel %vm10589_vm13, %v5365_v38, %v9905_v16  ;;  %v10590_v45 = vld [vmem:[#allocation21_spill] sm:$0xff]  ;;  %v5332_v46 = vsel %vm10594_vm0, %v9892_v1, %v9931_v6  ;;  %v10595_v16 = vld [vmem:[#allocation40_spill] sm:$0xff]  ;;  %v10603_v57 = vld [vmem:[#allocation42_spill] sm:$0xff]  ;;  %vm5622_vm15 = vcmask 1043456  }
0x1004   : > { %5495 = vmatpush.msra.mxu1 %v5223_v9  ;;  %5515 = vmatpush.msrb.mxu3 %v5224_v52  ;;  %v5351_v26 = vmul.f32 %v5343_v37, %v10595_v16  ;;  %v5390_v27 = vmul.f32 %v5373_v30, %v10597_v48  ;;  %v10598_v38 = vld [vmem:[#allocation36_spill] sm:$0xff]  ;;  %v10600_v52 = vld [vmem:[#allocation31_spill] sm:$0xff]  ;;  %v10604_v4 = vld [vmem:[#allocation13_spill] sm:$0xff] }
0x1005   : > { %5537 = vmatpush.msrb.mxu0 %v5143_v18  ;;  %5476 = vmatpush.msrb.mxu2 %v5181_v55  ;;  %v5391_v9 = vmul.f32 %v5374_v47, %v10598_v38  ;;  %v5349_v2 = vmul.f32 %v5332_v46, %v10600_v52  ;;  %v10601_v18 = vld [vmem:[#allocation39_spill] sm:$0xff]  ;;  %v10614_v37 = vld [vmem:[#allocation44_spill] sm:$0xff]  ;;  %vm10616_vm10 = vmmov %vm10564_vm2 }
0x1006   : > { %5496 = vmatpush.msra.mxu1 %v5182_v10  ;;  %5516 = vmatpush.msrb.mxu3 %v5183_v60  ;;  %v5350_v8 = vmul.f32 %v5333_v22, %v10601_v18  ;;  %v10607_v60 = vld [vmem:[#allocation38_spill] sm:$0xff]  ;;  %v10609_v50 = vld [vmem:[#allocation15_spill] sm:$0xff]  ;;  %v10629_v48 = vld [vmem:[#allocation53_spill] sm:$0xff] }
0x1007   : > { %v5406_v17 = vpop.permute.xlu1 %5405  ;;  %5477 = vmatpush.msrb.mxu2 %v5140_v29  ;;  %v5163_v21 = vpop.permute.xlu0 %5162  ;;  %6914 = vmatmul.msk.f32.vlgmr.msrb.gmra.mxu0 %vm1246_vm8, %v10032_v28  ;;  %v5267_v62 = vmul.f32 %v5250_v0, %v10607_v60  ;;  %v10608_v29 = vld [vmem:[#allocation10_spill] sm:$0xff]  ;;  %v10618_v30 = vld [vmem:[#allocation47_spill] sm:$0xff] }
0x1008   : > { %5497 = vmatpush.msra.mxu1 %v5141_v19  ;;  %v5414_v61 = vsel %vm10587_vm5, %v9865_v49, %v5406_v17  ;;  %v5415_v35 = vsel %vm10588_vm9, %v5406_v17, %v10572_v5  ;;  %5517 = vmatpush.msrb.mxu3 %v5142_v11  ;;  %v10593_v49 = vld [vmem:[#allocation55_spill] sm:$0xff]  ;;  %v10610_v19 = vld [vmem:[#allocation25_spill] sm:$0xff]  ;;  %v10617_v17 = vld [vmem:[#allocation46_spill] sm:$0xff] }
0x1009   : > { %6911 = vmatmul.msk.f32.vlgmr.msrb.gmra.mxu2 %vm1246_vm8, %v10032_v28  ;;  %v5431_v13 = vmul.f32 %v10590_v45, %v5414_v61  ;;  %v5432_v39 = vmul.f32 %v10591_v34, %v5415_v35  ;;  %6912 = vmatmul.msk.f32.vlgmr.msra.gmra.mxu1 %vm1246_vm8, %v10032_v28  ;;  %v5302_v59 = vsel %vm1062_vm3, %v10593_v49, %v10592_v3  ;;  %v10612_v11 = vld [vmem:[#allocation41_spill] sm:$0xff]  ;;  %v10620_v35 = vld [vmem:[#allocation48_spill] sm:$0xff] }
0x100a   : > { %5589 = vmatpush.msra.mxu3 %v5433_v25  ;;  %v5310_v1 = vmul.f32 %v5302_v59, %v10599_v14  ;;  %v5210_v25 = vsel %vm10613_vm6, %v10606_v43, %v9953_v63  ;;  %v10623_v34 = vld [vmem:[#allocation49_spill] sm:$0xff] }
0x100b   : > { %6913 = vmatmul.msk.f32.vlgmr.msrb.gmra.mxu3 %vm1246_vm8, %v10032_v28  ;;  %5549 = vmatpush.msra.mxu2 %v5431_v13  ;;  %v5227_v47 = vmul.f32 %v5210_v25, %v10620_v35 }
0x100c   : > { %5590 = vmatpush.msra.mxu3 %v5392_v7  ;;  %5569 = vmatpush.msrb.mxu1 %v5432_v39 }
0x100d   : > { %5550 = vmatpush.msra.mxu2 %v5390_v27 }
0x100e   : > { %5591 = vmatpush.msra.mxu3 %v5351_v26  ;;  %5570 = vmatpush.msrb.mxu1 %v5391_v9  ;;  %v10628_v26 = vld [vmem:[#allocation52_spill] sm:$0xff] }
0x100f   : > { %v5283_v6 = vpop.permute.xlu1 %5282  ;;  %5551 = vmatpush.msra.mxu2 %v5349_v2  ;;  %v5120_v24 = vpop.permute.xlu0 %5119 }
0x1010   : > { %5592 = vmatpush.msra.mxu3 %v5310_v1  ;;  %v5291_v12 = vsel %vm1062_vm3, %v9883_v44, %v5283_v6  ;;  %v5292_v55 = vsel %vm1062_vm3, %v5283_v6, %v10593_v49  ;;  %5571 = vmatpush.msrb.mxu1 %v5350_v8  ;;  %v5209_v44 = vsel %vm10564_vm2, %v9803_v41, %v10606_v43  ;;  %vm10611_vm3 = vcmask 261120   ;;  %v10625_v49 = vld [vmem:[#allocation51_spill] sm:$0xff] }
0x1011   : > { %v5308_v10 = vmul.f32 %v5291_v12, %v10602_v15  ;;  %v5309_v5 = vmul.f32 %v5292_v55, %v10603_v57  ;;  %v5168_v54 = vsel %vm10611_vm3, %v9824_v36, %v10610_v19  ;;  %v5226_v51 = vmul.f32 %v5209_v44, %v10612_v11  ;;  %v10615_v36 = vld [vmem:[#allocation8_spill] sm:$0xff]  ;;  %vm10619_vm11 = vmmov %vm10611_vm3 }
0x1012   : > { %5593 = vmatpush.msra.mxu3 %v10604_v4  ;;  %v5127_v41 = vsel %vm10568_vm7, %v9989_v53, %v5120_v24  ;;  %v5185_v42 = vmul.f32 %v5168_v54, %v10614_v37  ;;  %v5211_v7 = vsel %vm10616_vm10, %v9953_v63, %v10615_v36  ;;  %v5169_v53 = vsel %vm10619_vm11, %v10610_v19, %v5163_v21  ;;  %vm10621_vm12 = vmmov %vm10611_vm3  ;;  %v10624_v63 = vld [vmem:[#allocation50_spill] sm:$0xff] }
0x1013   : > { %5552 = vmatpush.msra.mxu2 %v5308_v10  ;;  %5572 = vmatpush.msrb.mxu1 %v5309_v5  ;;  %v5170_v45 = vsel %vm10621_vm12, %v5163_v21, %v9903_v23  ;;  %v5228_v39 = vmul.f32 %v5211_v7, %v10623_v34  ;;  %v5186_v3 = vmul.f32 %v5169_v53, %v10624_v63 }
0x1014   : > { %v5187_v59 = vmul.f32 %v5170_v45, %v10625_v49 }
0x1015   : > { %5553 = vmatpush.msra.mxu2 %v10608_v29  ;;  %5573 = vmatpush.msrb.mxu1 %v10609_v50 }
0x1017   : > { %v5245_v31 = vpop.permute.xlu1 %5244  ;;  %5554 = vmatpush.msra.mxu2 %v5267_v62 }
0x1018   : > { %v5251_v33 = vsel %vm1013_vm4, %v10605_v20, %v5245_v31  ;;  %v5252_v56 = vsel %vm1013_vm4, %v5245_v31, %v9912_v58  ;;  %v10622_v58 = vld [vmem:[#allocation45_spill] sm:$0xff]  ;;  %vm10626_vm4 = vmmov %vm10568_vm7 }
0x1019   : > { %v5268_v40 = vmul.f32 %v5251_v33, %v10617_v17  ;;  %v5269_v61 = vmul.f32 %v5252_v56, %v10618_v30  ;;  %5555 = vmatpush.msra.mxu2 %v5226_v51  ;;  %v5144_v13 = vmul.f32 %v5127_v41, %v10622_v58  ;;  %vm10627_vm14 = vmmov %vm10626_vm4 }
0x101b   : > { %5556 = vmatpush.msra.mxu2 %v5185_v42  ;;  %5574 = vmatpush.msrb.mxu1 %v5268_v40 }
0x101c   : > { %5594 = vmatpush.msra.mxu3 %v5269_v61 }
0x101d   : > { %5557 = vmatpush.msra.mxu2 %v5144_v13  ;;  %5575 = vmatpush.msrb.mxu1 %v5227_v47 }
0x101e   : > { %5595 = vmatpush.msra.mxu3 %v5228_v39  ;;  %6915 = vmatmul.msk.f32.vlgmr.msra.gmra.mxu2 %vm1246_vm8, %v10032_v28 }
0x101f   : > { %v5122_v46 = vpop.permute.xlu1 %5121  ;;  %5576 = vmatpush.msrb.mxu1 %v5186_v3 }
0x1020   : > { %v5128_v23 = vsel %vm10626_vm4, %v5120_v24, %v5122_v46  ;;  %v5129_v16 = vsel %vm10627_vm14, %v5122_v46, %v9936_v32  ;;  %5596 = vmatpush.msra.mxu3 %v5187_v59 }
0x1021   : > { %v5145_v22 = vmul.f32 %v5128_v23, %v10628_v26  ;;  %v5146_v27 = vmul.f32 %v5129_v16, %v10629_v48 }
0x1023   : > { %5577 = vmatpush.msrb.mxu1 %v5145_v22  ;;  %5597 = vmatpush.msra.mxu3 %v5146_v27 }
0x1024   : > { %6917 = vmatmul.msk.f32.vlgmr.msra.gmra.mxu3 %vm1246_vm8, %v10032_v28  ;;  %6916 = vmatmul.msk.f32.vlgmr.msrb.gmra.mxu1 %vm1246_vm8, %v10032_v28 }
0x1058   : > { %v5437_v38 = vpop.permute.xlu2 %5436 }
0x1079   : > { %v5459_v21 = vpop.f32.mrf.mxu0 }
0x107a   : > { %v5460_v9 = vadd.f32 %v5459_v21, %v5437_v38 }
0x107c   : > { %7332 = vtanh.f32 %v5460_v9 }
0x1082   : > { %v7333_v8 = vpop.eup %7332 }
0x1084   : > { %v5539_v5 = vpop.f32.mrf.mxu0 }
0x1085   : > { %v5540_v4 = vadd.f32 %v5539_v5, %v5437_v38 }
0x1086   : > { %v5499_v14 = vpop.f32.mrf.mxu1 }
0x1087   : > { %v5500_v32 = vadd.f32 %v5499_v14, %v5437_v38 }
0x108c   : > { %v5479_v1 = vpop.f32.mrf.mxu2 }
0x108d   : > { %v5480_v52 = vadd.f32 %v5479_v1, %v5437_v38 }
0x108e   : > { %v5519_v2 = vpop.f32.mrf.mxu3 }
0x108f   : > { %v5520_v18 = vadd.f32 %v5519_v2, %v5437_v38  ;;  %7334 = vtanh.f32 %v5480_v52 }
0x1090   : > { %7336 = vtanh.f32 %v5500_v32 }
0x1091   : > { %7338 = vtanh.f32 %v5520_v18 }
0x1092   : > { %7340 = vtanh.f32 %v5540_v4 }
0x1095   : > { %v7335_v6 = vpop.eup %7334 }
0x1096   : > { %v7337_v12 = vpop.eup %7336  ;;  %v5618_v55 = vrot.slane %v7335_v6, 4 }
0x1097   : > { %v7339_v28 = vpop.eup %7338 }
0x1098   : > { %v5619_v15 = vrot.slane %v7339_v28, 4  ;;  %v5623_v10 = vsel %vm5622_vm15, %v7333_v8, %v5618_v55  ;;  %v7341_v24 = vpop.eup %7340 }
0x1099   : > { %5631 = vst [vmem:[%s501_s21] sm:$0xff] %v5623_v10 }
0x109a   : > { %v5624_v57 = vsel %vm5622_vm15, %v7337_v12, %v5619_v15 }
0x109b   : > { %5632 = vst [vmem:[%s501_s21 + $0x8] sm:$0xff] %v5624_v57 }
0x10a1   : > { %v5559_v20 = vpop.f32.mrf.mxu2  ;;  %v5579_v43 = vpop.f32.mrf.mxu1 }
0x10a2   : > { %v5560_v0 = vadd.f32 %v5559_v20, %v5437_v38  ;;  %v5580_v62 = vadd.f32 %v5579_v43, %v5437_v38 }
0x10a4   : > { %7342 = vtanh.f32 %v5560_v0 }
0x10a7   : > { %v5599_v44 = vpop.f32.mrf.mxu3 }
0x10a8   : > { %v5600_v60 = vadd.f32 %v5599_v44, %v5437_v38 }
0x10aa   : > { %v7343_v29 = vpop.eup %7342  ;;  %7344 = vtanh.f32 %v5600_v60 }
0x10ab   : > { %v5620_v50 = vrot.slane %v7343_v29, 4  ;;  %7346 = vtanh.f32 %v5580_v62 }
0x10ad   : > { %v5625_v19 = vsel %vm5622_vm15, %v7341_v24, %v5620_v50 }
0x10ae   : > { %5633 = vst [vmem:[%s501_s21 + $0x10] sm:$0xff] %v5625_v19 }
0x10b0   : > { %v7345_v54 = vpop.eup %7344 }
0x10b1   : > { %v5621_v11 = vrot.slane %v7345_v54, 4  ;;  %v7347_v51 = vpop.eup %7346 }
0x10b3   : > { %v5626_v31 = vsel %vm5622_vm15, %v7347_v51, %v5621_v11 }
0x10b4   : > { %5634 = vst [vmem:[%s501_s21 + $0x18] sm:$0xff] %v5626_v31 }
0x10b5 PF: > { %s26_s29 = sadd.s32 1, %s7437_s29  }
0x10b6   : > { %p23_p7 = scmp.ge.s32.totalorder %s26_s29, 4  }
0x10b8   :  { %25 = sbr.rel (!%p23_p7) target bundleno = 2 (0x2), region = 115 }
0x10bd   :  { %5656 = vsyncpa [#allocation3], 1 }
0x10be   :  { %5658 = vsyncpa [#allocation3 + $0x1], 1 }
0x10bf   :  { %5659 = vsyncpa [#allocation5], 1 }

</bundles_post_ra>
